<compile_context>
chip_gen: v7x
topology: tpu7x:2x2x1
jax: 0.10.0
libtpu: 0.0.40
codegen_flags: <defaults>
</compile_context>

<pallas_src>
from functools import partial

import jax
import jax.numpy as jnp
from jax.experimental import pallas as pl
from jax.experimental.pallas import tpu as pltpu


WIDTH = 32
MODES1 = 4
MODES2 = 4
BN_EPS = 1e-5
ROW_TILE_TARGET = 1024   # review: 1024-4096 amortizes the ~0.35us/grid-step overhead


def _row_tile(n, target=ROW_TILE_TARGET):
    """Largest row tile <= target that divides n (multiple of 8 when tiled)."""
    if n <= target:
        return n
    t = (target // 8) * 8
    while t >= 8:
        if n % t == 0:
            return t
        t -= 8
    # TODO(synk): remainder masking for N not divisible by 8; fall back to one block.
    return n


# ---------------------------------------------------------------------------
# Row-tiled linear kernels (fc0, and the fused fc1+ReLU+fc2 head)
# ---------------------------------------------------------------------------

def _linear_kernel(x_ref, w_ref, b_ref, o_ref, *, relu):
    y = jnp.dot(x_ref[...], w_ref[...], preferred_element_type=jnp.float32)
    y = y + b_ref[...]
    if relu:
        y = jnp.maximum(y, 0.0)
    o_ref[...] = y


def pallas_linear(x, w, b, *, relu=False):
    n, cin = x.shape
    cout = w.shape[1]
    tile = _row_tile(n)
    return pl.pallas_call(
        partial(_linear_kernel, relu=relu),
        out_shape=jax.ShapeDtypeStruct((n, cout), jnp.float32),
        grid=(n // tile,),
        in_specs=[pl.BlockSpec((tile, cin), lambda i: (i, 0)),
                  pl.BlockSpec((cin, cout), lambda i: (0, 0)),
                  pl.BlockSpec((1, cout), lambda i: (0, 0))],
        out_specs=pl.BlockSpec((tile, cout), lambda i: (i, 0)),
        compiler_params=pltpu.CompilerParams(dimension_semantics=("parallel",)),
    )(x, w, b)


def _head_kernel(x_ref, w1_ref, b1_ref, w2_ref, b2_ref, o_ref):
    # relu(x @ W1 + b1) @ W2 + b2 -- the (tile, 128) intermediate stays in VMEM.
    t = jnp.dot(x_ref[...], w1_ref[...], preferred_element_type=jnp.float32)
    t = jnp.maximum(t + b1_ref[...], 0.0)
    o_ref[...] = jnp.dot(t, w2_ref[...], preferred_element_type=jnp.float32) + b2_ref[...]


def pallas_fc1_fc2(x, w1, b1, w2, b2):
    n, cin = x.shape
    ch = w1.shape[1]
    cout = w2.shape[1]
    tile = _row_tile(n)
    return pl.pallas_call(
        _head_kernel,
        out_shape=jax.ShapeDtypeStruct((n, cout), jnp.float32),
        grid=(n // tile,),
        in_specs=[pl.BlockSpec((tile, cin), lambda i: (i, 0)),
                  pl.BlockSpec((cin, ch), lambda i: (0, 0)),
                  pl.BlockSpec((1, ch), lambda i: (0, 0)),
                  pl.BlockSpec((ch, cout), lambda i: (0, 0)),
                  pl.BlockSpec((1, cout), lambda i: (0, 0))],
        out_specs=pl.BlockSpec((tile, cout), lambda i: (i, 0)),
        compiler_params=pltpu.CompilerParams(dimension_semantics=("parallel",)),
    )(x, w1, b1, w2, b2)


# ---------------------------------------------------------------------------
# Fused pointwise branch + residual add + BN statistics (pass 1),
# and BN normalize + ReLU (pass 2)
# ---------------------------------------------------------------------------

def _pw_add_stats_kernel(x1_ref, h_ref, w_ref, b_ref, s_ref, stats_ref):
    # s = x1 + (h @ w + b); also accumulate per-channel sum / sum-of-squares.
    s = x1_ref[...] + jnp.dot(h_ref[...], w_ref[...],
                              preferred_element_type=jnp.float32) + b_ref[...]
    s_ref[...] = s
    tile_stats = jnp.concatenate(
        [jnp.sum(s, axis=0, keepdims=True),
         jnp.sum(s * s, axis=0, keepdims=True)], axis=0)          # (2, C)

    @pl.when(pl.program_id(0) == 0)
    def _init():
        stats_ref[...] = jnp.zeros_like(stats_ref)

    stats_ref[...] += tile_stats


def pallas_pointwise_add_stats(x1, h, w, b):
    n, c = h.shape
    tile = _row_tile(n)
    return pl.pallas_call(
        _pw_add_stats_kernel,
        out_shape=(jax.ShapeDtypeStruct((n, c), jnp.float32),
                   jax.ShapeDtypeStruct((2, c), jnp.float32)),
        grid=(n // tile,),
        in_specs=[pl.BlockSpec((tile, c), lambda i: (i, 0)),
                  pl.BlockSpec((tile, c), lambda i: (i, 0)),
                  pl.BlockSpec((c, c), lambda i: (0, 0)),
                  pl.BlockSpec((1, c), lambda i: (0, 0))],
        out_specs=(pl.BlockSpec((tile, c), lambda i: (i, 0)),
                   pl.BlockSpec((2, c), lambda i: (0, 0))),
        compiler_params=pltpu.CompilerParams(dimension_semantics=("arbitrary",)),
    )(x1, h, w, b)


def _bn_apply_kernel(s_ref, stats_ref, o_ref, *, inv_n, relu, eps):
    mean = stats_ref[0:1, :] * inv_n
    var = stats_ref[1:2, :] * inv_n - mean * mean
    y = (s_ref[...] - mean) * jax.lax.rsqrt(var + eps)
    if relu:
        y = jnp.maximum(y, 0.0)
    o_ref[...] = y


def pallas_bn_apply(s, stats, *, relu):
    n, c = s.shape
    tile = _row_tile(n)
    return pl.pallas_call(
        partial(_bn_apply_kernel, inv_n=1.0 / n, relu=relu, eps=BN_EPS),
        out_shape=jax.ShapeDtypeStruct((n, c), jnp.float32),
        grid=(n // tile,),
        in_specs=[pl.BlockSpec((tile, c), lambda i: (i, 0)),
                  pl.BlockSpec((2, c), lambda i: (0, 0))],
        out_specs=pl.BlockSpec((tile, c), lambda i: (i, 0)),
        compiler_params=pltpu.CompilerParams(dimension_semantics=("parallel",)),
    )(s, stats)


# ---------------------------------------------------------------------------
# SpectralConv2d as a single Pallas kernel (truncated DFT -> packed complex
# channel mix -> truncated inverse DFT), gridded over the batch.
# ---------------------------------------------------------------------------

def _dft_matrices(hsp, wsp, m1, m2):
    """Forward / inverse truncated-DFT matrices for the kept Fourier modes.

    Mode order j = j1*m2 + j2 with k1 in [0..m1) ++ [H-m1..H), k2 in [0..m2).
    ft: (2J, P)  -- rows 0..J-1 give Re(rfft2), rows J..2J-1 give Im(rfft2) (ortho).
    gt: (P, 2J)  -- columns pair with [Or ; Oi]; implements irfft2 of the
                    zero-padded spectrum (hermitian doubling for 0 < k2 < W/2,
                    Im of the k2=0 / Nyquist bins discarded, exactly like irfft2).
    """
    assert 2 * m1 <= hsp and m2 <= wsp // 2 + 1
    p = hsp * wsp
    k1 = jnp.concatenate([jnp.arange(m1), jnp.arange(hsp - m1, hsp)]).astype(jnp.float32)
    k2 = jnp.arange(m2, dtype=jnp.float32)
    kk1 = jnp.repeat(k1, m2)                                    # (J,)
    kk2 = jnp.tile(k2, 2 * m1)                                  # (J,)
    hh = jnp.repeat(jnp.arange(hsp, dtype=jnp.float32), wsp)    # (P,)
    ww = jnp.tile(jnp.arange(wsp, dtype=jnp.float32), hsp)      # (P,)
    theta = 2.0 * jnp.pi * (kk1[:, None] * hh[None, :] / hsp
                            + kk2[:, None] * ww[None, :] / wsp)  # (J, P)
    s = jnp.sqrt(jnp.float32(p))
    ft = jnp.concatenate([jnp.cos(theta), -jnp.sin(theta)], axis=0) / s        # (2J, P)
    c = jnp.where((kk2 == 0) | (2.0 * kk2 == wsp), 1.0, 2.0)[:, None]          # (J, 1)
    gt = jnp.concatenate([c * jnp.cos(theta), -c * jnp.sin(theta)], axis=0).T / s  # (P, 2J)
    return ft, gt


def _pack_spectral_weights(w1, w2):
    """(Cin,Cout,m1,m2,2) x2 -> (J, 2*Cout, 2*Cin) packed real weight (transposed).

    [Or | Oi] = [Ar | Ai] @ [[Wr, Wi], [-Wi, Wr]]   (per mode j).
    """
    cin, cout, m1, m2, _ = w1.shape

    def split(w):
        wr = jnp.transpose(w[..., 0], (2, 3, 0, 1)).reshape(m1 * m2, cin, cout)
        wi = jnp.transpose(w[..., 1], (2, 3, 0, 1)).reshape(m1 * m2, cin, cout)
        return wr, wi

    wr1, wi1 = split(w1)
    wr2, wi2 = split(w2)
    wr = jnp.concatenate([wr1, wr2], axis=0)                     # (J, Cin, Cout)
    wi = jnp.concatenate([wi1, wi2], axis=0)
    top = jnp.concatenate([wr, wi], axis=2)                      # (J, Cin, 2Cout)
    bot = jnp.concatenate([-wi, wr], axis=2)                     # (J, Cin, 2Cout)
    wpack = jnp.concatenate([top, bot], axis=1)                  # (J, 2Cin, 2Cout)
    return jnp.transpose(wpack, (0, 2, 1))                       # (J, 2Cout, 2Cin)


def _spectral_kernel(x_ref, ft_ref, wt_ref, gt_ref, o_ref, *, n_modes, cout):
    x = x_ref[0]                                                           # (P, Cin)
    # truncated forward DFT for the kept modes (MXU)
    a = jnp.dot(ft_ref[...], x, preferred_element_type=jnp.float32)        # (2J, Cin)
    # pack real/imag along the channel axis: Apack[j] = [Ar_j | Ai_j]
    a_pack = jnp.concatenate([a[:n_modes], a[n_modes:]], axis=1)           # (J, 2Cin)
    # packed complex channel mix (single fused pass producing [Or | Oi]).
    # Executed as a broadcast-reduce because each grid step holds one batch
    # element (1 row per mode); for large per-step batches this becomes a
    # mode-batched MXU dot.  FLOPs here are negligible vs the DFT matmuls.
    o_pack = jnp.sum(a_pack[:, None, :] * wt_ref[...], axis=-1)            # (J, 2Cout)
    o_cat = jnp.concatenate([o_pack[:, :cout], o_pack[:, cout:]], axis=0)  # (2J, Cout)
    # truncated inverse DFT back to the spatial grid (MXU)
    o_ref[0] = jnp.dot(gt_ref[...], o_cat, preferred_element_type=jnp.float32)  # (P, Cout)


def pallas_spectral_conv(h_flat, wt, ft, gt, bsz, hsp, wsp):
    n, cin = h_flat.shape
    p = hsp * wsp
    n_modes = wt.shape[0]
    cout = wt.shape[1] // 2
    x3 = h_flat.reshape(bsz, p, cin)          # free reshape, stays channels-last
    out = pl.pallas_call(
        partial(_spectral_kernel, n_modes=n_modes, cout=cout),
        out_shape=jax.ShapeDtypeStruct((bsz, p, cout), jnp.float32),
        grid=(bsz,),
        in_specs=[pl.BlockSpec((1, p, cin), lambda b: (b, 0, 0)),
                  pl.BlockSpec(ft.shape, lambda b: (0, 0)),
                  pl.BlockSpec(wt.shape, lambda b: (0, 0, 0)),
                  pl.BlockSpec(gt.shape, lambda b: (0, 0))],
        out_specs=pl.BlockSpec((1, p, cout), lambda b: (b, 0, 0)),
        compiler_params=pltpu.CompilerParams(dimension_semantics=("parallel",)),
    )(x3, ft, wt, gt)
    return out.reshape(n, cout)


# ---------------------------------------------------------------------------
# Module-level forward
# ---------------------------------------------------------------------------

@jax.jit
def simple_block2d_forward(x, params):
    """x: (B, H, W, 3) float32  ->  (B, H, W, 1) float32."""
    bsz, hsp, wsp, cin0 = x.shape
    n = bsz * hsp * wsp

    ft, gt = _dft_matrices(hsp, wsp, MODES1, MODES2)

    # fc0
    h = pallas_linear(x.reshape(n, cin0), params["fc0_w"], params["fc0_b"])   # (N, C)

    for i in range(4):
        wt = _pack_spectral_weights(params[f"spec{i}_w1"], params[f"spec{i}_w2"])
        # spectral branch (fused truncated-DFT conv, grid over batch)
        x1 = pallas_spectral_conv(h, wt, ft, gt, bsz, hsp, wsp)               # (N, C)
        # pointwise 1x1 conv + residual add + BN stats (pass 1)
        s, stats = pallas_pointwise_add_stats(
            x1, h, params[f"w{i}_w"], params[f"w{i}_b"])
        # BN normalize (+ ReLU for the first three blocks)   (pass 2)
        # TODO(synk): BatchNorm2d modeled in training mode at init (batch stats,
        # gamma=1, beta=0); learned affine / running stats are not represented.
        h = pallas_bn_apply(s, stats, relu=(i < 3))

    # fused fc1 + ReLU + fc2 head
    out = pallas_fc1_fc2(h, params["fc1_w"], params["fc1_b"],
                         params["fc2_w"], params["fc2_b"])                    # (N, 1)
    return out.reshape(bsz, hsp, wsp, 1)


# ---------------------------------------------------------------------------
# Deterministic parameter construction (shapes from SimpleBlock2d.__init__)
# ---------------------------------------------------------------------------

def make_params(key):
    params = {}
    keys = iter(jax.random.split(key, 64))

    def lin(cin, cout):
        k = 1.0 / jnp.sqrt(cin)
        w = jax.random.uniform(next(keys), (cin, cout), jnp.float32, -k, k)
        b = jax.random.uniform(next(keys), (1, cout), jnp.float32, -k, k)
        return w, b

    params["fc0_w"], params["fc0_b"] = lin(3, WIDTH)

    scale = 1.0 / (WIDTH * WIDTH)
    for i in range(4):
        params[f"spec{i}_w1"] = scale * jax.random.uniform(
            next(keys), (WIDTH, WIDTH, MODES1, MODES2, 2), jnp.float32)
        params[f"spec{i}_w2"] = scale * jax.random.uniform(
            next(keys), (WIDTH, WIDTH, MODES1, MODES2, 2), jnp.float32)
        # Conv1d(width, width, 1): weight (Cout, Cin, 1) -> stored as (Cin, Cout)
        params[f"w{i}_w"], params[f"w{i}_b"] = lin(WIDTH, WIDTH)

    params["fc1_w"], params["fc1_b"] = lin(WIDTH, 128)
    params["fc2_w"], params["fc2_b"] = lin(128, 1)
    return params


# ---------------------------------------------------------------------------
# Pure-JAX (FFT-based) reference, used only for a numerical sanity check
# ---------------------------------------------------------------------------

def _spectral_conv_ref(h_flat, w1, w2, bsz, hsp, wsp, m1, m2):
    cin = h_flat.shape[1]
    cout = w1.shape[1]
    x = h_flat.reshape(bsz, hsp, wsp, cin)
    x_ft = jnp.fft.rfft2(x, axes=(1, 2), norm="ortho")

    def cmul(a, w):
        wc = w[..., 0] + 1j * w[..., 1]
        return jnp.einsum("bxyi,ioxy->bxyo", a, wc)

    out_ft = jnp.zeros((bsz, hsp, wsp // 2 + 1, cout), dtype=x_ft.dtype)
    out_ft = out_ft.at[:, :m1, :m2, :].set(cmul(x_ft[:, :m1, :m2, :], w1))
    out_ft = out_ft.at[:, hsp - m1:, :m2, :].set(cmul(x_ft[:, hsp - m1:, :m2, :], w2))
    out = jnp.fft.irfft2(out_ft, s=(hsp, wsp), axes=(1, 2), norm="ortho")
    return out.reshape(bsz * hsp * wsp, cout)


def _forward_ref(x, params):
    bsz, hsp, wsp, _ = x.shape
    n = bsz * hsp * wsp
    h = x.reshape(n, 3) @ params["fc0_w"] + params["fc0_b"]
    for i in range(4):
        x1 = _spectral_conv_ref(h, params[f"spec{i}_w1"], params[f"spec{i}_w2"],
                                bsz, hsp, wsp, MODES1, MODES2)
        x2 = h @ params[f"w{i}_w"] + params[f"w{i}_b"]
        s = x1 + x2
        mean = jnp.mean(s, axis=0, keepdims=True)
        var = jnp.mean((s - mean) ** 2, axis=0, keepdims=True)
        h = (s - mean) * jax.lax.rsqrt(var + BN_EPS)
        if i < 3:
            h = jnp.maximum(h, 0.0)
    h = jnp.maximum(h @ params["fc1_w"] + params["fc1_b"], 0.0)
    out = h @ params["fc2_w"] + params["fc2_b"]
    return out.reshape(bsz, hsp, wsp, 1)


if __name__ == "__main__":
    key = jax.random.PRNGKey(0)
    k_param, k_x = jax.random.split(key)

    params = make_params(k_param)
    x = jax.random.normal(k_x, (2, 16, 16, 3), dtype=jnp.float32)

    out = simple_block2d_forward(x, params)
    out = jax.block_until_ready(out)

    assert out.shape == (2, 16, 16, 1), out.shape
    assert out.dtype == jnp.float32
    assert bool(jnp.all(jnp.isfinite(out)))

    # Numerical sanity check against a pure-JAX FFT-based reference
    # (loose tolerance: TPU FFT vs truncated-DFT matmuls across 4 blocks).
    ref = _forward_ref(x, params)
    assert bool(jnp.allclose(out, ref, rtol=5e-2, atol=5e-3)), \
        float(jnp.max(jnp.abs(out - ref)))

    print("KERNEL_OK")
</pallas_src>

<mosaic_0001>
module attributes {stable_mosaic.version = 11 : i64} {
  func.func @_linear_kernel(%arg0: i32, %arg1: memref<512x3xf32, #tpu.memory_space<vmem>>, %arg2: memref<3x32xf32, #tpu.memory_space<vmem>>, %arg3: memref<1x32xf32, #tpu.memory_space<vmem>>, %arg4: memref<512x32xf32, #tpu.memory_space<vmem>>) attributes {dimension_semantics = [#tpu.dimension_semantics<parallel>], iteration_bounds = array<i64: 1>, scalar_prefetch = 0 : i64, scratch_operands = 0 : i64, tpu.core_type = #tpu.core_type<tc>, window_params = [{transform_indices = @transform_0, window_bounds = array<i64: 512, 3>}, {pipeline_mode = #tpu.pipeline_mode<synchronous>, transform_indices = @transform_1, window_bounds = array<i64: 3, 32>}, {pipeline_mode = #tpu.pipeline_mode<synchronous>, transform_indices = @transform_2, window_bounds = array<i64: 1, 32>}, {transform_indices = @transform_3, window_bounds = array<i64: 512, 32>}]} {
    %c0 = arith.constant 0 : index
    %c0_0 = arith.constant 0 : index
    %0 = vector.load %arg1[%c0, %c0_0] : memref<512x3xf32, #tpu.memory_space<vmem>>, vector<512x3xf32>
    %c0_1 = arith.constant 0 : index
    %c0_2 = arith.constant 0 : index
    %1 = vector.load %arg2[%c0_1, %c0_2] : memref<3x32xf32, #tpu.memory_space<vmem>>, vector<3x32xf32>
    %cst = arith.constant dense<0.000000e+00> : vector<512x32xf32>
    %2 = tpu.matmul %0, %1, %cst {dimension_numbers = #tpu.dot_dimension_numbers<[1], [0], [0], [1], [0, 0, 1, 1], [], []>} : vector<512x3xf32>, vector<3x32xf32>, vector<512x32xf32> -> vector<512x32xf32>
    %c0_3 = arith.constant 0 : index
    %c0_4 = arith.constant 0 : index
    %3 = vector.load %arg3[%c0_3, %c0_4] : memref<1x32xf32, #tpu.memory_space<vmem>>, vector<1x32xf32>
    %4 = vector.broadcast %3 : vector<1x32xf32> to vector<512x32xf32>
    %5 = arith.addf %2, %4 : vector<512x32xf32>
    %c0_5 = arith.constant 0 : index
    %c0_6 = arith.constant 0 : index
    %6 = vector.load %arg4[%c0_5, %c0_6] : memref<512x32xf32, #tpu.memory_space<vmem>>, vector<512x32xf32>
    tpu.vector_store %arg4[%c0_5, %c0_6], %5 {strides = array<i32>} : memref<512x32xf32, #tpu.memory_space<vmem>>, vector<512x32xf32>,
    return
  }
  func.func @transform_0(%arg0: i32) -> (i32, i32) {
    %c0_i32 = arith.constant 0 : i32
    %c0_i32_0 = arith.constant 0 : i32
    return %arg0, %c0_i32 : i32, i32
  }
  func.func @transform_1(%arg0: i32) -> (i32, i32) {
    %c0_i32 = arith.constant 0 : i32
    %c0_i32_0 = arith.constant 0 : i32
    %c0_i32_1 = arith.constant 0 : i32
    return %c0_i32, %c0_i32_0 : i32, i32
  }
  func.func @transform_2(%arg0: i32) -> (i32, i32) {
    %c0_i32 = arith.constant 0 : i32
    %c0_i32_0 = arith.constant 0 : i32
    %c0_i32_1 = arith.constant 0 : i32
    return %c0_i32, %c0_i32_0 : i32, i32
  }
  func.func @transform_3(%arg0: i32) -> (i32, i32) {
    %c0_i32 = arith.constant 0 : i32
    %c0_i32_0 = arith.constant 0 : i32
    return %arg0, %c0_i32 : i32, i32
  }
}

module attributes {stable_mosaic.version = 11 : i64} {
  func.func @_spectral_kernel(%arg0: i32, %arg1: memref<1x256x32xf32, #tpu.memory_space<vmem>>, %arg2: memref<64x256xf32, #tpu.memory_space<vmem>>, %arg3: memref<32x64x64xf32, #tpu.memory_space<vmem>>, %arg4: memref<256x64xf32, #tpu.memory_space<vmem>>, %arg5: memref<1x256x32xf32, #tpu.memory_space<vmem>>) attributes {dimension_semantics = [#tpu.dimension_semantics<parallel>], iteration_bounds = array<i64: 2>, scalar_prefetch = 0 : i64, scratch_operands = 0 : i64, tpu.core_type = #tpu.core_type<tc>, window_params = [{transform_indices = @transform_0, window_bounds = array<i64: 1, 256, 32>}, {pipeline_mode = #tpu.pipeline_mode<synchronous>, transform_indices = @transform_1, window_bounds = array<i64: 64, 256>}, {pipeline_mode = #tpu.pipeline_mode<synchronous>, transform_indices = @transform_2, window_bounds = array<i64: 32, 64, 64>}, {pipeline_mode = #tpu.pipeline_mode<synchronous>, transform_indices = @transform_3, window_bounds = array<i64: 256, 64>}, {transform_indices = @transform_4, window_bounds = array<i64: 1, 256, 32>}]} {
    %c0 = arith.constant 0 : index
    %c0_0 = arith.constant 0 : index
    %c0_1 = arith.constant 0 : index
    %0 = vector.load %arg1[%c0, %c0_0, %c0_1] : memref<1x256x32xf32, #tpu.memory_space<vmem>>, vector<1x256x32xf32>
    %1 = vector.shape_cast %0 : vector<1x256x32xf32> to vector<256x32xf32>
    %c0_2 = arith.constant 0 : index
    %c0_3 = arith.constant 0 : index
    %2 = vector.load %arg2[%c0_2, %c0_3] : memref<64x256xf32, #tpu.memory_space<vmem>>, vector<64x256xf32>
    %cst = arith.constant dense<0.000000e+00> : vector<64x32xf32>
    %3 = tpu.matmul %2, %1, %cst {dimension_numbers = #tpu.dot_dimension_numbers<[1], [0], [0], [1], [0, 0, 1, 1], [], []>} : vector<64x256xf32>, vector<256x32xf32>, vector<64x32xf32> -> vector<64x32xf32>
    %4 = vector.extract_strided_slice %3 {offsets = [0, 0], sizes = [32, 32], strides = [1, 1]} : vector<64x32xf32> to vector<32x32xf32>
    %5 = vector.extract_strided_slice %3 {offsets = [32, 0], sizes = [32, 32], strides = [1, 1]} : vector<64x32xf32> to vector<32x32xf32>
    %6 = tpu.concatenate %4, %5 in 1 : vector<32x32xf32>, vector<32x32xf32> -> vector<32x64xf32>
    %7 = vector.shape_cast %6 : vector<32x64xf32> to vector<32x1x64xf32>
    %c0_4 = arith.constant 0 : index
    %c0_5 = arith.constant 0 : index
    %c0_6 = arith.constant 0 : index
    %8 = vector.load %arg3[%c0_4, %c0_5, %c0_6] : memref<32x64x64xf32, #tpu.memory_space<vmem>>, vector<32x64x64xf32>
    %9 = vector.broadcast %7 : vector<32x1x64xf32> to vector<32x64x64xf32>
    %10 = arith.mulf %9, %8 : vector<32x64x64xf32>
    %cst_7 = arith.constant dense<0.000000e+00> : vector<32x64xf32>
    %11 = vector.multi_reduction <add>, %10, %cst_7 [2] : vector<32x64x64xf32> to vector<32x64xf32>
    %12 = vector.extract_strided_slice %11 {offsets = [0, 0], sizes = [32, 32], strides = [1, 1]} : vector<32x64xf32> to vector<32x32xf32>
    %13 = vector.extract_strided_slice %11 {offsets = [0, 32], sizes = [32, 32], strides = [1, 1]} : vector<32x64xf32> to vector<32x32xf32>
    %14 = tpu.concatenate %12, %13 in 0 : vector<32x32xf32>, vector<32x32xf32> -> vector<64x32xf32>
    %c0_8 = arith.constant 0 : index
    %c0_9 = arith.constant 0 : index
    %15 = vector.load %arg4[%c0_8, %c0_9] : memref<256x64xf32, #tpu.memory_space<vmem>>, vector<256x64xf32>
    %cst_10 = arith.constant dense<0.000000e+00> : vector<256x32xf32>
    %16 = tpu.matmul %15, %14, %cst_10 {dimension_numbers = #tpu.dot_dimension_numbers<[1], [0], [0], [1], [0, 0, 1, 1], [], []>} : vector<256x64xf32>, vector<64x32xf32>, vector<256x32xf32> -> vector<256x32xf32>
    %c0_11 = arith.constant 0 : index
    %c0_12 = arith.constant 0 : index
    %c0_13 = arith.constant 0 : index
    %17 = vector.load %arg5[%c0_11, %c0_12, %c0_13] : memref<1x256x32xf32, #tpu.memory_space<vmem>>, vector<1x256x32xf32>
    %18 = vector.shape_cast %17 : vector<1x256x32xf32> to vector<256x32xf32>
    %19 = vector.shape_cast %16 : vector<256x32xf32> to vector<1x256x32xf32>
    tpu.vector_store %arg5[%c0_11, %c0_12, %c0_13], %19 {strides = array<i32>} : memref<1x256x32xf32, #tpu.memory_space<vmem>>, vector<1x256x32xf32>,
    return
  }
  func.func @transform_0(%arg0: i32) -> (i32, i32, i32) {
    %c0_i32 = arith.constant 0 : i32
    %c0_i32_0 = arith.constant 0 : i32
    %c0_i32_1 = arith.constant 0 : i32
    return %arg0, %c0_i32, %c0_i32_0 : i32, i32, i32
  }
  func.func @transform_1(%arg0: i32) -> (i32, i32) {
    %c0_i32 = arith.constant 0 : i32
    %c0_i32_0 = arith.constant 0 : i32
    %c0_i32_1 = arith.constant 0 : i32
    return %c0_i32, %c0_i32_0 : i32, i32
  }
  func.func @transform_2(%arg0: i32) -> (i32, i32, i32) {
    %c0_i32 = arith.constant 0 : i32
    %c0_i32_0 = arith.constant 0 : i32
    %c0_i32_1 = arith.constant 0 : i32
    %c0_i32_2 = arith.constant 0 : i32
    return %c0_i32, %c0_i32_0, %c0_i32_1 : i32, i32, i32
  }
  func.func @transform_3(%arg0: i32) -> (i32, i32) {
    %c0_i32 = arith.constant 0 : i32
    %c0_i32_0 = arith.constant 0 : i32
    %c0_i32_1 = arith.constant 0 : i32
    return %c0_i32, %c0_i32_0 : i32, i32
  }
  func.func @transform_4(%arg0: i32) -> (i32, i32, i32) {
    %c0_i32 = arith.constant 0 : i32
    %c0_i32_0 = arith.constant 0 : i32
    %c0_i32_1 = arith.constant 0 : i32
    return %arg0, %c0_i32, %c0_i32_0 : i32, i32, i32
  }
}

module attributes {stable_mosaic.version = 11 : i64} {
  func.func @_pw_add_stats_kernel(%arg0: i32, %arg1: memref<512x32xf32, #tpu.memory_space<vmem>>, %arg2: memref<512x32xf32, #tpu.memory_space<vmem>>, %arg3: memref<32x32xf32, #tpu.memory_space<vmem>>, %arg4: memref<1x32xf32, #tpu.memory_space<vmem>>, %arg5: memref<512x32xf32, #tpu.memory_space<vmem>>, %arg6: memref<2x32xf32, #tpu.memory_space<vmem>>) attributes {dimension_semantics = [#tpu.dimension_semantics<arbitrary>], iteration_bounds = array<i64: 1>, scalar_prefetch = 0 : i64, scratch_operands = 0 : i64, tpu.core_type = #tpu.core_type<tc>, window_params = [{transform_indices = @transform_0, window_bounds = array<i64: 512, 32>}, {transform_indices = @transform_1, window_bounds = array<i64: 512, 32>}, {pipeline_mode = #tpu.pipeline_mode<synchronous>, transform_indices = @transform_2, window_bounds = array<i64: 32, 32>}, {pipeline_mode = #tpu.pipeline_mode<synchronous>, transform_indices = @transform_3, window_bounds = array<i64: 1, 32>}, {transform_indices = @transform_4, window_bounds = array<i64: 512, 32>}, {pipeline_mode = #tpu.pipeline_mode<synchronous>, transform_indices = @transform_5, window_bounds = array<i64: 2, 32>}]} {
    %c0 = arith.constant 0 : index
    %c0_0 = arith.constant 0 : index
    %0 = vector.load %arg1[%c0, %c0_0] : memref<512x32xf32, #tpu.memory_space<vmem>>, vector<512x32xf32>
    %c0_1 = arith.constant 0 : index
    %c0_2 = arith.constant 0 : index
    %1 = vector.load %arg2[%c0_1, %c0_2] : memref<512x32xf32, #tpu.memory_space<vmem>>, vector<512x32xf32>
    %c0_3 = arith.constant 0 : index
    %c0_4 = arith.constant 0 : index
    %2 = vector.load %arg3[%c0_3, %c0_4] : memref<32x32xf32, #tpu.memory_space<vmem>>, vector<32x32xf32>
    %cst = arith.constant dense<0.000000e+00> : vector<512x32xf32>
    %3 = tpu.matmul %1, %2, %cst {dimension_numbers = #tpu.dot_dimension_numbers<[1], [0], [0], [1], [0, 0, 1, 1], [], []>} : vector<512x32xf32>, vector<32x32xf32>, vector<512x32xf32> -> vector<512x32xf32>
    %4 = arith.addf %0, %3 : vector<512x32xf32>
    %c0_5 = arith.constant 0 : index
    %c0_6 = arith.constant 0 : index
    %5 = vector.load %arg4[%c0_5, %c0_6] : memref<1x32xf32, #tpu.memory_space<vmem>>, vector<1x32xf32>
    %6 = vector.broadcast %5 : vector<1x32xf32> to vector<512x32xf32>
    %7 = arith.addf %4, %6 : vector<512x32xf32>
    %c0_7 = arith.constant 0 : index
    %c0_8 = arith.constant 0 : index
    %8 = vector.load %arg5[%c0_7, %c0_8] : memref<512x32xf32, #tpu.memory_space<vmem>>, vector<512x32xf32>
    tpu.vector_store %arg5[%c0_7, %c0_8], %7 {strides = array<i32>} : memref<512x32xf32, #tpu.memory_space<vmem>>, vector<512x32xf32>,
    %cst_9 = arith.constant dense<0.000000e+00> : vector<32xf32>
    %9 = vector.multi_reduction <add>, %7, %cst_9 [0] : vector<512x32xf32> to vector<32xf32>
    %10 = vector.shape_cast %9 : vector<32xf32> to vector<1x32xf32>
    %11 = arith.mulf %7, %7 : vector<512x32xf32>
    %cst_10 = arith.constant dense<0.000000e+00> : vector<32xf32>
    %12 = vector.multi_reduction <add>, %11, %cst_10 [0] : vector<512x32xf32> to vector<32xf32>
    %13 = vector.shape_cast %12 : vector<32xf32> to vector<1x32xf32>
    %14 = tpu.concatenate %10, %13 in 0 : vector<1x32xf32>, vector<1x32xf32> -> vector<2x32xf32>
    %c0_i32 = arith.constant 0 : i32
    %15 = arith.cmpi eq, %arg0, %c0_i32 : i32
    %16 = arith.extui %15 : i1 to i32
    %c0_i32_11 = arith.constant 0 : i32
    %17 = arith.cmpi ne, %16, %c0_i32_11 : i32
    scf.if %17 {
      %cst_16 = arith.constant 0.000000e+00 : f32
      %21 = vector.broadcast %cst_16 : f32 to vector<2x32xf32>
      %c0_17 = arith.constant 0 : index
      %c0_18 = arith.constant 0 : index
      %22 = vector.load %arg6[%c0_17, %c0_18] : memref<2x32xf32, #tpu.memory_space<vmem>>, vector<2x32xf32>
      tpu.vector_store %arg6[%c0_17, %c0_18], %21 {strides = array<i32>} : memref<2x32xf32, #tpu.memory_space<vmem>>, vector<2x32xf32>,
    } else {
    }
    %c0_12 = arith.constant 0 : index
    %c0_13 = arith.constant 0 : index
    %18 = vector.load %arg6[%c0_12, %c0_13] : memref<2x32xf32, #tpu.memory_space<vmem>>, vector<2x32xf32>
    %19 = arith.addf %18, %14 : vector<2x32xf32>
    %c0_14 = arith.constant 0 : index
    %c0_15 = arith.constant 0 : index
    %20 = vector.load %arg6[%c0_14, %c0_15] : memref<2x32xf32, #tpu.memory_space<vmem>>, vector<2x32xf32>
    tpu.vector_store %arg6[%c0_14, %c0_15], %19 {strides = array<i32>} : memref<2x32xf32, #tpu.memory_space<vmem>>, vector<2x32xf32>,
    return
  }
  func.func @transform_0(%arg0: i32) -> (i32, i32) {
    %c0_i32 = arith.constant 0 : i32
    %c0_i32_0 = arith.constant 0 : i32
    return %arg0, %c0_i32 : i32, i32
  }
  func.func @transform_1(%arg0: i32) -> (i32, i32) {
    %c0_i32 = arith.constant 0 : i32
    %c0_i32_0 = arith.constant 0 : i32
    return %arg0, %c0_i32 : i32, i32
  }
  func.func @transform_2(%arg0: i32) -> (i32, i32) {
    %c0_i32 = arith.constant 0 : i32
    %c0_i32_0 = arith.constant 0 : i32
    %c0_i32_1 = arith.constant 0 : i32
    return %c0_i32, %c0_i32_0 : i32, i32
  }
  func.func @transform_3(%arg0: i32) -> (i32, i32) {
    %c0_i32 = arith.constant 0 : i32
    %c0_i32_0 = arith.constant 0 : i32
    %c0_i32_1 = arith.constant 0 : i32
    return %c0_i32, %c0_i32_0 : i32, i32
  }
  func.func @transform_4(%arg0: i32) -> (i32, i32) {
    %c0_i32 = arith.constant 0 : i32
    %c0_i32_0 = arith.constant 0 : i32
    return %arg0, %c0_i32 : i32, i32
  }
  func.func @transform_5(%arg0: i32) -> (i32, i32) {
    %c0_i32 = arith.constant 0 : i32
    %c0_i32_0 = arith.constant 0 : i32
    %c0_i32_1 = arith.constant 0 : i32
    return %c0_i32, %c0_i32_0 : i32, i32
  }
}

module attributes {stable_mosaic.version = 11 : i64} {
  func.func @_bn_apply_kernel(%arg0: i32, %arg1: memref<512x32xf32, #tpu.memory_space<vmem>>, %arg2: memref<2x32xf32, #tpu.memory_space<vmem>>, %arg3: memref<512x32xf32, #tpu.memory_space<vmem>>) attributes {dimension_semantics = [#tpu.dimension_semantics<parallel>], iteration_bounds = array<i64: 1>, scalar_prefetch = 0 : i64, scratch_operands = 0 : i64, tpu.core_type = #tpu.core_type<tc>, window_params = [{transform_indices = @transform_0, window_bounds = array<i64: 512, 32>}, {pipeline_mode = #tpu.pipeline_mode<synchronous>, transform_indices = @transform_1, window_bounds = array<i64: 2, 32>}, {transform_indices = @transform_2, window_bounds = array<i64: 512, 32>}]} {
    %c0 = arith.constant 0 : index
    %c0_0 = arith.constant 0 : index
    %0 = vector.load %arg2[%c0, %c0_0] : memref<2x32xf32, #tpu.memory_space<vmem>>, vector<1x32xf32>
    %cst = arith.constant 0.001953125 : f32
    %1 = vector.broadcast %cst : f32 to vector<1x32xf32>
    %2 = arith.mulf %0, %1 : vector<1x32xf32>
    %c1 = arith.constant 1 : index
    %c0_1 = arith.constant 0 : index
    %3 = vector.load %arg2[%c1, %c0_1] : memref<2x32xf32, #tpu.memory_space<vmem>>, vector<1x32xf32>
    %cst_2 = arith.constant 0.001953125 : f32
    %4 = vector.broadcast %cst_2 : f32 to vector<1x32xf32>
    %5 = arith.mulf %3, %4 : vector<1x32xf32>
    %6 = arith.mulf %2, %2 : vector<1x32xf32>
    %7 = arith.subf %5, %6 : vector<1x32xf32>
    %c0_3 = arith.constant 0 : index
    %c0_4 = arith.constant 0 : index
    %8 = vector.load %arg1[%c0_3, %c0_4] : memref<512x32xf32, #tpu.memory_space<vmem>>, vector<512x32xf32>
    %9 = vector.broadcast %2 : vector<1x32xf32> to vector<512x32xf32>
    %10 = arith.subf %8, %9 : vector<512x32xf32>
    %cst_5 = arith.constant 9.99999974E-6 : f32
    %11 = vector.broadcast %cst_5 : f32 to vector<1x32xf32>
    %12 = arith.addf %7, %11 : vector<1x32xf32>
    %13 = math.rsqrt %12 : vector<1x32xf32>
    %14 = vector.broadcast %13 : vector<1x32xf32> to vector<512x32xf32>
    %15 = arith.mulf %10, %14 : vector<512x32xf32>
    %cst_6 = arith.constant 0.000000e+00 : f32
    %16 = vector.broadcast %cst_6 : f32 to vector<512x32xf32>
    %17 = arith.maximumf %15, %16 : vector<512x32xf32>
    %c0_7 = arith.constant 0 : index
    %c0_8 = arith.constant 0 : index
    %18 = vector.load %arg3[%c0_7, %c0_8] : memref<512x32xf32, #tpu.memory_space<vmem>>, vector<512x32xf32>
    tpu.vector_store %arg3[%c0_7, %c0_8], %17 {strides = array<i32>} : memref<512x32xf32, #tpu.memory_space<vmem>>, vector<512x32xf32>,
    return
  }
  func.func @transform_0(%arg0: i32) -> (i32, i32) {
    %c0_i32 = arith.constant 0 : i32
    %c0_i32_0 = arith.constant 0 : i32
    return %arg0, %c0_i32 : i32, i32
  }
  func.func @transform_1(%arg0: i32) -> (i32, i32) {
    %c0_i32 = arith.constant 0 : i32
    %c0_i32_0 = arith.constant 0 : i32
    %c0_i32_1 = arith.constant 0 : i32
    return %c0_i32, %c0_i32_0 : i32, i32
  }
  func.func @transform_2(%arg0: i32) -> (i32, i32) {
    %c0_i32 = arith.constant 0 : i32
    %c0_i32_0 = arith.constant 0 : i32
    return %arg0, %c0_i32 : i32, i32
  }
}

module attributes {stable_mosaic.version = 11 : i64} {
  func.func @_bn_apply_kernel(%arg0: i32, %arg1: memref<512x32xf32, #tpu.memory_space<vmem>>, %arg2: memref<2x32xf32, #tpu.memory_space<vmem>>, %arg3: memref<512x32xf32, #tpu.memory_space<vmem>>) attributes {dimension_semantics = [#tpu.dimension_semantics<parallel>], iteration_bounds = array<i64: 1>, scalar_prefetch = 0 : i64, scratch_operands = 0 : i64, tpu.core_type = #tpu.core_type<tc>, window_params = [{transform_indices = @transform_0, window_bounds = array<i64: 512, 32>}, {pipeline_mode = #tpu.pipeline_mode<synchronous>, transform_indices = @transform_1, window_bounds = array<i64: 2, 32>}, {transform_indices = @transform_2, window_bounds = array<i64: 512, 32>}]} {
    %c0 = arith.constant 0 : index
    %c0_0 = arith.constant 0 : index
    %0 = vector.load %arg2[%c0, %c0_0] : memref<2x32xf32, #tpu.memory_space<vmem>>, vector<1x32xf32>
    %cst = arith.constant 0.001953125 : f32
    %1 = vector.broadcast %cst : f32 to vector<1x32xf32>
    %2 = arith.mulf %0, %1 : vector<1x32xf32>
    %c1 = arith.constant 1 : index
    %c0_1 = arith.constant 0 : index
    %3 = vector.load %arg2[%c1, %c0_1] : memref<2x32xf32, #tpu.memory_space<vmem>>, vector<1x32xf32>
    %cst_2 = arith.constant 0.001953125 : f32
    %4 = vector.broadcast %cst_2 : f32 to vector<1x32xf32>
    %5 = arith.mulf %3, %4 : vector<1x32xf32>
    %6 = arith.mulf %2, %2 : vector<1x32xf32>
    %7 = arith.subf %5, %6 : vector<1x32xf32>
    %c0_3 = arith.constant 0 : index
    %c0_4 = arith.constant 0 : index
    %8 = vector.load %arg1[%c0_3, %c0_4] : memref<512x32xf32, #tpu.memory_space<vmem>>, vector<512x32xf32>
    %9 = vector.broadcast %2 : vector<1x32xf32> to vector<512x32xf32>
    %10 = arith.subf %8, %9 : vector<512x32xf32>
    %cst_5 = arith.constant 9.99999974E-6 : f32
    %11 = vector.broadcast %cst_5 : f32 to vector<1x32xf32>
    %12 = arith.addf %7, %11 : vector<1x32xf32>
    %13 = math.rsqrt %12 : vector<1x32xf32>
    %14 = vector.broadcast %13 : vector<1x32xf32> to vector<512x32xf32>
    %15 = arith.mulf %10, %14 : vector<512x32xf32>
    %c0_6 = arith.constant 0 : index
    %c0_7 = arith.constant 0 : index
    %16 = vector.load %arg3[%c0_6, %c0_7] : memref<512x32xf32, #tpu.memory_space<vmem>>, vector<512x32xf32>
    tpu.vector_store %arg3[%c0_6, %c0_7], %15 {strides = array<i32>} : memref<512x32xf32, #tpu.memory_space<vmem>>, vector<512x32xf32>,
    return
  }
  func.func @transform_0(%arg0: i32) -> (i32, i32) {
    %c0_i32 = arith.constant 0 : i32
    %c0_i32_0 = arith.constant 0 : i32
    return %arg0, %c0_i32 : i32, i32
  }
  func.func @transform_1(%arg0: i32) -> (i32, i32) {
    %c0_i32 = arith.constant 0 : i32
    %c0_i32_0 = arith.constant 0 : i32
    %c0_i32_1 = arith.constant 0 : i32
    return %c0_i32, %c0_i32_0 : i32, i32
  }
  func.func @transform_2(%arg0: i32) -> (i32, i32) {
    %c0_i32 = arith.constant 0 : i32
    %c0_i32_0 = arith.constant 0 : i32
    return %arg0, %c0_i32 : i32, i32
  }
}

module attributes {stable_mosaic.version = 11 : i64} {
  func.func @_head_kernel(%arg0: i32, %arg1: memref<512x32xf32, #tpu.memory_space<vmem>>, %arg2: memref<32x128xf32, #tpu.memory_space<vmem>>, %arg3: memref<1x128xf32, #tpu.memory_space<vmem>>, %arg4: memref<128x1xf32, #tpu.memory_space<vmem>>, %arg5: memref<1x1xf32, #tpu.memory_space<vmem>>, %arg6: memref<512x1xf32, #tpu.memory_space<vmem>>) attributes {dimension_semantics = [#tpu.dimension_semantics<parallel>], iteration_bounds = array<i64: 1>, scalar_prefetch = 0 : i64, scratch_operands = 0 : i64, tpu.core_type = #tpu.core_type<tc>, window_params = [{transform_indices = @transform_0, window_bounds = array<i64: 512, 32>}, {pipeline_mode = #tpu.pipeline_mode<synchronous>, transform_indices = @transform_1, window_bounds = array<i64: 32, 128>}, {pipeline_mode = #tpu.pipeline_mode<synchronous>, transform_indices = @transform_2, window_bounds = array<i64: 1, 128>}, {pipeline_mode = #tpu.pipeline_mode<synchronous>, transform_indices = @transform_3, window_bounds = array<i64: 128, 1>}, {pipeline_mode = #tpu.pipeline_mode<synchronous>, transform_indices = @transform_4, window_bounds = array<i64: 1, 1>}, {transform_indices = @transform_5, window_bounds = array<i64: 512, 1>}]} {
    %c0 = arith.constant 0 : index
    %c0_0 = arith.constant 0 : index
    %0 = vector.load %arg1[%c0, %c0_0] : memref<512x32xf32, #tpu.memory_space<vmem>>, vector<512x32xf32>
    %c0_1 = arith.constant 0 : index
    %c0_2 = arith.constant 0 : index
    %1 = vector.load %arg2[%c0_1, %c0_2] : memref<32x128xf32, #tpu.memory_space<vmem>>, vector<32x128xf32>
    %cst = arith.constant dense<0.000000e+00> : vector<512x128xf32>
    %2 = tpu.matmul %0, %1, %cst {dimension_numbers = #tpu.dot_dimension_numbers<[1], [0], [0], [1], [0, 0, 1, 1], [], []>} : vector<512x32xf32>, vector<32x128xf32>, vector<512x128xf32> -> vector<512x128xf32>
    %c0_3 = arith.constant 0 : index
    %c0_4 = arith.constant 0 : index
    %3 = vector.load %arg3[%c0_3, %c0_4] : memref<1x128xf32, #tpu.memory_space<vmem>>, vector<1x128xf32>
    %4 = vector.broadcast %3 : vector<1x128xf32> to vector<512x128xf32>
    %5 = arith.addf %2, %4 : vector<512x128xf32>
    %cst_5 = arith.constant 0.000000e+00 : f32
    %6 = vector.broadcast %cst_5 : f32 to vector<512x128xf32>
    %7 = arith.maximumf %5, %6 : vector<512x128xf32>
    %c0_6 = arith.constant 0 : index
    %c0_7 = arith.constant 0 : index
    %8 = vector.load %arg4[%c0_6, %c0_7] : memref<128x1xf32, #tpu.memory_space<vmem>>, vector<128x1xf32>
    %cst_8 = arith.constant dense<0.000000e+00> : vector<512x1xf32>
    %9 = tpu.matmul %7, %8, %cst_8 {dimension_numbers = #tpu.dot_dimension_numbers<[1], [0], [0], [1], [0, 0, 1, 1], [], []>} : vector<512x128xf32>, vector<128x1xf32>, vector<512x1xf32> -> vector<512x1xf32>
    %c0_9 = arith.constant 0 : index
    %c0_10 = arith.constant 0 : index
    %10 = vector.load %arg5[%c0_9, %c0_10] : memref<1x1xf32, #tpu.memory_space<vmem>>, vector<1x1xf32>
    %11 = vector.broadcast %10 : vector<1x1xf32> to vector<512x1xf32>
    %12 = arith.addf %9, %11 : vector<512x1xf32>
    %c0_11 = arith.constant 0 : index
    %c0_12 = arith.constant 0 : index
    %13 = vector.load %arg6[%c0_11, %c0_12] : memref<512x1xf32, #tpu.memory_space<vmem>>, vector<512x1xf32>
    tpu.vector_store %arg6[%c0_11, %c0_12], %12 {strides = array<i32>} : memref<512x1xf32, #tpu.memory_space<vmem>>, vector<512x1xf32>,
    return
  }
  func.func @transform_0(%arg0: i32) -> (i32, i32) {
    %c0_i32 = arith.constant 0 : i32
    %c0_i32_0 = arith.constant 0 : i32
    return %arg0, %c0_i32 : i32, i32
  }
  func.func @transform_1(%arg0: i32) -> (i32, i32) {
    %c0_i32 = arith.constant 0 : i32
    %c0_i32_0 = arith.constant 0 : i32
    %c0_i32_1 = arith.constant 0 : i32
    return %c0_i32, %c0_i32_0 : i32, i32
  }
  func.func @transform_2(%arg0: i32) -> (i32, i32) {
    %c0_i32 = arith.constant 0 : i32
    %c0_i32_0 = arith.constant 0 : i32
    %c0_i32_1 = arith.constant 0 : i32
    return %c0_i32, %c0_i32_0 : i32, i32
  }
  func.func @transform_3(%arg0: i32) -> (i32, i32) {
    %c0_i32 = arith.constant 0 : i32
    %c0_i32_0 = arith.constant 0 : i32
    %c0_i32_1 = arith.constant 0 : i32
    return %c0_i32, %c0_i32_0 : i32, i32
  }
  func.func @transform_4(%arg0: i32) -> (i32, i32) {
    %c0_i32 = arith.constant 0 : i32
    %c0_i32_0 = arith.constant 0 : i32
    %c0_i32_1 = arith.constant 0 : i32
    return %c0_i32, %c0_i32_0 : i32, i32
  }
  func.func @transform_5(%arg0: i32) -> (i32, i32) {
    %c0_i32 = arith.constant 0 : i32
    %c0_i32_0 = arith.constant 0 : i32
    return %arg0, %c0_i32 : i32, i32
  }
}

</mosaic_0001>

<bundles_post_ra>
// kernel: mul.36
= control target key start
LH: loop header
LB: loop body
LE: loop exit
PB: predicated region body
PF: predicated region fallthrough
CT: control target
= control target key end

     0   :  { %s67_s10 = smov 28   ;;  %s68_s11 = smov 20   ;;  %vm3_vm0 = vcmask 31744   ;;  %vm9_vm1 = vcmask 261344   ;;  %vm15_vm2 = vcmask 228544   ;;  %vm21_vm3 = vcmask 195744   ;;  %s111_s0 = inlined_call_operand.vmem [shape: f32[8,4], index: 0, kind: input, shape index: {}]   ;;  %s112_s1 = inlined_call_operand.vmem [shape: f32[32], index: 1, kind: output, shape index: {}]  }
   0x1   :  { %v53_v0 = vld [vmem:[%s111_s0 + $0x7] sm:$0x1]   ;;  %v55_v1 = vld [vmem:[%s111_s0 + $0x5] sm:$0x1]   ;;  %v54_v2 = vld [vmem:[%s111_s0 + $0x6] sm:$0x1]  }
   0x2   :  { %7 = vrot.lane.b32.xlu0 %v53_v0, %s67_s10  ;;  %19 = vrot.lane.b32.xlu1 %v55_v1, %s68_s11  ;;  %v56_v3 = vld [vmem:[%s111_s0 + $0x4] sm:$0x1]   ;;  %v2_v4 = vld [vmem:[%s111_s0] sm:$0x1]   ;;  %s69_s18 = smov 24   ;;  %s70_s19 = smov 16  }
   0x3   :  { %4 = vst.msk [vmem:[#allocation0] sm:$0x1] %vm3_vm0, %v2_v4   ;;  %v57_v5 = vld [vmem:[%s111_s0 + $0x3] sm:$0x1]   ;;  %v58_v6 = vld [vmem:[%s111_s0 + $0x2] sm:$0x1]  }
   0x4   :  { %s71_s24 = smov 12   ;;  %s72_s25 = smov 8   ;;  %v59_v7 = vld [vmem:[%s111_s0 + $0x1] sm:$0x1]   ;;  %vm27_vm4 = vcmask 162944   ;;  %vm33_vm5 = vcmask 130144  }
   0x5   :  { %s73_s0 = smov 4   ;;  %vm39_vm6 = vcmask 97344   ;;  %vm45_vm7 = vcmask 64544  }
   0x6   :  { %13 = vrot.lane.b32.xlu0 %v54_v2, %s69_s18  ;;  %25 = vrot.lane.b32.xlu1 %v56_v3, %s70_s19 }
   0xa   :  { %31 = vrot.lane.b32.xlu0 %v57_v5, %s71_s24  ;;  %37 = vrot.lane.b32.xlu1 %v58_v6, %s72_s25 }
   0xe   :  { %43 = vrot.lane.b32.xlu0 %v59_v7, %s73_s0 }
  0x74   :  { %v8_v8 = vpop.permute.xlu0 %7   ;;  %v20_v9 = vpop.permute.xlu1 %19  }
  0x75   :  { %10 = vst.msk [vmem:[#allocation0] sm:$0x1] %vm9_vm1, %v8_v8  }
  0x78   :  { %v14_v10 = vpop.permute.xlu0 %13   ;;  %v26_v11 = vpop.permute.xlu1 %25  }
  0x79   :  { %16 = vst.msk [vmem:[#allocation0] sm:$0x1] %vm15_vm2, %v14_v10  }
  0x7a   :  { %22 = vst.msk [vmem:[#allocation0] sm:$0x1] %vm21_vm3, %v20_v9  }
  0x7b   :  { %28 = vst.msk [vmem:[#allocation0] sm:$0x1] %vm27_vm4, %v26_v11  }
  0x7c   :  { %v32_v12 = vpop.permute.xlu0 %31   ;;  %v38_v13 = vpop.permute.xlu1 %37  }
  0x7d   :  { %34 = vst.msk [vmem:[#allocation0] sm:$0x1] %vm33_vm5, %v32_v12  }
  0x7e   :  { %40 = vst.msk [vmem:[#allocation0] sm:$0x1] %vm39_vm6, %v38_v13  }
  0x80   :  { %v44_v14 = vpop.permute.xlu0 %43  }
  0x81   :  { %46 = vst.msk [vmem:[#allocation0] sm:$0x1] %vm45_vm7, %v44_v14  }
  0x88   :  { %v50_v15 = vld [vmem:[#allocation0] sm:$0x1] }
  0x89   :  { %52 = vst [vmem:[%s112_s1] sm:$0x1] %v50_v15 }

// kernel: mul.32
= control target key start
LH: loop header
LB: loop body
LE: loop exit
PB: predicated region body
PF: predicated region fallthrough
CT: control target
= control target key end

     0   :  { %s7_s6 = smov 3  ;;  %s21_s9 = smov 3  ;;  %vm4_vm0 = vcmask 130048   ;;  %vm11_vm1 = vcmask 1048448   ;;  %vm18_vm2 = vcmask 917248   ;;  %vm25_vm3 = vcmask 786048   ;;  %s119_s0 = inlined_call_operand.vmem [shape: f32[16,16], index: 0, kind: input, shape index: {}]   ;;  %s120_s1 = inlined_call_operand.vmem [shape: f32[256], index: 1, kind: output, shape index: {}]  }
   0x1   :  { %v61_v0 = vld [vmem:[%s119_s0 + $0x7] ss:$8 sm:%s7_s6]   ;;  %s75_s10 = smov 112   ;;  %v63_v1 = vld [vmem:[%s119_s0 + $0x5] ss:$8 sm:%s21_s9]   ;;  %s14_s13 = smov 3 }
   0x2   :  { %9 = vrot.lane.b32.xlu0 %v61_v0, %s75_s10  ;;  %s76_s14 = smov 80   ;;  %v62_v2 = vld [vmem:[%s119_s0 + $0x6] ss:$8 sm:%s14_s13]   ;;  %s28_s17 = smov 3  ;;  %vm32_vm4 = vcmask 654848   ;;  %vm39_vm5 = vcmask 523648  }
   0x3   :  { %23 = vrot.lane.b32.xlu1 %v63_v1, %s76_s14  ;;  %v64_v3 = vld [vmem:[%s119_s0 + $0x4] ss:$8 sm:%s28_s17]   ;;  %s35_s20 = smov 3  ;;  %s42_s21 = smov 3  ;;  %vm46_vm6 = vcmask 392448   ;;  %vm53_vm7 = vcmask 261248  }
   0x4   :  { %s77_s22 = smov 96   ;;  %s78_s23 = smov 64   ;;  %v65_v4 = vld [vmem:[%s119_s0 + $0x3] ss:$8 sm:%s35_s20]   ;;  %v66_v5 = vld [vmem:[%s119_s0 + $0x2] ss:$8 sm:%s42_s21]  }
   0x5   :  { %s2_s26 = smov 3  ;;  %s49_s29 = smov 3 }
   0x6   :  { %16 = vrot.lane.b32.xlu0 %v62_v2, %s77_s22  ;;  %v3_v6 = vld [vmem:[%s119_s0] ss:$8 sm:%s2_s26]   ;;  %s79_s3 = smov 48   ;;  %s80_s4 = smov 32  }
   0x7   :  { %30 = vrot.lane.b32.xlu1 %v64_v3, %s78_s23  ;;  %5 = vst.msk [vmem:[#allocation0] sm:$0x3] %vm4_vm0, %v3_v6   ;;  %v67_v7 = vld [vmem:[%s119_s0 + $0x1] ss:$8 sm:%s49_s29]   ;;  %s81_s0 = smov 16  }
   0xa   :  { %37 = vrot.lane.b32.xlu0 %v65_v4, %s79_s3 }
   0xb   :  { %44 = vrot.lane.b32.xlu1 %v66_v5, %s80_s4 }
   0xe   :  { %51 = vrot.lane.b32.xlu0 %v67_v7, %s81_s0 }
  0x74   :  { %v10_v8 = vpop.permute.xlu0 %9  }
  0x75   :  { %12 = vst.msk [vmem:[#allocation0] sm:$0x3] %vm11_vm1, %v10_v8   ;;  %v24_v9 = vpop.permute.xlu1 %23  }
  0x78   :  { %v17_v10 = vpop.permute.xlu0 %16  }
  0x79   :  { %19 = vst.msk [vmem:[#allocation0] sm:$0x3] %vm18_vm2, %v17_v10   ;;  %v31_v11 = vpop.permute.xlu1 %30  }
  0x7a   :  { %26 = vst.msk [vmem:[#allocation0] sm:$0x3] %vm25_vm3, %v24_v9  }
  0x7b   :  { %33 = vst.msk [vmem:[#allocation0] sm:$0x3] %vm32_vm4, %v31_v11  }
  0x7c   :  { %v38_v12 = vpop.permute.xlu0 %37  }
  0x7d   :  { %40 = vst.msk [vmem:[#allocation0] sm:$0x3] %vm39_vm5, %v38_v12   ;;  %v45_v13 = vpop.permute.xlu1 %44  }
  0x7e   :  { %47 = vst.msk [vmem:[#allocation0] sm:$0x3] %vm46_vm6, %v45_v13  }
  0x80   :  { %v52_v14 = vpop.permute.xlu0 %51  }
  0x81   :  { %54 = vst.msk [vmem:[#allocation0] sm:$0x3] %vm53_vm7, %v52_v14  }
  0x88   :  { %v58_v15 = vld [vmem:[#allocation0] sm:$0x3] }
  0x89   :  { %60 = vst [vmem:[%s120_s1] sm:$0x3] %v58_v15 }

// kernel: simple_block2d_forward.14
= control target key start
LH: loop header
LB: loop body
LE: loop exit
PB: predicated region body
PF: predicated region fallthrough
CT: control target
= control target key end

     0   :  { %vm279_vm0 = vcmask 1042432   ;;  %vm86_vm1 = vcmask 23552   ;;  %vm668_vm2 = vcmask 261120   ;;  %s1572_s1 = inlined_call_operand.vmem [shape: f32[3,32], index: 1, kind: input, shape index: {}]   ;;  %s1573_s0 = inlined_call_operand.vmem [shape: f32[512,3], index: 0, kind: input, shape index: {}]   ;;  %s1574_s2 = inlined_call_operand.vmem [shape: f32[1,32], index: 2, kind: input, shape index: {}]   ;;  %s1575_s3 = inlined_call_operand.vmem [shape: f32[512,32], index: 3, kind: output, shape index: {}]  }
   0x1   :  { %v78_v0 = vld [vmem:[%s1572_s1] sm:$0x7]  ;;  %v15_v3 = vld [vmem:[%s1573_s0 + $0x8] sm:$0xff]  ;;  %v16_v5 = vld [vmem:[%s1573_s0 + $0x10] sm:$0xff] }
   0x2   :  { %v14_v1 = vld [vmem:[%s1573_s0] sm:$0xff]  ;;  %868 = vmatprep.subr.msk.mxu0 %vm279_vm0, %v78_v0  ;;  %966 = vmatprep.subr.msk.mxu1 %vm279_vm0, %v78_v0  ;;  %v47_v4 = vld [vmem:[%s1573_s0 + $0x108] sm:$0xff]  ;;  %v48_v6 = vld [vmem:[%s1573_s0 + $0x110] sm:$0xff] }
   0x3   :  { %v46_v2 = vld [vmem:[%s1573_s0 + $0x100] sm:$0xff]  ;;  %869 = vmatpush3.msk.msra.mxu0 %vm279_vm0, %v78_v0  ;;  %967 = vmatpush3.msk.msra.mxu1 %vm279_vm0, %v78_v0  ;;  %v17_v7 = vld [vmem:[%s1573_s0 + $0x18] sm:$0xff]  ;;  %v19_v11 = vld [vmem:[%s1573_s0 + $0x28] sm:$0xff] }
   0x4   :  { %870 = vmatprep.mubr.msk.f32.mxu0 %vm86_vm1, %v14_v1  ;;  %918 = vmatprep.mubr.msk.f32.mxu1 %vm86_vm1, %v46_v2  ;;  %v49_v8 = vld [vmem:[%s1573_s0 + $0x118] sm:$0xff]  ;;  %v18_v9 = vld [vmem:[%s1573_s0 + $0x20] sm:$0xff]  ;;  %v51_v12 = vld [vmem:[%s1573_s0 + $0x128] sm:$0xff] }
   0x5   :  { %871 = vmatmul.mubr.msk.f32.vlgmr.msra.gmra.mrb[0].mxu0 %vm86_vm1, %v15_v3  ;;  %919 = vmatmul.mubr.msk.f32.vlgmr.msra.gmra.mrb[0].mxu1 %vm86_vm1, %v47_v4  ;;  %v50_v10 = vld [vmem:[%s1573_s0 + $0x120] sm:$0xff]  ;;  %v20_v13 = vld [vmem:[%s1573_s0 + $0x30] sm:$0xff]  ;;  %v21_v15 = vld [vmem:[%s1573_s0 + $0x38] sm:$0xff] }
   0x6   :  { %873 = vmatprep.mubr.msk.f32.mxu0 %vm86_vm1, %v16_v5  ;;  %921 = vmatprep.mubr.msk.f32.mxu1 %vm86_vm1, %v48_v6  ;;  %v52_v14 = vld [vmem:[%s1573_s0 + $0x130] sm:$0xff]  ;;  %v53_v16 = vld [vmem:[%s1573_s0 + $0x138] sm:$0xff]  ;;  %v22_v17 = vld [vmem:[%s1573_s0 + $0x40] sm:$0xff] }
   0x7   :  { %v54_v18 = vld [vmem:[%s1573_s0 + $0x140] sm:$0xff]  ;;  %v23_v19 = vld [vmem:[%s1573_s0 + $0x48] sm:$0xff]  ;;  %v24_v21 = vld [vmem:[%s1573_s0 + $0x50] sm:$0xff] }
   0x8   :  { %v55_v20 = vld [vmem:[%s1573_s0 + $0x148] sm:$0xff]  ;;  %v56_v22 = vld [vmem:[%s1573_s0 + $0x150] sm:$0xff]  ;;  %v25_v23 = vld [vmem:[%s1573_s0 + $0x58] sm:$0xff] }
   0x9   :  { %874 = vmatmul.mubr.msk.f32.gmra.mrb[2].mxu0 %vm86_vm1, %v17_v7  ;;  %922 = vmatmul.mubr.msk.f32.gmra.mrb[2].mxu1 %vm86_vm1, %v49_v8  ;;  %v57_v24 = vld [vmem:[%s1573_s0 + $0x158] sm:$0xff]  ;;  %v26_v25 = vld [vmem:[%s1573_s0 + $0x60] sm:$0xff]  ;;  %v27_v27 = vld [vmem:[%s1573_s0 + $0x68] sm:$0xff] }
   0xa   :  { %876 = vmatprep.mubr.msk.f32.mxu0 %vm86_vm1, %v18_v9  ;;  %924 = vmatprep.mubr.msk.f32.mxu1 %vm86_vm1, %v50_v10  ;;  %v58_v26 = vld [vmem:[%s1573_s0 + $0x160] sm:$0xff]  ;;  %v59_v28 = vld [vmem:[%s1573_s0 + $0x168] sm:$0xff]  ;;  %v28_v29 = vld [vmem:[%s1573_s0 + $0x70] sm:$0xff] }
   0xb   :  { %v60_v30 = vld [vmem:[%s1573_s0 + $0x170] sm:$0xff]  ;;  %v29_v31 = vld [vmem:[%s1573_s0 + $0x78] sm:$0xff]  ;;  %v30_v33 = vld [vmem:[%s1573_s0 + $0x80] sm:$0xff] }
   0xc   :  { %v61_v32 = vld [vmem:[%s1573_s0 + $0x178] sm:$0xff]  ;;  %v62_v34 = vld [vmem:[%s1573_s0 + $0x180] sm:$0xff]  ;;  %v31_v35 = vld [vmem:[%s1573_s0 + $0x88] sm:$0xff] }
   0xd   :  { %877 = vmatmul.mubr.msk.f32.gmra.mrb[4].mxu0 %vm86_vm1, %v19_v11  ;;  %925 = vmatmul.mubr.msk.f32.gmra.mrb[4].mxu1 %vm86_vm1, %v51_v12  ;;  %v63_v36 = vld [vmem:[%s1573_s0 + $0x188] sm:$0xff]  ;;  %v32_v37 = vld [vmem:[%s1573_s0 + $0x90] sm:$0xff]  ;;  %v33_v39 = vld [vmem:[%s1573_s0 + $0x98] sm:$0xff] }
   0xe   :  { %879 = vmatprep.mubr.msk.f32.mxu0 %vm86_vm1, %v20_v13  ;;  %927 = vmatprep.mubr.msk.f32.mxu1 %vm86_vm1, %v52_v14  ;;  %v64_v38 = vld [vmem:[%s1573_s0 + $0x190] sm:$0xff]  ;;  %v65_v40 = vld [vmem:[%s1573_s0 + $0x198] sm:$0xff]  ;;  %v34_v41 = vld [vmem:[%s1573_s0 + $0xa0] sm:$0xff] }
   0xf   :  { %v66_v42 = vld [vmem:[%s1573_s0 + $0x1a0] sm:$0xff]  ;;  %v35_v43 = vld [vmem:[%s1573_s0 + $0xa8] sm:$0xff]  ;;  %v36_v45 = vld [vmem:[%s1573_s0 + $0xb0] sm:$0xff] }
  0x10   :  { %v67_v44 = vld [vmem:[%s1573_s0 + $0x1a8] sm:$0xff]  ;;  %v68_v46 = vld [vmem:[%s1573_s0 + $0x1b0] sm:$0xff]  ;;  %v37_v47 = vld [vmem:[%s1573_s0 + $0xb8] sm:$0xff] }
  0x11   :  { %880 = vmatmul.mubr.msk.f32.gmra.mrb[6].mxu0 %vm86_vm1, %v21_v15  ;;  %928 = vmatmul.mubr.msk.f32.gmra.mrb[6].mxu1 %vm86_vm1, %v53_v16  ;;  %v69_v48 = vld [vmem:[%s1573_s0 + $0x1b8] sm:$0xff]  ;;  %v38_v49 = vld [vmem:[%s1573_s0 + $0xc0] sm:$0xff]  ;;  %v39_v51 = vld [vmem:[%s1573_s0 + $0xc8] sm:$0xff] }
  0x12   :  { %882 = vmatprep.mubr.msk.f32.mxu0 %vm86_vm1, %v22_v17  ;;  %930 = vmatprep.mubr.msk.f32.mxu1 %vm86_vm1, %v54_v18  ;;  %v70_v50 = vld [vmem:[%s1573_s0 + $0x1c0] sm:$0xff]  ;;  %v71_v52 = vld [vmem:[%s1573_s0 + $0x1c8] sm:$0xff]  ;;  %v40_v53 = vld [vmem:[%s1573_s0 + $0xd0] sm:$0xff] }
  0x13   :  { %v72_v54 = vld [vmem:[%s1573_s0 + $0x1d0] sm:$0xff]  ;;  %v41_v55 = vld [vmem:[%s1573_s0 + $0xd8] sm:$0xff]  ;;  %v42_v57 = vld [vmem:[%s1573_s0 + $0xe0] sm:$0xff] }
  0x14   :  { %v73_v56 = vld [vmem:[%s1573_s0 + $0x1d8] sm:$0xff]  ;;  %v74_v58 = vld [vmem:[%s1573_s0 + $0x1e0] sm:$0xff]  ;;  %v43_v59 = vld [vmem:[%s1573_s0 + $0xe8] sm:$0xff] }
  0x15   :  { %883 = vmatmul.mubr.msk.f32.gmra.mrb[8].mxu0 %vm86_vm1, %v23_v19  ;;  %931 = vmatmul.mubr.msk.f32.gmra.mrb[8].mxu1 %vm86_vm1, %v55_v20  ;;  %v75_v60 = vld [vmem:[%s1573_s0 + $0x1e8] sm:$0xff]  ;;  %v44_v61 = vld [vmem:[%s1573_s0 + $0xf0] sm:$0xff]  ;;  %v45_v63 = vld [vmem:[%s1573_s0 + $0xf8] sm:$0xff] }
  0x16   :  { %885 = vmatprep.mubr.msk.f32.mxu0 %vm86_vm1, %v24_v21  ;;  %933 = vmatprep.mubr.msk.f32.mxu1 %vm86_vm1, %v56_v22  ;;  %v76_v62 = vld [vmem:[%s1573_s0 + $0x1f0] sm:$0xff]  ;;  %v77_v0 = vld [vmem:[%s1573_s0 + $0x1f8] sm:$0xff]  ;;  %v1250_v1 = vld [vmem:[%s1574_s2] ss:$0 sm:$0xff] }
  0x19   :  { %886 = vmatmul.mubr.msk.f32.gmra.mrb[10].mxu0 %vm86_vm1, %v25_v23  ;;  %934 = vmatmul.mubr.msk.f32.gmra.mrb[10].mxu1 %vm86_vm1, %v57_v24 }
  0x1a   :  { %888 = vmatprep.mubr.msk.f32.mxu0 %vm86_vm1, %v26_v25  ;;  %936 = vmatprep.mubr.msk.f32.mxu1 %vm86_vm1, %v58_v26 }
  0x1d   :  { %889 = vmatmul.mubr.msk.f32.gmra.mrb[12].mxu0 %vm86_vm1, %v27_v27  ;;  %937 = vmatmul.mubr.msk.f32.gmra.mrb[12].mxu1 %vm86_vm1, %v59_v28 }
  0x1e   :  { %891 = vmatprep.mubr.msk.f32.mxu0 %vm86_vm1, %v28_v29  ;;  %939 = vmatprep.mubr.msk.f32.mxu1 %vm86_vm1, %v60_v30 }
  0x21   :  { %892 = vmatmul.mubr.msk.f32.gmra.mrb[14].mxu0 %vm86_vm1, %v29_v31  ;;  %940 = vmatmul.mubr.msk.f32.gmra.mrb[14].mxu1 %vm86_vm1, %v61_v32 }
  0x22   :  { %894 = vmatprep.mubr.msk.f32.mxu0 %vm86_vm1, %v30_v33  ;;  %942 = vmatprep.mubr.msk.f32.mxu1 %vm86_vm1, %v62_v34 }
  0x25   :  { %895 = vmatmul.mubr.msk.f32.gmra.mrb[16].mxu0 %vm86_vm1, %v31_v35  ;;  %943 = vmatmul.mubr.msk.f32.gmra.mrb[16].mxu1 %vm86_vm1, %v63_v36 }
  0x26   :  { %897 = vmatprep.mubr.msk.f32.mxu0 %vm86_vm1, %v32_v37  ;;  %945 = vmatprep.mubr.msk.f32.mxu1 %vm86_vm1, %v64_v38 }
  0x29   :  { %898 = vmatmul.mubr.msk.f32.gmra.mrb[18].mxu0 %vm86_vm1, %v33_v39  ;;  %946 = vmatmul.mubr.msk.f32.gmra.mrb[18].mxu1 %vm86_vm1, %v65_v40 }
  0x2a   :  { %900 = vmatprep.mubr.msk.f32.mxu0 %vm86_vm1, %v34_v41  ;;  %948 = vmatprep.mubr.msk.f32.mxu1 %vm86_vm1, %v66_v42 }
  0x2d   :  { %901 = vmatmul.mubr.msk.f32.gmra.mrb[20].mxu0 %vm86_vm1, %v35_v43  ;;  %949 = vmatmul.mubr.msk.f32.gmra.mrb[20].mxu1 %vm86_vm1, %v67_v44 }
  0x2e   :  { %903 = vmatprep.mubr.msk.f32.mxu0 %vm86_vm1, %v36_v45  ;;  %951 = vmatprep.mubr.msk.f32.mxu1 %vm86_vm1, %v68_v46 }
  0x31   :  { %904 = vmatmul.mubr.msk.f32.gmra.mrb[22].mxu0 %vm86_vm1, %v37_v47  ;;  %952 = vmatmul.mubr.msk.f32.gmra.mrb[22].mxu1 %vm86_vm1, %v69_v48 }
  0x32   :  { %906 = vmatprep.mubr.msk.f32.mxu0 %vm86_vm1, %v38_v49  ;;  %954 = vmatprep.mubr.msk.f32.mxu1 %vm86_vm1, %v70_v50 }
  0x35   :  { %907 = vmatmul.mubr.msk.f32.gmra.mrb[24].mxu0 %vm86_vm1, %v39_v51  ;;  %955 = vmatmul.mubr.msk.f32.gmra.mrb[24].mxu1 %vm86_vm1, %v71_v52 }
  0x36   :  { %909 = vmatprep.mubr.msk.f32.mxu0 %vm86_vm1, %v40_v53  ;;  %957 = vmatprep.mubr.msk.f32.mxu1 %vm86_vm1, %v72_v54 }
  0x39   :  { %910 = vmatmul.mubr.msk.f32.gmra.mrb[26].mxu0 %vm86_vm1, %v41_v55  ;;  %958 = vmatmul.mubr.msk.f32.gmra.mrb[26].mxu1 %vm86_vm1, %v73_v56 }
  0x3a   :  { %912 = vmatprep.mubr.msk.f32.mxu0 %vm86_vm1, %v42_v57  ;;  %960 = vmatprep.mubr.msk.f32.mxu1 %vm86_vm1, %v74_v58 }
  0x3d   :  { %913 = vmatmul.mubr.msk.f32.gmra.mrb[28].mxu0 %vm86_vm1, %v43_v59  ;;  %961 = vmatmul.mubr.msk.f32.gmra.mrb[28].mxu1 %vm86_vm1, %v75_v60 }
  0x3e   :  { %915 = vmatprep.mubr.msk.f32.mxu0 %vm86_vm1, %v44_v61  ;;  %963 = vmatprep.mubr.msk.f32.mxu1 %vm86_vm1, %v76_v62 }
  0x41   :  { %916 = vmatmul.mubr.msk.f32.gmra.mrb[30].mxu0 %vm86_vm1, %v45_v63  ;;  %964 = vmatmul.mubr.msk.f32.gmra.mrb[30].mxu1 %vm86_vm1, %v77_v0 }
  0xd8   :  { %v872_v2 = vpop.f32.mrb[0].mxu0  ;;  %v920_v3 = vpop.f32.mrb[0].mxu1 }
  0xd9   :  { %v355_v4 = vadd.f32 %v872_v2, %v1250_v1  ;;  %v515_v5 = vadd.f32 %v920_v3, %v1250_v1  ;;  %v349_v6 = vpop.f32.mrb[1].mxu0  ;;  %v509_v7 = vpop.f32.mrb[1].mxu1 }
  0xda   :  { %v350_v8 = vadd.f32 %v1250_v1, %v349_v6  ;;  %v510_v9 = vadd.f32 %v1250_v1, %v509_v7 }
  0xdb   :  { %670 = vst.msk [vmem:[%s1575_s3 + $0x8] sm:$0xff] %vm668_vm2, %v355_v4  ;;  %702 = vst.msk [vmem:[%s1575_s3 + $0x108] sm:$0xff] %vm668_vm2, %v515_v5 }
  0xdc   :  { %669 = vst.msk [vmem:[%s1575_s3] sm:$0xff] %vm668_vm2, %v350_v8  ;;  %701 = vst.msk [vmem:[%s1575_s3 + $0x100] sm:$0xff] %vm668_vm2, %v510_v9  ;;  %v875_v10 = vpop.f32.mrb[2].mxu0  ;;  %v923_v11 = vpop.f32.mrb[2].mxu1 }
  0xdd   :  { %v365_v12 = vadd.f32 %v875_v10, %v1250_v1  ;;  %v525_v13 = vadd.f32 %v923_v11, %v1250_v1  ;;  %v359_v14 = vpop.f32.mrb[3].mxu0  ;;  %v519_v15 = vpop.f32.mrb[3].mxu1 }
  0xde   :  { %v360_v16 = vadd.f32 %v1250_v1, %v359_v14  ;;  %v520_v17 = vadd.f32 %v1250_v1, %v519_v15 }
  0xdf   :  { %672 = vst.msk [vmem:[%s1575_s3 + $0x18] sm:$0xff] %vm668_vm2, %v365_v12  ;;  %704 = vst.msk [vmem:[%s1575_s3 + $0x118] sm:$0xff] %vm668_vm2, %v525_v13 }
  0xe0   :  { %671 = vst.msk [vmem:[%s1575_s3 + $0x10] sm:$0xff] %vm668_vm2, %v360_v16  ;;  %703 = vst.msk [vmem:[%s1575_s3 + $0x110] sm:$0xff] %vm668_vm2, %v520_v17  ;;  %v878_v18 = vpop.f32.mrb[4].mxu0  ;;  %v926_v19 = vpop.f32.mrb[4].mxu1 }
  0xe1   :  { %v375_v20 = vadd.f32 %v878_v18, %v1250_v1  ;;  %v535_v21 = vadd.f32 %v926_v19, %v1250_v1  ;;  %v369_v22 = vpop.f32.mrb[5].mxu0  ;;  %v529_v23 = vpop.f32.mrb[5].mxu1 }
  0xe2   :  { %v370_v24 = vadd.f32 %v1250_v1, %v369_v22  ;;  %v530_v25 = vadd.f32 %v1250_v1, %v529_v23 }
  0xe3   :  { %674 = vst.msk [vmem:[%s1575_s3 + $0x28] sm:$0xff] %vm668_vm2, %v375_v20  ;;  %706 = vst.msk [vmem:[%s1575_s3 + $0x128] sm:$0xff] %vm668_vm2, %v535_v21 }
  0xe4   :  { %673 = vst.msk [vmem:[%s1575_s3 + $0x20] sm:$0xff] %vm668_vm2, %v370_v24  ;;  %705 = vst.msk [vmem:[%s1575_s3 + $0x120] sm:$0xff] %vm668_vm2, %v530_v25  ;;  %v881_v26 = vpop.f32.mrb[6].mxu0  ;;  %v929_v27 = vpop.f32.mrb[6].mxu1 }
  0xe5   :  { %v385_v28 = vadd.f32 %v881_v26, %v1250_v1  ;;  %v545_v29 = vadd.f32 %v929_v27, %v1250_v1  ;;  %v379_v30 = vpop.f32.mrb[7].mxu0  ;;  %v539_v31 = vpop.f32.mrb[7].mxu1 }
  0xe6   :  { %v380_v32 = vadd.f32 %v1250_v1, %v379_v30  ;;  %v540_v33 = vadd.f32 %v1250_v1, %v539_v31 }
  0xe7   :  { %676 = vst.msk [vmem:[%s1575_s3 + $0x38] sm:$0xff] %vm668_vm2, %v385_v28  ;;  %708 = vst.msk [vmem:[%s1575_s3 + $0x138] sm:$0xff] %vm668_vm2, %v545_v29 }
  0xe8   :  { %675 = vst.msk [vmem:[%s1575_s3 + $0x30] sm:$0xff] %vm668_vm2, %v380_v32  ;;  %707 = vst.msk [vmem:[%s1575_s3 + $0x130] sm:$0xff] %vm668_vm2, %v540_v33  ;;  %v884_v34 = vpop.f32.mrb[8].mxu0  ;;  %v932_v35 = vpop.f32.mrb[8].mxu1 }
  0xe9   :  { %v395_v36 = vadd.f32 %v884_v34, %v1250_v1  ;;  %v555_v37 = vadd.f32 %v932_v35, %v1250_v1  ;;  %v389_v38 = vpop.f32.mrb[9].mxu0  ;;  %v549_v39 = vpop.f32.mrb[9].mxu1 }
  0xea   :  { %v390_v40 = vadd.f32 %v1250_v1, %v389_v38  ;;  %v550_v41 = vadd.f32 %v1250_v1, %v549_v39 }
  0xeb   :  { %678 = vst.msk [vmem:[%s1575_s3 + $0x48] sm:$0xff] %vm668_vm2, %v395_v36  ;;  %710 = vst.msk [vmem:[%s1575_s3 + $0x148] sm:$0xff] %vm668_vm2, %v555_v37 }
  0xec   :  { %677 = vst.msk [vmem:[%s1575_s3 + $0x40] sm:$0xff] %vm668_vm2, %v390_v40  ;;  %709 = vst.msk [vmem:[%s1575_s3 + $0x140] sm:$0xff] %vm668_vm2, %v550_v41  ;;  %v887_v42 = vpop.f32.mrb[10].mxu0  ;;  %v935_v43 = vpop.f32.mrb[10].mxu1 }
  0xed   :  { %v405_v44 = vadd.f32 %v887_v42, %v1250_v1  ;;  %v565_v45 = vadd.f32 %v935_v43, %v1250_v1  ;;  %v399_v46 = vpop.f32.mrb[11].mxu0  ;;  %v559_v47 = vpop.f32.mrb[11].mxu1 }
  0xee   :  { %v400_v48 = vadd.f32 %v1250_v1, %v399_v46  ;;  %v560_v49 = vadd.f32 %v1250_v1, %v559_v47 }
  0xef   :  { %680 = vst.msk [vmem:[%s1575_s3 + $0x58] sm:$0xff] %vm668_vm2, %v405_v44  ;;  %712 = vst.msk [vmem:[%s1575_s3 + $0x158] sm:$0xff] %vm668_vm2, %v565_v45 }
  0xf0   :  { %679 = vst.msk [vmem:[%s1575_s3 + $0x50] sm:$0xff] %vm668_vm2, %v400_v48  ;;  %711 = vst.msk [vmem:[%s1575_s3 + $0x150] sm:$0xff] %vm668_vm2, %v560_v49  ;;  %v890_v50 = vpop.f32.mrb[12].mxu0  ;;  %v938_v51 = vpop.f32.mrb[12].mxu1 }
  0xf1   :  { %v415_v52 = vadd.f32 %v890_v50, %v1250_v1  ;;  %v575_v53 = vadd.f32 %v938_v51, %v1250_v1  ;;  %v409_v54 = vpop.f32.mrb[13].mxu0  ;;  %v569_v55 = vpop.f32.mrb[13].mxu1 }
  0xf2   :  { %v410_v56 = vadd.f32 %v1250_v1, %v409_v54  ;;  %v570_v57 = vadd.f32 %v1250_v1, %v569_v55 }
  0xf3   :  { %682 = vst.msk [vmem:[%s1575_s3 + $0x68] sm:$0xff] %vm668_vm2, %v415_v52  ;;  %714 = vst.msk [vmem:[%s1575_s3 + $0x168] sm:$0xff] %vm668_vm2, %v575_v53 }
  0xf4   :  { %681 = vst.msk [vmem:[%s1575_s3 + $0x60] sm:$0xff] %vm668_vm2, %v410_v56  ;;  %713 = vst.msk [vmem:[%s1575_s3 + $0x160] sm:$0xff] %vm668_vm2, %v570_v57  ;;  %v893_v58 = vpop.f32.mrb[14].mxu0  ;;  %v941_v59 = vpop.f32.mrb[14].mxu1 }
  0xf5   :  { %v425_v60 = vadd.f32 %v893_v58, %v1250_v1  ;;  %v585_v61 = vadd.f32 %v941_v59, %v1250_v1  ;;  %v419_v62 = vpop.f32.mrb[15].mxu0  ;;  %v579_v63 = vpop.f32.mrb[15].mxu1 }
  0xf6   :  { %v420_v0 = vadd.f32 %v1250_v1, %v419_v62  ;;  %v580_v2 = vadd.f32 %v1250_v1, %v579_v63 }
  0xf7   :  { %684 = vst.msk [vmem:[%s1575_s3 + $0x78] sm:$0xff] %vm668_vm2, %v425_v60  ;;  %716 = vst.msk [vmem:[%s1575_s3 + $0x178] sm:$0xff] %vm668_vm2, %v585_v61 }
  0xf8   :  { %683 = vst.msk [vmem:[%s1575_s3 + $0x70] sm:$0xff] %vm668_vm2, %v420_v0  ;;  %715 = vst.msk [vmem:[%s1575_s3 + $0x170] sm:$0xff] %vm668_vm2, %v580_v2  ;;  %v896_v3 = vpop.f32.mrb[16].mxu0  ;;  %v944_v4 = vpop.f32.mrb[16].mxu1 }
  0xf9   :  { %v435_v5 = vadd.f32 %v896_v3, %v1250_v1  ;;  %v595_v6 = vadd.f32 %v944_v4, %v1250_v1  ;;  %v429_v7 = vpop.f32.mrb[17].mxu0  ;;  %v589_v8 = vpop.f32.mrb[17].mxu1 }
  0xfa   :  { %v430_v9 = vadd.f32 %v1250_v1, %v429_v7  ;;  %v590_v10 = vadd.f32 %v1250_v1, %v589_v8 }
  0xfb   :  { %686 = vst.msk [vmem:[%s1575_s3 + $0x88] sm:$0xff] %vm668_vm2, %v435_v5  ;;  %718 = vst.msk [vmem:[%s1575_s3 + $0x188] sm:$0xff] %vm668_vm2, %v595_v6 }
  0xfc   :  { %685 = vst.msk [vmem:[%s1575_s3 + $0x80] sm:$0xff] %vm668_vm2, %v430_v9  ;;  %717 = vst.msk [vmem:[%s1575_s3 + $0x180] sm:$0xff] %vm668_vm2, %v590_v10  ;;  %v899_v11 = vpop.f32.mrb[18].mxu0  ;;  %v947_v12 = vpop.f32.mrb[18].mxu1 }
  0xfd   :  { %v445_v13 = vadd.f32 %v899_v11, %v1250_v1  ;;  %v605_v14 = vadd.f32 %v947_v12, %v1250_v1  ;;  %v439_v15 = vpop.f32.mrb[19].mxu0  ;;  %v599_v16 = vpop.f32.mrb[19].mxu1 }
  0xfe   :  { %v440_v17 = vadd.f32 %v1250_v1, %v439_v15  ;;  %v600_v18 = vadd.f32 %v1250_v1, %v599_v16 }
  0xff   :  { %688 = vst.msk [vmem:[%s1575_s3 + $0x98] sm:$0xff] %vm668_vm2, %v445_v13  ;;  %720 = vst.msk [vmem:[%s1575_s3 + $0x198] sm:$0xff] %vm668_vm2, %v605_v14 }
 0x100   :  { %687 = vst.msk [vmem:[%s1575_s3 + $0x90] sm:$0xff] %vm668_vm2, %v440_v17  ;;  %719 = vst.msk [vmem:[%s1575_s3 + $0x190] sm:$0xff] %vm668_vm2, %v600_v18  ;;  %v902_v19 = vpop.f32.mrb[20].mxu0  ;;  %v950_v20 = vpop.f32.mrb[20].mxu1 }
 0x101   :  { %v455_v21 = vadd.f32 %v902_v19, %v1250_v1  ;;  %v615_v22 = vadd.f32 %v950_v20, %v1250_v1  ;;  %v449_v23 = vpop.f32.mrb[21].mxu0  ;;  %v609_v24 = vpop.f32.mrb[21].mxu1 }
 0x102   :  { %v450_v25 = vadd.f32 %v1250_v1, %v449_v23  ;;  %v610_v26 = vadd.f32 %v1250_v1, %v609_v24 }
 0x103   :  { %690 = vst.msk [vmem:[%s1575_s3 + $0xa8] sm:$0xff] %vm668_vm2, %v455_v21  ;;  %722 = vst.msk [vmem:[%s1575_s3 + $0x1a8] sm:$0xff] %vm668_vm2, %v615_v22 }
 0x104   :  { %689 = vst.msk [vmem:[%s1575_s3 + $0xa0] sm:$0xff] %vm668_vm2, %v450_v25  ;;  %721 = vst.msk [vmem:[%s1575_s3 + $0x1a0] sm:$0xff] %vm668_vm2, %v610_v26  ;;  %v905_v27 = vpop.f32.mrb[22].mxu0  ;;  %v953_v28 = vpop.f32.mrb[22].mxu1 }
 0x105   :  { %v465_v29 = vadd.f32 %v905_v27, %v1250_v1  ;;  %v625_v30 = vadd.f32 %v953_v28, %v1250_v1  ;;  %v459_v31 = vpop.f32.mrb[23].mxu0  ;;  %v619_v32 = vpop.f32.mrb[23].mxu1 }
 0x106   :  { %v460_v33 = vadd.f32 %v1250_v1, %v459_v31  ;;  %v620_v34 = vadd.f32 %v1250_v1, %v619_v32 }
 0x107   :  { %692 = vst.msk [vmem:[%s1575_s3 + $0xb8] sm:$0xff] %vm668_vm2, %v465_v29  ;;  %724 = vst.msk [vmem:[%s1575_s3 + $0x1b8] sm:$0xff] %vm668_vm2, %v625_v30 }
 0x108   :  { %691 = vst.msk [vmem:[%s1575_s3 + $0xb0] sm:$0xff] %vm668_vm2, %v460_v33  ;;  %723 = vst.msk [vmem:[%s1575_s3 + $0x1b0] sm:$0xff] %vm668_vm2, %v620_v34  ;;  %v908_v35 = vpop.f32.mrb[24].mxu0  ;;  %v956_v36 = vpop.f32.mrb[24].mxu1 }
 0x109   :  { %v475_v37 = vadd.f32 %v908_v35, %v1250_v1  ;;  %v635_v38 = vadd.f32 %v956_v36, %v1250_v1  ;;  %v469_v39 = vpop.f32.mrb[25].mxu0  ;;  %v629_v40 = vpop.f32.mrb[25].mxu1 }
 0x10a   :  { %v470_v41 = vadd.f32 %v1250_v1, %v469_v39  ;;  %v630_v42 = vadd.f32 %v1250_v1, %v629_v40 }
 0x10b   :  { %694 = vst.msk [vmem:[%s1575_s3 + $0xc8] sm:$0xff] %vm668_vm2, %v475_v37  ;;  %726 = vst.msk [vmem:[%s1575_s3 + $0x1c8] sm:$0xff] %vm668_vm2, %v635_v38 }
 0x10c   :  { %693 = vst.msk [vmem:[%s1575_s3 + $0xc0] sm:$0xff] %vm668_vm2, %v470_v41  ;;  %725 = vst.msk [vmem:[%s1575_s3 + $0x1c0] sm:$0xff] %vm668_vm2, %v630_v42  ;;  %v911_v43 = vpop.f32.mrb[26].mxu0  ;;  %v959_v44 = vpop.f32.mrb[26].mxu1 }
 0x10d   :  { %v485_v45 = vadd.f32 %v911_v43, %v1250_v1  ;;  %v645_v46 = vadd.f32 %v959_v44, %v1250_v1  ;;  %v479_v47 = vpop.f32.mrb[27].mxu0  ;;  %v639_v48 = vpop.f32.mrb[27].mxu1 }
 0x10e   :  { %v480_v49 = vadd.f32 %v1250_v1, %v479_v47  ;;  %v640_v50 = vadd.f32 %v1250_v1, %v639_v48 }
 0x10f   :  { %696 = vst.msk [vmem:[%s1575_s3 + $0xd8] sm:$0xff] %vm668_vm2, %v485_v45  ;;  %728 = vst.msk [vmem:[%s1575_s3 + $0x1d8] sm:$0xff] %vm668_vm2, %v645_v46 }
 0x110   :  { %695 = vst.msk [vmem:[%s1575_s3 + $0xd0] sm:$0xff] %vm668_vm2, %v480_v49  ;;  %727 = vst.msk [vmem:[%s1575_s3 + $0x1d0] sm:$0xff] %vm668_vm2, %v640_v50  ;;  %v914_v51 = vpop.f32.mrb[28].mxu0  ;;  %v962_v52 = vpop.f32.mrb[28].mxu1 }
 0x111   :  { %v495_v53 = vadd.f32 %v914_v51, %v1250_v1  ;;  %v655_v54 = vadd.f32 %v962_v52, %v1250_v1  ;;  %v489_v55 = vpop.f32.mrb[29].mxu0  ;;  %v649_v56 = vpop.f32.mrb[29].mxu1 }
 0x112   :  { %v490_v57 = vadd.f32 %v1250_v1, %v489_v55  ;;  %v650_v58 = vadd.f32 %v1250_v1, %v649_v56 }
 0x113   :  { %698 = vst.msk [vmem:[%s1575_s3 + $0xe8] sm:$0xff] %vm668_vm2, %v495_v53  ;;  %730 = vst.msk [vmem:[%s1575_s3 + $0x1e8] sm:$0xff] %vm668_vm2, %v655_v54 }
 0x114   :  { %697 = vst.msk [vmem:[%s1575_s3 + $0xe0] sm:$0xff] %vm668_vm2, %v490_v57  ;;  %729 = vst.msk [vmem:[%s1575_s3 + $0x1e0] sm:$0xff] %vm668_vm2, %v650_v58  ;;  %v917_v59 = vpop.f32.mrb[30].mxu0  ;;  %v965_v60 = vpop.f32.mrb[30].mxu1 }
 0x115   :  { %v505_v61 = vadd.f32 %v917_v59, %v1250_v1  ;;  %v665_v62 = vadd.f32 %v965_v60, %v1250_v1  ;;  %v499_v63 = vpop.f32.mrb[31].mxu0  ;;  %v659_v0 = vpop.f32.mrb[31].mxu1 }
 0x116   :  { %v500_v2 = vadd.f32 %v1250_v1, %v499_v63  ;;  %v660_v3 = vadd.f32 %v1250_v1, %v659_v0 }
 0x117   :  { %700 = vst.msk [vmem:[%s1575_s3 + $0xf8] sm:$0xff] %vm668_vm2, %v505_v61  ;;  %732 = vst.msk [vmem:[%s1575_s3 + $0x1f8] sm:$0xff] %vm668_vm2, %v665_v62 }
 0x118   :  { %699 = vst.msk [vmem:[%s1575_s3 + $0xf0] sm:$0xff] %vm668_vm2, %v500_v2  ;;  %731 = vst.msk [vmem:[%s1575_s3 + $0x1f0] sm:$0xff] %vm668_vm2, %v660_v3 }

// kernel: simple_block2d_forward.16
= control target key start
LH: loop header
LB: loop body
LE: loop exit
PB: predicated region body
PF: predicated region fallthrough
CT: control target
= control target key end

     0   :  { %vm151_vm0 = vcmask 261120   ;;  %vm1264_vm1 = vcmask 254976   ;;  %vm1258_vm2 = vcmask 1040384   ;;  %s2753_s2 = inlined_call_operand.vmem [shape: f32[32,32], index: 2, kind: input, shape index: {}]   ;;  %s2754_s1 = inlined_call_operand.vmem [shape: f32[512,32], index: 1, kind: input, shape index: {}]   ;;  %s2755_s0 = inlined_call_operand.vmem [shape: f32[512,32], index: 0, kind: input, shape index: {}]   ;;  %s2756_s3 = inlined_call_operand.vmem [shape: f32[1,32], index: 3, kind: input, shape index: {}]   ;;  %s2757_s4 = inlined_call_operand.vmem [shape: f32[512,32], index: 4, kind: output, shape index: {0}]   ;;  %s2758_s5 = inlined_call_operand.vmem [shape: f32[2,32], index: 5, kind: output, shape index: {1}]  }
   0x1   :  { %v147_v0 = vld [vmem:[%s2753_s2] sm:$0xff]  ;;  %v148_v1 = vld [vmem:[%s2753_s2 + $0x8] sm:$0xff]  ;;  %v149_v2 = vld [vmem:[%s2753_s2 + $0x10] sm:$0xff] }
   0x2   :  { %v1515_v3 = vpack.c.bf16 %v148_v1, %v147_v0  ;;  %v150_v4 = vld [vmem:[%s2753_s2 + $0x18] sm:$0xff]  ;;  %v83_v5 = vld [vmem:[%s2754_s1] sm:$0xff]  ;;  %v84_v7 = vld [vmem:[%s2754_s1 + $0x8] sm:$0xff] }
   0x3   :  { %v1519_v6 = vpack.c.bf16 %v150_v4, %v149_v2  ;;  %1419 = vmatprep.mubr.msk.f32.mxu0 %vm151_vm0, %v83_v5  ;;  %v85_v8 = vld [vmem:[%s2754_s1 + $0x10] sm:$0xff]  ;;  %v86_v9 = vld [vmem:[%s2754_s1 + $0x18] sm:$0xff]  ;;  %v115_v10 = vld [vmem:[%s2754_s1 + $0x100] sm:$0xff] }
   0x4   :  { %1516 = vmatprep.subr.bf16.mxu0 %v1515_v3  ;;  %1523 = vmatprep.subr.bf16.mxu1 %v1515_v3  ;;  %v116_v11 = vld [vmem:[%s2754_s1 + $0x108] sm:$0xff]  ;;  %v117_v12 = vld [vmem:[%s2754_s1 + $0x110] sm:$0xff]  ;;  %v87_v13 = vld [vmem:[%s2754_s1 + $0x20] sm:$0xff] }
   0x5   :  { %1518 = vmatpush3.bf16.msra.mxu0 %v1515_v3  ;;  %1525 = vmatpush3.bf16.msra.mxu1 %v1515_v3  ;;  %v118_v14 = vld [vmem:[%s2754_s1 + $0x118] sm:$0xff]  ;;  %v88_v15 = vld [vmem:[%s2754_s1 + $0x28] sm:$0xff]  ;;  %v119_v16 = vld [vmem:[%s2754_s1 + $0x120] sm:$0xff] }
   0x6   :  { %1520 = vmatprep.subr.bf16.mxu0 %v1519_v6  ;;  %1524 = vmatprep.subr.bf16.mxu1 %v1519_v6  ;;  %v89_v17 = vld [vmem:[%s2754_s1 + $0x30] sm:$0xff]  ;;  %v120_v18 = vld [vmem:[%s2754_s1 + $0x128] sm:$0xff]  ;;  %v90_v19 = vld [vmem:[%s2754_s1 + $0x38] sm:$0xff] }
   0x7   :  { %1467 = vmatprep.mubr.msk.f32.mxu1 %vm151_vm0, %v115_v10  ;;  %v121_v20 = vld [vmem:[%s2754_s1 + $0x130] sm:$0xff]  ;;  %v91_v21 = vld [vmem:[%s2754_s1 + $0x40] sm:$0xff]  ;;  %v122_v22 = vld [vmem:[%s2754_s1 + $0x138] sm:$0xff] }
   0x8   :  { %v92_v23 = vld [vmem:[%s2754_s1 + $0x48] sm:$0xff]  ;;  %v123_v24 = vld [vmem:[%s2754_s1 + $0x140] sm:$0xff]  ;;  %v93_v25 = vld [vmem:[%s2754_s1 + $0x50] sm:$0xff] }
   0x9   :  { %1522 = vmatpush3.bf16.msra.mxu0 %v1519_v6  ;;  %1526 = vmatpush3.bf16.msra.mxu1 %v1519_v6  ;;  %v124_v26 = vld [vmem:[%s2754_s1 + $0x148] sm:$0xff]  ;;  %v94_v27 = vld [vmem:[%s2754_s1 + $0x58] sm:$0xff]  ;;  %v125_v28 = vld [vmem:[%s2754_s1 + $0x150] sm:$0xff] }
   0xa   :  { %v95_v29 = vld [vmem:[%s2754_s1 + $0x60] sm:$0xff]  ;;  %v126_v30 = vld [vmem:[%s2754_s1 + $0x158] sm:$0xff]  ;;  %v96_v31 = vld [vmem:[%s2754_s1 + $0x68] sm:$0xff] }
   0xb   :  { %v127_v32 = vld [vmem:[%s2754_s1 + $0x160] sm:$0xff]  ;;  %v97_v33 = vld [vmem:[%s2754_s1 + $0x70] sm:$0xff]  ;;  %v128_v34 = vld [vmem:[%s2754_s1 + $0x168] sm:$0xff] }
   0xc   :  { %1420 = vmatmul.mubr.msk.f32.vlgmr.msra.gmra.mrb[0].mxu0 %vm151_vm0, %v84_v7  ;;  %1468 = vmatmul.mubr.msk.f32.vlgmr.msra.gmra.mrb[0].mxu1 %vm151_vm0, %v116_v11  ;;  %v98_v35 = vld [vmem:[%s2754_s1 + $0x78] sm:$0xff]  ;;  %v129_v36 = vld [vmem:[%s2754_s1 + $0x170] sm:$0xff]  ;;  %v99_v37 = vld [vmem:[%s2754_s1 + $0x80] sm:$0xff] }
   0xd   :  { %1422 = vmatprep.mubr.msk.f32.mxu0 %vm151_vm0, %v85_v8  ;;  %1470 = vmatprep.mubr.msk.f32.mxu1 %vm151_vm0, %v117_v12  ;;  %v130_v38 = vld [vmem:[%s2754_s1 + $0x178] sm:$0xff]  ;;  %v100_v39 = vld [vmem:[%s2754_s1 + $0x88] sm:$0xff]  ;;  %v131_v40 = vld [vmem:[%s2754_s1 + $0x180] sm:$0xff] }
   0xe   :  { %v101_v41 = vld [vmem:[%s2754_s1 + $0x90] sm:$0xff]  ;;  %v132_v42 = vld [vmem:[%s2754_s1 + $0x188] sm:$0xff]  ;;  %v102_v43 = vld [vmem:[%s2754_s1 + $0x98] sm:$0xff] }
   0xf   :  { %v133_v44 = vld [vmem:[%s2754_s1 + $0x190] sm:$0xff]  ;;  %v103_v45 = vld [vmem:[%s2754_s1 + $0xa0] sm:$0xff]  ;;  %v134_v46 = vld [vmem:[%s2754_s1 + $0x198] sm:$0xff] }
  0x10   :  { %1423 = vmatmul.mubr.msk.f32.gmra.mrb[2].mxu0 %vm151_vm0, %v86_v9  ;;  %1471 = vmatmul.mubr.msk.f32.gmra.mrb[2].mxu1 %vm151_vm0, %v118_v14  ;;  %v104_v47 = vld [vmem:[%s2754_s1 + $0xa8] sm:$0xff]  ;;  %v135_v48 = vld [vmem:[%s2754_s1 + $0x1a0] sm:$0xff]  ;;  %v105_v49 = vld [vmem:[%s2754_s1 + $0xb0] sm:$0xff] }
  0x11   :  { %1425 = vmatprep.mubr.msk.f32.mxu0 %vm151_vm0, %v87_v13  ;;  %1473 = vmatprep.mubr.msk.f32.mxu1 %vm151_vm0, %v119_v16  ;;  %v136_v50 = vld [vmem:[%s2754_s1 + $0x1a8] sm:$0xff]  ;;  %v106_v51 = vld [vmem:[%s2754_s1 + $0xb8] sm:$0xff]  ;;  %v137_v52 = vld [vmem:[%s2754_s1 + $0x1b0] sm:$0xff] }
  0x12   :  { %v107_v53 = vld [vmem:[%s2754_s1 + $0xc0] sm:$0xff]  ;;  %v138_v54 = vld [vmem:[%s2754_s1 + $0x1b8] sm:$0xff]  ;;  %v108_v55 = vld [vmem:[%s2754_s1 + $0xc8] sm:$0xff] }
  0x13   :  { %v139_v56 = vld [vmem:[%s2754_s1 + $0x1c0] sm:$0xff]  ;;  %v109_v57 = vld [vmem:[%s2754_s1 + $0xd0] sm:$0xff]  ;;  %v140_v58 = vld [vmem:[%s2754_s1 + $0x1c8] sm:$0xff] }
  0x14   :  { %1426 = vmatmul.mubr.msk.f32.gmra.mrb[4].mxu0 %vm151_vm0, %v88_v15  ;;  %1474 = vmatmul.mubr.msk.f32.gmra.mrb[4].mxu1 %vm151_vm0, %v120_v18  ;;  %v110_v59 = vld [vmem:[%s2754_s1 + $0xd8] sm:$0xff]  ;;  %v141_v60 = vld [vmem:[%s2754_s1 + $0x1d0] sm:$0xff]  ;;  %v111_v61 = vld [vmem:[%s2754_s1 + $0xe0] sm:$0xff] }
  0x15   :  { %1428 = vmatprep.mubr.msk.f32.mxu0 %vm151_vm0, %v89_v17  ;;  %1476 = vmatprep.mubr.msk.f32.mxu1 %vm151_vm0, %v121_v20  ;;  %v142_v62 = vld [vmem:[%s2754_s1 + $0x1d8] sm:$0xff]  ;;  %v112_v63 = vld [vmem:[%s2754_s1 + $0xe8] sm:$0xff]  ;;  %v143_v0 = vld [vmem:[%s2754_s1 + $0x1e0] sm:$0xff] }
  0x16   :  { %v113_v1 = vld [vmem:[%s2754_s1 + $0xf0] sm:$0xff]  ;;  %v144_v2 = vld [vmem:[%s2754_s1 + $0x1e8] sm:$0xff]  ;;  %v114_v3 = vld [vmem:[%s2754_s1 + $0xf8] sm:$0xff] }
  0x17   :  { %v145_v4 = vld [vmem:[%s2754_s1 + $0x1f0] sm:$0xff]  ;;  %v146_v5 = vld [vmem:[%s2754_s1 + $0x1f8] sm:$0xff]  ;;  %v20_v6 = vld [vmem:[%s2755_s0 + $0x8] sm:$0xff] }
  0x18   :  { %1429 = vmatmul.mubr.msk.f32.gmra.mrb[6].mxu0 %vm151_vm0, %v90_v19  ;;  %1477 = vmatmul.mubr.msk.f32.gmra.mrb[6].mxu1 %vm151_vm0, %v122_v22  ;;  %v19_v7 = vld [vmem:[%s2755_s0] sm:$0xff]  ;;  %v52_v12 = vld [vmem:[%s2755_s0 + $0x108] sm:$0xff]  ;;  %v22_v14 = vld [vmem:[%s2755_s0 + $0x18] sm:$0xff] }
  0x19   :  { %1431 = vmatprep.mubr.msk.f32.mxu0 %vm151_vm0, %v91_v21  ;;  %1479 = vmatprep.mubr.msk.f32.mxu1 %vm151_vm0, %v123_v24  ;;  %v1837_v9 = vld [vmem:[%s2756_s3] ss:$0 sm:$0xff]  ;;  %v21_v17 = vld [vmem:[%s2755_s0 + $0x10] sm:$0xff] }
  0x1a   :  { %v51_v15 = vld [vmem:[%s2755_s0 + $0x100] sm:$0xff] }
  0x1c   :  { %1432 = vmatmul.mubr.msk.f32.gmra.mrb[8].mxu0 %vm151_vm0, %v92_v23  ;;  %1480 = vmatmul.mubr.msk.f32.gmra.mrb[8].mxu1 %vm151_vm0, %v124_v26 }
  0x1d   :  { %1434 = vmatprep.mubr.msk.f32.mxu0 %vm151_vm0, %v93_v25  ;;  %1482 = vmatprep.mubr.msk.f32.mxu1 %vm151_vm0, %v125_v28 }
  0x20   :  { %1435 = vmatmul.mubr.msk.f32.gmra.mrb[10].mxu0 %vm151_vm0, %v94_v27  ;;  %1483 = vmatmul.mubr.msk.f32.gmra.mrb[10].mxu1 %vm151_vm0, %v126_v30 }
  0x21   :  { %1437 = vmatprep.mubr.msk.f32.mxu0 %vm151_vm0, %v95_v29  ;;  %1485 = vmatprep.mubr.msk.f32.mxu1 %vm151_vm0, %v127_v32 }
  0x24   :  { %1438 = vmatmul.mubr.msk.f32.gmra.mrb[12].mxu0 %vm151_vm0, %v96_v31  ;;  %1486 = vmatmul.mubr.msk.f32.gmra.mrb[12].mxu1 %vm151_vm0, %v128_v34  ;;  %v24_v31 = vld [vmem:[%s2755_s0 + $0x28] sm:$0xff] }
  0x25   :  { %1440 = vmatprep.mubr.msk.f32.mxu0 %vm151_vm0, %v97_v33  ;;  %1488 = vmatprep.mubr.msk.f32.mxu1 %vm151_vm0, %v129_v36  ;;  %v23_v36 = vld [vmem:[%s2755_s0 + $0x20] sm:$0xff] }
  0x28   :  { %1441 = vmatmul.mubr.msk.f32.gmra.mrb[14].mxu0 %vm151_vm0, %v98_v35  ;;  %1489 = vmatmul.mubr.msk.f32.gmra.mrb[14].mxu1 %vm151_vm0, %v130_v38 }
  0x29   :  { %1443 = vmatprep.mubr.msk.f32.mxu0 %vm151_vm0, %v99_v37  ;;  %1491 = vmatprep.mubr.msk.f32.mxu1 %vm151_vm0, %v131_v40 }
  0x2c   :  { %1444 = vmatmul.mubr.msk.f32.gmra.mrb[16].mxu0 %vm151_vm0, %v100_v39  ;;  %1492 = vmatmul.mubr.msk.f32.gmra.mrb[16].mxu1 %vm151_vm0, %v132_v42 }
  0x2d   :  { %1446 = vmatprep.mubr.msk.f32.mxu0 %vm151_vm0, %v101_v41  ;;  %1494 = vmatprep.mubr.msk.f32.mxu1 %vm151_vm0, %v133_v44 }
  0x30   :  { %1447 = vmatmul.mubr.msk.f32.gmra.mrb[18].mxu0 %vm151_vm0, %v102_v43  ;;  %1495 = vmatmul.mubr.msk.f32.gmra.mrb[18].mxu1 %vm151_vm0, %v134_v46 }
  0x31   :  { %1449 = vmatprep.mubr.msk.f32.mxu0 %vm151_vm0, %v103_v45  ;;  %1497 = vmatprep.mubr.msk.f32.mxu1 %vm151_vm0, %v135_v48 }
  0x34   :  { %1450 = vmatmul.mubr.msk.f32.gmra.mrb[20].mxu0 %vm151_vm0, %v104_v47  ;;  %1498 = vmatmul.mubr.msk.f32.gmra.mrb[20].mxu1 %vm151_vm0, %v136_v50  ;;  %v54_v47 = vld [vmem:[%s2755_s0 + $0x118] sm:$0xff] }
  0x35   :  { %1452 = vmatprep.mubr.msk.f32.mxu0 %vm151_vm0, %v105_v49  ;;  %1500 = vmatprep.mubr.msk.f32.mxu1 %vm151_vm0, %v137_v52 }
  0x38   :  { %1453 = vmatmul.mubr.msk.f32.gmra.mrb[22].mxu0 %vm151_vm0, %v106_v51  ;;  %1501 = vmatmul.mubr.msk.f32.gmra.mrb[22].mxu1 %vm151_vm0, %v138_v54  ;;  %v25_v54 = vld [vmem:[%s2755_s0 + $0x30] sm:$0xff] }
  0x39   :  { %1455 = vmatprep.mubr.msk.f32.mxu0 %vm151_vm0, %v107_v53  ;;  %1503 = vmatprep.mubr.msk.f32.mxu1 %vm151_vm0, %v139_v56  ;;  %v26_v53 = vld [vmem:[%s2755_s0 + $0x38] sm:$0xff] }
  0x3c   :  { %1456 = vmatmul.mubr.msk.f32.gmra.mrb[24].mxu0 %vm151_vm0, %v108_v55  ;;  %1504 = vmatmul.mubr.msk.f32.gmra.mrb[24].mxu1 %vm151_vm0, %v140_v58 }
  0x3d   :  { %1458 = vmatprep.mubr.msk.f32.mxu0 %vm151_vm0, %v109_v57  ;;  %1506 = vmatprep.mubr.msk.f32.mxu1 %vm151_vm0, %v141_v60 }
  0x40   :  { %1459 = vmatmul.mubr.msk.f32.gmra.mrb[26].mxu0 %vm151_vm0, %v110_v59  ;;  %1507 = vmatmul.mubr.msk.f32.gmra.mrb[26].mxu1 %vm151_vm0, %v142_v62 }
  0x41   :  { %1461 = vmatprep.mubr.msk.f32.mxu0 %vm151_vm0, %v111_v61  ;;  %1509 = vmatprep.mubr.msk.f32.mxu1 %vm151_vm0, %v143_v0 }
  0x44   :  { %1462 = vmatmul.mubr.msk.f32.gmra.mrb[28].mxu0 %vm151_vm0, %v112_v63  ;;  %1510 = vmatmul.mubr.msk.f32.gmra.mrb[28].mxu1 %vm151_vm0, %v144_v2 }
  0x45   :  { %1464 = vmatprep.mubr.msk.f32.mxu0 %vm151_vm0, %v113_v1  ;;  %1512 = vmatprep.mubr.msk.f32.mxu1 %vm151_vm0, %v145_v4 }
  0x48   :  { %1465 = vmatmul.mubr.msk.f32.gmra.mrb[30].mxu0 %vm151_vm0, %v114_v3  ;;  %1513 = vmatmul.mubr.msk.f32.gmra.mrb[30].mxu1 %vm151_vm0, %v146_v5 }
  0xdf   :  { %v1421_v8 = vpop.f32.mrb[0].mxu0  ;;  %v1469_v18 = vpop.f32.mrb[0].mxu1 }
  0xe0   :  { %v730_v10 = vadd.f32 %v1421_v8, %v20_v6  ;;  %v410_v11 = vpop.f32.mrb[1].mxu0  ;;  %v762_v21 = vadd.f32 %v1469_v18, %v52_v12  ;;  %v570_v22 = vpop.f32.mrb[1].mxu1 }
  0xe1   :  { %v729_v13 = vadd.f32 %v410_v11, %v19_v7  ;;  %v761_v27 = vadd.f32 %v570_v22, %v51_v15  ;;  %v28_v7 = vld [vmem:[%s2755_s0 + $0x48] sm:$0xff] }
  0xe2   :  { %v801_v16 = vadd.f32 %v1837_v9, %v730_v10  ;;  %v1867_v32 = vadd.f32 %v1837_v9, %v762_v21 }
  0xe3   :  { %v800_v19 = vadd.f32 %v1837_v9, %v729_v13  ;;  %v1424_v20 = vpop.f32.mrb[2].mxu0  ;;  %v1875_v37 = vadd.f32 %v1837_v9, %v761_v27  ;;  %v1472_v38 = vpop.f32.mrb[2].mxu1 }
  0xe4   :  { %865 = vst.msk [vmem:[%s2757_s4 + $0x8] sm:$0xff] %vm151_vm0, %v801_v16  ;;  %v929_v23 = vsel %vm151_vm0, %v801_v16, 0.0  ;;  %v1062_v24 = vmul.f32 %v801_v16, %v801_v16  ;;  %v732_v25 = vadd.f32 %v1424_v20, %v22_v14  ;;  %v420_v26 = vpop.f32.mrb[3].mxu0  ;;  %897 = vst.msk [vmem:[%s2757_s4 + $0x108] sm:$0xff] %vm151_vm0, %v1867_v32  ;;  %v1884_v42 = vpop.f32.mrb[3].mxu1  ;;  %v764_v60 = vadd.f32 %v1472_v38, %v54_v47 }
  0xe5   :  { %864 = vst.msk [vmem:[%s2757_s4] sm:$0xff] %vm151_vm0, %v800_v19  ;;  %v928_v28 = vsel %vm151_vm0, %v800_v19, 0.0  ;;  %v1061_v29 = vmul.f32 %v800_v19, %v800_v19  ;;  %v731_v30 = vadd.f32 %v420_v26, %v21_v17  ;;  %896 = vst.msk [vmem:[%s2757_s4 + $0x100] sm:$0xff] %vm151_vm0, %v1875_v37  ;;  %v27_v17 = vld [vmem:[%s2755_s0 + $0x40] sm:$0xff] }
  0xe6   :  { %v1126_v33 = vsel %vm151_vm0, %v1062_v24, 0.0  ;;  %v930_v34 = vadd.f32 %v929_v23, %v928_v28  ;;  %v803_v35 = vadd.f32 %v1837_v9, %v732_v25  ;;  %v1940_v18 = vadd.f32 %v1837_v9, %v764_v60  ;;  %v53_v24 = vld [vmem:[%s2755_s0 + $0x110] sm:$0xff] }
  0xe7   :  { %v1125_v39 = vsel %vm151_vm0, %v1061_v29, 0.0  ;;  %v802_v40 = vadd.f32 %v1837_v9, %v731_v30  ;;  %v1427_v41 = vpop.f32.mrb[4].mxu0  ;;  %v1910_v55 = vpop.f32.mrb[4].mxu1 }
  0xe8   :  { %v1127_v43 = vadd.f32 %v1126_v33, %v1125_v39  ;;  %867 = vst.msk [vmem:[%s2757_s4 + $0x18] sm:$0xff] %vm151_vm0, %v803_v35  ;;  %v1064_v44 = vmul.f32 %v803_v35, %v803_v35  ;;  %v734_v45 = vadd.f32 %v1427_v41, %v24_v31  ;;  %v430_v46 = vpop.f32.mrb[5].mxu0  ;;  %v933_v56 = vsel %vm151_vm0, %v803_v35, 0.0  ;;  %v1915_v61 = vpop.f32.mrb[5].mxu1  ;;  %899 = vst.msk [vmem:[%s2757_s4 + $0x118] sm:$0xff] %vm151_vm0, %v1940_v18  ;;  %v29_v35 = vld [vmem:[%s2755_s0 + $0x50] sm:$0xff] }
  0xe9   :  { %866 = vst.msk [vmem:[%s2757_s4 + $0x10] sm:$0xff] %vm151_vm0, %v802_v40  ;;  %v931_v48 = vsel %vm151_vm0, %v802_v40, 0.0  ;;  %v1063_v49 = vmul.f32 %v802_v40, %v802_v40  ;;  %v733_v50 = vadd.f32 %v430_v46, %v23_v36  ;;  %v763_v40 = vadd.f32 %v1884_v42, %v53_v24  ;;  %v32_v42 = vld [vmem:[%s2755_s0 + $0x68] sm:$0xff] }
  0xea   :  { %v932_v51 = vadd.f32 %v931_v48, %v930_v34  ;;  %v805_v52 = vadd.f32 %v1837_v9, %v734_v45  ;;  %v1130_v62 = vsel %vm151_vm0, %v1064_v44, 0.0  ;;  %v30_v34 = vld [vmem:[%s2755_s0 + $0x58] sm:$0xff] }
  0xeb   :  { %v1128_v57 = vsel %vm151_vm0, %v1063_v49, 0.0  ;;  %v804_v58 = vadd.f32 %v1837_v9, %v733_v50  ;;  %v1430_v59 = vpop.f32.mrb[6].mxu0  ;;  %v1931_v12 = vpop.f32.mrb[6].mxu1 }
  0xec   :  { %v1129_v63 = vadd.f32 %v1128_v57, %v1127_v43  ;;  %869 = vst.msk [vmem:[%s2757_s4 + $0x28] sm:$0xff] %vm151_vm0, %v805_v52  ;;  %v1066_v0 = vmul.f32 %v805_v52, %v805_v52  ;;  %v934_v1 = vadd.f32 %v933_v56, %v932_v51  ;;  %v440_v2 = vpop.f32.mrb[7].mxu0  ;;  %v736_v5 = vadd.f32 %v1430_v59, %v26_v53  ;;  %v1942_v19 = vpop.f32.mrb[7].mxu1 }
  0xed   :  { %868 = vst.msk [vmem:[%s2757_s4 + $0x20] sm:$0xff] %vm151_vm0, %v804_v58  ;;  %v935_v3 = vsel %vm151_vm0, %v804_v58, 0.0  ;;  %v1065_v4 = vmul.f32 %v804_v58, %v804_v58  ;;  %v735_v6 = vadd.f32 %v440_v2, %v25_v54  ;;  %v937_v8 = vsel %vm151_vm0, %v805_v52, 0.0 }
  0xee   :  { %v936_v10 = vadd.f32 %v935_v3, %v934_v1  ;;  %v1131_v11 = vadd.f32 %v1130_v62, %v1129_v63  ;;  %v807_v14 = vadd.f32 %v1837_v9, %v736_v5  ;;  %v1134_v25 = vsel %vm151_vm0, %v1066_v0, 0.0  ;;  %v31_v62 = vld [vmem:[%s2755_s0 + $0x60] sm:$0xff]  ;;  %v56_v5 = vld [vmem:[%s2755_s0 + $0x128] sm:$0xff] }
  0xef   :  { %v1132_v13 = vsel %vm151_vm0, %v1065_v4, 0.0  ;;  %v806_v15 = vadd.f32 %v1837_v9, %v735_v6  ;;  %v1433_v16 = vpop.f32.mrb[8].mxu0  ;;  %v1969_v36 = vpop.f32.mrb[8].mxu1  ;;  %v1998_v63 = vadd.f32 %v1837_v9, %v763_v40  ;;  %v766_v24 = vadd.f32 %v1910_v55, %v56_v5  ;;  %v36_v55 = vld [vmem:[%s2755_s0 + $0x88] sm:$0xff]  ;;  %v38_v5 = vld [vmem:[%s2755_s0 + $0x98] sm:$0xff] }
  0xf0   :  { %v1133_v20 = vadd.f32 %v1132_v13, %v1131_v11  ;;  %v938_v21 = vadd.f32 %v937_v8, %v936_v10  ;;  %v738_v22 = vadd.f32 %v1433_v16, %v28_v7  ;;  %v450_v23 = vpop.f32.mrb[9].mxu0  ;;  %871 = vst.msk [vmem:[%s2757_s4 + $0x38] sm:$0xff] %vm151_vm0, %v807_v14  ;;  %v1068_v26 = vmul.f32 %v807_v14, %v807_v14  ;;  %v1973_v41 = vpop.f32.mrb[9].mxu1  ;;  %v34_v16 = vld [vmem:[%s2755_s0 + $0x78] sm:$0xff] }
  0xf1   :  { %870 = vst.msk [vmem:[%s2757_s4 + $0x30] sm:$0xff] %vm151_vm0, %v806_v15  ;;  %v939_v27 = vsel %vm151_vm0, %v806_v15, 0.0  ;;  %v1067_v28 = vmul.f32 %v806_v15, %v806_v15  ;;  %v737_v33 = vadd.f32 %v450_v23, %v27_v17  ;;  %v941_v43 = vsel %vm151_vm0, %v807_v14, 0.0  ;;  %898 = vst.msk [vmem:[%s2757_s4 + $0x110] sm:$0xff] %vm151_vm0, %v1998_v63  ;;  %v33_v17 = vld [vmem:[%s2755_s0 + $0x70] sm:$0xff] }
  0xf2   :  { %v940_v29 = vadd.f32 %v939_v27, %v938_v21  ;;  %v1135_v30 = vadd.f32 %v1134_v25, %v1133_v20  ;;  %v809_v31 = vadd.f32 %v1837_v9, %v738_v22  ;;  %v1138_v44 = vsel %vm151_vm0, %v1068_v26, 0.0 }
  0xf3   :  { %v1136_v38 = vsel %vm151_vm0, %v1067_v28, 0.0  ;;  %v1436_v39 = vpop.f32.mrb[10].mxu0  ;;  %v808_v46 = vadd.f32 %v1837_v9, %v737_v33  ;;  %v1990_v56 = vpop.f32.mrb[10].mxu1 }
  0xf4   :  { %v1137_v45 = vadd.f32 %v1136_v38, %v1135_v30  ;;  %873 = vst.msk [vmem:[%s2757_s4 + $0x48] sm:$0xff] %vm151_vm0, %v809_v31  ;;  %v460_v47 = vpop.f32.mrb[11].mxu0  ;;  %v1070_v48 = vmul.f32 %v809_v31, %v809_v31  ;;  %v942_v49 = vadd.f32 %v941_v43, %v940_v29  ;;  %v740_v50 = vadd.f32 %v1436_v39, %v30_v34  ;;  %v2000_v0 = vpop.f32.mrb[11].mxu1 }
  0xf5   :  { %v739_v51 = vadd.f32 %v460_v47, %v29_v35  ;;  %872 = vst.msk [vmem:[%s2757_s4 + $0x40] sm:$0xff] %vm151_vm0, %v808_v46  ;;  %v943_v52 = vsel %vm151_vm0, %v808_v46, 0.0  ;;  %v1069_v53 = vmul.f32 %v808_v46, %v808_v46  ;;  %v945_v1 = vsel %vm151_vm0, %v809_v31, 0.0 }
  0xf6   :  { %v1139_v54 = vadd.f32 %v1138_v44, %v1137_v45  ;;  %v944_v57 = vadd.f32 %v943_v52, %v942_v49  ;;  %v811_v58 = vadd.f32 %v1837_v9, %v740_v50  ;;  %v1142_v6 = vsel %vm151_vm0, %v1070_v48, 0.0  ;;  %v35_v49 = vld [vmem:[%s2755_s0 + $0x80] sm:$0xff] }
  0xf7   :  { %v810_v59 = vadd.f32 %v1837_v9, %v739_v51  ;;  %v1439_v60 = vpop.f32.mrb[12].mxu0  ;;  %v1140_v2 = vsel %vm151_vm0, %v1069_v53, 0.0  ;;  %v2029_v20 = vpop.f32.mrb[12].mxu1 }
  0xf8   :  { %v742_v3 = vadd.f32 %v1439_v60, %v32_v42  ;;  %v470_v4 = vpop.f32.mrb[13].mxu0  ;;  %v1141_v7 = vadd.f32 %v1140_v2, %v1139_v54  ;;  %875 = vst.msk [vmem:[%s2757_s4 + $0x58] sm:$0xff] %vm151_vm0, %v811_v58  ;;  %v1072_v8 = vmul.f32 %v811_v58, %v811_v58  ;;  %v946_v10 = vadd.f32 %v945_v1, %v944_v57  ;;  %v2032_v25 = vpop.f32.mrb[13].mxu1  ;;  %v55_v57 = vld [vmem:[%s2755_s0 + $0x120] sm:$0xff] }
  0xf9   :  { %874 = vst.msk [vmem:[%s2757_s4 + $0x50] sm:$0xff] %vm151_vm0, %v810_v59  ;;  %v947_v11 = vsel %vm151_vm0, %v810_v59, 0.0  ;;  %v1071_v13 = vmul.f32 %v810_v59, %v810_v59  ;;  %v741_v15 = vadd.f32 %v470_v4, %v31_v62  ;;  %v949_v26 = vsel %vm151_vm0, %v811_v58, 0.0 }
  0xfa   :  { %v813_v14 = vadd.f32 %v1837_v9, %v742_v3  ;;  %v948_v21 = vadd.f32 %v947_v11, %v946_v10  ;;  %v1143_v22 = vadd.f32 %v1142_v6, %v1141_v7  ;;  %v1146_v38 = vsel %vm151_vm0, %v1072_v8, 0.0  ;;  %v37_v6 = vld [vmem:[%s2755_s0 + $0x90] sm:$0xff] }
  0xfb   :  { %v1442_v23 = vpop.f32.mrb[14].mxu0  ;;  %v1144_v27 = vsel %vm151_vm0, %v1071_v13, 0.0  ;;  %v812_v29 = vadd.f32 %v1837_v9, %v741_v15  ;;  %v2050_v43 = vpop.f32.mrb[14].mxu1  ;;  %v2062_v54 = vadd.f32 %v1837_v9, %v766_v24  ;;  %v765_v13 = vadd.f32 %v1915_v61, %v55_v57  ;;  %v40_v61 = vld [vmem:[%s2755_s0 + $0xa8] sm:$0xff] }
  0xfc   :  { %877 = vst.msk [vmem:[%s2757_s4 + $0x68] sm:$0xff] %vm151_vm0, %v813_v14  ;;  %v1074_v28 = vmul.f32 %v813_v14, %v813_v14  ;;  %v480_v30 = vpop.f32.mrb[15].mxu0  ;;  %v1145_v31 = vadd.f32 %v1144_v27, %v1143_v22  ;;  %v950_v33 = vadd.f32 %v949_v26, %v948_v21  ;;  %v744_v34 = vadd.f32 %v1442_v23, %v34_v16  ;;  %v2057_v50 = vpop.f32.mrb[15].mxu1 }
  0xfd   :  { %v743_v35 = vadd.f32 %v480_v30, %v33_v17  ;;  %876 = vst.msk [vmem:[%s2757_s4 + $0x60] sm:$0xff] %vm151_vm0, %v812_v29  ;;  %v951_v39 = vsel %vm151_vm0, %v812_v29, 0.0  ;;  %v1073_v40 = vmul.f32 %v812_v29, %v812_v29  ;;  %v953_v51 = vsel %vm151_vm0, %v813_v14, 0.0  ;;  %901 = vst.msk [vmem:[%s2757_s4 + $0x128] sm:$0xff] %vm151_vm0, %v2062_v54 }
  0xfe   :  { %v952_v44 = vadd.f32 %v951_v39, %v950_v33  ;;  %v1147_v45 = vadd.f32 %v1146_v38, %v1145_v31  ;;  %v815_v46 = vadd.f32 %v1837_v9, %v744_v34  ;;  %v1150_v58 = vsel %vm151_vm0, %v1074_v28, 0.0  ;;  %v39_v39 = vld [vmem:[%s2755_s0 + $0xa0] sm:$0xff] }
  0xff   :  { %v814_v47 = vadd.f32 %v1837_v9, %v743_v35  ;;  %v1445_v48 = vpop.f32.mrb[16].mxu0  ;;  %v1148_v42 = vsel %vm151_vm0, %v1073_v40, 0.0  ;;  %v2089_v7 = vpop.f32.mrb[16].mxu1 }
 0x100   :  { %v746_v52 = vadd.f32 %v1445_v48, %v36_v55  ;;  %v490_v53 = vpop.f32.mrb[17].mxu0  ;;  %v1149_v59 = vadd.f32 %v1148_v42, %v1147_v45  ;;  %879 = vst.msk [vmem:[%s2757_s4 + $0x78] sm:$0xff] %vm151_vm0, %v815_v46  ;;  %v1076_v60 = vmul.f32 %v815_v46, %v815_v46  ;;  %v954_v62 = vadd.f32 %v953_v51, %v952_v44  ;;  %v2092_v14 = vpop.f32.mrb[17].mxu1 }
 0x101   :  { %878 = vst.msk [vmem:[%s2757_s4 + $0x70] sm:$0xff] %vm151_vm0, %v814_v47  ;;  %v955_v1 = vsel %vm151_vm0, %v814_v47, 0.0  ;;  %v1075_v2 = vmul.f32 %v814_v47, %v814_v47  ;;  %v745_v4 = vadd.f32 %v490_v53, %v35_v49  ;;  %v957_v15 = vsel %vm151_vm0, %v815_v46, 0.0 }
 0x102   :  { %v817_v3 = vadd.f32 %v1837_v9, %v746_v52  ;;  %v956_v8 = vadd.f32 %v955_v1, %v954_v62  ;;  %v1151_v10 = vadd.f32 %v1150_v58, %v1149_v59  ;;  %v1154_v28 = vsel %vm151_vm0, %v1076_v60, 0.0  ;;  %v42_v60 = vld [vmem:[%s2755_s0 + $0xb8] sm:$0xff]  ;;  %v41_v62 = vld [vmem:[%s2755_s0 + $0xb0] sm:$0xff] }
 0x103   :  { %v1448_v11 = vpop.f32.mrb[18].mxu0  ;;  %v1152_v16 = vsel %vm151_vm0, %v1075_v2, 0.0  ;;  %v816_v21 = vadd.f32 %v1837_v9, %v745_v4  ;;  %v2110_v31 = vpop.f32.mrb[18].mxu1  ;;  %v2122_v48 = vadd.f32 %v1837_v9, %v765_v13 }
 0x104   :  { %881 = vst.msk [vmem:[%s2757_s4 + $0x88] sm:$0xff] %vm151_vm0, %v817_v3  ;;  %v1078_v17 = vmul.f32 %v817_v3, %v817_v3  ;;  %v500_v22 = vpop.f32.mrb[19].mxu0  ;;  %v1153_v23 = vadd.f32 %v1152_v16, %v1151_v10  ;;  %v958_v24 = vadd.f32 %v957_v15, %v956_v8  ;;  %v748_v26 = vadd.f32 %v1448_v11, %v38_v5  ;;  %v2117_v40 = vpop.f32.mrb[19].mxu1 }
 0x105   :  { %v747_v27 = vadd.f32 %v500_v22, %v37_v6  ;;  %880 = vst.msk [vmem:[%s2757_s4 + $0x80] sm:$0xff] %vm151_vm0, %v816_v21  ;;  %v959_v29 = vsel %vm151_vm0, %v816_v21, 0.0  ;;  %v1077_v30 = vmul.f32 %v816_v21, %v816_v21  ;;  %v961_v44 = vsel %vm151_vm0, %v817_v3, 0.0  ;;  %900 = vst.msk [vmem:[%s2757_s4 + $0x120] sm:$0xff] %vm151_vm0, %v2122_v48  ;;  %v44_v22 = vld [vmem:[%s2755_s0 + $0xc8] sm:$0xff] }
 0x106   :  { %v960_v33 = vadd.f32 %v959_v29, %v958_v24  ;;  %v1155_v34 = vadd.f32 %v1154_v28, %v1153_v23  ;;  %v819_v35 = vadd.f32 %v1837_v9, %v748_v26  ;;  %v1158_v49 = vsel %vm151_vm0, %v1078_v17, 0.0  ;;  %v58_v23 = vld [vmem:[%s2755_s0 + $0x138] sm:$0xff] }
 0x107   :  { %v818_v55 = vadd.f32 %v1837_v9, %v747_v27  ;;  %v1451_v38 = vpop.f32.mrb[20].mxu0  ;;  %v1156_v45 = vsel %vm151_vm0, %v1077_v30, 0.0  ;;  %v2146_v1 = vpop.f32.mrb[20].mxu1 }
 0x108   :  { %v750_v46 = vadd.f32 %v1451_v38, %v40_v61  ;;  %v510_v47 = vpop.f32.mrb[21].mxu0  ;;  %v1157_v51 = vadd.f32 %v1156_v45, %v1155_v34  ;;  %883 = vst.msk [vmem:[%s2757_s4 + $0x98] sm:$0xff] %vm151_vm0, %v819_v35  ;;  %v1080_v42 = vmul.f32 %v819_v35, %v819_v35  ;;  %v962_v52 = vadd.f32 %v961_v44, %v960_v33  ;;  %v2148_v5 = vpop.f32.mrb[21].mxu1 }
 0x109   :  { %882 = vst.msk [vmem:[%s2757_s4 + $0x90] sm:$0xff] %vm151_vm0, %v818_v55  ;;  %v963_v53 = vsel %vm151_vm0, %v818_v55, 0.0  ;;  %v1079_v57 = vmul.f32 %v818_v55, %v818_v55  ;;  %v749_v59 = vadd.f32 %v510_v47, %v39_v39  ;;  %v965_v6 = vsel %vm151_vm0, %v819_v35, 0.0  ;;  %v43_v35 = vld [vmem:[%s2755_s0 + $0xc0] sm:$0xff] }
 0x10a   :  { %v821_v58 = vadd.f32 %v1837_v9, %v750_v46  ;;  %v964_v2 = vadd.f32 %v963_v53, %v962_v52  ;;  %v1159_v3 = vadd.f32 %v1158_v49, %v1157_v51  ;;  %v1162_v24 = vsel %vm151_vm0, %v1080_v42, 0.0 }
 0x10b   :  { %v1454_v4 = vpop.f32.mrb[22].mxu0  ;;  %v1160_v8 = vsel %vm151_vm0, %v1079_v57, 0.0  ;;  %v820_v11 = vadd.f32 %v1837_v9, %v749_v59  ;;  %v2169_v61 = vpop.f32.mrb[22].mxu1  ;;  %v768_v46 = vadd.f32 %v1931_v12, %v58_v23  ;;  %v45_v59 = vld [vmem:[%s2755_s0 + $0xd0] sm:$0xff]  ;;  %v48_v23 = vld [vmem:[%s2755_s0 + $0xe8] sm:$0xff] }
 0x10c   :  { %885 = vst.msk [vmem:[%s2757_s4 + $0xa8] sm:$0xff] %vm151_vm0, %v821_v58  ;;  %v1082_v10 = vmul.f32 %v821_v58, %v821_v58  ;;  %v520_v13 = vpop.f32.mrb[23].mxu0  ;;  %v1161_v15 = vadd.f32 %v1160_v8, %v1159_v3  ;;  %v966_v16 = vadd.f32 %v965_v6, %v964_v2  ;;  %v752_v17 = vadd.f32 %v1454_v4, %v42_v60  ;;  %v2176_v55 = vpop.f32.mrb[23].mxu1 }
 0x10d   :  { %v751_v21 = vadd.f32 %v520_v13, %v41_v62  ;;  %884 = vst.msk [vmem:[%s2757_s4 + $0xa0] sm:$0xff] %vm151_vm0, %v820_v11  ;;  %v967_v26 = vsel %vm151_vm0, %v820_v11, 0.0  ;;  %v1081_v27 = vmul.f32 %v820_v11, %v820_v11  ;;  %v969_v38 = vsel %vm151_vm0, %v821_v58, 0.0  ;;  %v46_v58 = vld [vmem:[%s2755_s0 + $0xd8] sm:$0xff] }
 0x10e   :  { %v968_v28 = vadd.f32 %v967_v26, %v966_v16  ;;  %v1163_v29 = vadd.f32 %v1162_v24, %v1161_v15  ;;  %v823_v30 = vadd.f32 %v1837_v9, %v752_v17  ;;  %v1166_v47 = vsel %vm151_vm0, %v1082_v10, 0.0 }
 0x10f   :  { %v822_v33 = vadd.f32 %v1837_v9, %v751_v21  ;;  %v1457_v34 = vpop.f32.mrb[24].mxu0  ;;  %v1164_v39 = vsel %vm151_vm0, %v1081_v27, 0.0  ;;  %v2198_v60 = vpop.f32.mrb[24].mxu1  ;;  %v2201_v4 = vadd.f32 %v1837_v9, %v768_v46 }
 0x110   :  { %v754_v44 = vadd.f32 %v1457_v34, %v44_v22  ;;  %v530_v45 = vpop.f32.mrb[25].mxu0  ;;  %v1165_v49 = vadd.f32 %v1164_v39, %v1163_v29  ;;  %887 = vst.msk [vmem:[%s2757_s4 + $0xb8] sm:$0xff] %vm151_vm0, %v823_v30  ;;  %v1084_v51 = vmul.f32 %v823_v30, %v823_v30  ;;  %v970_v42 = vadd.f32 %v969_v38, %v968_v28  ;;  %v2203_v6 = vpop.f32.mrb[25].mxu1  ;;  %v57_v28 = vld [vmem:[%s2755_s0 + $0x130] sm:$0xff]  ;;  %v47_v39 = vld [vmem:[%s2755_s0 + $0xe0] sm:$0xff] }
 0x111   :  { %886 = vst.msk [vmem:[%s2757_s4 + $0xb0] sm:$0xff] %vm151_vm0, %v822_v33  ;;  %v971_v52 = vsel %vm151_vm0, %v822_v33, 0.0  ;;  %v1083_v53 = vmul.f32 %v822_v33, %v822_v33  ;;  %v753_v57 = vadd.f32 %v530_v45, %v43_v35  ;;  %v973_v8 = vsel %vm151_vm0, %v823_v30, 0.0  ;;  %903 = vst.msk [vmem:[%s2757_s4 + $0x138] sm:$0xff] %vm151_vm0, %v2201_v4 }
 0x112   :  { %v825_v12 = vadd.f32 %v1837_v9, %v754_v44  ;;  %v972_v62 = vadd.f32 %v971_v52, %v970_v42  ;;  %v1167_v2 = vadd.f32 %v1166_v47, %v1165_v49  ;;  %v1170_v24 = vsel %vm151_vm0, %v1084_v51, 0.0 }
 0x113   :  { %v1460_v3 = vpop.f32.mrb[26].mxu0  ;;  %v1168_v10 = vsel %vm151_vm0, %v1083_v53, 0.0  ;;  %v824_v13 = vadd.f32 %v1837_v9, %v753_v57  ;;  %v2229_v29 = vpop.f32.mrb[26].mxu1 }
 0x114   :  { %889 = vst.msk [vmem:[%s2757_s4 + $0xc8] sm:$0xff] %vm151_vm0, %v825_v12  ;;  %v1086_v11 = vmul.f32 %v825_v12, %v825_v12  ;;  %v540_v15 = vpop.f32.mrb[27].mxu0  ;;  %v1169_v16 = vadd.f32 %v1168_v10, %v1167_v2  ;;  %v974_v17 = vadd.f32 %v973_v8, %v972_v62  ;;  %v756_v21 = vadd.f32 %v1460_v3, %v46_v58  ;;  %v2236_v44 = vpop.f32.mrb[27].mxu1  ;;  %v50_v2 = vld [vmem:[%s2755_s0 + $0xf8] sm:$0xff]  ;;  %v49_v3 = vld [vmem:[%s2755_s0 + $0xf0] sm:$0xff] }
 0x115   :  { %v755_v22 = vadd.f32 %v540_v15, %v45_v59  ;;  %888 = vst.msk [vmem:[%s2757_s4 + $0xc0] sm:$0xff] %vm151_vm0, %v824_v13  ;;  %v975_v26 = vsel %vm151_vm0, %v824_v13, 0.0  ;;  %v1085_v27 = vmul.f32 %v824_v13, %v824_v13  ;;  %v977_v45 = vsel %vm151_vm0, %v825_v12, 0.0 }
 0x116   :  { %v976_v30 = vadd.f32 %v975_v26, %v974_v17  ;;  %v1171_v33 = vadd.f32 %v1170_v24, %v1169_v16  ;;  %v827_v34 = vadd.f32 %v1837_v9, %v756_v21  ;;  %v1174_v46 = vsel %vm151_vm0, %v1086_v11, 0.0 }
 0x117   :  { %v826_v35 = vadd.f32 %v1837_v9, %v755_v22  ;;  %v1463_v38 = vpop.f32.mrb[28].mxu0  ;;  %v1172_v47 = vsel %vm151_vm0, %v1085_v27, 0.0  ;;  %v767_v12 = vadd.f32 %v1942_v19, %v57_v28  ;;  %v2258_v8 = vpop.f32.mrb[28].mxu1  ;;  %v1093_v19 = vmul.f32 %v1875_v37, %v1875_v37 }
 0x118   :  { %v758_v49 = vadd.f32 %v1463_v38, %v48_v23  ;;  %v550_v51 = vpop.f32.mrb[29].mxu0  ;;  %v1173_v42 = vadd.f32 %v1172_v47, %v1171_v33  ;;  %891 = vst.msk [vmem:[%s2757_s4 + $0xd8] sm:$0xff] %vm151_vm0, %v827_v34  ;;  %v1088_v52 = vmul.f32 %v827_v34, %v827_v34  ;;  %v978_v53 = vadd.f32 %v977_v45, %v976_v30  ;;  %v2262_v15 = vpop.f32.mrb[29].mxu1  ;;  %v60_v30 = vld [vmem:[%s2755_s0 + $0x148] sm:$0xff] }
 0x119   :  { %890 = vst.msk [vmem:[%s2757_s4 + $0xd0] sm:$0xff] %vm151_vm0, %v826_v35  ;;  %v979_v57 = vsel %vm151_vm0, %v826_v35, 0.0  ;;  %v1087_v58 = vmul.f32 %v826_v35, %v826_v35  ;;  %v757_v62 = vadd.f32 %v550_v51, %v47_v39  ;;  %v981_v16 = vsel %vm151_vm0, %v827_v34, 0.0 }
 0x11a   :  { %v829_v59 = vadd.f32 %v1837_v9, %v758_v49  ;;  %v980_v10 = vadd.f32 %v979_v57, %v978_v53  ;;  %v1175_v11 = vadd.f32 %v1174_v46, %v1173_v42  ;;  %v1178_v33 = vsel %vm151_vm0, %v1088_v52, 0.0  ;;  %v59_v57 = vld [vmem:[%s2755_s0 + $0x140] sm:$0xff] }
 0x11b   :  { %v1466_v13 = vpop.f32.mrb[30].mxu0  ;;  %v1176_v17 = vsel %vm151_vm0, %v1087_v58, 0.0  ;;  %v828_v22 = vadd.f32 %v1837_v9, %v757_v62  ;;  %v2281_v38 = vadd.f32 %v1837_v9, %v767_v12  ;;  %v2283_v39 = vpop.f32.mrb[30].mxu1  ;;  %v1094_v53 = vmul.f32 %v1867_v32, %v1867_v32 }
 0x11c   :  { %893 = vst.msk [vmem:[%s2757_s4 + $0xe8] sm:$0xff] %vm151_vm0, %v829_v59  ;;  %v1090_v21 = vmul.f32 %v829_v59, %v829_v59  ;;  %v560_v23 = vpop.f32.mrb[31].mxu0  ;;  %v1177_v24 = vadd.f32 %v1176_v17, %v1175_v11  ;;  %v982_v26 = vadd.f32 %v981_v16, %v980_v10  ;;  %v760_v27 = vadd.f32 %v1466_v13, %v50_v2  ;;  %v2287_v51 = vpop.f32.mrb[31].mxu1  ;;  %v62_v2 = vld [vmem:[%s2755_s0 + $0x158] sm:$0xff]  ;;  %v61_v16 = vld [vmem:[%s2755_s0 + $0x150] sm:$0xff] }
 0x11d   :  { %v759_v28 = vadd.f32 %v560_v23, %v49_v3  ;;  %892 = vst.msk [vmem:[%s2757_s4 + $0xe0] sm:$0xff] %vm151_vm0, %v828_v22  ;;  %v983_v34 = vsel %vm151_vm0, %v828_v22, 0.0  ;;  %v1089_v35 = vmul.f32 %v828_v22, %v828_v22  ;;  %v985_v42 = vsel %vm151_vm0, %v829_v59, 0.0  ;;  %902 = vst.msk [vmem:[%s2757_s4 + $0x130] sm:$0xff] %vm151_vm0, %v2281_v38  ;;  %v64_v23 = vld [vmem:[%s2755_s0 + $0x168] sm:$0xff] }
 0x11e   :  { %v984_v45 = vadd.f32 %v983_v34, %v982_v26  ;;  %v1179_v46 = vadd.f32 %v1178_v33, %v1177_v24  ;;  %v831_v47 = vadd.f32 %v1837_v9, %v760_v27  ;;  %v770_v12 = vadd.f32 %v1969_v36, %v60_v30  ;;  %v63_v24 = vld [vmem:[%s2755_s0 + $0x160] sm:$0xff] }
 0x11f   :  { %v830_v49 = vadd.f32 %v1837_v9, %v759_v28  ;;  %v1180_v52 = vsel %vm151_vm0, %v1089_v35, 0.0  ;;  %v1182_v58 = vsel %vm151_vm0, %v1090_v21, 0.0  ;;  %v991_v36 = vsel %vm151_vm0, %v1875_v37, 0.0 }
 0x120   :  { %v1181_v59 = vadd.f32 %v1180_v52, %v1179_v46  ;;  %895 = vst.msk [vmem:[%s2757_s4 + $0xf8] sm:$0xff] %vm151_vm0, %v831_v47  ;;  %v986_v62 = vadd.f32 %v985_v42, %v984_v45  ;;  %v1092_v3 = vmul.f32 %v831_v47, %v831_v47  ;;  %v2318_v13 = vadd.f32 %v1837_v9, %v770_v12 }
 0x121   :  { %894 = vst.msk [vmem:[%s2757_s4 + $0xf0] sm:$0xff] %vm151_vm0, %v830_v49  ;;  %v987_v10 = vsel %vm151_vm0, %v830_v49, 0.0  ;;  %v1091_v11 = vmul.f32 %v830_v49, %v830_v49  ;;  %v1188_v22 = vsel %vm151_vm0, %v1093_v19, 0.0  ;;  %v769_v37 = vadd.f32 %v1973_v41, %v59_v57 }
 0x122   :  { %v988_v17 = vadd.f32 %v987_v10, %v986_v62  ;;  %v1183_v21 = vadd.f32 %v1182_v58, %v1181_v59  ;;  %v989_v26 = vsel %vm151_vm0, %v831_v47, 0.0  ;;  %v1095_v28 = vmul.f32 %v1998_v63, %v1998_v63  ;;  %905 = vst.msk [vmem:[%s2757_s4 + $0x148] sm:$0xff] %vm151_vm0, %v2318_v13  ;;  %v65_v59 = vld [vmem:[%s2755_s0 + $0x170] sm:$0xff] }
 0x123   :  { %v1184_v27 = vsel %vm151_vm0, %v1091_v11, 0.0  ;;  %v772_v41 = vadd.f32 %v1990_v56, %v62_v2  ;;  %v2342_v33 = vadd.f32 %v1837_v9, %v769_v37  ;;  %v771_v34 = vadd.f32 %v2000_v0, %v61_v16  ;;  %v68_v2 = vld [vmem:[%s2755_s0 + $0x188] sm:$0xff]  ;;  %v67_v16 = vld [vmem:[%s2755_s0 + $0x180] sm:$0xff]  ;;  %v70_v37 = vld [vmem:[%s2755_s0 + $0x198] sm:$0xff] }
 0x124   :  { %v1185_v19 = vadd.f32 %v1184_v27, %v1183_v21  ;;  %v990_v30 = vadd.f32 %v989_v26, %v988_v17  ;;  %v1186_v35 = vsel %vm151_vm0, %v1092_v3, 0.0  ;;  %v774_v46 = vadd.f32 %v2029_v20, %v64_v23 }
 0x125   :  { %v2347_v45 = vadd.f32 %v1837_v9, %v772_v41  ;;  %v773_v47 = vadd.f32 %v2032_v25, %v63_v24  ;;  %v1096_v56 = vmul.f32 %v1940_v18, %v1940_v18  ;;  %904 = vst.msk [vmem:[%s2757_s4 + $0x140] sm:$0xff] %vm151_vm0, %v2342_v33  ;;  %v993_v0 = vsel %vm151_vm0, %v1867_v32, 0.0 }
 0x126   :  { %v992_v49 = vadd.f32 %v991_v36, %v990_v30  ;;  %v1187_v42 = vadd.f32 %v1186_v35, %v1185_v19  ;;  %v995_v52 = vsel %vm151_vm0, %v1998_v63, 0.0  ;;  %v2368_v20 = vadd.f32 %v1837_v9, %v771_v34  ;;  %v66_v63 = vld [vmem:[%s2755_s0 + $0x178] sm:$0xff] }
 0x127   :  { %907 = vst.msk [vmem:[%s2757_s4 + $0x158] sm:$0xff] %vm151_vm0, %v2347_v45  ;;  %v2371_v25 = vadd.f32 %v1837_v9, %v774_v46  ;;  %v1097_v32 = vmul.f32 %v2122_v48, %v2122_v48  ;;  %v2376_v58 = vadd.f32 %v1837_v9, %v773_v47  ;;  %v1190_v62 = vsel %vm151_vm0, %v1094_v53, 0.0 }
 0x128   :  { %v1189_v12 = vadd.f32 %v1188_v22, %v1187_v42  ;;  %v994_v57 = vadd.f32 %v993_v0, %v992_v49  ;;  %v1192_v36 = vsel %vm151_vm0, %v1095_v28, 0.0  ;;  %906 = vst.msk [vmem:[%s2757_s4 + $0x150] sm:$0xff] %vm151_vm0, %v2368_v20  ;;  %v997_v53 = vsel %vm151_vm0, %v1940_v18, 0.0  ;;  %v72_v0 = vld [vmem:[%s2755_s0 + $0x1a8] sm:$0xff] }
 0x129   :  { %909 = vst.msk [vmem:[%s2757_s4 + $0x168] sm:$0xff] %vm151_vm0, %v2371_v25  ;;  %v1194_v3 = vsel %vm151_vm0, %v1096_v56, 0.0  ;;  %908 = vst.msk [vmem:[%s2757_s4 + $0x160] sm:$0xff] %vm151_vm0, %v2376_v58  ;;  %v1098_v17 = vmul.f32 %v2062_v54, %v2062_v54  ;;  %v999_v18 = vsel %vm151_vm0, %v2122_v48, 0.0  ;;  %v776_v21 = vadd.f32 %v2050_v43, %v66_v63  ;;  %v74_v63 = vld [vmem:[%s2755_s0 + $0x1b8] sm:$0xff] }
 0x12a   :  { %v996_v10 = vadd.f32 %v995_v52, %v994_v57  ;;  %v1191_v11 = vadd.f32 %v1190_v62, %v1189_v12  ;;  %v775_v22 = vadd.f32 %v2057_v50, %v65_v59  ;;  %v1196_v26 = vsel %vm151_vm0, %v1097_v32, 0.0  ;;  %v71_v32 = vld [vmem:[%s2755_s0 + $0x1a0] sm:$0xff] }
 0x12b   :  { %v778_v27 = vadd.f32 %v2089_v7, %v68_v2  ;;  %v1099_v28 = vmul.f32 %v2281_v38, %v2281_v38  ;;  %v2424_v41 = vadd.f32 %v1837_v9, %v776_v21  ;;  %v777_v50 = vadd.f32 %v2092_v14, %v67_v16 }
 0x12c   :  { %v1193_v23 = vadd.f32 %v1192_v36, %v1191_v11  ;;  %v998_v24 = vadd.f32 %v997_v53, %v996_v10  ;;  %v2427_v43 = vadd.f32 %v1837_v9, %v775_v22  ;;  %v780_v34 = vadd.f32 %v2110_v31, %v70_v37 }
 0x12d   :  { %v2431_v30 = vadd.f32 %v1837_v9, %v778_v27  ;;  %v1001_v7 = vsel %vm151_vm0, %v2062_v54, 0.0  ;;  %v1100_v35 = vmul.f32 %v2201_v4, %v2201_v4  ;;  %v1003_v46 = vsel %vm151_vm0, %v2281_v38, 0.0  ;;  %911 = vst.msk [vmem:[%s2757_s4 + $0x178] sm:$0xff] %vm151_vm0, %v2424_v41  ;;  %v69_v54 = vld [vmem:[%s2755_s0 + $0x190] sm:$0xff] }
 0x12e   :  { %v1000_v48 = vadd.f32 %v999_v18, %v998_v24  ;;  %v1195_v19 = vadd.f32 %v1194_v3, %v1193_v23  ;;  %910 = vst.msk [vmem:[%s2757_s4 + $0x170] sm:$0xff] %vm151_vm0, %v2427_v43  ;;  %v1198_v14 = vsel %vm151_vm0, %v1098_v17, 0.0  ;;  %v1200_v47 = vsel %vm151_vm0, %v1099_v28, 0.0  ;;  %v76_v18 = vld [vmem:[%s2755_s0 + $0x1c8] sm:$0xff] }
 0x12f   :  { %913 = vst.msk [vmem:[%s2757_s4 + $0x188] sm:$0xff] %vm151_vm0, %v2431_v30  ;;  %v1101_v49 = vmul.f32 %v2342_v33, %v2342_v33  ;;  %v2463_v42 = vadd.f32 %v1837_v9, %v777_v50  ;;  %v2466_v56 = vadd.f32 %v1837_v9, %v780_v34  ;;  %v779_v57 = vadd.f32 %v2117_v40, %v69_v54 }
 0x130   :  { %v1197_v31 = vadd.f32 %v1196_v26, %v1195_v19  ;;  %v1002_v38 = vadd.f32 %v1001_v7, %v1000_v48  ;;  %v1005_v59 = vsel %vm151_vm0, %v2201_v4, 0.0  ;;  %v1202_v62 = vsel %vm151_vm0, %v1100_v35, 0.0 }
 0x131   :  { %v1102_v36 = vmul.f32 %v2318_v13, %v2318_v13  ;;  %v1007_v2 = vsel %vm151_vm0, %v2342_v33, 0.0  ;;  %912 = vst.msk [vmem:[%s2757_s4 + $0x180] sm:$0xff] %vm151_vm0, %v2463_v42  ;;  %915 = vst.msk [vmem:[%s2757_s4 + $0x198] sm:$0xff] %vm151_vm0, %v2466_v56  ;;  %v2496_v53 = vadd.f32 %v1837_v9, %v779_v57  ;;  %v782_v3 = vadd.f32 %v2146_v1, %v72_v0  ;;  %v73_v33 = vld [vmem:[%s2755_s0 + $0x1b0] sm:$0xff] }
 0x132   :  { %v1004_v52 = vadd.f32 %v1003_v46, %v1002_v38  ;;  %v1199_v12 = vadd.f32 %v1198_v14, %v1197_v31  ;;  %v1204_v10 = vsel %vm151_vm0, %v1101_v49, 0.0  ;;  %v1103_v11 = vmul.f32 %v2368_v20, %v2368_v20  ;;  %v78_v14 = vld [vmem:[%s2755_s0 + $0x1d8] sm:$0xff] }
 0x133   :  { %v781_v16 = vadd.f32 %v2148_v5, %v71_v32  ;;  %v784_v17 = vadd.f32 %v2169_v61, %v74_v63  ;;  %v1009_v1 = vsel %vm151_vm0, %v2318_v13, 0.0  ;;  %v1011_v37 = vsel %vm151_vm0, %v2368_v20, 0.0  ;;  %914 = vst.msk [vmem:[%s2757_s4 + $0x190] sm:$0xff] %vm151_vm0, %v2496_v53 }
 0x134   :  { %v1201_v40 = vadd.f32 %v1200_v47, %v1199_v12  ;;  %v1006_v4 = vadd.f32 %v1005_v59, %v1004_v52  ;;  %v2520_v5 = vadd.f32 %v1837_v9, %v782_v3  ;;  %v783_v13 = vadd.f32 %v2176_v55, %v73_v33  ;;  %v75_v55 = vld [vmem:[%s2755_s0 + $0x1c0] sm:$0xff] }
 0x135   :  { %v2523_v61 = vadd.f32 %v1837_v9, %v781_v16  ;;  %v2526_v23 = vadd.f32 %v1837_v9, %v784_v17  ;;  %v1206_v24 = vsel %vm151_vm0, %v1102_v36, 0.0  ;;  %v786_v27 = vadd.f32 %v2198_v60, %v76_v18  ;;  %v79_v59 = vld [vmem:[%s2755_s0 + $0x1e0] sm:$0xff] }
 0x136   :  { %v1008_v21 = vadd.f32 %v1007_v2, %v1006_v4  ;;  %v1203_v22 = vadd.f32 %v1202_v62, %v1201_v40  ;;  %v1104_v28 = vmul.f32 %v2347_v45, %v2347_v45  ;;  %v1208_v50 = vsel %vm151_vm0, %v1103_v11, 0.0  ;;  %917 = vst.msk [vmem:[%s2757_s4 + $0x1a8] sm:$0xff] %vm151_vm0, %v2520_v5  ;;  %v82_v4 = vld [vmem:[%s2755_s0 + $0x1f8] sm:$0xff] }
 0x137   :  { %v1106_v48 = vmul.f32 %v2371_v25, %v2371_v25  ;;  %v1105_v19 = vmul.f32 %v2376_v58, %v2376_v58  ;;  %916 = vst.msk [vmem:[%s2757_s4 + $0x1a0] sm:$0xff] %vm151_vm0, %v2523_v61  ;;  %919 = vst.msk [vmem:[%s2757_s4 + $0x1b8] sm:$0xff] %vm151_vm0, %v2526_v23  ;;  %v1013_v7 = vsel %vm151_vm0, %v2347_v45, 0.0  ;;  %v1015_v35 = vsel %vm151_vm0, %v2376_v58, 0.0  ;;  %v77_v58 = vld [vmem:[%s2755_s0 + $0x1d0] sm:$0xff] }
 0x138   :  { %v1205_v20 = vadd.f32 %v1204_v10, %v1203_v22  ;;  %v1010_v26 = vadd.f32 %v1009_v1, %v1008_v21  ;;  %v2561_v46 = vadd.f32 %v1837_v9, %v783_v13  ;;  %v2564_v54 = vadd.f32 %v1837_v9, %v786_v27  ;;  %v80_v9 = vld [vmem:[%s2755_s0 + $0x1e8] sm:$0xff] }
 0x139   :  { %v1107_v47 = vmul.f32 %v2427_v43, %v2427_v43  ;;  %v785_v45 = vadd.f32 %v2203_v6, %v75_v55  ;;  %v1210_v49 = vsel %vm151_vm0, %v1104_v28, 0.0  ;;  %v1017_v0 = vsel %vm151_vm0, %v2371_v25, 0.0  ;;  %v1528_v25 = vld [vmem:[%s2756_s3] ss:$0 sm:$0xff] }
 0x13a   :  { %v1012_v60 = vadd.f32 %v1011_v37, %v1010_v26  ;;  %v1207_v34 = vadd.f32 %v1206_v24, %v1205_v20  ;;  %v1214_v52 = vsel %vm151_vm0, %v1106_v48, 0.0  ;;  %v1212_v12 = vsel %vm151_vm0, %v1105_v19, 0.0  ;;  %918 = vst.msk [vmem:[%s2757_s4 + $0x1b0] sm:$0xff] %vm151_vm0, %v2561_v46  ;;  %921 = vst.msk [vmem:[%s2757_s4 + $0x1c8] sm:$0xff] %vm151_vm0, %v2564_v54 }
 0x13b   :  { %v2596_v32 = vadd.f32 %v1528_v25, %v785_v45  ;;  %v788_v63 = vadd.f32 %v2229_v29, %v78_v14  ;;  %v1108_v62 = vmul.f32 %v2424_v41, %v2424_v41  ;;  %v1019_v36 = vsel %vm151_vm0, %v2427_v43, 0.0 }
 0x13c   :  { %v1209_v31 = vadd.f32 %v1208_v50, %v1207_v34  ;;  %v1014_v38 = vadd.f32 %v1013_v7, %v1012_v60  ;;  %v787_v2 = vadd.f32 %v2236_v44, %v77_v58  ;;  %v790_v40 = vadd.f32 %v2258_v8, %v80_v9 }
 0x13d   :  { %v1216_v33 = vsel %vm151_vm0, %v1107_v47, 0.0  ;;  %v1109_v10 = vmul.f32 %v2463_v42, %v2463_v42  ;;  %920 = vst.msk [vmem:[%s2757_s4 + $0x1c0] sm:$0xff] %vm151_vm0, %v2596_v32  ;;  %v2619_v44 = vadd.f32 %v1528_v25, %v788_v63  ;;  %v789_v11 = vadd.f32 %v2262_v15, %v79_v59  ;;  %v81_v15 = vld [vmem:[%s2755_s0 + $0x1f0] sm:$0xff] }
 0x13e   :  { %v1016_v6 = vadd.f32 %v1015_v35, %v1014_v38  ;;  %v1211_v57 = vadd.f32 %v1210_v49, %v1209_v31  ;;  %v2621_v8 = vadd.f32 %v1528_v25, %v787_v2  ;;  %v2623_v43 = vadd.f32 %v1528_v25, %v790_v40 }
 0x13f   :  { %v792_v18 = vadd.f32 %v2283_v39, %v82_v4  ;;  %v1021_v1 = vsel %vm151_vm0, %v2424_v41, 0.0  ;;  %v1110_v21 = vmul.f32 %v2431_v30, %v2431_v30  ;;  %v1023_v22 = vsel %vm151_vm0, %v2463_v42, 0.0  ;;  %923 = vst.msk [vmem:[%s2757_s4 + $0x1d8] sm:$0xff] %vm151_vm0, %v2619_v44 }
 0x140   :  { %v1213_v3 = vadd.f32 %v1212_v12, %v1211_v57  ;;  %v1018_v29 = vadd.f32 %v1017_v0, %v1016_v6  ;;  %922 = vst.msk [vmem:[%s2757_s4 + $0x1d0] sm:$0xff] %vm151_vm0, %v2621_v8  ;;  %925 = vst.msk [vmem:[%s2757_s4 + $0x1e8] sm:$0xff] %vm151_vm0, %v2623_v43  ;;  %v1218_v39 = vsel %vm151_vm0, %v1108_v62, 0.0  ;;  %v1220_v37 = vsel %vm151_vm0, %v1109_v10, 0.0 }
 0x141   :  { %v1111_v13 = vmul.f32 %v2496_v53, %v2496_v53  ;;  %v2655_v24 = vadd.f32 %v1528_v25, %v789_v11  ;;  %v2657_v20 = vadd.f32 %v1528_v25, %v792_v18  ;;  %v791_v28 = vadd.f32 %v2287_v51, %v81_v15 }
 0x142   :  { %v1020_v16 = vadd.f32 %v1019_v36, %v1018_v29  ;;  %v1215_v17 = vadd.f32 %v1214_v52, %v1213_v3  ;;  %v1025_v50 = vsel %vm151_vm0, %v2431_v30, 0.0  ;;  %v1222_v48 = vsel %vm151_vm0, %v1110_v21, 0.0 }
 0x143   :  { %v1027_v19 = vsel %vm151_vm0, %v2496_v53, 0.0  ;;  %924 = vst.msk [vmem:[%s2757_s4 + $0x1e0] sm:$0xff] %vm151_vm0, %v2655_v24  ;;  %927 = vst.msk [vmem:[%s2757_s4 + $0x1f8] sm:$0xff] %vm151_vm0, %v2657_v20  ;;  %v1112_v30 = vmul.f32 %v2466_v56, %v2466_v56  ;;  %v862_v60 = vadd.f32 %v1528_v25, %v791_v28  ;;  %v1224_v53 = vsel %vm151_vm0, %v1111_v13, 0.0 }
 0x144   :  { %v1217_v41 = vadd.f32 %v1216_v33, %v1215_v17  ;;  %v1022_v42 = vadd.f32 %v1021_v1, %v1020_v16  ;;  %v1113_v34 = vmul.f32 %v2523_v61, %v2523_v61  ;;  %v1529_v14 = vmov 0.0  }
 0x145   :  { %926 = vst.msk [vmem:[%s2757_s4 + $0x1f0] sm:$0xff] %vm151_vm0, %v862_v60  ;;  %v1029_v31 = vsel %vm151_vm0, %v2466_v56, 0.0  ;;  %v1031_v38 = vsel %vm151_vm0, %v2523_v61, 0.0  ;;  %v1226_v58 = vsel %vm151_vm0, %v1112_v30, 0.0  ;;  %v1114_v9 = vmul.f32 %v2520_v5, %v2520_v5 }
 0x146   :  { %v1024_v26 = vadd.f32 %v1023_v22, %v1022_v42  ;;  %v1219_v27 = vadd.f32 %v1218_v39, %v1217_v41  ;;  %1265 = vst.msk [vmem:[%s2758_s5] sm:$0x3] %vm1264_vm1, %v1529_v14  ;;  %v1228_v49 = vsel %vm151_vm0, %v1113_v34, 0.0  ;;  %v1115_v0 = vmul.f32 %v2561_v46, %v2561_v46 }
 0x147   :  { %v1033_v56 = vsel %vm151_vm0, %v2520_v5, 0.0  ;;  %v1035_v61 = vsel %vm151_vm0, %v2561_v46, 0.0  ;;  %v1230_v25 = vsel %vm151_vm0, %v1114_v9, 0.0  ;;  %v1116_v63 = vmul.f32 %v2526_v23, %v2526_v23 }
 0x148   :  { %v1221_v51 = vadd.f32 %v1220_v37, %v1219_v27  ;;  %v1026_v55 = vadd.f32 %v1025_v50, %v1024_v26  ;;  %v1232_v59 = vsel %vm151_vm0, %v1115_v0, 0.0  ;;  %v1117_v62 = vmul.f32 %v2596_v32, %v2596_v32 }
 0x149   :  { %v1037_v5 = vsel %vm151_vm0, %v2526_v23, 0.0  ;;  %v1039_v46 = vsel %vm151_vm0, %v2596_v32, 0.0  ;;  %v1234_v3 = vsel %vm151_vm0, %v1116_v63, 0.0  ;;  %v1118_v29 = vmul.f32 %v2564_v54, %v2564_v54 }
 0x14a   :  { %v1028_v7 = vadd.f32 %v1027_v19, %v1026_v55  ;;  %v1223_v35 = vadd.f32 %v1222_v48, %v1221_v51  ;;  %v1236_v33 = vsel %vm151_vm0, %v1117_v62, 0.0  ;;  %v1119_v10 = vmul.f32 %v2621_v8, %v2621_v8 }
 0x14b   :  { %v1041_v23 = vsel %vm151_vm0, %v2564_v54, 0.0  ;;  %v1043_v32 = vsel %vm151_vm0, %v2621_v8, 0.0  ;;  %v1238_v1 = vsel %vm151_vm0, %v1118_v29, 0.0  ;;  %v1120_v21 = vmul.f32 %v2619_v44, %v2619_v44 }
 0x14c   :  { %v1225_v47 = vadd.f32 %v1224_v53, %v1223_v35  ;;  %v1030_v45 = vadd.f32 %v1029_v31, %v1028_v7  ;;  %v1240_v22 = vsel %vm151_vm0, %v1119_v10, 0.0  ;;  %v1121_v15 = vmul.f32 %v2655_v24, %v2655_v24 }
 0x14d   :  { %v1045_v54 = vsel %vm151_vm0, %v2619_v44, 0.0  ;;  %v1047_v8 = vsel %vm151_vm0, %v2655_v24, 0.0  ;;  %v1242_v13 = vsel %vm151_vm0, %v1120_v21, 0.0  ;;  %v1122_v26 = vmul.f32 %v2623_v43, %v2623_v43 }
 0x14e   :  { %v1032_v52 = vadd.f32 %v1031_v38, %v1030_v45  ;;  %v1227_v12 = vadd.f32 %v1226_v58, %v1225_v47  ;;  %v1244_v27 = vsel %vm151_vm0, %v1121_v15, 0.0  ;;  %v1123_v28 = vmul.f32 %v862_v60, %v862_v60 }
 0x14f   :  { %v1049_v19 = vsel %vm151_vm0, %v2623_v43, 0.0  ;;  %v1051_v44 = vsel %vm151_vm0, %v862_v60, 0.0  ;;  %v1246_v24 = vsel %vm151_vm0, %v1122_v26, 0.0  ;;  %v1124_v55 = vmul.f32 %v2657_v20, %v2657_v20 }
 0x150   :  { %v1229_v6 = vadd.f32 %v1228_v49, %v1227_v12  ;;  %v1034_v57 = vadd.f32 %v1033_v56, %v1032_v52  ;;  %v1248_v53 = vsel %vm151_vm0, %v1123_v28, 0.0  ;;  %v1053_v35 = vsel %vm151_vm0, %v2657_v20, 0.0  ;;  %v1266_v20 = vld [vmem:[%s2758_s5] sm:$0x3] }
 0x151   :  { %v1250_v43 = vsel %vm151_vm0, %v1124_v55, 0.0 }
 0x152   :  { %v1036_v36 = vadd.f32 %v1035_v61, %v1034_v57  ;;  %v1231_v2 = vadd.f32 %v1230_v25, %v1229_v6 }
 0x154   :  { %v1233_v40 = vadd.f32 %v1232_v59, %v1231_v2  ;;  %v1038_v4 = vadd.f32 %v1037_v5, %v1036_v36 }
 0x156   :  { %v1040_v11 = vadd.f32 %v1039_v46, %v1038_v4  ;;  %v1235_v16 = vadd.f32 %v1234_v3, %v1233_v40 }
 0x158   :  { %v1237_v17 = vadd.f32 %v1236_v33, %v1235_v16  ;;  %v1042_v18 = vadd.f32 %v1041_v23, %v1040_v11 }
 0x15a   :  { %v1044_v39 = vadd.f32 %v1043_v32, %v1042_v18  ;;  %v1239_v41 = vadd.f32 %v1238_v1, %v1237_v17 }
 0x15c   :  { %v1241_v42 = vadd.f32 %v1240_v22, %v1239_v41  ;;  %v1046_v37 = vadd.f32 %v1045_v54, %v1044_v39 }
 0x15e   :  { %v1048_v50 = vadd.f32 %v1047_v8, %v1046_v37  ;;  %v1243_v48 = vadd.f32 %v1242_v13, %v1241_v42 }
 0x160   :  { %v1245_v51 = vadd.f32 %v1244_v27, %v1243_v48  ;;  %v1050_v30 = vadd.f32 %v1049_v19, %v1048_v50 }
 0x162   :  { %v1052_v34 = vadd.f32 %v1051_v44, %v1050_v30  ;;  %v1247_v7 = vadd.f32 %v1246_v24, %v1245_v51 }
 0x164   :  { %v1054_v14 = vadd.f32 %v1053_v35, %v1052_v34  ;;  %v1249_v31 = vadd.f32 %v1248_v53, %v1247_v7 }
 0x166   :  { %v1055_v38 = vrot.slane %v1054_v14, 4  ;;  %v1251_v60 = vadd.f32 %v1250_v43, %v1249_v31 }
 0x168   :  { %v1056_v47 = vadd.f32 %v1055_v38, %v1054_v14  ;;  %v1252_v45 = vrot.slane %v1251_v60, 4 }
 0x16a   :  { %v1057_v58 = vrot.slane %v1056_v47, 2  ;;  %v1253_v9 = vadd.f32 %v1252_v45, %v1251_v60 }
 0x16c   :  { %v1058_v49 = vadd.f32 %v1057_v58, %v1056_v47  ;;  %v1254_v0 = vrot.slane %v1253_v9, 2 }
 0x16e   :  { %v1059_v52 = vrot.slane %v1058_v49, 1  ;;  %v1255_v12 = vadd.f32 %v1254_v0, %v1253_v9 }
 0x170   :  { %v1256_v56 = vrot.slane %v1255_v12, 1  ;;  %v1060_v61 = vadd.f32 %v1059_v52, %v1058_v49 }
 0x172   :  { %v1257_v6 = vadd.f32 %v1256_v56, %v1255_v12 }
 0x174   :  { %v1259_v57 = vsel %vm1258_vm2, %v1060_v61, %v1257_v6 }
 0x175   :  { %v1267_v25 = vadd.f32 %v1266_v20, %v1259_v57 }
 0x177   :  { %1269 = vst.msk [vmem:[%s2758_s5] sm:$0x3] %vm1264_vm1, %v1267_v25 }

// kernel: simple_block2d_forward.17
= control target key start
LH: loop header
LB: loop body
LE: loop exit
PB: predicated region body
PF: predicated region fallthrough
CT: control target
= control target key end

     0   :  { %v81_v0 = vlaneseq  ;;  %vm283_vm0 = vcmask 261120   ;;  %s1304_s0 = inlined_call_operand.vmem [shape: f32[512,32], index: 0, kind: input, shape index: {}]   ;;  %s1305_s1 = inlined_call_operand.vmem [shape: f32[2,32], index: 1, kind: input, shape index: {}]   ;;  %s1306_s2 = inlined_call_operand.vmem [shape: f32[512,32], index: 2, kind: output, shape index: {}]  }
   0x1   :  { %v11_v1 = vld [vmem:[%s1305_s1] sm:$0x1]  ;;  %v13_v2 = vld [vmem:[%s1305_s1 + $0x1] sm:$0x1]  ;;  %v385_v7 = vld [vmem:[%s1304_s0 + $0x8] sm:$0xff] }
   0x2   :  { %v12_v3 = vmul.f32 0.001953125, %v11_v1  ;;  %v14_v4 = vmul.f32 0.001953125, %v13_v2  ;;  %v375_v5 = vshrl.u32 %v81_v0, 7  ;;  %v380_v6 = vld [vmem:[%s1304_s0] sm:$0xff]  ;;  %v390_v8 = vld [vmem:[%s1304_s0 + $0x10] sm:$0xff]  ;;  %v396_v11 = vld [vmem:[%s1304_s0 + $0x18] sm:$0xff] }
   0x3   :  { %v401_v12 = vld [vmem:[%s1304_s0 + $0x20] sm:$0xff]  ;;  %v406_v13 = vld [vmem:[%s1304_s0 + $0x28] sm:$0xff]  ;;  %v411_v14 = vld [vmem:[%s1304_s0 + $0x30] sm:$0xff] }
   0x4   :  { %v15_v9 = vmul.f32 %v12_v3, %v12_v3  ;;  %v1307_v10 = vsub.s32 0, %v375_v5  ;;  %v416_v15 = vld [vmem:[%s1304_s0 + $0x38] sm:$0xff]  ;;  %v421_v16 = vld [vmem:[%s1304_s0 + $0x40] sm:$0xff]  ;;  %v426_v17 = vld [vmem:[%s1304_s0 + $0x48] sm:$0xff] }
   0x5   :  { %v435_v20 = vld [vmem:[%s1304_s0 + $0x50] sm:$0xff]  ;;  %v440_v21 = vld [vmem:[%s1304_s0 + $0x58] sm:$0xff]  ;;  %v445_v22 = vld [vmem:[%s1304_s0 + $0x60] sm:$0xff] }
   0x6   :  { %v16_v18 = vsub.f32 %v14_v4, %v15_v9  ;;  %v430_v19 = vrot.slane %v12_v3, %v1307_v10  ;;  %v450_v23 = vld [vmem:[%s1304_s0 + $0x68] sm:$0xff]  ;;  %v455_v24 = vld [vmem:[%s1304_s0 + $0x70] sm:$0xff]  ;;  %v460_v25 = vld [vmem:[%s1304_s0 + $0x78] sm:$0xff] }
   0x7   :  { %v465_v26 = vld [vmem:[%s1304_s0 + $0x80] sm:$0xff]  ;;  %v470_v27 = vld [vmem:[%s1304_s0 + $0x88] sm:$0xff]  ;;  %v481_v32 = vld [vmem:[%s1304_s0 + $0x90] sm:$0xff] }
   0x8   :  { %v149_v29 = vadd.f32 1e-05, %v16_v18  ;;  %v486_v33 = vld [vmem:[%s1304_s0 + $0x98] sm:$0xff]  ;;  %v491_v34 = vld [vmem:[%s1304_s0 + $0xa0] sm:$0xff]  ;;  %v496_v35 = vld [vmem:[%s1304_s0 + $0xa8] sm:$0xff]  ;;  %v1324_v18 = vsub.s32 0, %v375_v5  ;;  %v1326_v38 = vsub.f32 %v385_v7, %v430_v19  ;;  %v1328_v5 = vsub.f32 %v396_v11, %v430_v19 }
   0x9   :  { %v509_v40 = vld [vmem:[%s1304_s0 + $0xb0] sm:$0xff]  ;;  %v514_v41 = vld [vmem:[%s1304_s0 + $0xb8] sm:$0xff]  ;;  %v519_v42 = vld [vmem:[%s1304_s0 + $0xc0] sm:$0xff]  ;;  %v1330_v7 = vsub.f32 %v406_v13, %v430_v19  ;;  %v1332_v11 = vsub.f32 %v416_v15, %v430_v19  ;;  %v1334_v15 = vsub.f32 %v426_v17, %v430_v19 }
   0xa   :  { %352 = vrsqrt.f32 %v149_v29  ;;  %v530_v46 = vld [vmem:[%s1304_s0 + $0xc8] sm:$0xff]  ;;  %v535_v47 = vld [vmem:[%s1304_s0 + $0xd0] sm:$0xff]  ;;  %v540_v48 = vld [vmem:[%s1304_s0 + $0xd8] sm:$0xff] }
   0xb   :  { %v553_v53 = vld [vmem:[%s1304_s0 + $0xe0] sm:$0xff]  ;;  %v558_v54 = vld [vmem:[%s1304_s0 + $0xe8] sm:$0xff]  ;;  %v563_v55 = vld [vmem:[%s1304_s0 + $0xf0] sm:$0xff] }
   0xc   :  { %v576_v60 = vld [vmem:[%s1304_s0 + $0xf8] sm:$0xff]  ;;  %v581_v61 = vld [vmem:[%s1304_s0 + $0x100] sm:$0xff]  ;;  %v586_v62 = vld [vmem:[%s1304_s0 + $0x108] sm:$0xff] }
   0xd   :  { %v599_v3 = vld [vmem:[%s1304_s0 + $0x110] sm:$0xff]  ;;  %v604_v4 = vld [vmem:[%s1304_s0 + $0x118] sm:$0xff]  ;;  %v609_v9 = vld [vmem:[%s1304_s0 + $0x120] sm:$0xff] }
   0xe   :  { %v622_v0 = vld [vmem:[%s1304_s0 + $0x128] sm:$0xff]  ;;  %v627_v63 = vld [vmem:[%s1304_s0 + $0x130] sm:$0xff]  ;;  %v632_v29 = vld [vmem:[%s1304_s0 + $0x138] sm:$0xff] }
   0xf   :  { %v645_v58 = vld [vmem:[%s1304_s0 + $0x140] sm:$0xff]  ;;  %v650_v57 = vld [vmem:[%s1304_s0 + $0x148] sm:$0xff]  ;;  %v655_v1 = vld [vmem:[%s1304_s0 + $0x150] sm:$0xff] }
  0x10   :  { %v668_v52 = vld [vmem:[%s1304_s0 + $0x158] sm:$0xff]  ;;  %v673_v51 = vld [vmem:[%s1304_s0 + $0x160] sm:$0xff]  ;;  %v678_v59 = vld [vmem:[%s1304_s0 + $0x168] sm:$0xff] }
  0x11   :  { %v691_v49 = vld [vmem:[%s1304_s0 + $0x170] sm:$0xff]  ;;  %v696_v45 = vld [vmem:[%s1304_s0 + $0x178] sm:$0xff]  ;;  %v701_v56 = vld [vmem:[%s1304_s0 + $0x180] sm:$0xff] }
  0x12   :  { %1316 = vst [vmem:[#allocation2_spill] sm:$0xff] %v691_v49  ;;  %1317 = vst [vmem:[#allocation3_spill] sm:$0xff] %v701_v56  ;;  %v714_v43 = vld [vmem:[%s1304_s0 + $0x188] sm:$0xff]  ;;  %v719_v39 = vld [vmem:[%s1304_s0 + $0x190] sm:$0xff] }
  0x13   :  { %1318 = vst [vmem:[#allocation4_spill] sm:$0xff] %v714_v43  ;;  %v724_v50 = vld [vmem:[%s1304_s0 + $0x198] sm:$0xff]  ;;  %v737_v37 = vld [vmem:[%s1304_s0 + $0x1a0] sm:$0xff]  ;;  %v742_v36 = vld [vmem:[%s1304_s0 + $0x1a8] sm:$0xff]  ;;  %v1327_v43 = vsub.f32 %v390_v8, %v430_v19  ;;  %v1331_v8 = vsub.f32 %v411_v14, %v430_v19  ;;  %v1333_v14 = vsub.f32 %v421_v16, %v430_v19  ;;  %v1337_v16 = vsub.f32 %v445_v22, %v430_v19 }
  0x14   :  { %1319 = vst [vmem:[#allocation5_spill] sm:$0xff] %v737_v37  ;;  %1320 = vst [vmem:[#allocation6_spill] sm:$0xff] %v742_v36  ;;  %v747_v44 = vld [vmem:[%s1304_s0 + $0x1b0] sm:$0xff]  ;;  %v353_v2 = vpop.eup %352  ;;  %v760_v28 = vld [vmem:[%s1304_s0 + $0x1b8] sm:$0xff] }
  0x15   :  { %1321 = vst [vmem:[#allocation7_spill] sm:$0xff] %v747_v44  ;;  %1322 = vst [vmem:[#allocation8_spill] sm:$0xff] %v760_v28  ;;  %v765_v10 = vld [vmem:[%s1304_s0 + $0x1c0] sm:$0xff]  ;;  %v769_v49 = vrot.slane %v353_v2, %v1324_v18  ;;  %v1325_v18 = vsub.f32 %v380_v6, %v430_v19  ;;  %v1329_v6 = vsub.f32 %v401_v12, %v430_v19 }
  0x16   :  { %1323 = vst [vmem:[#allocation9_spill] sm:$0xff] %v765_v10 }
  0x17   :  { %v155_v30 = vmul.f32 %v769_v49, %v1325_v18  ;;  %v156_v31 = vmul.f32 %v769_v49, %v1326_v38  ;;  %v157_v56 = vmul.f32 %v769_v49, %v1327_v43  ;;  %v158_v2 = vmul.f32 %v769_v49, %v1328_v5 }
  0x18   :  { %v159_v18 = vmul.f32 %v769_v49, %v1329_v6  ;;  %v160_v38 = vmul.f32 %v769_v49, %v1330_v7  ;;  %v161_v43 = vmul.f32 %v769_v49, %v1331_v8  ;;  %v162_v5 = vmul.f32 %v769_v49, %v1332_v11 }
  0x19   :  { %v219_v10 = vmax.f32 %v155_v30, 0.0  ;;  %v220_v28 = vmax.f32 %v156_v31, 0.0  ;;  %v221_v12 = vmax.f32 %v157_v56, 0.0  ;;  %v222_v44 = vmax.f32 %v158_v2, 0.0 }
  0x1a   :  { %v223_v6 = vmax.f32 %v159_v18, 0.0  ;;  %v224_v36 = vmax.f32 %v160_v38, 0.0  ;;  %v225_v37 = vmax.f32 %v161_v43, 0.0  ;;  %v226_v13 = vmax.f32 %v162_v5, 0.0 }
  0x1b   :  { %284 = vst.msk [vmem:[%s1306_s2] sm:$0xff] %vm283_vm0, %v219_v10  ;;  %285 = vst.msk [vmem:[%s1306_s2 + $0x8] sm:$0xff] %vm283_vm0, %v220_v28  ;;  %v163_v10 = vmul.f32 %v769_v49, %v1333_v14  ;;  %v164_v28 = vmul.f32 %v769_v49, %v1334_v15  ;;  %v1335_v30 = vsub.f32 %v435_v20, %v430_v19 }
  0x1c   :  { %286 = vst.msk [vmem:[%s1306_s2 + $0x10] sm:$0xff] %vm283_vm0, %v221_v12  ;;  %287 = vst.msk [vmem:[%s1306_s2 + $0x18] sm:$0xff] %vm283_vm0, %v222_v44  ;;  %v1336_v56 = vsub.f32 %v440_v21, %v430_v19  ;;  %v167_v17 = vmul.f32 %v769_v49, %v1337_v16  ;;  %v1338_v20 = vsub.f32 %v450_v23, %v430_v19 }
  0x1d   :  { %v165_v31 = vmul.f32 %v769_v49, %v1335_v30  ;;  %288 = vst.msk [vmem:[%s1306_s2 + $0x20] sm:$0xff] %vm283_vm0, %v223_v6  ;;  %289 = vst.msk [vmem:[%s1306_s2 + $0x28] sm:$0xff] %vm283_vm0, %v224_v36  ;;  %v1339_v36 = vsub.f32 %v455_v24, %v430_v19  ;;  %v1340_v2 = vsub.f32 %v460_v25, %v430_v19  ;;  %v227_v7 = vmax.f32 %v163_v10, 0.0 }
  0x1e   :  { %v166_v44 = vmul.f32 %v769_v49, %v1336_v56  ;;  %290 = vst.msk [vmem:[%s1306_s2 + $0x30] sm:$0xff] %vm283_vm0, %v225_v37  ;;  %291 = vst.msk [vmem:[%s1306_s2 + $0x38] sm:$0xff] %vm283_vm0, %v226_v13  ;;  %v168_v21 = vmul.f32 %v769_v49, %v1338_v20  ;;  %v228_v38 = vmax.f32 %v164_v28, 0.0  ;;  %v231_v43 = vmax.f32 %v167_v17, 0.0 }
  0x1f   :  { %v169_v37 = vmul.f32 %v769_v49, %v1339_v36  ;;  %v170_v18 = vmul.f32 %v769_v49, %v1340_v2  ;;  %v229_v22 = vmax.f32 %v165_v31, 0.0  ;;  %292 = vst.msk [vmem:[%s1306_s2 + $0x40] sm:$0xff] %vm283_vm0, %v227_v7  ;;  %v1341_v24 = vsub.f32 %v465_v26, %v430_v19 }
  0x20   :  { %v230_v8 = vmax.f32 %v166_v44, 0.0  ;;  %v232_v11 = vmax.f32 %v168_v21, 0.0  ;;  %293 = vst.msk [vmem:[%s1306_s2 + $0x48] sm:$0xff] %vm283_vm0, %v228_v38  ;;  %v1342_v12 = vsub.f32 %v470_v27, %v430_v19  ;;  %v1343_v13 = vsub.f32 %v481_v32, %v430_v19  ;;  %296 = vst.msk [vmem:[%s1306_s2 + $0x60] sm:$0xff] %vm283_vm0, %v231_v43 }
  0x21   :  { %v233_v5 = vmax.f32 %v169_v37, 0.0  ;;  %v234_v23 = vmax.f32 %v170_v18, 0.0  ;;  %294 = vst.msk [vmem:[%s1306_s2 + $0x50] sm:$0xff] %vm283_vm0, %v229_v22  ;;  %v171_v25 = vmul.f32 %v769_v49, %v1341_v24  ;;  %v1344_v10 = vsub.f32 %v486_v33, %v430_v19 }
  0x22   :  { %295 = vst.msk [vmem:[%s1306_s2 + $0x58] sm:$0xff] %vm283_vm0, %v230_v8  ;;  %v172_v6 = vmul.f32 %v769_v49, %v1342_v12  ;;  %v173_v14 = vmul.f32 %v769_v49, %v1343_v13  ;;  %297 = vst.msk [vmem:[%s1306_s2 + $0x68] sm:$0xff] %vm283_vm0, %v232_v11  ;;  %v1345_v26 = vsub.f32 %v491_v34, %v430_v19 }
  0x23   :  { %v174_v15 = vmul.f32 %v769_v49, %v1344_v10  ;;  %298 = vst.msk [vmem:[%s1306_s2 + $0x70] sm:$0xff] %vm283_vm0, %v233_v5  ;;  %299 = vst.msk [vmem:[%s1306_s2 + $0x78] sm:$0xff] %vm283_vm0, %v234_v23  ;;  %v1346_v32 = vsub.f32 %v496_v35, %v430_v19  ;;  %v1347_v28 = vsub.f32 %v509_v40, %v430_v19  ;;  %v235_v44 = vmax.f32 %v171_v25, 0.0 }
  0x24   :  { %v175_v27 = vmul.f32 %v769_v49, %v1345_v26  ;;  %v1348_v31 = vsub.f32 %v514_v41, %v430_v19  ;;  %v236_v16 = vmax.f32 %v172_v6, 0.0  ;;  %v237_v34 = vmax.f32 %v173_v14, 0.0 }
  0x25   :  { %v176_v33 = vmul.f32 %v769_v49, %v1346_v32  ;;  %v177_v30 = vmul.f32 %v769_v49, %v1347_v28  ;;  %v238_v17 = vmax.f32 %v174_v15, 0.0  ;;  %300 = vst.msk [vmem:[%s1306_s2 + $0x80] sm:$0xff] %vm283_vm0, %v235_v44  ;;  %v1349_v40 = vsub.f32 %v519_v42, %v430_v19 }
  0x26   :  { %v178_v56 = vmul.f32 %v769_v49, %v1348_v31  ;;  %v239_v20 = vmax.f32 %v175_v27, 0.0  ;;  %301 = vst.msk [vmem:[%s1306_s2 + $0x88] sm:$0xff] %vm283_vm0, %v236_v16  ;;  %302 = vst.msk [vmem:[%s1306_s2 + $0x90] sm:$0xff] %vm283_vm0, %v237_v34  ;;  %v1350_v37 = vsub.f32 %v530_v46, %v430_v19  ;;  %v1351_v18 = vsub.f32 %v535_v47, %v430_v19 }
  0x27   :  { %v240_v21 = vmax.f32 %v176_v33, 0.0  ;;  %v241_v36 = vmax.f32 %v177_v30, 0.0  ;;  %303 = vst.msk [vmem:[%s1306_s2 + $0x98] sm:$0xff] %vm283_vm0, %v238_v17  ;;  %v179_v41 = vmul.f32 %v769_v49, %v1349_v40  ;;  %v1352_v38 = vsub.f32 %v540_v48, %v430_v19 }
  0x28   :  { %v242_v35 = vmax.f32 %v178_v56, 0.0  ;;  %v180_v2 = vmul.f32 %v769_v49, %v1350_v37  ;;  %v181_v7 = vmul.f32 %v769_v49, %v1351_v18  ;;  %304 = vst.msk [vmem:[%s1306_s2 + $0xa0] sm:$0xff] %vm283_vm0, %v239_v20  ;;  %v1353_v42 = vsub.f32 %v553_v53, %v430_v19 }
  0x29   :  { %v182_v22 = vmul.f32 %v769_v49, %v1352_v38  ;;  %305 = vst.msk [vmem:[%s1306_s2 + $0xa8] sm:$0xff] %vm283_vm0, %v240_v21  ;;  %306 = vst.msk [vmem:[%s1306_s2 + $0xb0] sm:$0xff] %vm283_vm0, %v241_v36  ;;  %v1354_v47 = vsub.f32 %v558_v54, %v430_v19  ;;  %v1355_v8 = vsub.f32 %v563_v55, %v430_v19  ;;  %v243_v23 = vmax.f32 %v179_v41, 0.0 }
  0x2a   :  { %307 = vst.msk [vmem:[%s1306_s2 + $0xb8] sm:$0xff] %vm283_vm0, %v242_v35  ;;  %v183_v46 = vmul.f32 %v769_v49, %v1353_v42  ;;  %v1356_v11 = vsub.f32 %v576_v60, %v430_v19  ;;  %v244_v24 = vmax.f32 %v180_v2, 0.0  ;;  %v245_v53 = vmax.f32 %v181_v7, 0.0  ;;  %v1371_v2 = vld [vmem:[#allocation2_spill] sm:$0xff] }
  0x2b   :  { %v184_v48 = vmul.f32 %v769_v49, %v1354_v47  ;;  %v185_v43 = vmul.f32 %v769_v49, %v1355_v8  ;;  %v246_v25 = vmax.f32 %v182_v22, 0.0  ;;  %308 = vst.msk [vmem:[%s1306_s2 + $0xc0] sm:$0xff] %vm283_vm0, %v243_v23  ;;  %v1357_v55 = vsub.f32 %v581_v61, %v430_v19  ;;  %v1376_v23 = vld [vmem:[#allocation4_spill] sm:$0xff] }
  0x2c   :  { %v186_v5 = vmul.f32 %v769_v49, %v1356_v11  ;;  %v247_v12 = vmax.f32 %v183_v46, 0.0  ;;  %309 = vst.msk [vmem:[%s1306_s2 + $0xc8] sm:$0xff] %vm283_vm0, %v244_v24  ;;  %310 = vst.msk [vmem:[%s1306_s2 + $0xd0] sm:$0xff] %vm283_vm0, %v245_v53  ;;  %v1358_v14 = vsub.f32 %v586_v62, %v430_v19  ;;  %v1359_v15 = vsub.f32 %v599_v3, %v430_v19 }
  0x2d   :  { %v248_v6 = vmax.f32 %v184_v48, 0.0  ;;  %v249_v13 = vmax.f32 %v185_v43, 0.0  ;;  %311 = vst.msk [vmem:[%s1306_s2 + $0xd8] sm:$0xff] %vm283_vm0, %v246_v25  ;;  %v187_v60 = vmul.f32 %v769_v49, %v1357_v55  ;;  %v1360_v27 = vsub.f32 %v604_v4, %v430_v19  ;;  %v75_v55 = vld [vmem:[%s1304_s0 + $0x1d0] sm:$0xff] }
  0x2e   :  { %v250_v54 = vmax.f32 %v186_v5, 0.0  ;;  %v188_v10 = vmul.f32 %v769_v49, %v1358_v14  ;;  %v189_v26 = vmul.f32 %v769_v49, %v1359_v15  ;;  %312 = vst.msk [vmem:[%s1306_s2 + $0xe0] sm:$0xff] %vm283_vm0, %v247_v12  ;;  %v1361_v61 = vsub.f32 %v609_v9, %v430_v19  ;;  %v1382_v14 = vld [vmem:[#allocation6_spill] sm:$0xff] }
  0x2f   :  { %v190_v32 = vmul.f32 %v769_v49, %v1360_v27  ;;  %313 = vst.msk [vmem:[%s1306_s2 + $0xe8] sm:$0xff] %vm283_vm0, %v248_v6  ;;  %314 = vst.msk [vmem:[%s1306_s2 + $0xf0] sm:$0xff] %vm283_vm0, %v249_v13  ;;  %v1362_v3 = vsub.f32 %v622_v0, %v430_v19  ;;  %v1363_v33 = vsub.f32 %v627_v63, %v430_v19  ;;  %v251_v56 = vmax.f32 %v187_v60, 0.0 }
  0x30   :  { %315 = vst.msk [vmem:[%s1306_s2 + $0xf8] sm:$0xff] %vm283_vm0, %v250_v54  ;;  %v191_v62 = vmul.f32 %v769_v49, %v1361_v61  ;;  %v1364_v30 = vsub.f32 %v632_v29, %v430_v19  ;;  %v252_v44 = vmax.f32 %v188_v10, 0.0  ;;  %v253_v9 = vmax.f32 %v189_v26, 0.0  ;;  %v74_v54 = vld [vmem:[%s1304_s0 + $0x1c8] sm:$0xff]  ;;  %v1386_v61 = vld [vmem:[#allocation8_spill] sm:$0xff] }
  0x31   :  { %v192_v4 = vmul.f32 %v769_v49, %v1362_v3  ;;  %v193_v28 = vmul.f32 %v769_v49, %v1363_v33  ;;  %v254_v16 = vmax.f32 %v190_v32, 0.0  ;;  %316 = vst.msk [vmem:[%s1306_s2 + $0x100] sm:$0xff] %vm283_vm0, %v251_v56  ;;  %v1365_v63 = vsub.f32 %v645_v58, %v430_v19  ;;  %v1384_v26 = vld [vmem:[#allocation7_spill] sm:$0xff]  ;;  %v77_v33 = vld [vmem:[%s1304_s0 + $0x1e0] sm:$0xff] }
  0x32   :  { %v194_v31 = vmul.f32 %v769_v49, %v1364_v30  ;;  %v255_v34 = vmax.f32 %v191_v62, 0.0  ;;  %317 = vst.msk [vmem:[%s1306_s2 + $0x108] sm:$0xff] %vm283_vm0, %v252_v44  ;;  %318 = vst.msk [vmem:[%s1306_s2 + $0x110] sm:$0xff] %vm283_vm0, %v253_v9  ;;  %v1366_v21 = vsub.f32 %v650_v57, %v430_v19  ;;  %v1367_v35 = vsub.f32 %v655_v1, %v430_v19  ;;  %v79_v9 = vld [vmem:[%s1304_s0 + $0x1f0] sm:$0xff] }
  0x33   :  { %v256_v17 = vmax.f32 %v192_v4, 0.0  ;;  %v257_v20 = vmax.f32 %v193_v28, 0.0  ;;  %319 = vst.msk [vmem:[%s1306_s2 + $0x118] sm:$0xff] %vm283_vm0, %v254_v16  ;;  %v195_v29 = vmul.f32 %v769_v49, %v1365_v63  ;;  %v1368_v41 = vsub.f32 %v668_v52, %v430_v19  ;;  %v76_v4 = vld [vmem:[%s1304_s0 + $0x1d8] sm:$0xff]  ;;  %v78_v28 = vld [vmem:[%s1304_s0 + $0x1e8] sm:$0xff] }
  0x34   :  { %v258_v0 = vmax.f32 %v194_v31, 0.0  ;;  %v196_v36 = vmul.f32 %v769_v49, %v1366_v21  ;;  %v197_v40 = vmul.f32 %v769_v49, %v1367_v35  ;;  %320 = vst.msk [vmem:[%s1306_s2 + $0x120] sm:$0xff] %vm283_vm0, %v255_v34  ;;  %v1369_v52 = vsub.f32 %v673_v51, %v430_v19  ;;  %v80_v16 = vld [vmem:[%s1304_s0 + $0x1f8] sm:$0xff] }
  0x35   :  { %v198_v37 = vmul.f32 %v769_v49, %v1368_v41  ;;  %321 = vst.msk [vmem:[%s1306_s2 + $0x128] sm:$0xff] %vm283_vm0, %v256_v17  ;;  %322 = vst.msk [vmem:[%s1306_s2 + $0x130] sm:$0xff] %vm283_vm0, %v257_v20  ;;  %v1370_v58 = vsub.f32 %v678_v59, %v430_v19  ;;  %v1372_v18 = vsub.f32 %v1371_v2, %v430_v19  ;;  %v259_v42 = vmax.f32 %v195_v29, 0.0  ;;  %v1388_v63 = vld [vmem:[#allocation9_spill] sm:$0xff] }
  0x36   :  { %323 = vst.msk [vmem:[%s1306_s2 + $0x138] sm:$0xff] %vm283_vm0, %v258_v0  ;;  %v199_v57 = vmul.f32 %v769_v49, %v1369_v52  ;;  %v1373_v38 = vsub.f32 %v696_v45, %v430_v19  ;;  %v260_v46 = vmax.f32 %v196_v36, 0.0  ;;  %v261_v51 = vmax.f32 %v197_v40, 0.0  ;;  %v1374_v45 = vld [vmem:[#allocation3_spill] sm:$0xff] }
  0x37   :  { %v200_v1 = vmul.f32 %v769_v49, %v1370_v58  ;;  %v201_v7 = vmul.f32 %v769_v49, %v1372_v18  ;;  %v262_v47 = vmax.f32 %v198_v37, 0.0  ;;  %324 = vst.msk [vmem:[%s1306_s2 + $0x140] sm:$0xff] %vm283_vm0, %v259_v42  ;;  %v1375_v11 = vsub.f32 %v1374_v45, %v430_v19 }
  0x38   :  { %v202_v22 = vmul.f32 %v769_v49, %v1373_v38  ;;  %v263_v48 = vmax.f32 %v199_v57, 0.0  ;;  %325 = vst.msk [vmem:[%s1306_s2 + $0x148] sm:$0xff] %vm283_vm0, %v260_v46  ;;  %326 = vst.msk [vmem:[%s1306_s2 + $0x150] sm:$0xff] %vm283_vm0, %v261_v51  ;;  %v1377_v24 = vsub.f32 %v1376_v23, %v430_v19  ;;  %v1378_v25 = vsub.f32 %v719_v39, %v430_v19  ;;  %v1380_v39 = vld [vmem:[#allocation5_spill] sm:$0xff] }
  0x39   :  { %v264_v8 = vmax.f32 %v200_v1, 0.0  ;;  %v265_v43 = vmax.f32 %v201_v7, 0.0  ;;  %327 = vst.msk [vmem:[%s1306_s2 + $0x158] sm:$0xff] %vm283_vm0, %v262_v47  ;;  %v203_v5 = vmul.f32 %v769_v49, %v1375_v11  ;;  %v1379_v6 = vsub.f32 %v724_v50, %v430_v19 }
  0x3a   :  { %v266_v59 = vmax.f32 %v202_v22, 0.0  ;;  %v204_v53 = vmul.f32 %v769_v49, %v1377_v24  ;;  %v205_v12 = vmul.f32 %v769_v49, %v1378_v25  ;;  %328 = vst.msk [vmem:[%s1306_s2 + $0x160] sm:$0xff] %vm283_vm0, %v263_v48  ;;  %v1381_v50 = vsub.f32 %v1380_v39, %v430_v19 }
  0x3b   :  { %v206_v13 = vmul.f32 %v769_v49, %v1379_v6  ;;  %329 = vst.msk [vmem:[%s1306_s2 + $0x168] sm:$0xff] %vm283_vm0, %v264_v8  ;;  %330 = vst.msk [vmem:[%s1306_s2 + $0x170] sm:$0xff] %vm283_vm0, %v265_v43  ;;  %v1383_v10 = vsub.f32 %v1382_v14, %v430_v19  ;;  %v1385_v27 = vsub.f32 %v1384_v26, %v430_v19  ;;  %v267_v30 = vmax.f32 %v203_v5, 0.0 }
  0x3c   :  { %331 = vst.msk [vmem:[%s1306_s2 + $0x178] sm:$0xff] %vm283_vm0, %v266_v59  ;;  %v207_v60 = vmul.f32 %v769_v49, %v1381_v50  ;;  %v1387_v62 = vsub.f32 %v1386_v61, %v430_v19  ;;  %v268_v31 = vmax.f32 %v204_v53, 0.0  ;;  %v269_v56 = vmax.f32 %v205_v12, 0.0 }
  0x3d   :  { %v208_v15 = vmul.f32 %v769_v49, %v1383_v10  ;;  %v209_v32 = vmul.f32 %v769_v49, %v1385_v27  ;;  %v270_v44 = vmax.f32 %v206_v13, 0.0  ;;  %332 = vst.msk [vmem:[%s1306_s2 + $0x180] sm:$0xff] %vm283_vm0, %v267_v30  ;;  %v1389_v29 = vsub.f32 %v1388_v63, %v430_v19 }
  0x3e   :  { %v210_v3 = vmul.f32 %v769_v49, %v1387_v62  ;;  %v271_v34 = vmax.f32 %v207_v60, 0.0  ;;  %333 = vst.msk [vmem:[%s1306_s2 + $0x188] sm:$0xff] %vm283_vm0, %v268_v31  ;;  %334 = vst.msk [vmem:[%s1306_s2 + $0x190] sm:$0xff] %vm283_vm0, %v269_v56  ;;  %v142_v36 = vsub.f32 %v74_v54, %v430_v19  ;;  %v143_v35 = vsub.f32 %v75_v55, %v430_v19 }
  0x3f   :  { %v272_v17 = vmax.f32 %v208_v15, 0.0  ;;  %v273_v20 = vmax.f32 %v209_v32, 0.0  ;;  %335 = vst.msk [vmem:[%s1306_s2 + $0x198] sm:$0xff] %vm283_vm0, %v270_v44  ;;  %v211_v21 = vmul.f32 %v769_v49, %v1389_v29  ;;  %v144_v40 = vsub.f32 %v76_v4, %v430_v19 }
  0x40   :  { %v274_v0 = vmax.f32 %v210_v3, 0.0  ;;  %336 = vst.msk [vmem:[%s1306_s2 + $0x1a0] sm:$0xff] %vm283_vm0, %v271_v34  ;;  %v145_v41 = vsub.f32 %v77_v33, %v430_v19  ;;  %v146_v37 = vsub.f32 %v78_v28, %v430_v19  ;;  %v147_v52 = vsub.f32 %v79_v9, %v430_v19 }
  0x41   :  { %337 = vst.msk [vmem:[%s1306_s2 + $0x1a8] sm:$0xff] %vm283_vm0, %v272_v17  ;;  %338 = vst.msk [vmem:[%s1306_s2 + $0x1b0] sm:$0xff] %vm283_vm0, %v273_v20  ;;  %v148_v57 = vsub.f32 %v80_v16, %v430_v19  ;;  %v275_v58 = vmax.f32 %v211_v21, 0.0  ;;  %v212_v1 = vmul.f32 %v769_v49, %v142_v36  ;;  %v213_v2 = vmul.f32 %v769_v49, %v143_v35 }
  0x42   :  { %339 = vst.msk [vmem:[%s1306_s2 + $0x1b8] sm:$0xff] %vm283_vm0, %v274_v0  ;;  %v214_v18 = vmul.f32 %v769_v49, %v144_v40  ;;  %v215_v7 = vmul.f32 %v769_v49, %v145_v41  ;;  %v216_v38 = vmul.f32 %v769_v49, %v146_v37  ;;  %v217_v22 = vmul.f32 %v769_v49, %v147_v52 }
  0x43   :  { %v218_v42 = vmul.f32 %v769_v49, %v148_v57  ;;  %340 = vst.msk [vmem:[%s1306_s2 + $0x1c0] sm:$0xff] %vm283_vm0, %v275_v58  ;;  %v276_v19 = vmax.f32 %v212_v1, 0.0  ;;  %v277_v46 = vmax.f32 %v213_v2, 0.0 }
  0x44   :  { %v278_v51 = vmax.f32 %v214_v18, 0.0  ;;  %v279_v47 = vmax.f32 %v215_v7, 0.0  ;;  %v280_v48 = vmax.f32 %v216_v38, 0.0  ;;  %v281_v8 = vmax.f32 %v217_v22, 0.0 }
  0x45   :  { %v282_v43 = vmax.f32 %v218_v42, 0.0  ;;  %341 = vst.msk [vmem:[%s1306_s2 + $0x1c8] sm:$0xff] %vm283_vm0, %v276_v19  ;;  %342 = vst.msk [vmem:[%s1306_s2 + $0x1d0] sm:$0xff] %vm283_vm0, %v277_v46 }
  0x46   :  { %343 = vst.msk [vmem:[%s1306_s2 + $0x1d8] sm:$0xff] %vm283_vm0, %v278_v51  ;;  %344 = vst.msk [vmem:[%s1306_s2 + $0x1e0] sm:$0xff] %vm283_vm0, %v279_v47 }
  0x47   :  { %345 = vst.msk [vmem:[%s1306_s2 + $0x1e8] sm:$0xff] %vm283_vm0, %v280_v48  ;;  %346 = vst.msk [vmem:[%s1306_s2 + $0x1f0] sm:$0xff] %vm283_vm0, %v281_v8 }
  0x48   :  { %347 = vst.msk [vmem:[%s1306_s2 + $0x1f8] sm:$0xff] %vm283_vm0, %v282_v43 }

// kernel: simple_block2d_forward.26
= control target key start
LH: loop header
LB: loop body
LE: loop exit
PB: predicated region body
PF: predicated region fallthrough
CT: control target
= control target key end

     0   :  { %v81_v0 = vlaneseq  ;;  %vm219_vm0 = vcmask 261120   ;;  %s1240_s0 = inlined_call_operand.vmem [shape: f32[512,32], index: 0, kind: input, shape index: {}]   ;;  %s1241_s1 = inlined_call_operand.vmem [shape: f32[2,32], index: 1, kind: input, shape index: {}]   ;;  %s1242_s2 = inlined_call_operand.vmem [shape: f32[512,32], index: 2, kind: output, shape index: {}]  }
   0x1   :  { %v11_v1 = vld [vmem:[%s1241_s1] sm:$0x1]  ;;  %v13_v2 = vld [vmem:[%s1241_s1 + $0x1] sm:$0x1]  ;;  %v321_v7 = vld [vmem:[%s1240_s0 + $0x8] sm:$0xff] }
   0x2   :  { %v12_v3 = vmul.f32 0.001953125, %v11_v1  ;;  %v14_v4 = vmul.f32 0.001953125, %v13_v2  ;;  %v311_v5 = vshrl.u32 %v81_v0, 7  ;;  %v316_v6 = vld [vmem:[%s1240_s0] sm:$0xff]  ;;  %v326_v8 = vld [vmem:[%s1240_s0 + $0x10] sm:$0xff]  ;;  %v332_v11 = vld [vmem:[%s1240_s0 + $0x18] sm:$0xff] }
   0x3   :  { %v337_v12 = vld [vmem:[%s1240_s0 + $0x20] sm:$0xff]  ;;  %v342_v13 = vld [vmem:[%s1240_s0 + $0x28] sm:$0xff]  ;;  %v347_v14 = vld [vmem:[%s1240_s0 + $0x30] sm:$0xff] }
   0x4   :  { %v15_v9 = vmul.f32 %v12_v3, %v12_v3  ;;  %v1243_v10 = vsub.s32 0, %v311_v5  ;;  %v352_v15 = vld [vmem:[%s1240_s0 + $0x38] sm:$0xff]  ;;  %v357_v16 = vld [vmem:[%s1240_s0 + $0x40] sm:$0xff]  ;;  %v362_v17 = vld [vmem:[%s1240_s0 + $0x48] sm:$0xff] }
   0x5   :  { %v371_v20 = vld [vmem:[%s1240_s0 + $0x50] sm:$0xff]  ;;  %v376_v21 = vld [vmem:[%s1240_s0 + $0x58] sm:$0xff]  ;;  %v381_v22 = vld [vmem:[%s1240_s0 + $0x60] sm:$0xff] }
   0x6   :  { %v16_v18 = vsub.f32 %v14_v4, %v15_v9  ;;  %v366_v19 = vrot.slane %v12_v3, %v1243_v10  ;;  %v386_v23 = vld [vmem:[%s1240_s0 + $0x68] sm:$0xff]  ;;  %v391_v24 = vld [vmem:[%s1240_s0 + $0x70] sm:$0xff]  ;;  %v396_v25 = vld [vmem:[%s1240_s0 + $0x78] sm:$0xff] }
   0x7   :  { %v401_v26 = vld [vmem:[%s1240_s0 + $0x80] sm:$0xff]  ;;  %v406_v27 = vld [vmem:[%s1240_s0 + $0x88] sm:$0xff]  ;;  %v417_v32 = vld [vmem:[%s1240_s0 + $0x90] sm:$0xff] }
   0x8   :  { %v149_v29 = vadd.f32 1e-05, %v16_v18  ;;  %v422_v33 = vld [vmem:[%s1240_s0 + $0x98] sm:$0xff]  ;;  %v427_v34 = vld [vmem:[%s1240_s0 + $0xa0] sm:$0xff]  ;;  %v432_v35 = vld [vmem:[%s1240_s0 + $0xa8] sm:$0xff]  ;;  %v1250_v18 = vsub.s32 0, %v311_v5  ;;  %v1252_v38 = vsub.f32 %v321_v7, %v366_v19  ;;  %v1254_v5 = vsub.f32 %v332_v11, %v366_v19 }
   0x9   :  { %v445_v40 = vld [vmem:[%s1240_s0 + $0xb0] sm:$0xff]  ;;  %v450_v41 = vld [vmem:[%s1240_s0 + $0xb8] sm:$0xff]  ;;  %v455_v42 = vld [vmem:[%s1240_s0 + $0xc0] sm:$0xff]  ;;  %v1256_v7 = vsub.f32 %v342_v13, %v366_v19  ;;  %v1258_v11 = vsub.f32 %v352_v15, %v366_v19 }
   0xa   :  { %288 = vrsqrt.f32 %v149_v29  ;;  %v466_v46 = vld [vmem:[%s1240_s0 + $0xc8] sm:$0xff]  ;;  %v471_v47 = vld [vmem:[%s1240_s0 + $0xd0] sm:$0xff]  ;;  %v476_v48 = vld [vmem:[%s1240_s0 + $0xd8] sm:$0xff] }
   0xb   :  { %v489_v53 = vld [vmem:[%s1240_s0 + $0xe0] sm:$0xff]  ;;  %v494_v54 = vld [vmem:[%s1240_s0 + $0xe8] sm:$0xff]  ;;  %v499_v55 = vld [vmem:[%s1240_s0 + $0xf0] sm:$0xff] }
   0xc   :  { %v512_v60 = vld [vmem:[%s1240_s0 + $0xf8] sm:$0xff]  ;;  %v517_v61 = vld [vmem:[%s1240_s0 + $0x100] sm:$0xff]  ;;  %v522_v62 = vld [vmem:[%s1240_s0 + $0x108] sm:$0xff] }
   0xd   :  { %v535_v3 = vld [vmem:[%s1240_s0 + $0x110] sm:$0xff]  ;;  %v540_v4 = vld [vmem:[%s1240_s0 + $0x118] sm:$0xff]  ;;  %v545_v9 = vld [vmem:[%s1240_s0 + $0x120] sm:$0xff] }
   0xe   :  { %v558_v0 = vld [vmem:[%s1240_s0 + $0x128] sm:$0xff]  ;;  %v563_v63 = vld [vmem:[%s1240_s0 + $0x130] sm:$0xff]  ;;  %v568_v29 = vld [vmem:[%s1240_s0 + $0x138] sm:$0xff] }
   0xf   :  { %v581_v58 = vld [vmem:[%s1240_s0 + $0x140] sm:$0xff]  ;;  %v586_v57 = vld [vmem:[%s1240_s0 + $0x148] sm:$0xff]  ;;  %v591_v1 = vld [vmem:[%s1240_s0 + $0x150] sm:$0xff] }
  0x10   :  { %v604_v52 = vld [vmem:[%s1240_s0 + $0x158] sm:$0xff]  ;;  %v609_v51 = vld [vmem:[%s1240_s0 + $0x160] sm:$0xff]  ;;  %v614_v59 = vld [vmem:[%s1240_s0 + $0x168] sm:$0xff] }
  0x11   :  { %v627_v49 = vld [vmem:[%s1240_s0 + $0x170] sm:$0xff]  ;;  %v632_v45 = vld [vmem:[%s1240_s0 + $0x178] sm:$0xff]  ;;  %v637_v56 = vld [vmem:[%s1240_s0 + $0x180] sm:$0xff] }
  0x12   :  { %1247 = vst [vmem:[#allocation2_spill] sm:$0xff] %v627_v49  ;;  %1248 = vst [vmem:[#allocation3_spill] sm:$0xff] %v637_v56  ;;  %v650_v43 = vld [vmem:[%s1240_s0 + $0x188] sm:$0xff]  ;;  %v655_v39 = vld [vmem:[%s1240_s0 + $0x190] sm:$0xff] }
  0x13   :  { %1249 = vst [vmem:[#allocation4_spill] sm:$0xff] %v650_v43  ;;  %v660_v50 = vld [vmem:[%s1240_s0 + $0x198] sm:$0xff]  ;;  %v673_v37 = vld [vmem:[%s1240_s0 + $0x1a0] sm:$0xff]  ;;  %v678_v36 = vld [vmem:[%s1240_s0 + $0x1a8] sm:$0xff]  ;;  %v1253_v43 = vsub.f32 %v326_v8, %v366_v19  ;;  %v1257_v8 = vsub.f32 %v347_v14, %v366_v19  ;;  %v1260_v14 = vsub.f32 %v362_v17, %v366_v19 }
  0x14   :  { %v683_v44 = vld [vmem:[%s1240_s0 + $0x1b0] sm:$0xff]  ;;  %v289_v2 = vpop.eup %288  ;;  %v696_v28 = vld [vmem:[%s1240_s0 + $0x1b8] sm:$0xff]  ;;  %v701_v10 = vld [vmem:[%s1240_s0 + $0x1c0] sm:$0xff] }
  0x15   :  { %v705_v49 = vrot.slane %v289_v2, %v1250_v18  ;;  %v1251_v18 = vsub.f32 %v316_v6, %v366_v19  ;;  %v1255_v6 = vsub.f32 %v337_v12, %v366_v19  ;;  %v1259_v12 = vsub.f32 %v357_v16, %v366_v19 }
  0x16   :  { %v1263_v16 = vsub.f32 %v381_v22, %v366_v19  ;;  %v1267_v22 = vsub.f32 %v401_v26, %v366_v19  ;;  %v1271_v26 = vsub.f32 %v427_v34, %v366_v19  ;;  %v1275_v34 = vsub.f32 %v455_v42, %v366_v19 }
  0x17   :  { %v155_v30 = vmul.f32 %v705_v49, %v1251_v18  ;;  %v156_v31 = vmul.f32 %v705_v49, %v1252_v38  ;;  %v157_v56 = vmul.f32 %v705_v49, %v1253_v43  ;;  %v158_v2 = vmul.f32 %v705_v49, %v1254_v5 }
  0x18   :  { %v159_v18 = vmul.f32 %v705_v49, %v1255_v6  ;;  %v160_v38 = vmul.f32 %v705_v49, %v1256_v7  ;;  %v161_v43 = vmul.f32 %v705_v49, %v1257_v8  ;;  %v162_v5 = vmul.f32 %v705_v49, %v1258_v11 }
  0x19   :  { %220 = vst.msk [vmem:[%s1242_s2] sm:$0xff] %vm219_vm0, %v155_v30  ;;  %221 = vst.msk [vmem:[%s1242_s2 + $0x8] sm:$0xff] %vm219_vm0, %v156_v31  ;;  %v163_v13 = vmul.f32 %v705_v49, %v1259_v12  ;;  %v164_v15 = vmul.f32 %v705_v49, %v1260_v14  ;;  %v1261_v30 = vsub.f32 %v371_v20, %v366_v19 }
  0x1a   :  { %222 = vst.msk [vmem:[%s1242_s2 + $0x10] sm:$0xff] %vm219_vm0, %v157_v56  ;;  %223 = vst.msk [vmem:[%s1242_s2 + $0x18] sm:$0xff] %vm219_vm0, %v158_v2  ;;  %v1262_v56 = vsub.f32 %v376_v21, %v366_v19  ;;  %v167_v17 = vmul.f32 %v705_v49, %v1263_v16  ;;  %v1264_v20 = vsub.f32 %v386_v23, %v366_v19 }
  0x1b   :  { %v165_v31 = vmul.f32 %v705_v49, %v1261_v30  ;;  %224 = vst.msk [vmem:[%s1242_s2 + $0x20] sm:$0xff] %vm219_vm0, %v159_v18  ;;  %225 = vst.msk [vmem:[%s1242_s2 + $0x28] sm:$0xff] %vm219_vm0, %v160_v38  ;;  %v1265_v6 = vsub.f32 %v391_v24, %v366_v19  ;;  %v1266_v7 = vsub.f32 %v396_v25, %v366_v19 }
  0x1c   :  { %v166_v2 = vmul.f32 %v705_v49, %v1262_v56  ;;  %226 = vst.msk [vmem:[%s1242_s2 + $0x30] sm:$0xff] %vm219_vm0, %v161_v43  ;;  %227 = vst.msk [vmem:[%s1242_s2 + $0x38] sm:$0xff] %vm219_vm0, %v162_v5  ;;  %v168_v21 = vmul.f32 %v705_v49, %v1264_v20  ;;  %v171_v23 = vmul.f32 %v705_v49, %v1267_v22 }
  0x1d   :  { %v169_v18 = vmul.f32 %v705_v49, %v1265_v6  ;;  %v170_v38 = vmul.f32 %v705_v49, %v1266_v7  ;;  %228 = vst.msk [vmem:[%s1242_s2 + $0x40] sm:$0xff] %vm219_vm0, %v163_v13  ;;  %229 = vst.msk [vmem:[%s1242_s2 + $0x48] sm:$0xff] %vm219_vm0, %v164_v15  ;;  %v1268_v24 = vsub.f32 %v406_v27, %v366_v19 }
  0x1e   :  { %230 = vst.msk [vmem:[%s1242_s2 + $0x50] sm:$0xff] %vm219_vm0, %v165_v31  ;;  %231 = vst.msk [vmem:[%s1242_s2 + $0x58] sm:$0xff] %vm219_vm0, %v166_v2  ;;  %v1269_v8 = vsub.f32 %v417_v32, %v366_v19  ;;  %v1270_v11 = vsub.f32 %v422_v33, %v366_v19  ;;  %v175_v27 = vmul.f32 %v705_v49, %v1271_v26 }
  0x1f   :  { %v172_v25 = vmul.f32 %v705_v49, %v1268_v24  ;;  %232 = vst.msk [vmem:[%s1242_s2 + $0x60] sm:$0xff] %vm219_vm0, %v167_v17  ;;  %233 = vst.msk [vmem:[%s1242_s2 + $0x68] sm:$0xff] %vm219_vm0, %v168_v21  ;;  %v1272_v32 = vsub.f32 %v432_v35, %v366_v19  ;;  %v1273_v12 = vsub.f32 %v445_v40, %v366_v19 }
  0x20   :  { %v173_v43 = vmul.f32 %v705_v49, %v1269_v8  ;;  %v174_v5 = vmul.f32 %v705_v49, %v1270_v11  ;;  %234 = vst.msk [vmem:[%s1242_s2 + $0x70] sm:$0xff] %vm219_vm0, %v169_v18  ;;  %235 = vst.msk [vmem:[%s1242_s2 + $0x78] sm:$0xff] %vm219_vm0, %v170_v38  ;;  %v1274_v14 = vsub.f32 %v450_v41, %v366_v19 }
  0x21   :  { %v176_v33 = vmul.f32 %v705_v49, %v1272_v32  ;;  %v177_v13 = vmul.f32 %v705_v49, %v1273_v12  ;;  %236 = vst.msk [vmem:[%s1242_s2 + $0x80] sm:$0xff] %vm219_vm0, %v171_v23  ;;  %237 = vst.msk [vmem:[%s1242_s2 + $0x88] sm:$0xff] %vm219_vm0, %v172_v25  ;;  %v179_v35 = vmul.f32 %v705_v49, %v1275_v34 }
  0x22   :  { %v178_v15 = vmul.f32 %v705_v49, %v1274_v14  ;;  %238 = vst.msk [vmem:[%s1242_s2 + $0x90] sm:$0xff] %vm219_vm0, %v173_v43  ;;  %239 = vst.msk [vmem:[%s1242_s2 + $0x98] sm:$0xff] %vm219_vm0, %v174_v5  ;;  %v1276_v40 = vsub.f32 %v466_v46, %v366_v19  ;;  %v1277_v30 = vsub.f32 %v471_v47, %v366_v19  ;;  %v77_v14 = vld [vmem:[%s1240_s0 + $0x1e0] sm:$0xff] }
  0x23   :  { %v1278_v56 = vsub.f32 %v476_v48, %v366_v19  ;;  %240 = vst.msk [vmem:[%s1242_s2 + $0xa0] sm:$0xff] %vm219_vm0, %v175_v27  ;;  %241 = vst.msk [vmem:[%s1242_s2 + $0xa8] sm:$0xff] %vm219_vm0, %v176_v33  ;;  %v1279_v42 = vsub.f32 %v489_v53, %v366_v19  ;;  %v1280_v47 = vsub.f32 %v494_v54, %v366_v19  ;;  %v1297_v27 = vld [vmem:[#allocation2_spill] sm:$0xff] }
  0x24   :  { %v180_v41 = vmul.f32 %v705_v49, %v1276_v40  ;;  %v181_v31 = vmul.f32 %v705_v49, %v1277_v30  ;;  %242 = vst.msk [vmem:[%s1242_s2 + $0xb0] sm:$0xff] %vm219_vm0, %v177_v13  ;;  %243 = vst.msk [vmem:[%s1242_s2 + $0xb8] sm:$0xff] %vm219_vm0, %v178_v15  ;;  %v1281_v16 = vsub.f32 %v499_v55, %v366_v19 }
  0x25   :  { %v182_v2 = vmul.f32 %v705_v49, %v1278_v56  ;;  %v183_v46 = vmul.f32 %v705_v49, %v1279_v42  ;;  %v184_v48 = vmul.f32 %v705_v49, %v1280_v47  ;;  %v1282_v20 = vsub.f32 %v512_v60, %v366_v19  ;;  %244 = vst.msk [vmem:[%s1242_s2 + $0xc0] sm:$0xff] %vm219_vm0, %v179_v35  ;;  %v1302_v35 = vld [vmem:[#allocation4_spill] sm:$0xff]  ;;  %v78_v42 = vld [vmem:[%s1240_s0 + $0x1e8] sm:$0xff]  ;;  %v80_v47 = vld [vmem:[%s1240_s0 + $0x1f8] sm:$0xff] }
  0x26   :  { %v185_v17 = vmul.f32 %v705_v49, %v1281_v16  ;;  %245 = vst.msk [vmem:[%s1242_s2 + $0xc8] sm:$0xff] %vm219_vm0, %v180_v41  ;;  %246 = vst.msk [vmem:[%s1242_s2 + $0xd0] sm:$0xff] %vm219_vm0, %v181_v31  ;;  %v1283_v53 = vsub.f32 %v517_v61, %v366_v19  ;;  %v1284_v55 = vsub.f32 %v522_v62, %v366_v19 }
  0x27   :  { %v186_v21 = vmul.f32 %v705_v49, %v1282_v20  ;;  %247 = vst.msk [vmem:[%s1242_s2 + $0xd8] sm:$0xff] %vm219_vm0, %v182_v2  ;;  %v1285_v6 = vsub.f32 %v535_v3, %v366_v19  ;;  %v1286_v7 = vsub.f32 %v540_v4, %v366_v19  ;;  %248 = vst.msk [vmem:[%s1242_s2 + $0xe0] sm:$0xff] %vm219_vm0, %v183_v46  ;;  %v79_v46 = vld [vmem:[%s1240_s0 + $0x1f0] sm:$0xff] }
  0x28   :  { %v187_v54 = vmul.f32 %v705_v49, %v1283_v53  ;;  %v188_v60 = vmul.f32 %v705_v49, %v1284_v55  ;;  %249 = vst.msk [vmem:[%s1242_s2 + $0xe8] sm:$0xff] %vm219_vm0, %v184_v48  ;;  %250 = vst.msk [vmem:[%s1242_s2 + $0xf0] sm:$0xff] %vm219_vm0, %v185_v17  ;;  %v1287_v61 = vsub.f32 %v545_v9, %v366_v19 }
  0x29   :  { %v189_v18 = vmul.f32 %v705_v49, %v1285_v6  ;;  %v190_v38 = vmul.f32 %v705_v49, %v1286_v7  ;;  %251 = vst.msk [vmem:[%s1242_s2 + $0xf8] sm:$0xff] %vm219_vm0, %v186_v21  ;;  %v1288_v3 = vsub.f32 %v558_v0, %v366_v19  ;;  %v1289_v22 = vsub.f32 %v563_v63, %v366_v19 }
  0x2a   :  { %v191_v62 = vmul.f32 %v705_v49, %v1287_v61  ;;  %v1290_v24 = vsub.f32 %v568_v29, %v366_v19  ;;  %252 = vst.msk [vmem:[%s1242_s2 + $0x100] sm:$0xff] %vm219_vm0, %v187_v54  ;;  %253 = vst.msk [vmem:[%s1242_s2 + $0x108] sm:$0xff] %vm219_vm0, %v188_v60  ;;  %v1291_v63 = vsub.f32 %v581_v58, %v366_v19  ;;  %v74_v58 = vld [vmem:[%s1240_s0 + $0x1c8] sm:$0xff] }
  0x2b   :  { %v192_v4 = vmul.f32 %v705_v49, %v1288_v3  ;;  %v193_v23 = vmul.f32 %v705_v49, %v1289_v22  ;;  %254 = vst.msk [vmem:[%s1242_s2 + $0x110] sm:$0xff] %vm219_vm0, %v189_v18  ;;  %255 = vst.msk [vmem:[%s1242_s2 + $0x118] sm:$0xff] %vm219_vm0, %v190_v38  ;;  %v1292_v9 = vsub.f32 %v586_v57, %v366_v19 }
  0x2c   :  { %v194_v25 = vmul.f32 %v705_v49, %v1290_v24  ;;  %v195_v0 = vmul.f32 %v705_v49, %v1291_v63  ;;  %v1293_v8 = vsub.f32 %v591_v1, %v366_v19  ;;  %v1294_v11 = vsub.f32 %v604_v52, %v366_v19  ;;  %256 = vst.msk [vmem:[%s1242_s2 + $0x120] sm:$0xff] %vm219_vm0, %v191_v62 }
  0x2d   :  { %v196_v29 = vmul.f32 %v705_v49, %v1292_v9  ;;  %257 = vst.msk [vmem:[%s1242_s2 + $0x128] sm:$0xff] %vm219_vm0, %v192_v4  ;;  %258 = vst.msk [vmem:[%s1242_s2 + $0x130] sm:$0xff] %vm219_vm0, %v193_v23  ;;  %v1295_v52 = vsub.f32 %v609_v51, %v366_v19  ;;  %v1296_v1 = vsub.f32 %v614_v59, %v366_v19  ;;  %v75_v51 = vld [vmem:[%s1240_s0 + $0x1d0] sm:$0xff]  ;;  %v76_v59 = vld [vmem:[%s1240_s0 + $0x1d8] sm:$0xff] }
  0x2e   :  { %v197_v43 = vmul.f32 %v705_v49, %v1293_v8  ;;  %v198_v5 = vmul.f32 %v705_v49, %v1294_v11  ;;  %259 = vst.msk [vmem:[%s1242_s2 + $0x138] sm:$0xff] %vm219_vm0, %v194_v25  ;;  %v1298_v32 = vsub.f32 %v1297_v27, %v366_v19  ;;  %v1299_v12 = vsub.f32 %v632_v45, %v366_v19  ;;  %v1300_v45 = vld [vmem:[#allocation3_spill] sm:$0xff] }
  0x2f   :  { %v199_v57 = vmul.f32 %v705_v49, %v1295_v52  ;;  %v200_v26 = vmul.f32 %v705_v49, %v1296_v1  ;;  %260 = vst.msk [vmem:[%s1242_s2 + $0x140] sm:$0xff] %vm219_vm0, %v195_v0  ;;  %261 = vst.msk [vmem:[%s1242_s2 + $0x148] sm:$0xff] %vm219_vm0, %v196_v29  ;;  %v1301_v15 = vsub.f32 %v1300_v45, %v366_v19 }
  0x30   :  { %v201_v33 = vmul.f32 %v705_v49, %v1298_v32  ;;  %v202_v13 = vmul.f32 %v705_v49, %v1299_v12  ;;  %262 = vst.msk [vmem:[%s1242_s2 + $0x150] sm:$0xff] %vm219_vm0, %v197_v43  ;;  %263 = vst.msk [vmem:[%s1242_s2 + $0x158] sm:$0xff] %vm219_vm0, %v198_v5  ;;  %v1303_v40 = vsub.f32 %v1302_v35, %v366_v19 }
  0x31   :  { %v203_v34 = vmul.f32 %v705_v49, %v1301_v15  ;;  %v1304_v30 = vsub.f32 %v655_v39, %v366_v19  ;;  %v1305_v56 = vsub.f32 %v660_v50, %v366_v19  ;;  %264 = vst.msk [vmem:[%s1242_s2 + $0x160] sm:$0xff] %vm219_vm0, %v199_v57  ;;  %265 = vst.msk [vmem:[%s1242_s2 + $0x168] sm:$0xff] %vm219_vm0, %v200_v26 }
  0x32   :  { %v204_v41 = vmul.f32 %v705_v49, %v1303_v40  ;;  %266 = vst.msk [vmem:[%s1242_s2 + $0x170] sm:$0xff] %vm219_vm0, %v201_v33  ;;  %267 = vst.msk [vmem:[%s1242_s2 + $0x178] sm:$0xff] %vm219_vm0, %v202_v13  ;;  %v1306_v39 = vsub.f32 %v673_v37, %v366_v19  ;;  %v1307_v48 = vsub.f32 %v678_v36, %v366_v19 }
  0x33   :  { %v205_v31 = vmul.f32 %v705_v49, %v1304_v30  ;;  %v206_v2 = vmul.f32 %v705_v49, %v1305_v56  ;;  %v1308_v17 = vsub.f32 %v683_v44, %v366_v19  ;;  %v1309_v21 = vsub.f32 %v696_v28, %v366_v19  ;;  %268 = vst.msk [vmem:[%s1242_s2 + $0x180] sm:$0xff] %vm219_vm0, %v203_v34 }
  0x34   :  { %v207_v50 = vmul.f32 %v705_v49, %v1306_v39  ;;  %v208_v16 = vmul.f32 %v705_v49, %v1307_v48  ;;  %269 = vst.msk [vmem:[%s1242_s2 + $0x188] sm:$0xff] %vm219_vm0, %v204_v41  ;;  %v1310_v28 = vsub.f32 %v701_v10, %v366_v19  ;;  %v142_v37 = vsub.f32 %v74_v58, %v366_v19 }
  0x35   :  { %v209_v20 = vmul.f32 %v705_v49, %v1308_v17  ;;  %v210_v53 = vmul.f32 %v705_v49, %v1309_v21  ;;  %270 = vst.msk [vmem:[%s1242_s2 + $0x190] sm:$0xff] %vm219_vm0, %v205_v31  ;;  %271 = vst.msk [vmem:[%s1242_s2 + $0x198] sm:$0xff] %vm219_vm0, %v206_v2  ;;  %v143_v44 = vsub.f32 %v75_v51, %v366_v19 }
  0x36   :  { %v211_v36 = vmul.f32 %v705_v49, %v1310_v28  ;;  %v144_v54 = vsub.f32 %v76_v59, %v366_v19  ;;  %272 = vst.msk [vmem:[%s1242_s2 + $0x1a0] sm:$0xff] %vm219_vm0, %v207_v50  ;;  %273 = vst.msk [vmem:[%s1242_s2 + $0x1a8] sm:$0xff] %vm219_vm0, %v208_v16  ;;  %v145_v10 = vsub.f32 %v77_v14, %v366_v19 }
  0x37   :  { %274 = vst.msk [vmem:[%s1242_s2 + $0x1b0] sm:$0xff] %vm219_vm0, %v209_v20  ;;  %275 = vst.msk [vmem:[%s1242_s2 + $0x1b8] sm:$0xff] %vm219_vm0, %v210_v53  ;;  %v146_v55 = vsub.f32 %v78_v42, %v366_v19  ;;  %v147_v60 = vsub.f32 %v79_v46, %v366_v19  ;;  %v148_v6 = vsub.f32 %v80_v47, %v366_v19 }
  0x38   :  { %276 = vst.msk [vmem:[%s1242_s2 + $0x1c0] sm:$0xff] %vm219_vm0, %v211_v36  ;;  %v212_v18 = vmul.f32 %v705_v49, %v142_v37  ;;  %v213_v7 = vmul.f32 %v705_v49, %v143_v44  ;;  %v214_v38 = vmul.f32 %v705_v49, %v144_v54  ;;  %v215_v61 = vmul.f32 %v705_v49, %v145_v10 }
  0x39   :  { %v216_v62 = vmul.f32 %v705_v49, %v146_v55  ;;  %v217_v3 = vmul.f32 %v705_v49, %v147_v60  ;;  %v218_v4 = vmul.f32 %v705_v49, %v148_v6 }
  0x3a   :  { %277 = vst.msk [vmem:[%s1242_s2 + $0x1c8] sm:$0xff] %vm219_vm0, %v212_v18  ;;  %278 = vst.msk [vmem:[%s1242_s2 + $0x1d0] sm:$0xff] %vm219_vm0, %v213_v7 }
  0x3b   :  { %279 = vst.msk [vmem:[%s1242_s2 + $0x1d8] sm:$0xff] %vm219_vm0, %v214_v38  ;;  %280 = vst.msk [vmem:[%s1242_s2 + $0x1e0] sm:$0xff] %vm219_vm0, %v215_v61 }
  0x3c   :  { %281 = vst.msk [vmem:[%s1242_s2 + $0x1e8] sm:$0xff] %vm219_vm0, %v216_v62  ;;  %282 = vst.msk [vmem:[%s1242_s2 + $0x1f0] sm:$0xff] %vm219_vm0, %v217_v3 }
  0x3d   :  { %283 = vst.msk [vmem:[%s1242_s2 + $0x1f8] sm:$0xff] %vm219_vm0, %v218_v4 }

// kernel: simple_block2d_forward.15
= control target key start
LH: loop header
LB: loop body
LE: loop exit
PB: predicated region body
PF: predicated region fallthrough
CT: control target
= control target key end

     0   :  { %s4310_s15 = smov 0   ;;  %s6763_s0 = inlined_call_operand.vmem [shape: f32[2,256,32], index: 0, kind: input, shape index: {}]   ;;  %s6764_s1 = inlined_call_operand.vmem [shape: f32[64,256], index: 1, kind: input, shape index: {}]   ;;  %s6765_s2 = inlined_call_operand.vmem [shape: f32[32,64,64], index: 2, kind: input, shape index: {}]   ;;  %s6766_s3 = inlined_call_operand.vmem [shape: f32[256,64], index: 3, kind: input, shape index: {}]   ;;  %s6767_s4 = inlined_call_operand.vmem [shape: f32[2,256,32], index: 4, kind: output, shape index: {}]  }
   0x1 LB: > { %s4004_s16 = sadd.s32 4294967295, %s4281_s15   ;;  %p4008_p0 = scmp.ge.s32.totalorder %s4281_s15, 1  ;;  %s4281_s15 = sphi %s4310_s15, %s14_s15  }
   0x2   : > { %p162_p1 = scmp.lt.s32.totalorder %s4281_s15, 3 }
   0x4   : > { %p163_p2 = pnand %p4008_p0, %p162_p1 }
   0x5   : > { %p188_p3 = scmp.lt.s32.totalorder (!%p163_p2), %s4004_s16, 1  ;;  %v231_v0 = vld [vmem:[%s6764_s1 + $0x8] sm:$0xff] (!%p163_p2)  ;;  %v230_v49 = vld [vmem:[%s6764_s1] sm:$0xff] (!%p163_p2)  ;;  %v233_v50 = vld [vmem:[%s6764_s1 + $0x18] sm:$0xff] (!%p163_p2)  ;;  %s4283_s30 = smov (!%p163_p2), 32   ;;  %vm367_vm0 = vcmask (!%p163_p2), 261120  }
   0x6   : > { %166 = sbr.rel (%p163_p2) target bundleno = 1347 (0x543), region = 36  ;;  %310 = vmatprep.mubr.f32.mxu0 (!%p163_p2), %v231_v0  ;;  %v232_v51 = vld [vmem:[%s6764_s1 + $0x10] sm:$0xff] (!%p163_p2)  ;;  %v235_v52 = vld [vmem:[%s6764_s1 + $0x28] sm:$0xff] (!%p163_p2)  ;;  %v234_v53 = vld [vmem:[%s6764_s1 + $0x20] sm:$0xff] (!%p163_p2)  ;;  %v380_v0 = vlaneseq (!%p163_p2)  ;;  %vm1244_vm1 = vcmask (!%p163_p2), 523264   ;;  %vm2152_vm2 = vcmask (!%p163_p2), 130112  }
   0x7   : > { %v237_v54 = vld [vmem:[%s6764_s1 + $0x38] sm:$0xff] (!%p163_p2)  ;;  %v236_v55 = vld [vmem:[%s6764_s1 + $0x30] sm:$0xff] (!%p163_p2)  ;;  %v239_v56 = vld [vmem:[%s6764_s1 + $0x48] sm:$0xff] (!%p163_p2)  ;;  %vm2159_vm3 = vcmask (!%p163_p2), 195712   ;;  %vm2166_vm4 = vcmask (!%p163_p2), 261312   ;;  %vm2757_vm5 = vcmask (!%p163_p2), 1041409  }
   0x8   : > { %v238_v57 = vld [vmem:[%s6764_s1 + $0x40] sm:$0xff] (!%p163_p2)  ;;  %v241_v58 = vld [vmem:[%s6764_s1 + $0x58] sm:$0xff] (!%p163_p2)  ;;  %v240_v59 = vld [vmem:[%s6764_s1 + $0x50] sm:$0xff] (!%p163_p2)  ;;  %vm2759_vm6 = vcmask (!%p163_p2), 1042434   ;;  %vm2761_vm7 = vcmask (!%p163_p2), 1043459   ;;  %vm2763_vm8 = vcmask (!%p163_p2), 1044484  }
   0x9   : > { %v243_v60 = vld [vmem:[%s6764_s1 + $0x68] sm:$0xff] (!%p163_p2)  ;;  %v242_v61 = vld [vmem:[%s6764_s1 + $0x60] sm:$0xff] (!%p163_p2)  ;;  %v245_v62 = vld [vmem:[%s6764_s1 + $0x78] sm:$0xff] (!%p163_p2)  ;;  %vm2765_vm9 = vcmask (!%p163_p2), 1045509   ;;  %vm2767_vm10 = vcmask (!%p163_p2), 1046534   ;;  %vm2769_vm11 = vcmask (!%p163_p2), 1047559  }
   0xa   : > { %v244_v63 = vld [vmem:[%s6764_s1 + $0x70] sm:$0xff] (!%p163_p2) }
   0xd   : > { %s6769_s16 = smov (!%p188_p3, %s4004_s16), 1 }
   0xe   : > { %s4047_s19 = sshll.u32 %s6769_s16, 8 }
   0xf   : > { %s4329_s22 = scalar_lea.vmem %s6763_s0, %s4047_s19  ;;  %s6694_s8 = scalar_lea.vmem %s6767_s4, %s4047_s19 }
  0x10   : > { %v214_v1 = vld [vmem:[%s4329_s22 + $0x80] sm:$0xff]  ;;  %v215_v2 = vld [vmem:[%s4329_s22 + $0x88] sm:$0xff]  ;;  %v216_v6 = vld [vmem:[%s4329_s22 + $0x90] sm:$0xff] }
  0x11   : > { %v198_v3 = vld [vmem:[%s4329_s22] sm:$0xff]  ;;  %v4209_v4 = vpack.c.bf16 %v215_v2, %v214_v1  ;;  %v199_v5 = vld [vmem:[%s4329_s22 + $0x8] sm:$0xff]  ;;  %v217_v7 = vld [vmem:[%s4329_s22 + $0x98] sm:$0xff]  ;;  %v381_v1 = vshrl.u32 %v380_v0, 7  ;;  %v2142_v2 = vand.u32 127, %v380_v0 }
  0x12   : > { %v4211_v8 = vpack.c.bf16 %v199_v5, %v198_v3  ;;  %v4213_v9 = vpack.c.bf16 %v217_v7, %v216_v6  ;;  %v200_v10 = vld [vmem:[%s4329_s22 + $0x10] sm:$0xff]  ;;  %v201_v11 = vld [vmem:[%s4329_s22 + $0x18] sm:$0xff]  ;;  %v218_v12 = vld [vmem:[%s4329_s22 + $0xa0] sm:$0xff] }
  0x13   : > { %4210 = vmatprep.subr.bf16.mxu0 %v4209_v4  ;;  %v219_v13 = vld [vmem:[%s4329_s22 + $0xa8] sm:$0xff]  ;;  %v4215_v14 = vpack.c.bf16 %v201_v11, %v200_v10  ;;  %v202_v16 = vld [vmem:[%s4329_s22 + $0x20] sm:$0xff]  ;;  %v220_v18 = vld [vmem:[%s4329_s22 + $0xb0] sm:$0xff]  ;;  %v4408_v3 = vsub.s32 %v2142_v2, %v381_v1  ;;  %v2147_v4 = vadd.s32 4294967288, %v2142_v2  ;;  %v2154_v5 = vadd.s32 4294967280, %v2142_v2 }
  0x14   : > { %4212 = vmatpush3.bf16.msra.mxu0 %v4211_v8  ;;  %v4217_v15 = vpack.c.bf16 %v219_v13, %v218_v12  ;;  %v203_v17 = vld [vmem:[%s4329_s22 + $0x28] sm:$0xff]  ;;  %v221_v19 = vld [vmem:[%s4329_s22 + $0xb8] sm:$0xff]  ;;  %v204_v22 = vld [vmem:[%s4329_s22 + $0x30] sm:$0xff]  ;;  %v2161_v6 = vadd.s32 4294967272, %v2142_v2 }
  0x15   : > { %4214 = vmatprep.subr.bf16.mxu0 %v4213_v9  ;;  %v4219_v20 = vpack.c.bf16 %v203_v17, %v202_v16  ;;  %v4221_v21 = vpack.c.bf16 %v221_v19, %v220_v18  ;;  %v205_v23 = vld [vmem:[%s4329_s22 + $0x38] sm:$0xff]  ;;  %v222_v24 = vld [vmem:[%s4329_s22 + $0xc0] sm:$0xff]  ;;  %v223_v25 = vld [vmem:[%s4329_s22 + $0xc8] sm:$0xff]  ;;  %v4410_v7 = vsub.s32 %v2147_v4, %v381_v1  ;;  %v4412_v8 = vsub.s32 %v2154_v5, %v381_v1 }
  0x16   : > { %v4223_v26 = vpack.c.bf16 %v205_v23, %v204_v22  ;;  %v4225_v27 = vpack.c.bf16 %v223_v25, %v222_v24  ;;  %v206_v28 = vld [vmem:[%s4329_s22 + $0x40] sm:$0xff]  ;;  %v207_v29 = vld [vmem:[%s4329_s22 + $0x48] sm:$0xff]  ;;  %v224_v30 = vld [vmem:[%s4329_s22 + $0xd0] sm:$0xff]  ;;  %v4414_v9 = vsub.s32 %v2161_v6, %v381_v1 }
  0x17   : > { %v225_v31 = vld [vmem:[%s4329_s22 + $0xd8] sm:$0xff]  ;;  %v4227_v32 = vpack.c.bf16 %v207_v29, %v206_v28  ;;  %v208_v34 = vld [vmem:[%s4329_s22 + $0x50] sm:$0xff]  ;;  %v226_v36 = vld [vmem:[%s4329_s22 + $0xe0] sm:$0xff] }
  0x18   : > { %4216 = vmatpush3.bf16.msra.mxu0 %v4215_v14  ;;  %v4229_v33 = vpack.c.bf16 %v225_v31, %v224_v30  ;;  %v209_v35 = vld [vmem:[%s4329_s22 + $0x58] sm:$0xff]  ;;  %v227_v37 = vld [vmem:[%s4329_s22 + $0xe8] sm:$0xff]  ;;  %v210_v40 = vld [vmem:[%s4329_s22 + $0x60] sm:$0xff] }
  0x19   : > { %4218 = vmatprep.subr.bf16.mxu0 %v4217_v15  ;;  %v4231_v38 = vpack.c.bf16 %v209_v35, %v208_v34  ;;  %v4233_v39 = vpack.c.bf16 %v227_v37, %v226_v36  ;;  %v211_v41 = vld [vmem:[%s4329_s22 + $0x68] sm:$0xff]  ;;  %v228_v42 = vld [vmem:[%s4329_s22 + $0xf0] sm:$0xff]  ;;  %v229_v43 = vld [vmem:[%s4329_s22 + $0xf8] sm:$0xff]  ;;  %v4284_v34 = vmov 1966171168  }
  0x1a   : > { %v4235_v44 = vpack.c.bf16 %v211_v41, %v210_v40  ;;  %v4237_v45 = vpack.c.bf16 %v229_v43, %v228_v42  ;;  %v212_v46 = vld [vmem:[%s4329_s22 + $0x70] sm:$0xff]  ;;  %v213_v47 = vld [vmem:[%s4329_s22 + $0x78] sm:$0xff]  ;;  %v378_v35 = vunpack.c.l.s4 %v4284_v34  ;;  %v4422_v42 = vsub.s32 0, %v381_v1 }
  0x1b   : > { %v4239_v48 = vpack.c.bf16 %v213_v47, %v212_v46  ;;  %v574_v34 = vld [vmem:[%s6765_s2 + $0x10] sm:$0xff] }
  0x1c   : > { %4220 = vmatpush3.bf16.msra.mxu0 %v4219_v20  ;;  %v379_v36 = vunpack.c.0.s8 %v378_v35 }
  0x1d   : > { %4222 = vmatprep.subr.bf16.mxu0 %v4221_v21 }
  0x1e   : > { %v4418_v37 = vsub.s32 %v379_v36, %v381_v1 }
  0x20   : > { %4224 = vmatpush3.bf16.msra.mxu0 %v4223_v26 }
  0x21   : > { %4226 = vmatprep.subr.bf16.mxu0 %v4225_v27 }
  0x24   : > { %4228 = vmatpush3.bf16.msra.mxu0 %v4227_v32 }
  0x25   : > { %4230 = vmatprep.subr.bf16.mxu0 %v4229_v33 }
  0x28   : > { %4232 = vmatpush3.bf16.msra.mxu0 %v4231_v38 }
  0x29   : > { %4234 = vmatprep.subr.bf16.mxu0 %v4233_v39 }
  0x2c   : > { %4236 = vmatpush3.bf16.msra.mxu0 %v4235_v44 }
  0x2d   : > { %4238 = vmatprep.subr.bf16.mxu0 %v4237_v45 }
  0x30   : > { %4240 = vmatpush3.bf16.msra.mxu0 %v4239_v48 }
  0x33   : > { %311 = vmatmul.mubr.f32.vlgmr.msra.gmra.mrb[0].mxu0 %v230_v49 }
  0x34   : > { %315 = vmatprep.mubr.f32.mxu0 %v233_v50 }
  0x37   : > { %316 = vmatmul.mubr.f32.gmra.mrb[2].mxu0 %v232_v51 }
  0x38   : > { %320 = vmatprep.mubr.f32.mxu0 %v235_v52 }
  0x3b   : > { %321 = vmatmul.mubr.f32.gmra.mrb[4].mxu0 %v234_v53 }
  0x3c   : > { %325 = vmatprep.mubr.f32.mxu0 %v237_v54 }
  0x3f   : > { %326 = vmatmul.mubr.f32.gmra.mrb[6].mxu0 %v236_v55 }
  0x40   : > { %330 = vmatprep.mubr.f32.mxu0 %v239_v56 }
  0x43   : > { %331 = vmatmul.mubr.f32.gmra.mrb[8].mxu0 %v238_v57 }
  0x44   : > { %335 = vmatprep.mubr.f32.mxu0 %v241_v58 }
  0x47   : > { %336 = vmatmul.mubr.f32.gmra.mrb[10].mxu0 %v240_v59 }
  0x48   : > { %340 = vmatprep.mubr.f32.mxu0 %v243_v60 }
  0x4b   : > { %341 = vmatmul.mubr.f32.gmra.mrb[12].mxu0 %v242_v61  ;;  %v573_v61 = vld [vmem:[%s6765_s2 + $0x8] sm:$0xff] }
  0x4c   : > { %345 = vmatprep.mubr.f32.mxu0 %v245_v62  ;;  %v572_v62 = vld [vmem:[%s6765_s2] sm:$0xff] }
  0x4f   : > { %346 = vmatmul.mubr.f32.gmra.mrb[14].mxu0 %v244_v63 }
 0x106   : > { %v4081_v10 = vpop.f32.mrb[0].mxu0 }
 0x107   : > { %v4082_v11 = vpop.f32.mrb[1].mxu0 }
 0x108   : > { %v4083_v12 = vadd.f32 %v4082_v11, %v4081_v10 }
 0x10a   : > { %v4084_v13 = vpop.f32.mrb[2].mxu0 }
 0x10b   : > { %v4085_v14 = vpop.f32.mrb[3].mxu0 }
 0x10c   : > { %v4086_v15 = vadd.f32 %v4085_v14, %v4084_v13 }
 0x10e   : > { %v4087_v16 = vpop.f32.mrb[4].mxu0 }
 0x10f   : > { %v4088_v17 = vpop.f32.mrb[5].mxu0 }
 0x110   : > { %v4089_v18 = vadd.f32 %v4088_v17, %v4087_v16 }
 0x112   : > { %v4090_v19 = vpop.f32.mrb[6].mxu0 }
 0x113   : > { %v4091_v20 = vpop.f32.mrb[7].mxu0 }
 0x114   : > { %v4416_v21 = vadd.f32 %v4091_v20, %v4090_v19 }
 0x116   : > { %v4093_v22 = vpop.f32.mrb[8].mxu0 }
 0x117   : > { %v4094_v23 = vpop.f32.mrb[9].mxu0 }
 0x118   : > { %v4095_v24 = vadd.f32 %v4094_v23, %v4093_v22 }
 0x11a   : > { %v4096_v25 = vpop.f32.mrb[10].mxu0  ;;  %355 = vrot.lane.b32.xlu0 %v4095_v24, %s4283_s30 }
 0x11b   : > { %v4097_v26 = vpop.f32.mrb[11].mxu0 }
 0x11c   : > { %v4098_v27 = vadd.f32 %v4097_v26, %v4096_v25  ;;  %v576_v25 = vld [vmem:[%s6765_s2 + $0x20] sm:$0xff] }
 0x11e   : > { %v4099_v28 = vpop.f32.mrb[12].mxu0  ;;  %357 = vrot.lane.b32.xlu0 %v4098_v27, %s4283_s30 }
 0x11f   : > { %v4100_v29 = vpop.f32.mrb[13].mxu0 }
 0x120   : > { %v4101_v30 = vadd.f32 %v4100_v29, %v4099_v28 }
 0x122   : > { %v4102_v31 = vpop.f32.mrb[14].mxu0  ;;  %359 = vrot.lane.b32.xlu1 %v4101_v30, %s4283_s30 }
 0x123   : > { %v4103_v32 = vpop.f32.mrb[15].mxu0 }
 0x124   : > { %v4104_v33 = vadd.f32 %v4103_v32, %v4102_v31 }
 0x126   : > { %361 = vrot.lane.b32.xlu1 %v4104_v33, %s4283_s30 }
 0x18c   : > { %v356_v38 = vpop.permute.xlu0 %355 }
 0x18d   : > { %v368_v39 = vsel %vm367_vm0, %v4083_v12, %v356_v38 }
 0x18e   : > { %v376_v40 = vcombine.high %v368_v39, %v368_v39  ;;  %v383_v41 = vrot.slane %v368_v39, %v4418_v37 }
 0x190   : > { %v390_v43 = vrot.slane %v376_v40, %v4418_v37  ;;  %v391_v44 = vcombine.high %v383_v41, %v383_v41  ;;  %v4426_v45 = vrot.slane %v383_v41, %v4418_v37  ;;  %v358_v46 = vpop.permute.xlu0 %357 }
 0x191   : > { %v369_v47 = vsel %vm367_vm0, %v4086_v15, %v358_v46 }
 0x192   : > { %v392_v48 = vcombine.high %v390_v43, %v390_v43  ;;  %v4430_v49 = vrot.slane %v390_v43, %v4418_v37  ;;  %v413_v50 = vrot.slane %v391_v44, %v4418_v37  ;;  %v425_v51 = vcombine.high %v369_v47, %v369_v47 }
 0x193   : > { %v432_v52 = vrot.slane %v369_v47, %v4418_v37  ;;  %v4439_v56 = vrot.slane %v4426_v45, %v4422_v42 }
 0x194   : > { %v420_v53 = vrot.slane %v392_v48, %v4418_v37  ;;  %v422_v54 = vcombine.high %v4430_v49, %v4430_v49  ;;  %v423_v55 = vcombine.high %v413_v50, %v413_v50  ;;  %v360_v57 = vpop.permute.xlu1 %359  ;;  %v4442_v58 = vrot.slane %v413_v50, %v4422_v42 }
 0x195   : > { %v439_v59 = vrot.slane %v425_v51, %v4418_v37  ;;  %v440_v60 = vcombine.high %v432_v52, %v432_v52  ;;  %v448_v5 = vrot.slane %v432_v52, %v4418_v37  ;;  %v370_v12 = vsel %vm367_vm0, %v4089_v18, %v360_v57 }
 0x196   : > { %v424_v63 = vcombine.high %v420_v53, %v420_v53  ;;  %v4452_v0 = vrot.slane %v423_v55, %v4422_v42  ;;  %v4455_v1 = vrot.slane %v420_v53, %v4422_v42  ;;  %v4458_v2 = vrot.slane %v422_v54, %v4422_v42 }
 0x197   : > { %v441_v4 = vcombine.high %v439_v59, %v439_v59  ;;  %v455_v6 = vrot.slane %v439_v59, %v4418_v37  ;;  %v462_v10 = vrot.slane %v440_v60, %v4418_v37  ;;  %v989_v13 = vmul.f32 %v4439_v56, %v573_v61 }
 0x198   : > { %v4464_v11 = vrot.slane %v424_v63, %v4422_v42  ;;  %v988_v14 = vmul.f32 %v4439_v56, %v572_v62  ;;  %v470_v16 = vcombine.high %v448_v5, %v448_v5  ;;  %v4471_v20 = vrot.slane %v448_v5, %v4422_v42  ;;  %v362_v18 = vpop.permute.xlu1 %361 }
 0x199   : > { %v469_v15 = vrot.slane %v441_v4, %v4418_v37  ;;  %v471_v17 = vcombine.high %v455_v6, %v455_v6  ;;  %v472_v19 = vcombine.high %v462_v10, %v462_v10  ;;  %v4474_v22 = vrot.slane %v462_v10, %v4422_v42 }
 0x19a   : > { %v4477_v23 = vrot.slane %v455_v6, %v4422_v42  ;;  %v474_v24 = vcombine.high %v370_v12, %v370_v12  ;;  %v4483_v27 = vrot.slane %v470_v16, %v4422_v42  ;;  %v481_v31 = vrot.slane %v370_v12, %v4418_v37  ;;  %v578_v16 = vld [vmem:[%s6765_s2 + $0x30] sm:$0xff] }
 0x19b   : > { %v473_v26 = vcombine.high %v469_v15, %v469_v15  ;;  %v4486_v28 = vrot.slane %v472_v19, %v4422_v42  ;;  %v4489_v29 = vrot.slane %v469_v15, %v4422_v42  ;;  %v4492_v30 = vrot.slane %v471_v17, %v4422_v42 }
 0x19c   : > { %v488_v32 = vrot.slane %v474_v24, %v4418_v37  ;;  %v1248_v33 = vsel %vm1244_vm1, %v989_v13, 0.0  ;;  %v1245_v36 = vsel %vm1244_vm1, %v988_v14, 0.0  ;;  %v371_v38 = vsel %vm367_vm0, %v4416_v21, %v362_v18 }
 0x19d   : > { %v4501_v35 = vrot.slane %v473_v26, %v4422_v42  ;;  %1249 = vadd.xlane.f32.xlu1 %v1248_v33  ;;  %v992_v39 = vmul.f32 %v4439_v56, %v576_v25  ;;  %v489_v40 = vcombine.high %v481_v31, %v481_v31  ;;  %v497_v43 = vrot.slane %v481_v31, %v4418_v37  ;;  %v575_v25 = vld [vmem:[%s6765_s2 + $0x18] sm:$0xff] }
 0x19e   : > { %v490_v41 = vcombine.high %v488_v32, %v488_v32  ;;  %v504_v44 = vrot.slane %v488_v32, %v4418_v37  ;;  %1246 = vadd.xlane.f32.xlu0 %v1245_v36  ;;  %v523_v46 = vcombine.high %v371_v38, %v371_v38  ;;  %v530_v47 = vrot.slane %v371_v38, %v4418_v37 }
 0x19f   : > { %v1257_v48 = vsel %vm1244_vm1, %v992_v39, 0.0  ;;  %v990_v50 = vmul.f32 %v4439_v56, %v574_v34  ;;  %v511_v51 = vrot.slane %v489_v40, %v4418_v37  ;;  %v519_v52 = vcombine.high %v497_v43, %v497_v43  ;;  %v577_v40 = vld [vmem:[%s6765_s2 + $0x28] sm:$0xff] }
 0x1a0   : > { %v518_v21 = vrot.slane %v490_v41, %v4418_v37  ;;  %v520_v53 = vcombine.high %v504_v44, %v504_v44  ;;  %v4515_v54 = vrot.slane %v497_v43, %v4422_v42  ;;  %v4518_v55 = vrot.slane %v504_v44, %v4422_v42 }
 0x1a1   : > { %v537_v57 = vrot.slane %v523_v46, %v4418_v37  ;;  %v538_v59 = vcombine.high %v530_v47, %v530_v47  ;;  %1258 = vadd.xlane.f32.xlu1 %v1257_v48  ;;  %v521_v60 = vcombine.high %v511_v51, %v511_v51  ;;  %v4522_v62 = vrot.slane %v511_v51, %v4422_v42 }
 0x1a2   : > { %v522_v61 = vcombine.high %v518_v21, %v518_v21  ;;  %v4525_v63 = vrot.slane %v519_v52, %v4422_v42  ;;  %v4528_v4 = vrot.slane %v518_v21, %v4422_v42  ;;  %v4531_v5 = vrot.slane %v520_v53, %v4422_v42  ;;  %v582_v21 = vld [vmem:[%s6765_s2 + $0x50] sm:$0xff]  ;;  %v579_v52 = vld [vmem:[%s6765_s2 + $0x38] sm:$0xff] }
 0x1a3   : > { %v539_v6 = vcombine.high %v537_v57, %v537_v57  ;;  %v546_v10 = vrot.slane %v530_v47, %v4418_v37  ;;  %v4535_v12 = vrot.slane %v521_v60, %v4422_v42  ;;  %v553_v14 = vrot.slane %v537_v57, %v4418_v37 }
 0x1a4   : > { %v4538_v13 = vrot.slane %v522_v61, %v4422_v42  ;;  %v560_v15 = vrot.slane %v538_v59, %v4418_v37  ;;  %v1251_v18 = vsel %vm1244_vm1, %v990_v50, 0.0  ;;  %v994_v39 = vmul.f32 %v4439_v56, %v578_v16  ;;  %v584_v61 = vld [vmem:[%s6765_s2 + $0x60] sm:$0xff] }
 0x1a5   : > { %v567_v17 = vrot.slane %v539_v6, %v4418_v37  ;;  %v568_v19 = vcombine.high %v546_v10, %v546_v10  ;;  %v4547_v24 = vrot.slane %v546_v10, %v4422_v42  ;;  %v569_v26 = vcombine.high %v553_v14, %v553_v14  ;;  %1252 = vadd.xlane.f32.xlu0 %v1251_v18  ;;  %v580_v37 = vld [vmem:[%s6765_s2 + $0x40] sm:$0xff]  ;;  %v581_v6 = vld [vmem:[%s6765_s2 + $0x48] sm:$0xff] }
 0x1a6   : > { %v570_v31 = vcombine.high %v560_v15, %v560_v15  ;;  %v4554_v32 = vrot.slane %v560_v15, %v4422_v42  ;;  %v4557_v33 = vrot.slane %v553_v14, %v4422_v42  ;;  %v991_v44 = vmul.f32 %v4439_v56, %v575_v25 }
 0x1a7   : > { %v571_v34 = vcombine.high %v567_v17, %v567_v17  ;;  %v4563_v36 = vrot.slane %v568_v19, %v4422_v42  ;;  %v4566_v38 = vrot.slane %v567_v17, %v4422_v42  ;;  %v4576_v43 = vrot.slane %v569_v26, %v4422_v42  ;;  %v586_v17 = vld [vmem:[%s6765_s2 + $0x70] sm:$0xff]  ;;  %v583_v19 = vld [vmem:[%s6765_s2 + $0x58] sm:$0xff] }
 0x1a8   : > { %v4573_v41 = vrot.slane %v570_v31, %v4422_v42  ;;  %v1263_v47 = vsel %vm1244_vm1, %v994_v39, 0.0  ;;  %v996_v48 = vmul.f32 %v4442_v58, %v580_v37  ;;  %v1254_v50 = vsel %vm1244_vm1, %v991_v44, 0.0  ;;  %v588_v37 = vld [vmem:[%s6765_s2 + $0x80] sm:$0xff] }
 0x1a9   : > { %v4580_v46 = vrot.slane %v571_v34, %v4422_v42  ;;  %1264 = vadd.xlane.f32.xlu1 %v1263_v47  ;;  %v993_v51 = vmul.f32 %v4439_v56, %v577_v40  ;;  %1255 = vadd.xlane.f32.xlu0 %v1254_v50  ;;  %v998_v57 = vmul.f32 %v4442_v58, %v582_v21  ;;  %v585_v34 = vld [vmem:[%s6765_s2 + $0x68] sm:$0xff]  ;;  %v587_v50 = vld [vmem:[%s6765_s2 + $0x78] sm:$0xff] }
 0x1aa   : > { %v1269_v53 = vsel %vm1244_vm1, %v996_v48, 0.0  ;;  %v995_v60 = vmul.f32 %v4439_v56, %v579_v52  ;;  %v421_v10 = vcombine.high %v4426_v45, %v4426_v45  ;;  %v1000_v15 = vmul.f32 %v4442_v58, %v584_v61  ;;  %v590_v48 = vld [vmem:[%s6765_s2 + $0x90] sm:$0xff] }
 0x1ab   : > { %v1260_v59 = vsel %vm1244_vm1, %v993_v51, 0.0  ;;  %v1275_v14 = vsel %vm1244_vm1, %v998_v57, 0.0  ;;  %v997_v56 = vmul.f32 %v4442_v58, %v581_v6  ;;  %v1002_v25 = vmul.f32 %v4442_v58, %v586_v17  ;;  %v592_v57 = vld [vmem:[%s6765_s2 + $0xa0] sm:$0xff] }
 0x1ac   : > { %v1266_v16 = vsel %vm1244_vm1, %v995_v60, 0.0  ;;  %v839_v45 = vrot.slane %v421_v10, %v4422_v42  ;;  %v1281_v18 = vsel %vm1244_vm1, %v1000_v15, 0.0  ;;  %v999_v31 = vmul.f32 %v4442_v58, %v583_v19 }
 0x1ad   : > { %1270 = vadd.xlane.f32.xlu1 %v1269_v53  ;;  %1261 = vadd.xlane.f32.xlu0 %v1260_v59  ;;  %v1272_v26 = vsel %vm1244_vm1, %v997_v56, 0.0  ;;  %v1287_v39 = vsel %vm1244_vm1, %v1002_v25, 0.0  ;;  %v1001_v47 = vmul.f32 %v4442_v58, %v585_v34  ;;  %v1003_v53 = vmul.f32 %v4442_v58, %v587_v50  ;;  %v589_v59 = vld [vmem:[%s6765_s2 + $0x88] sm:$0xff]  ;;  %v594_v58 = vld [vmem:[%s6765_s2 + $0xb0] sm:$0xff]  ;;  %v595_v34 = vld [vmem:[%s6765_s2 + $0xb8] sm:$0xff] }
 0x1ae   : > { %v1004_v40 = vmul.f32 %v839_v45, %v588_v37  ;;  %v1278_v44 = vsel %vm1244_vm1, %v999_v31, 0.0  ;;  %v1006_v21 = vmul.f32 %v839_v45, %v590_v48  ;;  %v1008_v61 = vmul.f32 %v839_v45, %v592_v57  ;;  %v593_v25 = vld [vmem:[%s6765_s2 + $0xa8] sm:$0xff]  ;;  %v606_v37 = vld [vmem:[%s6765_s2 + $0x110] sm:$0xff]  ;;  %v608_v48 = vld [vmem:[%s6765_s2 + $0x120] sm:$0xff] }
 0x1af   : > { %v1284_v52 = vsel %vm1244_vm1, %v1001_v47, 0.0  ;;  %v1290_v6 = vsel %vm1244_vm1, %v1003_v53, 0.0  ;;  %v1005_v10 = vmul.f32 %v839_v45, %v589_v59  ;;  %v847_v15 = vrot.slane %v4430_v49, %v4422_v42  ;;  %v605_v50 = vld [vmem:[%s6765_s2 + $0x108] sm:$0xff]  ;;  %v607_v57 = vld [vmem:[%s6765_s2 + $0x118] sm:$0xff] }
 0x1b0   : > { %v1293_v51 = vsel %vm1244_vm1, %v1004_v40, 0.0  ;;  %v1299_v60 = vsel %vm1244_vm1, %v1006_v21, 0.0  ;;  %v1010_v56 = vmul.f32 %v839_v45, %v594_v58  ;;  %v1009_v49 = vmul.f32 %v839_v45, %v593_v25  ;;  %v609_v58 = vld [vmem:[%s6765_s2 + $0x128] sm:$0xff] }
 0x1b1   : > { %1276 = vadd.xlane.f32.xlu1 %v1275_v14  ;;  %1267 = vadd.xlane.f32.xlu0 %v1266_v16  ;;  %v591_v14 = vld [vmem:[%s6765_s2 + $0x98] sm:$0xff]  ;;  %v1305_v16 = vsel %vm1244_vm1, %v1008_v61, 0.0  ;;  %v1296_v17 = vsel %vm1244_vm1, %v1005_v10, 0.0  ;;  %v1022_v40 = vmul.f32 %v847_v15, %v606_v37  ;;  %v1011_v47 = vmul.f32 %v839_v45, %v595_v34  ;;  %v596_v10 = vld [vmem:[%s6765_s2 + $0xc0] sm:$0xff]  ;;  %v597_v37 = vld [vmem:[%s6765_s2 + $0xc8] sm:$0xff] }
 0x1b2   : > { %v1007_v19 = vmul.f32 %v839_v45, %v591_v14  ;;  %v1024_v21 = vmul.f32 %v847_v15, %v608_v48  ;;  %v1021_v53 = vmul.f32 %v847_v15, %v605_v50  ;;  %v610_v45 = vld [vmem:[%s6765_s2 + $0x130] sm:$0xff] }
 0x1b4   : > { %v1302_v42 = vsel %vm1244_vm1, %v1007_v19, 0.0  ;;  %v1353_v59 = vsel %vm1244_vm1, %v1024_v21, 0.0  ;;  %v1344_v61 = vsel %vm1244_vm1, %v1021_v53, 0.0  ;;  %v598_v19 = vld [vmem:[%s6765_s2 + $0xd0] sm:$0xff]  ;;  %v601_v53 = vld [vmem:[%s6765_s2 + $0xe8] sm:$0xff] }
 0x1b5   : > { %1282 = vadd.xlane.f32.xlu1 %v1281_v18  ;;  %1273 = vadd.xlane.f32.xlu0 %v1272_v26  ;;  %v604_v18 = vld [vmem:[%s6765_s2 + $0x100] sm:$0xff]  ;;  %v1311_v26 = vsel %vm1244_vm1, %v1010_v56, 0.0 }
 0x1b6   : > { %v1020_v31 = vmul.f32 %v847_v15, %v604_v18  ;;  %v611_v18 = vld [vmem:[%s6765_s2 + $0x138] sm:$0xff] }
 0x1b9   : > { %1288 = vadd.xlane.f32.xlu1 %v1287_v39  ;;  %1279 = vadd.xlane.f32.xlu0 %v1278_v44  ;;  %v1341_v39 = vsel %vm1244_vm1, %v1020_v31, 0.0  ;;  %v1308_v44 = vsel %vm1244_vm1, %v1009_v49, 0.0  ;;  %v600_v49 = vld [vmem:[%s6765_s2 + $0xe0] sm:$0xff] }
 0x1bd   : > { %1294 = vadd.xlane.f32.xlu1 %v1293_v51  ;;  %1285 = vadd.xlane.f32.xlu0 %v1284_v52  ;;  %v1347_v51 = vsel %vm1244_vm1, %v1022_v40, 0.0  ;;  %v1314_v52 = vsel %vm1244_vm1, %v1011_v47, 0.0  ;;  %v599_v47 = vld [vmem:[%s6765_s2 + $0xd8] sm:$0xff] }
 0x1be   : > { %v1015_v21 = vmul.f32 %v4452_v0, %v599_v47 }
 0x1c1   : > { %1300 = vadd.xlane.f32.xlu1 %v1299_v60  ;;  %1291 = vadd.xlane.f32.xlu0 %v1290_v6  ;;  %v1026_v60 = vmul.f32 %v847_v15, %v610_v45  ;;  %v1023_v6 = vmul.f32 %v847_v15, %v607_v57 }
 0x1c3   : > { %v1359_v14 = vsel %vm1244_vm1, %v1026_v60, 0.0  ;;  %v1350_v56 = vsel %vm1244_vm1, %v1023_v6, 0.0  ;;  %v1017_v60 = vmul.f32 %v4452_v0, %v601_v53  ;;  %v603_v6 = vld [vmem:[%s6765_s2 + $0xf8] sm:$0xff] }
 0x1c5   : > { %1306 = vadd.xlane.f32.xlu1 %v1305_v16  ;;  %1297 = vadd.xlane.f32.xlu0 %v1296_v17  ;;  %v1012_v16 = vmul.f32 %v4452_v0, %v596_v10  ;;  %v1025_v17 = vmul.f32 %v847_v15, %v609_v58 }
 0x1c7   : > { %v1317_v25 = vsel %vm1244_vm1, %v1012_v16, 0.0  ;;  %v1356_v31 = vsel %vm1244_vm1, %v1025_v17, 0.0  ;;  %v1019_v16 = vmul.f32 %v4452_v0, %v603_v6  ;;  %v613_v17 = vld [vmem:[%s6765_s2 + $0x148] sm:$0xff] }
 0x1c9   : > { %1312 = vadd.xlane.f32.xlu1 %v1311_v26  ;;  %1303 = vadd.xlane.f32.xlu0 %v1302_v42  ;;  %v1014_v26 = vmul.f32 %v4452_v0, %v598_v19  ;;  %v1027_v42 = vmul.f32 %v847_v15, %v611_v18  ;;  %v602_v15 = vld [vmem:[%s6765_s2 + $0xf0] sm:$0xff] }
 0x1ca   : > { %v1018_v50 = vmul.f32 %v4452_v0, %v602_v15 }
 0x1cb   : > { %v1323_v34 = vsel %vm1244_vm1, %v1014_v26, 0.0  ;;  %v1362_v40 = vsel %vm1244_vm1, %v1027_v42, 0.0  ;;  %v1029_v26 = vmul.f32 %v4455_v1, %v613_v17 }
 0x1cc   : > { %v1335_v45 = vsel %vm1244_vm1, %v1018_v50, 0.0  ;;  %v622_v50 = vld [vmem:[%s6765_s2 + $0x190] sm:$0xff] }
 0x1cd   : > { %1342 = vadd.xlane.f32.xlu1 %v1341_v39  ;;  %1309 = vadd.xlane.f32.xlu0 %v1308_v44  ;;  %v1016_v39 = vmul.f32 %v4452_v0, %v600_v49  ;;  %v1013_v44 = vmul.f32 %v4452_v0, %v597_v37  ;;  %v618_v0 = vld [vmem:[%s6765_s2 + $0x170] sm:$0xff]  ;;  %v1368_v37 = vsel %vm1244_vm1, %v1029_v26, 0.0 }
 0x1ce   : > { %v1034_v49 = vmul.f32 %v4455_v1, %v618_v0 }
 0x1cf   : > { %v1329_v48 = vsel %vm1244_vm1, %v1016_v39, 0.0  ;;  %v620_v39 = vld [vmem:[%s6765_s2 + $0x180] sm:$0xff] }
 0x1d0   : > { %v1036_v15 = vmul.f32 %v4458_v2, %v620_v39 }
 0x1d1   : > { %1348 = vadd.xlane.f32.xlu1 %v1347_v51  ;;  %1315 = vadd.xlane.f32.xlu0 %v1314_v52  ;;  %v1320_v51 = vsel %vm1244_vm1, %v1013_v44, 0.0  ;;  %v612_v52 = vld [vmem:[%s6765_s2 + $0x140] sm:$0xff]  ;;  %v1383_v44 = vsel %vm1244_vm1, %v1034_v49, 0.0  ;;  %v627_v49 = vld [vmem:[%s6765_s2 + $0x1b8] sm:$0xff] }
 0x1d2   : > { %v1028_v57 = vmul.f32 %v4455_v1, %v612_v52  ;;  %v1038_v52 = vmul.f32 %v4458_v2, %v622_v50 }
 0x1d4   : > { %v1365_v10 = vsel %vm1244_vm1, %v1028_v57, 0.0  ;;  %v624_v57 = vld [vmem:[%s6765_s2 + $0x1a0] sm:$0xff] }
 0x1d5   : > { %1354 = vadd.xlane.f32.xlu1 %v1353_v59  ;;  %1345 = vadd.xlane.f32.xlu0 %v1344_v61  ;;  %v1326_v59 = vsel %vm1244_vm1, %v1015_v21, 0.0  ;;  %v614_v61 = vld [vmem:[%s6765_s2 + $0x150] sm:$0xff]  ;;  %v1389_v21 = vsel %vm1244_vm1, %v1036_v15, 0.0  ;;  %v637_v15 = vld [vmem:[%s6765_s2 + $0x208] sm:$0xff] }
 0x1d6   : > { %v1030_v58 = vmul.f32 %v4455_v1, %v614_v61  ;;  %v1040_v61 = vmul.f32 %v4458_v2, %v624_v57 }
 0x1d8   : > { %v1371_v19 = vsel %vm1244_vm1, %v1030_v58, 0.0  ;;  %v623_v58 = vld [vmem:[%s6765_s2 + $0x198] sm:$0xff] }
 0x1d9   : > { %1360 = vadd.xlane.f32.xlu1 %v1359_v14  ;;  %1351 = vadd.xlane.f32.xlu0 %v1350_v56  ;;  %v1332_v14 = vsel %vm1244_vm1, %v1017_v60, 0.0  ;;  %v616_v56 = vld [vmem:[%s6765_s2 + $0x160] sm:$0xff]  ;;  %v1395_v60 = vsel %vm1244_vm1, %v1038_v52, 0.0  ;;  %v1039_v17 = vmul.f32 %v4458_v2, %v623_v58  ;;  %v630_v58 = vld [vmem:[%s6765_s2 + $0x1d0] sm:$0xff] }
 0x1da   : > { %v1032_v18 = vmul.f32 %v4455_v1, %v616_v56 }
 0x1db   : > { %v1398_v0 = vsel %vm1244_vm1, %v1039_v17, 0.0 }
 0x1dc   : > { %v1377_v42 = vsel %vm1244_vm1, %v1032_v18, 0.0  ;;  %v625_v18 = vld [vmem:[%s6765_s2 + $0x1a8] sm:$0xff] }
 0x1dd   : > { %1318 = vadd.xlane.f32.xlu1 %v1317_v25  ;;  %1357 = vadd.xlane.f32.xlu0 %v1356_v31  ;;  %v1338_v25 = vsel %vm1244_vm1, %v1019_v16, 0.0  ;;  %v615_v31 = vld [vmem:[%s6765_s2 + $0x158] sm:$0xff] }
 0x1e1   : > { %1324 = vadd.xlane.f32.xlu1 %v1323_v34  ;;  %1363 = vadd.xlane.f32.xlu0 %v1362_v40  ;;  %v1031_v34 = vmul.f32 %v4455_v1, %v615_v31  ;;  %v617_v40 = vld [vmem:[%s6765_s2 + $0x168] sm:$0xff]  ;;  %v1041_v31 = vmul.f32 %v4458_v2, %v625_v18  ;;  %v632_v18 = vld [vmem:[%s6765_s2 + $0x1e0] sm:$0xff] }
 0x1e3   : > { %v1374_v47 = vsel %vm1244_vm1, %v1031_v34, 0.0  ;;  %v1404_v39 = vsel %vm1244_vm1, %v1041_v31, 0.0 }
 0x1e5   : > { %1330 = vadd.xlane.f32.xlu1 %v1329_v48  ;;  %1321 = vadd.xlane.f32.xlu0 %v1320_v51  ;;  %v1033_v48 = vmul.f32 %v4455_v1, %v617_v40  ;;  %v619_v51 = vld [vmem:[%s6765_s2 + $0x178] sm:$0xff]  ;;  %v1043_v40 = vmul.f32 %v4458_v2, %v627_v49 }
 0x1e6   : > { %v631_v49 = vld [vmem:[%s6765_s2 + $0x1d8] sm:$0xff] }
 0x1e7   : > { %v1380_v53 = vsel %vm1244_vm1, %v1033_v48, 0.0  ;;  %v1410_v50 = vsel %vm1244_vm1, %v1043_v40, 0.0  ;;  %v1047_v40 = vmul.f32 %v4464_v11, %v631_v49 }
 0x1e9   : > { %1336 = vadd.xlane.f32.xlu1 %v1335_v45  ;;  %1327 = vadd.xlane.f32.xlu0 %v1326_v59  ;;  %v1035_v45 = vmul.f32 %v4455_v1, %v619_v51  ;;  %v621_v59 = vld [vmem:[%s6765_s2 + $0x188] sm:$0xff]  ;;  %v626_v1 = vld [vmem:[%s6765_s2 + $0x1b0] sm:$0xff]  ;;  %v1053_v51 = vmul.f32 %v4471_v20, %v637_v15 }
 0x1ea   : > { %v1042_v16 = vmul.f32 %v4458_v2, %v626_v1  ;;  %v633_v15 = vld [vmem:[%s6765_s2 + $0x1e8] sm:$0xff] }
 0x1eb   : > { %v1386_v6 = vsel %vm1244_vm1, %v1035_v45, 0.0  ;;  %v1440_v45 = vsel %vm1244_vm1, %v1053_v51, 0.0  ;;  %v1049_v51 = vmul.f32 %v4464_v11, %v633_v15 }
 0x1ed   : > { %1366 = vadd.xlane.f32.xlu1 %v1365_v10  ;;  %1333 = vadd.xlane.f32.xlu0 %v1332_v14  ;;  %v1037_v10 = vmul.f32 %v4458_v2, %v621_v59  ;;  %v1401_v14 = vsel %vm1244_vm1, %v1040_v61, 0.0  ;;  %v642_v2 = vld [vmem:[%s6765_s2 + $0x230] sm:$0xff]  ;;  %v628_v59 = vld [vmem:[%s6765_s2 + $0x1c0] sm:$0xff] }
 0x1ef   : > { %v1392_v56 = vsel %vm1244_vm1, %v1037_v10, 0.0 }
 0x1f1   : > { %1372 = vadd.xlane.f32.xlu1 %v1371_v19  ;;  %1339 = vadd.xlane.f32.xlu0 %v1338_v25  ;;  %v636_v19 = vld [vmem:[%s6765_s2 + $0x200] sm:$0xff]  ;;  %v1407_v25 = vsel %vm1244_vm1, %v1042_v16, 0.0 }
 0x1f2   : > { %v1052_v26 = vmul.f32 %v4471_v20, %v636_v19 }
 0x1f5   : > { %1378 = vadd.xlane.f32.xlu1 %v1377_v42  ;;  %1369 = vadd.xlane.f32.xlu0 %v1368_v37  ;;  %v638_v42 = vld [vmem:[%s6765_s2 + $0x210] sm:$0xff]  ;;  %v1437_v37 = vsel %vm1244_vm1, %v1052_v26, 0.0 }
 0x1f6   : > { %v1054_v34 = vmul.f32 %v4471_v20, %v638_v42 }
 0x1f9   : > { %1384 = vadd.xlane.f32.xlu1 %v1383_v44  ;;  %1375 = vadd.xlane.f32.xlu0 %v1374_v47  ;;  %v640_v44 = vld [vmem:[%s6765_s2 + $0x220] sm:$0xff]  ;;  %v1443_v47 = vsel %vm1244_vm1, %v1054_v34, 0.0 }
 0x1fa   : > { %v1056_v48 = vmul.f32 %v4471_v20, %v640_v44  ;;  %v644_v44 = vld [vmem:[%s6765_s2 + $0x240] sm:$0xff] }
 0x1fc   : > { %v1449_v52 = vsel %vm1244_vm1, %v1056_v48, 0.0  ;;  %v1060_v48 = vmul.f32 %v4474_v22, %v644_v44 }
 0x1fd   : > { %1390 = vadd.xlane.f32.xlu1 %v1389_v21  ;;  %1381 = vadd.xlane.f32.xlu0 %v1380_v53  ;;  %v639_v21 = vld [vmem:[%s6765_s2 + $0x218] sm:$0xff]  ;;  %v1058_v53 = vmul.f32 %v4471_v20, %v642_v2 }
 0x1fe   : > { %v1055_v57 = vmul.f32 %v4471_v20, %v639_v21  ;;  %v646_v21 = vld [vmem:[%s6765_s2 + $0x250] sm:$0xff] }
 0x1ff   : > { %v1455_v61 = vsel %vm1244_vm1, %v1058_v53, 0.0 }
 0x200   : > { %v1446_v10 = vsel %vm1244_vm1, %v1055_v57, 0.0 }
 0x201   : > { %1396 = vadd.xlane.f32.xlu1 %v1395_v60  ;;  %1387 = vadd.xlane.f32.xlu0 %v1386_v6  ;;  %v641_v60 = vld [vmem:[%s6765_s2 + $0x228] sm:$0xff]  ;;  %v1044_v6 = vmul.f32 %v4464_v11, %v628_v59  ;;  %v1461_v59 = vsel %vm1244_vm1, %v1060_v48, 0.0 }
 0x202   : > { %v1057_v1 = vmul.f32 %v4471_v20, %v641_v60  ;;  %v1062_v60 = vmul.f32 %v4474_v22, %v646_v21 }
 0x203   : > { %v1413_v16 = vsel %vm1244_vm1, %v1044_v6, 0.0 }
 0x204   : > { %v1452_v17 = vsel %vm1244_vm1, %v1057_v1, 0.0  ;;  %v653_v1 = vld [vmem:[%s6765_s2 + $0x288] sm:$0xff] }
 0x205   : > { %1402 = vadd.xlane.f32.xlu1 %v1401_v14  ;;  %1393 = vadd.xlane.f32.xlu0 %v1392_v56  ;;  %v643_v14 = vld [vmem:[%s6765_s2 + $0x238] sm:$0xff]  ;;  %v1046_v56 = vmul.f32 %v4464_v11, %v630_v58  ;;  %v645_v58 = vld [vmem:[%s6765_s2 + $0x248] sm:$0xff] }
 0x206   : > { %v1059_v19 = vmul.f32 %v4471_v20, %v643_v14  ;;  %v634_v20 = vld [vmem:[%s6765_s2 + $0x1f0] sm:$0xff]  ;;  %v1467_v14 = vsel %vm1244_vm1, %v1062_v60, 0.0 }
 0x207   : > { %v1419_v26 = vsel %vm1244_vm1, %v1046_v56, 0.0  ;;  %v1050_v34 = vmul.f32 %v4464_v11, %v634_v20  ;;  %v1069_v56 = vmul.f32 %v4483_v27, %v653_v1  ;;  %v649_v1 = vld [vmem:[%s6765_s2 + $0x268] sm:$0xff] }
 0x208   : > { %v1458_v31 = vsel %vm1244_vm1, %v1059_v19, 0.0  ;;  %v1061_v19 = vmul.f32 %v4474_v22, %v645_v58 }
 0x209   : > { %1408 = vadd.xlane.f32.xlu1 %v1407_v25  ;;  %1399 = vadd.xlane.f32.xlu0 %v1398_v0  ;;  %v629_v25 = vld [vmem:[%s6765_s2 + $0x1c8] sm:$0xff]  ;;  %v1048_v0 = vmul.f32 %v4464_v11, %v632_v18 }
 0x20a   : > { %v1045_v42 = vmul.f32 %v4464_v11, %v629_v25  ;;  %v652_v25 = vld [vmem:[%s6765_s2 + $0x280] sm:$0xff]  ;;  %v1464_v20 = vsel %vm1244_vm1, %v1061_v19, 0.0 }
 0x20b   : > { %v1068_v49 = vmul.f32 %v4483_v27, %v652_v25 }
 0x20d   : > { %1438 = vadd.xlane.f32.xlu1 %v1437_v37  ;;  %1405 = vadd.xlane.f32.xlu0 %v1404_v39  ;;  %v1425_v37 = vsel %vm1244_vm1, %v1048_v0, 0.0  ;;  %v1416_v39 = vsel %vm1244_vm1, %v1045_v42, 0.0  ;;  %v1488_v0 = vsel %vm1244_vm1, %v1069_v56, 0.0  ;;  %v1485_v48 = vsel %vm1244_vm1, %v1068_v49, 0.0 }
 0x211   : > { %1444 = vadd.xlane.f32.xlu1 %v1443_v47  ;;  %1411 = vadd.xlane.f32.xlu0 %v1410_v50  ;;  %v1431_v47 = vsel %vm1244_vm1, %v1050_v34, 0.0  ;;  %v1422_v50 = vsel %vm1244_vm1, %v1047_v40, 0.0 }
 0x215   : > { %1450 = vadd.xlane.f32.xlu1 %v1449_v52  ;;  %1441 = vadd.xlane.f32.xlu0 %v1440_v45  ;;  %v635_v45 = vld [vmem:[%s6765_s2 + $0x1f8] sm:$0xff] }
 0x219   : > { %1456 = vadd.xlane.f32.xlu1 %v1455_v61  ;;  %1447 = vadd.xlane.f32.xlu0 %v1446_v10  ;;  %v1428_v61 = vsel %vm1244_vm1, %v1049_v51, 0.0  ;;  %v1051_v10 = vmul.f32 %v4464_v11, %v635_v45  ;;  %v654_v11 = vld [vmem:[%s6765_s2 + $0x290] sm:$0xff] }
 0x21a   : > { %v670_v51 = vld [vmem:[%s6765_s2 + $0x310] sm:$0xff] }
 0x21b   : > { %v1086_v60 = vmul.f32 %v4477_v23, %v670_v51 }
 0x21d   : > { %1414 = vadd.xlane.f32.xlu1 %v1413_v16  ;;  %1453 = vadd.xlane.f32.xlu0 %v1452_v17  ;;  %v1434_v17 = vsel %vm1244_vm1, %v1051_v10, 0.0 }
 0x221   : > { %1420 = vadd.xlane.f32.xlu1 %v1419_v26  ;;  %1459 = vadd.xlane.f32.xlu0 %v1458_v31  ;;  %v1070_v31 = vmul.f32 %v4483_v27, %v654_v11  ;;  %v1539_v11 = vsel %vm1244_vm1, %v1086_v60, 0.0 }
 0x223   : > { %v1491_v15 = vsel %vm1244_vm1, %v1070_v31, 0.0 }
 0x225   : > { %1426 = vadd.xlane.f32.xlu1 %v1425_v37  ;;  %1417 = vadd.xlane.f32.xlu0 %v1416_v39  ;;  %v669_v37 = vld [vmem:[%s6765_s2 + $0x308] sm:$0xff]  ;;  %v647_v39 = vld [vmem:[%s6765_s2 + $0x258] sm:$0xff] }
 0x229   : > { %1432 = vadd.xlane.f32.xlu1 %v1431_v47  ;;  %1423 = vadd.xlane.f32.xlu0 %v1422_v50  ;;  %v1085_v47 = vmul.f32 %v4477_v23, %v669_v37  ;;  %v1063_v50 = vmul.f32 %v4474_v22, %v647_v39 }
 0x22a   : > { %v1250_v2 = vpop.xlane.xlu1 %1249 }
 0x22b   : > { %v2151_v52 = vrot.slane %v1250_v2, %v4410_v7  ;;  %v1247_v53 = vpop.xlane.xlu0 %1246 }
 0x22c   : > { %v2146_v57 = vrot.slane %v1247_v53, %v4408_v3 }
 0x22d   : > { %1462 = vadd.xlane.f32.xlu1 %v1461_v59  ;;  %1429 = vadd.xlane.f32.xlu0 %v1428_v61  ;;  %v1536_v59 = vsel %vm1244_vm1, %v1085_v47, 0.0 }
 0x22e   : > { %v2153_v6 = vsel %vm2152_vm2, %v2151_v52, %v2146_v57  ;;  %v1259_v16 = vpop.xlane.xlu1 %1258  ;;  %v655_v52 = vld [vmem:[%s6765_s2 + $0x298] sm:$0xff] }
 0x22f   : > { %v2927_v45 = vrot.slane %v1259_v16, %v4408_v3  ;;  %v1071_v10 = vmul.f32 %v4483_v27, %v655_v52  ;;  %v668_v16 = vld [vmem:[%s6765_s2 + $0x300] sm:$0xff] }
 0x231   : > { %1468 = vadd.xlane.f32.xlu1 %v1467_v14  ;;  %1435 = vadd.xlane.f32.xlu0 %v1434_v17  ;;  %v1494_v25 = vsel %vm1244_vm1, %v1071_v10, 0.0 }
 0x232   : > { %v1253_v18 = vpop.xlane.xlu0 %1252 }
 0x233   : > { %v2158_v26 = vrot.slane %v1253_v18, %v4412_v8  ;;  %v1065_v18 = vmul.f32 %v4474_v22, %v649_v1 }
 0x235   : > { %v2160_v42 = vsel %vm2159_vm3, %v2158_v26, %v2153_v6  ;;  %1489 = vadd.xlane.f32.xlu1 %v1488_v0  ;;  %1465 = vadd.xlane.f32.xlu0 %v1464_v20  ;;  %v1470_v6 = vsel %vm1244_vm1, %v1063_v50, 0.0  ;;  %v1084_v26 = vmul.f32 %v4477_v23, %v668_v16  ;;  %v650_v0 = vld [vmem:[%s6765_s2 + $0x270] sm:$0xff]  ;;  %v671_v20 = vld [vmem:[%s6765_s2 + $0x318] sm:$0xff]  ;;  %v1476_v39 = vsel %vm1244_vm1, %v1065_v18, 0.0 }
 0x236   : > { %v1265_v34 = vpop.xlane.xlu1 %1264  ;;  %v1256_v40 = vpop.xlane.xlu0 %1255  ;;  %v1087_v47 = vmul.f32 %v4477_v23, %v671_v20  ;;  %v651_v20 = vld [vmem:[%s6765_s2 + $0x278] sm:$0xff] }
 0x237   : > { %v2165_v44 = vrot.slane %v1256_v40, %v4414_v9  ;;  %v2936_v61 = vrot.slane %v1265_v34, %v4412_v8  ;;  %v1066_v40 = vmul.f32 %v4474_v22, %v650_v0 }
 0x238   : > { %v1542_v60 = vsel %vm1244_vm1, %v1087_v47, 0.0  ;;  %v674_v47 = vld [vmem:[%s6765_s2 + $0x330] sm:$0xff] }
 0x239   : > { %1492 = vadd.xlane.f32.xlu1 %v1491_v15  ;;  %v2167_v2 = vsel %vm2166_vm4, %v2165_v44, %v2160_v42  ;;  %1486 = vadd.xlane.f32.xlu0 %v1485_v48  ;;  %v1533_v15 = vsel %vm1244_vm1, %v1084_v26, 0.0  ;;  %v657_v48 = vld [vmem:[%s6765_s2 + $0x2a8] sm:$0xff] }
 0x23a   : > { %v1271_v21 = vpop.xlane.xlu1 %1270  ;;  %v1262_v53 = vpop.xlane.xlu0 %1261 }
 0x23b   : > { %v2931_v57 = vrot.slane %v1262_v53, %v4410_v7  ;;  %v2171_v37 = vrot.slane %v1271_v21, %v4408_v3  ;;  %v648_v21 = vld [vmem:[%s6765_s2 + $0x260] sm:$0xff] }
 0x23d   : > { %1537 = vadd.xlane.f32.xlu1 %v1536_v59  ;;  %v2932_v58 = vsel %vm2152_vm2, %v2931_v57, %v2927_v45  ;;  %1471 = vadd.xlane.f32.xlu0 %v1470_v6  ;;  %v1479_v57 = vsel %vm1244_vm1, %v1066_v40, 0.0  ;;  %v1073_v59 = vmul.f32 %v4483_v27, %v657_v48  ;;  %v658_v6 = vld [vmem:[%s6765_s2 + $0x2b0] sm:$0xff] }
 0x23e   : > { %v1277_v14 = vpop.xlane.xlu1 %1276  ;;  %v2937_v56 = vsel %vm2159_vm3, %v2936_v61, %v2932_v58  ;;  %v1268_v17 = vpop.xlane.xlu0 %1267  ;;  %v1064_v61 = vmul.f32 %v4474_v22, %v648_v21  ;;  %v656_v58 = vld [vmem:[%s6765_s2 + $0x2a0] sm:$0xff] }
 0x23f   : > { %v2941_v19 = vrot.slane %v1268_v17, %v4414_v9  ;;  %v2180_v44 = vrot.slane %v1277_v14, %v4412_v8  ;;  %v1072_v26 = vmul.f32 %v4483_v27, %v656_v58 }
 0x241   : > { %1540 = vadd.xlane.f32.xlu1 %v1539_v11  ;;  %v2942_v31 = vsel %vm2166_vm4, %v2941_v19, %v2937_v56  ;;  %1495 = vadd.xlane.f32.xlu0 %v1494_v25  ;;  %v1500_v19 = vsel %vm1244_vm1, %v1073_v59, 0.0  ;;  %v1074_v11 = vmul.f32 %v4483_v27, %v658_v6  ;;  %v1473_v25 = vsel %vm1244_vm1, %v1064_v61, 0.0 }
 0x242   : > { %v1283_v42 = vpop.xlane.xlu1 %1282  ;;  %v1274_v49 = vpop.xlane.xlu0 %1273 }
 0x243   : > { %v2175_v34 = vrot.slane %v1274_v49, %v4410_v7  ;;  %v2946_v56 = vrot.slane %v1283_v42, %v4408_v3 }
 0x245   : > { %1477 = vadd.xlane.f32.xlu1 %v1476_v39  ;;  %v2176_v50 = vsel %vm2152_vm2, %v2175_v34, %v2171_v37  ;;  %1534 = vadd.xlane.f32.xlu0 %v1533_v15  ;;  %v1503_v39 = vsel %vm1244_vm1, %v1074_v11, 0.0  ;;  %v1067_v15 = vmul.f32 %v4474_v22, %v651_v20 }
 0x246   : > { %v1289_v51 = vpop.xlane.xlu1 %1288  ;;  %v1280_v52 = vpop.xlane.xlu0 %1279  ;;  %v2181_v53 = vsel %vm2159_vm3, %v2180_v44, %v2176_v50  ;;  %v1497_v44 = vsel %vm1244_vm1, %v1072_v26, 0.0 }
 0x247   : > { %v2185_v45 = vrot.slane %v1280_v52, %v4414_v9  ;;  %v2955_v18 = vrot.slane %v1289_v51, %v4412_v8  ;;  %v659_v51 = vld [vmem:[%s6765_s2 + $0x2b8] sm:$0xff] }
 0x248   : > { %v1075_v61 = vmul.f32 %v4483_v27, %v659_v51 }
 0x249   : > { %1480 = vadd.xlane.f32.xlu1 %v1479_v57  ;;  %v2186_v10 = vsel %vm2166_vm4, %v2185_v45, %v2181_v53  ;;  %1543 = vadd.xlane.f32.xlu0 %v1542_v60  ;;  %v1090_v57 = vmul.f32 %v4477_v23, %v674_v47  ;;  %v1482_v60 = vsel %vm1244_vm1, %v1067_v15, 0.0 }
 0x24a   : > { %v1295_v1 = vpop.xlane.xlu1 %1294  ;;  %v2758_v14 = vsel %vm2757_vm5, %v2186_v10, %v2167_v2  ;;  %v1286_v16 = vpop.xlane.xlu0 %1285  ;;  %v673_v2 = vld [vmem:[%s6765_s2 + $0x328] sm:$0xff] }
 0x24b   : > { %v2950_v17 = vrot.slane %v1286_v16, %v4410_v7  ;;  %v1089_v40 = vmul.f32 %v4477_v23, %v673_v2  ;;  %v2190_v53 = vrot.slane %v1295_v1, %v4408_v3  ;;  %v672_v1 = vld [vmem:[%s6765_s2 + $0x320] sm:$0xff]  ;;  %v1551_v27 = vsel %vm1244_vm1, %v1090_v57, 0.0  ;;  %v675_v2 = vld [vmem:[%s6765_s2 + $0x338] sm:$0xff]  ;;  %v701_v57 = vld [vmem:[%s6765_s2 + $0x408] sm:$0xff] }
 0x24c   : > { %v1088_v11 = vmul.f32 %v4477_v23, %v672_v1 }
 0x24d   : > { %1501 = vadd.xlane.f32.xlu1 %v1500_v19  ;;  %v2951_v0 = vsel %vm2152_vm2, %v2950_v17, %v2946_v56  ;;  %1474 = vadd.xlane.f32.xlu0 %v1473_v25  ;;  %v1548_v22 = vsel %vm1244_vm1, %v1089_v40, 0.0  ;;  %v1506_v19 = vsel %vm1244_vm1, %v1075_v61, 0.0  ;;  %v663_v61 = vld [vmem:[%s6765_s2 + $0x2d8] sm:$0xff] }
 0x24e   : > { %v1301_v42 = vpop.xlane.xlu1 %1300  ;;  %v1292_v49 = vpop.xlane.xlu0 %1291  ;;  %v2956_v37 = vsel %vm2159_vm3, %v2955_v18, %v2951_v0  ;;  %v662_v18 = vld [vmem:[%s6765_s2 + $0x2d0] sm:$0xff]  ;;  %v1545_v40 = vsel %vm1244_vm1, %v1088_v11, 0.0 }
 0x24f   : > { %v2960_v34 = vrot.slane %v1292_v49, %v4414_v9  ;;  %v2199_v59 = vrot.slane %v1301_v42, %v4412_v8 }
 0x251   : > { %1504 = vadd.xlane.f32.xlu1 %v1503_v39  ;;  %v2961_v48 = vsel %vm2166_vm4, %v2960_v34, %v2956_v37  ;;  %1498 = vadd.xlane.f32.xlu0 %v1497_v44  ;;  %v1078_v34 = vmul.f32 %v4486_v28, %v662_v18  ;;  %v1091_v44 = vmul.f32 %v4477_v23, %v675_v2  ;;  %v676_v18 = vld [vmem:[%s6765_s2 + $0x340] sm:$0xff] }
 0x252   : > { %v1307_v50 = vpop.xlane.xlu1 %1306  ;;  %v3532_v21 = vsel %vm2757_vm5, %v2961_v48, %v2942_v31  ;;  %v1298_v52 = vpop.xlane.xlu0 %1297  ;;  %v661_v31 = vld [vmem:[%s6765_s2 + $0x2c8] sm:$0xff]  ;;  %v660_v48 = vld [vmem:[%s6765_s2 + $0x2c0] sm:$0xff] }
 0x253   : > { %v2194_v45 = vrot.slane %v1298_v52, %v4410_v7  ;;  %v1077_v17 = vmul.f32 %v4486_v28, %v661_v31  ;;  %v2965_v20 = vrot.slane %v1307_v50, %v4408_v3 }
 0x255   : > { %1549 = vadd.xlane.f32.xlu1 %v1548_v22  ;;  %v2195_v6 = vsel %vm2152_vm2, %v2194_v45, %v2190_v53  ;;  %1483 = vadd.xlane.f32.xlu0 %v1482_v60  ;;  %v1512_v37 = vsel %vm1244_vm1, %v1077_v17, 0.0  ;;  %v1515_v53 = vsel %vm1244_vm1, %v1078_v34, 0.0  ;;  %v1554_v45 = vsel %vm1244_vm1, %v1091_v44, 0.0  ;;  %v685_v34 = vld [vmem:[%s6765_s2 + $0x388] sm:$0xff]  ;;  %v700_v44 = vld [vmem:[%s6765_s2 + $0x400] sm:$0xff] }
 0x256   : > { %v1313_v10 = vpop.xlane.xlu1 %1312  ;;  %v1304_v58 = vpop.xlane.xlu0 %1303  ;;  %v2200_v16 = vsel %vm2159_vm3, %v2199_v59, %v2195_v6  ;;  %v1076_v22 = vmul.f32 %v4486_v28, %v660_v48  ;;  %v1079_v17 = vmul.f32 %v4486_v28, %v663_v61 }
 0x257   : > { %v2204_v56 = vrot.slane %v1304_v58, %v4414_v9  ;;  %v2974_v39 = vrot.slane %v1313_v10, %v4412_v8 }
 0x259   : > { %1552 = vadd.xlane.f32.xlu1 %v1551_v27  ;;  %v2205_v25 = vsel %vm2166_vm4, %v2204_v56, %v2200_v16  ;;  %1507 = vadd.xlane.f32.xlu0 %v1506_v19  ;;  %v1117_v16 = vmul.f32 %v4515_v54, %v701_v57  ;;  %v1509_v27 = vsel %vm1244_vm1, %v1076_v22, 0.0  ;;  %v684_v57 = vld [vmem:[%s6765_s2 + $0x380] sm:$0xff] }
 0x25a   : > { %v1343_v26 = vpop.xlane.xlu1 %1342  ;;  %v5059_v0 = vsel %vm2759_vm6, %v2205_v25, %v2758_v14  ;;  %v1310_v42 = vpop.xlane.xlu0 %1309  ;;  %v677_v14 = vld [vmem:[%s6765_s2 + $0x348] sm:$0xff] }
 0x25b   : > { %v2969_v49 = vrot.slane %v1310_v42, %v4410_v7  ;;  %v1093_v23 = vmul.f32 %v4489_v29, %v677_v14  ;;  %v2228_v10 = vrot.slane %v1343_v26, %v4408_v3  ;;  %v1632_v42 = vsel %vm1244_vm1, %v1117_v16, 0.0  ;;  %v665_v16 = vld [vmem:[%s6765_s2 + $0x2e8] sm:$0xff] }
 0x25d   : > { %1513 = vadd.xlane.f32.xlu1 %v1512_v37  ;;  %v2970_v15 = vsel %vm2152_vm2, %v2969_v49, %v2965_v20  ;;  %1546 = vadd.xlane.f32.xlu0 %v1545_v40  ;;  %v1560_v58 = vsel %vm1244_vm1, %v1093_v23, 0.0  ;;  %v1518_v49 = vsel %vm1244_vm1, %v1079_v17, 0.0  ;;  %v1092_v37 = vmul.f32 %v4489_v29, %v676_v18  ;;  %v686_v23 = vld [vmem:[%s6765_s2 + $0x390] sm:$0xff] }
 0x25e   : > { %v1349_v47 = vpop.xlane.xlu1 %1348  ;;  %v1316_v50 = vpop.xlane.xlu0 %1315  ;;  %v2975_v51 = vsel %vm2159_vm3, %v2974_v39, %v2970_v15  ;;  %v702_v17 = vld [vmem:[%s6765_s2 + $0x410] sm:$0xff] }
 0x25f   : > { %v2979_v52 = vrot.slane %v1316_v50, %v4414_v9  ;;  %v2237_v56 = vrot.slane %v1349_v47, %v4412_v8  ;;  %v1101_v50 = vmul.f32 %v4492_v30, %v685_v34  ;;  %v679_v34 = vld [vmem:[%s6765_s2 + $0x358] sm:$0xff] }
 0x261   : > { %1516 = vadd.xlane.f32.xlu1 %v1515_v53  ;;  %v2980_v59 = vsel %vm2166_vm4, %v2979_v52, %v2975_v51  ;;  %1555 = vadd.xlane.f32.xlu0 %v1554_v45  ;;  %v1557_v52 = vsel %vm1244_vm1, %v1092_v37, 0.0  ;;  %v1116_v53 = vmul.f32 %v4515_v54, %v700_v44 }
 0x262   : > { %v1355_v60 = vpop.xlane.xlu1 %1354  ;;  %v5089_v31 = vsel %vm2759_vm6, %v2980_v59, %v3532_v21  ;;  %v1346_v6 = vpop.xlane.xlu0 %1345  ;;  %v678_v21 = vld [vmem:[%s6765_s2 + $0x350] sm:$0xff] }
 0x263   : > { %v2232_v1 = vrot.slane %v1346_v6, %v4410_v7  ;;  %v1094_v20 = vmul.f32 %v4489_v29, %v678_v21  ;;  %v3003_v15 = vrot.slane %v1355_v60, %v4408_v3  ;;  %v1584_v6 = vsel %vm1244_vm1, %v1101_v50, 0.0 }
 0x265   : > { %1561 = vadd.xlane.f32.xlu1 %v1560_v58  ;;  %v2233_v19 = vsel %vm2152_vm2, %v2232_v1, %v2228_v10  ;;  %1510 = vadd.xlane.f32.xlu0 %v1509_v27  ;;  %v1563_v48 = vsel %vm1244_vm1, %v1094_v20, 0.0  ;;  %v1102_v10 = vmul.f32 %v4492_v30, %v686_v23  ;;  %v1629_v1 = vsel %vm1244_vm1, %v1116_v53, 0.0  ;;  %v666_v20 = vld [vmem:[%s6765_s2 + $0x2f0] sm:$0xff]  ;;  %v703_v23 = vld [vmem:[%s6765_s2 + $0x418] sm:$0xff] }
 0x266   : > { %v1361_v11 = vpop.xlane.xlu1 %1360  ;;  %v1352_v25 = vpop.xlane.xlu0 %1351  ;;  %v2238_v26 = vsel %vm2159_vm3, %v2237_v56, %v2233_v19  ;;  %v1100_v58 = vmul.f32 %v4492_v30, %v684_v57 }
 0x267   : > { %v2242_v2 = vrot.slane %v1352_v25, %v4414_v9  ;;  %v3012_v51 = vrot.slane %v1361_v11, %v4412_v8  ;;  %v1587_v18 = vsel %vm1244_vm1, %v1102_v10, 0.0  ;;  %v1081_v25 = vmul.f32 %v4486_v28, %v665_v16 }
 0x269   : > { %1633 = vadd.xlane.f32.xlu1 %v1632_v42  ;;  %v5115_v39 = vsel %vm2166_vm4, %v2242_v2, %v2238_v26  ;;  %1519 = vadd.xlane.f32.xlu0 %v1518_v49  ;;  %v1581_v2 = vsel %vm1244_vm1, %v1100_v58, 0.0  ;;  %v1118_v42 = vmul.f32 %v4515_v54, %v702_v17  ;;  %v1119_v58 = vmul.f32 %v4515_v54, %v703_v23  ;;  %v687_v17 = vld [vmem:[%s6765_s2 + $0x398] sm:$0xff] }
 0x26a   : > { %v1319_v40 = vpop.xlane.xlu1 %1318  ;;  %v1358_v14 = vpop.xlane.xlu0 %1357  ;;  %v667_v23 = vld [vmem:[%s6765_s2 + $0x2f8] sm:$0xff] }
 0x26b   : > { %v3007_v47 = vrot.slane %v1358_v14, %v4410_v7  ;;  %v2209_v19 = vrot.slane %v1319_v40, %v4408_v3  ;;  %v1635_v50 = vsel %vm1244_vm1, %v1118_v42, 0.0 }
 0x26d   : > { %1564 = vadd.xlane.f32.xlu1 %v1563_v48  ;;  %v3008_v45 = vsel %vm2152_vm2, %v3007_v47, %v3003_v15  ;;  %1558 = vadd.xlane.f32.xlu0 %v1557_v52  ;;  %v1524_v15 = vsel %vm1244_vm1, %v1081_v25, 0.0  ;;  %v1082_v47 = vmul.f32 %v4486_v28, %v666_v20  ;;  %v681_v48 = vld [vmem:[%s6765_s2 + $0x368] sm:$0xff] }
 0x26e   : > { %v1325_v22 = vpop.xlane.xlu1 %1324  ;;  %v1364_v59 = vpop.xlane.xlu0 %1363  ;;  %v3013_v60 = vsel %vm2159_vm3, %v3012_v51, %v3008_v45  ;;  %v1095_v51 = vmul.f32 %v4489_v29, %v679_v34  ;;  %v1097_v57 = vmul.f32 %v4489_v29, %v681_v48  ;;  %v709_v25 = vld [vmem:[%s6765_s2 + $0x448] sm:$0xff] }
 0x26f   : > { %v3017_v61 = vrot.slane %v1364_v59, %v4414_v9  ;;  %v2218_v26 = vrot.slane %v1325_v22, %v4412_v8 }
 0x271   : > { %1585 = vadd.xlane.f32.xlu1 %v1584_v6  ;;  %v5144_v56 = vsel %vm2166_vm4, %v3017_v61, %v3013_v60  ;;  %1630 = vadd.xlane.f32.xlu0 %v1629_v1  ;;  %v1527_v61 = vsel %vm1244_vm1, %v1082_v47, 0.0  ;;  %v1566_v1 = vsel %vm1244_vm1, %v1095_v51, 0.0 }
 0x272   : > { %v1331_v27 = vpop.xlane.xlu1 %1330  ;;  %v1322_v21 = vpop.xlane.xlu0 %1321 }
 0x273   : > { %v2213_v11 = vrot.slane %v1322_v21, %v4410_v7  ;;  %v2984_v59 = vrot.slane %v1331_v27, %v4408_v3 }
 0x275   : > { %1588 = vadd.xlane.f32.xlu1 %v1587_v18  ;;  %v2214_v49 = vsel %vm2152_vm2, %v2213_v11, %v2209_v19  ;;  %1582 = vadd.xlane.f32.xlu0 %v1581_v2  ;;  %v1572_v11 = vsel %vm1244_vm1, %v1097_v57, 0.0  ;;  %v1103_v2 = vmul.f32 %v4492_v30, %v687_v17 }
 0x276   : > { %v1337_v37 = vpop.xlane.xlu1 %1336  ;;  %v1328_v40 = vpop.xlane.xlu0 %1327  ;;  %v2219_v44 = vsel %vm2159_vm3, %v2218_v26, %v2214_v49  ;;  %v1638_v26 = vsel %vm1244_vm1, %v1119_v58, 0.0  ;;  %v664_v49 = vld [vmem:[%s6765_s2 + $0x2e0] sm:$0xff] }
 0x277   : > { %v2223_v14 = vrot.slane %v1328_v40, %v4414_v9  ;;  %v2993_v10 = vrot.slane %v1337_v37, %v4412_v8  ;;  %v1125_v40 = vmul.f32 %v4522_v62, %v709_v25  ;;  %v1080_v51 = vmul.f32 %v4486_v28, %v664_v49 }
 0x279   : > { %1525 = vadd.xlane.f32.xlu1 %v1524_v15  ;;  %v2224_v52 = vsel %vm2166_vm4, %v2223_v14, %v2219_v44  ;;  %1636 = vadd.xlane.f32.xlu0 %v1635_v50  ;;  %v1590_v50 = vsel %vm1244_vm1, %v1103_v2, 0.0  ;;  %v1656_v57 = vsel %vm1244_vm1, %v1125_v40, 0.0  ;;  %v704_v2 = vld [vmem:[%s6765_s2 + $0x420] sm:$0xff] }
 0x27a   : > { %v1367_v53 = vpop.xlane.xlu1 %1366  ;;  %v2762_v45 = vsel %vm2761_vm7, %v2224_v52, %v5059_v0  ;;  %v1334_v22 = vpop.xlane.xlu0 %1333  ;;  %v705_v0 = vld [vmem:[%s6765_s2 + $0x428] sm:$0xff] }
 0x27b   : > { %v2988_v60 = vrot.slane %v1334_v22, %v4410_v7  ;;  %v2764_v6 = vsel %vm2763_vm8, %v5115_v39, %v2762_v45  ;;  %v1121_v18 = vmul.f32 %v4515_v54, %v705_v0  ;;  %v2247_v44 = vrot.slane %v1367_v53, %v4408_v3  ;;  %v680_v0 = vld [vmem:[%s6765_s2 + $0x360] sm:$0xff] }
 0x27d   : > { %1528 = vadd.xlane.f32.xlu1 %v1527_v61  ;;  %v2989_v16 = vsel %vm2152_vm2, %v2988_v60, %v2984_v59  ;;  %1567 = vadd.xlane.f32.xlu0 %v1566_v1  ;;  %v1644_v15 = vsel %vm1244_vm1, %v1121_v18, 0.0  ;;  %v1521_v60 = vsel %vm1244_vm1, %v1080_v51, 0.0  ;;  %v1083_v61 = vmul.f32 %v4486_v28, %v667_v23 }
 0x27e   : > { %v1373_v27 = vpop.xlane.xlu1 %1372  ;;  %v1340_v39 = vpop.xlane.xlu0 %1339  ;;  %v2994_v21 = vsel %vm2159_vm3, %v2993_v10, %v2989_v16  ;;  %v717_v10 = vld [vmem:[%s6765_s2 + $0x488] sm:$0xff]  ;;  %v1096_v18 = vmul.f32 %v4489_v29, %v680_v0 }
 0x27f   : > { %v2998_v19 = vrot.slane %v1340_v39, %v4414_v9  ;;  %v2256_v48 = vrot.slane %v1373_v27, %v4412_v8 }
 0x280   : > { %v1569_v40 = vsel %vm1244_vm1, %v1096_v18, 0.0 }
 0x281   : > { %1573 = vadd.xlane.f32.xlu1 %v1572_v11  ;;  %v2999_v42 = vsel %vm2166_vm4, %v2998_v19, %v2994_v21  ;;  %1639 = vadd.xlane.f32.xlu0 %v1638_v26  ;;  %v1133_v21 = vmul.f32 %v4525_v63, %v717_v10  ;;  %v1530_v11 = vsel %vm1244_vm1, %v1083_v61, 0.0  ;;  %v716_v61 = vld [vmem:[%s6765_s2 + $0x480] sm:$0xff] }
 0x282   : > { %v1379_v20 = vpop.xlane.xlu1 %1378  ;;  %v3534_v37 = vsel %vm2761_vm7, %v2999_v42, %v5089_v31  ;;  %v1370_v34 = vpop.xlane.xlu0 %1369  ;;  %v710_v31 = vld [vmem:[%s6765_s2 + $0x450] sm:$0xff] }
 0x283   : > { %v2251_v14 = vrot.slane %v1370_v34, %v4410_v7  ;;  %v3535_v47 = vsel %vm2763_vm8, %v5144_v56, %v3534_v37  ;;  %v1126_v59 = vmul.f32 %v4522_v62, %v710_v31  ;;  %v3022_v17 = vrot.slane %v1379_v20, %v4408_v3 }
 0x284   : > { %v1680_v37 = vsel %vm1244_vm1, %v1133_v21, 0.0 }
 0x285   : > { %1645 = vadd.xlane.f32.xlu1 %v1644_v15  ;;  %v2252_v52 = vsel %vm2152_vm2, %v2251_v14, %v2247_v44  ;;  %1591 = vadd.xlane.f32.xlu0 %v1590_v50  ;;  %v1659_v28 = vsel %vm1244_vm1, %v1126_v59, 0.0  ;;  %v1120_v44 = vmul.f32 %v4515_v54, %v704_v2  ;;  %v711_v14 = vld [vmem:[%s6765_s2 + $0x458] sm:$0xff]  ;;  %v708_v50 = vld [vmem:[%s6765_s2 + $0x440] sm:$0xff] }
 0x286   : > { %v1385_v53 = vpop.xlane.xlu1 %1384  ;;  %v1376_v56 = vpop.xlane.xlu0 %1375  ;;  %v2257_v45 = vsel %vm2159_vm3, %v2256_v48, %v2252_v52 }
 0x287   : > { %v2261_v22 = vrot.slane %v1376_v56, %v4414_v9  ;;  %v3031_v19 = vrot.slane %v1385_v53, %v4412_v8  ;;  %v1127_v56 = vmul.f32 %v4522_v62, %v711_v14 }
 0x289   : > { %1657 = vadd.xlane.f32.xlu1 %v1656_v57  ;;  %v2262_v1 = vsel %vm2166_vm4, %v2261_v22, %v2257_v45  ;;  %1522 = vadd.xlane.f32.xlu0 %v1521_v60  ;;  %v1641_v22 = vsel %vm1244_vm1, %v1120_v44, 0.0  ;;  %v1124_v57 = vmul.f32 %v4522_v62, %v708_v50  ;;  %v1662_v0 = vsel %vm1244_vm1, %v1127_v56, 0.0  ;;  %v718_v44 = vld [vmem:[%s6765_s2 + $0x490] sm:$0xff] }
 0x28a   : > { %v1391_v58 = vpop.xlane.xlu1 %1390  ;;  %v2766_v16 = vsel %vm2765_vm9, %v2262_v1, %v2764_v6  ;;  %v1382_v27 = vpop.xlane.xlu0 %1381  ;;  %v693_v6 = vld [vmem:[%s6765_s2 + $0x3c8] sm:$0xff] }
 0x28b   : > { %v3026_v39 = vrot.slane %v1382_v27, %v4410_v7  ;;  %v1109_v34 = vmul.f32 %v4501_v35, %v693_v6  ;;  %v2266_v52 = vrot.slane %v1391_v58, %v4408_v3 }
 0x28d   : > { %1660 = vadd.xlane.f32.xlu1 %v1659_v28  ;;  %v3027_v25 = vsel %vm2152_vm2, %v3026_v39, %v3022_v17  ;;  %1531 = vadd.xlane.f32.xlu0 %v1530_v11  ;;  %v1608_v23 = vsel %vm1244_vm1, %v1109_v34, 0.0  ;;  %v1653_v17 = vsel %vm1244_vm1, %v1124_v57, 0.0  ;;  %v1132_v39 = vmul.f32 %v4525_v63, %v716_v61  ;;  %v733_v28 = vld [vmem:[%s6765_s2 + $0x508] sm:$0xff]  ;;  %v692_v11 = vld [vmem:[%s6765_s2 + $0x3c0] sm:$0xff] }
 0x28e   : > { %v1397_v26 = vpop.xlane.xlu1 %1396  ;;  %v1388_v42 = vpop.xlane.xlu0 %1387  ;;  %v3032_v20 = vsel %vm2159_vm3, %v3031_v19, %v3027_v25 }
 0x28f   : > { %v3036_v49 = vrot.slane %v1388_v42, %v4414_v9  ;;  %v2275_v45 = vrot.slane %v1397_v26, %v4412_v8  ;;  %v1149_v42 = vmul.f32 %v4518_v55, %v733_v28 }
 0x291   : > { %1681 = vadd.xlane.f32.xlu1 %v1680_v37  ;;  %v3037_v15 = vsel %vm2166_vm4, %v3036_v49, %v3032_v20  ;;  %1570 = vadd.xlane.f32.xlu0 %v1569_v40  ;;  %v1677_v49 = vsel %vm1244_vm1, %v1132_v39, 0.0  ;;  %v1108_v37 = vmul.f32 %v4501_v35, %v692_v11  ;;  %v1728_v50 = vsel %vm1244_vm1, %v1149_v42, 0.0  ;;  %v732_v39 = vld [vmem:[%s6765_s2 + $0x500] sm:$0xff] }
 0x292   : > { %v1403_v48 = vpop.xlane.xlu1 %1402  ;;  %v3536_v51 = vsel %vm2765_vm9, %v3037_v15, %v3535_v47  ;;  %v1394_v31 = vpop.xlane.xlu0 %1393  ;;  %v694_v47 = vld [vmem:[%s6765_s2 + $0x3d0] sm:$0xff] }
 0x293   : > { %v2270_v53 = vrot.slane %v1394_v31, %v4410_v7  ;;  %v1110_v27 = vmul.f32 %v4501_v35, %v694_v47  ;;  %v3041_v25 = vrot.slane %v1403_v48, %v4408_v3 }
 0x295   : > { %1609 = vadd.xlane.f32.xlu1 %v1608_v23  ;;  %v2271_v59 = vsel %vm2152_vm2, %v2270_v53, %v2266_v52  ;;  %1642 = vadd.xlane.f32.xlu0 %v1641_v22  ;;  %v1611_v2 = vsel %vm1244_vm1, %v1110_v27, 0.0  ;;  %v1605_v52 = vsel %vm1244_vm1, %v1108_v37, 0.0  ;;  %v1134_v53 = vmul.f32 %v4525_v63, %v718_v44  ;;  %v765_v23 = vld [vmem:[%s6765_s2 + $0x608] sm:$0xff]  ;;  %v719_v22 = vld [vmem:[%s6765_s2 + $0x498] sm:$0xff] }
 0x296   : > { %v1409_v60 = vpop.xlane.xlu1 %1408  ;;  %v1400_v10 = vpop.xlane.xlu0 %1399  ;;  %v2276_v1 = vsel %vm2159_vm3, %v2275_v45, %v2271_v59 }
 0x297   : > { %v2280_v58 = vrot.slane %v1400_v10, %v4414_v9  ;;  %v3050_v20 = vrot.slane %v1409_v60, %v4412_v8  ;;  %v1181_v10 = vmul.f32 %v4547_v24, %v765_v23 }
 0x299   : > { %1663 = vadd.xlane.f32.xlu1 %v1662_v0  ;;  %v2281_v21 = vsel %vm2166_vm4, %v2280_v58, %v2276_v1  ;;  %1654 = vadd.xlane.f32.xlu0 %v1653_v17  ;;  %v1683_v58 = vsel %vm1244_vm1, %v1134_v53, 0.0  ;;  %v1135_v0 = vmul.f32 %v4525_v63, %v719_v22  ;;  %v1824_v11 = vsel %vm1244_vm1, %v1181_v10, 0.0  ;;  %v734_v53 = vld [vmem:[%s6765_s2 + $0x510] sm:$0xff] }
 0x29a   : > { %v1439_v19 = vpop.xlane.xlu1 %1438  ;;  %v5295_v18 = vsel %vm2767_vm10, %v2281_v21, %v2766_v16  ;;  %v1406_v6 = vpop.xlane.xlu0 %1405  ;;  %v713_v16 = vld [vmem:[%s6765_s2 + $0x468] sm:$0xff] }
 0x29b   : > { %v3045_v26 = vrot.slane %v1406_v6, %v4410_v7  ;;  %v1129_v31 = vmul.f32 %v4522_v62, %v713_v16  ;;  %v2304_v59 = vrot.slane %v1439_v19, %v4408_v3 }
 0x29d   : > { %1612 = vadd.xlane.f32.xlu1 %v1611_v2  ;;  %v3046_v34 = vsel %vm2152_vm2, %v3045_v26, %v3041_v25  ;;  %1678 = vadd.xlane.f32.xlu0 %v1677_v49  ;;  %v1668_v61 = vsel %vm1244_vm1, %v1129_v31, 0.0  ;;  %v1686_v25 = vsel %vm1244_vm1, %v1135_v0, 0.0  ;;  %v1148_v26 = vmul.f32 %v4518_v55, %v732_v39  ;;  %v767_v2 = vld [vmem:[%s6765_s2 + $0x618] sm:$0xff] }
 0x29e   : > { %v1445_v40 = vpop.xlane.xlu1 %1444  ;;  %v1412_v14 = vpop.xlane.xlu0 %1411  ;;  %v3051_v15 = vsel %vm2159_vm3, %v3050_v20, %v3046_v34  ;;  %v695_v49 = vld [vmem:[%s6765_s2 + $0x3d8] sm:$0xff]  ;;  %v1183_v44 = vmul.f32 %v4547_v24, %v767_v2 }
 0x29f   : > { %v3055_v48 = vrot.slane %v1412_v14, %v4414_v9  ;;  %v2313_v1 = vrot.slane %v1445_v40, %v4412_v8 }
 0x2a0   : > { %v1830_v22 = vsel %vm1244_vm1, %v1183_v44, 0.0  ;;  %v742_v44 = vld [vmem:[%s6765_s2 + $0x550] sm:$0xff] }
 0x2a1   : > { %1729 = vadd.xlane.f32.xlu1 %v1728_v50  ;;  %v3056_v56 = vsel %vm2166_vm4, %v3055_v48, %v3051_v15  ;;  %1606 = vadd.xlane.f32.xlu0 %v1605_v52  ;;  %v1725_v15 = vsel %vm1244_vm1, %v1148_v26, 0.0  ;;  %v1111_v48 = vmul.f32 %v4501_v35, %v695_v49  ;;  %v726_v50 = vld [vmem:[%s6765_s2 + $0x4d0] sm:$0xff]  ;;  %v712_v26 = vld [vmem:[%s6765_s2 + $0x460] sm:$0xff] }
 0x2a2   : > { %v1451_v45 = vpop.xlane.xlu1 %1450  ;;  %v5325_v57 = vsel %vm2767_vm10, %v3056_v56, %v3536_v51  ;;  %v1442_v47 = vpop.xlane.xlu0 %1441  ;;  %v724_v51 = vld [vmem:[%s6765_s2 + $0x4c0] sm:$0xff] }
 0x2a3   : > { %v2308_v60 = vrot.slane %v1442_v47, %v4410_v7  ;;  %v1140_v6 = vmul.f32 %v4535_v12, %v724_v51  ;;  %v3079_v16 = vrot.slane %v1451_v45, %v4408_v3  ;;  %v1142_v47 = vmul.f32 %v4535_v12, %v726_v50 }
 0x2a5   : > { %1669 = vadd.xlane.f32.xlu1 %v1668_v61  ;;  %v2309_v27 = vsel %vm2152_vm2, %v2308_v60, %v2304_v59  ;;  %1684 = vadd.xlane.f32.xlu0 %v1683_v58  ;;  %v1701_v40 = vsel %vm1244_vm1, %v1140_v6, 0.0  ;;  %v1614_v59 = vsel %vm1244_vm1, %v1111_v48, 0.0  ;;  %v1150_v60 = vmul.f32 %v4518_v55, %v734_v53  ;;  %v727_v61 = vld [vmem:[%s6765_s2 + $0x4d8] sm:$0xff]  ;;  %v764_v48 = vld [vmem:[%s6765_s2 + $0x600] sm:$0xff] }
 0x2a6   : > { %v1457_v17 = vpop.xlane.xlu1 %1456  ;;  %v1448_v28 = vpop.xlane.xlu0 %1447  ;;  %v2314_v21 = vsel %vm2159_vm3, %v2313_v1, %v2309_v27  ;;  %v735_v58 = vld [vmem:[%s6765_s2 + $0x518] sm:$0xff]  ;;  %v1143_v39 = vmul.f32 %v4535_v12, %v727_v61  ;;  %v766_v61 = vld [vmem:[%s6765_s2 + $0x610] sm:$0xff] }
 0x2a7   : > { %v2318_v19 = vrot.slane %v1448_v28, %v4414_v9  ;;  %v3088_v14 = vrot.slane %v1457_v17, %v4412_v8  ;;  %v1707_v17 = vsel %vm1244_vm1, %v1142_v47, 0.0  ;;  %v1180_v47 = vmul.f32 %v4547_v24, %v764_v48 }
 0x2a9   : > { %1825 = vadd.xlane.f32.xlu1 %v1824_v11  ;;  %v5351_v42 = vsel %vm2166_vm4, %v2318_v19, %v2314_v21  ;;  %1687 = vadd.xlane.f32.xlu0 %v1686_v25  ;;  %v1731_v21 = vsel %vm1244_vm1, %v1150_v60, 0.0  ;;  %v1151_v19 = vmul.f32 %v4518_v55, %v735_v58  ;;  %v740_v11 = vld [vmem:[%s6765_s2 + $0x540] sm:$0xff] }
 0x2aa   : > { %v1415_v20 = vpop.xlane.xlu1 %1414  ;;  %v1454_v37 = vpop.xlane.xlu0 %1453 }
 0x2ab   : > { %v3083_v34 = vrot.slane %v1454_v37, %v4410_v7  ;;  %v2285_v51 = vrot.slane %v1415_v20, %v4408_v3  ;;  %v1710_v37 = vsel %vm1244_vm1, %v1143_v39, 0.0  ;;  %v1182_v39 = vmul.f32 %v4547_v24, %v766_v61 }
 0x2ad   : > { %1702 = vadd.xlane.f32.xlu1 %v1701_v40  ;;  %v3084_v31 = vsel %vm2152_vm2, %v3083_v34, %v3079_v16  ;;  %1726 = vadd.xlane.f32.xlu0 %v1725_v15  ;;  %v1156_v16 = vmul.f32 %v4528_v4, %v740_v11  ;;  %v1734_v34 = vsel %vm1244_vm1, %v1151_v19, 0.0  ;;  %v1128_v40 = vmul.f32 %v4522_v62, %v712_v26  ;;  %v725_v11 = vld [vmem:[%s6765_s2 + $0x4c8] sm:$0xff] }
 0x2ae   : > { %v1421_v52 = vpop.xlane.xlu1 %1420  ;;  %v1460_v23 = vpop.xlane.xlu0 %1459  ;;  %v3089_v56 = vsel %vm2159_vm3, %v3088_v14, %v3084_v31 }
 0x2af   : > { %v3093_v45 = vrot.slane %v1460_v23, %v4414_v9  ;;  %v2294_v28 = vrot.slane %v1421_v52, %v4412_v8  ;;  %v1749_v23 = vsel %vm1244_vm1, %v1156_v16, 0.0  ;;  %v1827_v16 = vsel %vm1244_vm1, %v1182_v39, 0.0  ;;  %v774_v39 = vld [vmem:[%s6765_s2 + $0x650] sm:$0xff] }
 0x2b1   : > { %1831 = vadd.xlane.f32.xlu1 %v1830_v22  ;;  %v5380_v10 = vsel %vm2166_vm4, %v3093_v45, %v3089_v56  ;;  %1615 = vadd.xlane.f32.xlu0 %v1614_v59  ;;  %v1158_v56 = vmul.f32 %v4528_v4, %v742_v44  ;;  %v1665_v22 = vsel %vm1244_vm1, %v1128_v40, 0.0 }
 0x2b2   : > { %v1427_v1 = vpop.xlane.xlu1 %1426  ;;  %v1418_v0 = vpop.xlane.xlu0 %1417 }
 0x2b3   : > { %v2289_v27 = vrot.slane %v1418_v0, %v4410_v7  ;;  %v3060_v52 = vrot.slane %v1427_v1, %v4408_v3 }
 0x2b5   : > { %1708 = vadd.xlane.f32.xlu1 %v1707_v17  ;;  %v2290_v6 = vsel %vm2152_vm2, %v2289_v27, %v2285_v51  ;;  %1732 = vadd.xlane.f32.xlu0 %v1731_v21  ;;  %v1755_v51 = vsel %vm1244_vm1, %v1158_v56, 0.0  ;;  %v1821_v17 = vsel %vm1244_vm1, %v1180_v47, 0.0  ;;  %v773_v47 = vld [vmem:[%s6765_s2 + $0x648] sm:$0xff] }
 0x2b6   : > { %v1433_v25 = vpop.xlane.xlu1 %1432  ;;  %v1424_v2 = vpop.xlane.xlu0 %1423  ;;  %v2295_v20 = vsel %vm2159_vm3, %v2294_v28, %v2290_v6  ;;  %v750_v28 = vld [vmem:[%s6765_s2 + $0x590] sm:$0xff] }
 0x2b7   : > { %v2299_v49 = vrot.slane %v1424_v2, %v4414_v9  ;;  %v3069_v45 = vrot.slane %v1433_v25, %v4412_v8 }
 0x2b9   : > { %1711 = vadd.xlane.f32.xlu1 %v1710_v37  ;;  %v2300_v14 = vsel %vm2166_vm4, %v2299_v49, %v2295_v20  ;;  %1735 = vadd.xlane.f32.xlu0 %v1734_v34  ;;  %v1166_v49 = vmul.f32 %v4531_v5, %v750_v28  ;;  %v1141_v34 = vmul.f32 %v4535_v12, %v725_v11 }
 0x2ba   : > { %v1463_v15 = vpop.xlane.xlu1 %1462  ;;  %v1430_v50 = vpop.xlane.xlu0 %1429  ;;  %v5414_v31 = vsel %vm2769_vm11, %v2300_v14, %v5295_v18  ;;  %v749_v18 = vld [vmem:[%s6765_s2 + $0x588] sm:$0xff] }
 0x2bb   : > { %v3064_v53 = vrot.slane %v1430_v50, %v4410_v7  ;;  %v1165_v27 = vmul.f32 %v4531_v5, %v749_v18  ;;  %v2323_v26 = vrot.slane %v1463_v15, %v4408_v3  ;;  %v741_v14 = vld [vmem:[%s6765_s2 + $0x548] sm:$0xff] }
 0x2bd   : > { %1750 = vadd.xlane.f32.xlu1 %v1749_v23  ;;  %v3065_v59 = vsel %vm2152_vm2, %v3064_v53, %v3060_v52  ;;  %1666 = vadd.xlane.f32.xlu0 %v1665_v22  ;;  %v1776_v20 = vsel %vm1244_vm1, %v1165_v27, 0.0  ;;  %v1779_v23 = vsel %vm1244_vm1, %v1166_v49, 0.0  ;;  %v1157_v22 = vmul.f32 %v4528_v4, %v741_v14 }
 0x2be   : > { %v1469_v60 = vpop.xlane.xlu1 %1468  ;;  %v1436_v1 = vpop.xlane.xlu0 %1435  ;;  %v3070_v58 = vsel %vm2159_vm3, %v3069_v45, %v3065_v59  ;;  %v1704_v45 = vsel %vm1244_vm1, %v1141_v34, 0.0 }
 0x2bf   : > { %v3074_v0 = vrot.slane %v1436_v1, %v4414_v9  ;;  %v2332_v37 = vrot.slane %v1469_v60, %v4412_v8  ;;  %v748_v60 = vld [vmem:[%s6765_s2 + $0x580] sm:$0xff]  ;;  %v1752_v27 = vsel %vm1244_vm1, %v1157_v22, 0.0 }
 0x2c1   : > { %1756 = vadd.xlane.f32.xlu1 %v1755_v51  ;;  %v3075_v21 = vsel %vm2166_vm4, %v3074_v0, %v3070_v58  ;;  %1822 = vadd.xlane.f32.xlu0 %v1821_v17  ;;  %v1189_v51 = vmul.f32 %v4554_v32, %v773_v47  ;;  %v1164_v17 = vmul.f32 %v4531_v5, %v748_v60  ;;  %v769_v47 = vld [vmem:[%s6765_s2 + $0x628] sm:$0xff] }
 0x2c2   : > { %v1490_v19 = vpop.xlane.xlu1 %1489  ;;  %v1466_v6 = vpop.xlane.xlu0 %1465  ;;  %v5445_v25 = vsel %vm2769_vm11, %v3075_v21, %v5325_v57  ;;  %v768_v57 = vld [vmem:[%s6765_s2 + $0x620] sm:$0xff] }
 0x2c3   : > { %v2327_v2 = vrot.slane %v1466_v6, %v4410_v7  ;;  %v2346_v52 = vrot.slane %v1490_v19, %v4410_v7  ;;  %v1184_v56 = vmul.f32 %v4547_v24, %v768_v57  ;;  %v743_v19 = vld [vmem:[%s6765_s2 + $0x558] sm:$0xff]  ;;  %v1773_v49 = vsel %vm1244_vm1, %v1164_v17, 0.0 }
 0x2c4   : > { %v751_v57 = vld [vmem:[%s6765_s2 + $0x598] sm:$0xff] }
 0x2c5   : > { %1777 = vadd.xlane.f32.xlu1 %v1776_v20  ;;  %v2328_v40 = vsel %vm2152_vm2, %v2327_v2, %v2323_v26  ;;  %1828 = vadd.xlane.f32.xlu0 %v1827_v16  ;;  %v1833_v0 = vsel %vm1244_vm1, %v1184_v56, 0.0  ;;  %v1848_v2 = vsel %vm1244_vm1, %v1189_v51, 0.0  ;;  %v1190_v20 = vmul.f32 %v4554_v32, %v774_v39  ;;  %v781_v16 = vld [vmem:[%s6765_s2 + $0x688] sm:$0xff]  ;;  %v782_v56 = vld [vmem:[%s6765_s2 + $0x690] sm:$0xff]  ;;  %v772_v39 = vld [vmem:[%s6765_s2 + $0x640] sm:$0xff] }
 0x2c6   : > { %v1493_v44 = vpop.xlane.xlu1 %1492  ;;  %v1487_v15 = vpop.xlane.xlu0 %1486  ;;  %v2333_v50 = vsel %vm2159_vm3, %v2332_v37, %v2328_v40  ;;  %v1159_v37 = vmul.f32 %v4528_v4, %v743_v19  ;;  %v797_v51 = vld [vmem:[%s6765_s2 + $0x708] sm:$0xff] }
 0x2c7   : > { %v2351_v48 = vrot.slane %v1493_v44, %v4412_v8  ;;  %v2342_v53 = vrot.slane %v1487_v15, %v4408_v3 }
 0x2c9   : > { %1780 = vadd.xlane.f32.xlu1 %v1779_v23  ;;  %v2347_v18 = vsel %vm2152_vm2, %v2346_v52, %v2342_v53  ;;  %1705 = vadd.xlane.f32.xlu0 %v1704_v45  ;;  %v1758_v53 = vsel %vm1244_vm1, %v1159_v37, 0.0  ;;  %v1167_v23 = vmul.f32 %v4531_v5, %v751_v57 }
 0x2ca   : > { %v1538_v59 = vpop.xlane.xlu1 %1537  ;;  %v2352_v61 = vsel %vm2159_vm3, %v2351_v48, %v2347_v18  ;;  %v1472_v1 = vpop.xlane.xlu0 %1471  ;;  %v1851_v48 = vsel %vm1244_vm1, %v1190_v20, 0.0  ;;  %v1188_v20 = vmul.f32 %v4554_v32, %v772_v39  ;;  %v783_v39 = vld [vmem:[%s6765_s2 + $0x698] sm:$0xff] }
 0x2cb   : > { %v2337_v58 = vrot.slane %v1472_v1, %v4414_v9  ;;  %v2384_v14 = vrot.slane %v1538_v59, %v4410_v7  ;;  %v1198_v1 = vmul.f32 %v4563_v36, %v782_v56 }
 0x2cd   : > { %1834 = vadd.xlane.f32.xlu1 %v1833_v0  ;;  %v2338_v28 = vsel %vm2166_vm4, %v2337_v58, %v2333_v50  ;;  %1753 = vadd.xlane.f32.xlu0 %v1752_v27  ;;  %v1197_v50 = vmul.f32 %v4563_v36, %v781_v16  ;;  %v1782_v58 = vsel %vm1244_vm1, %v1167_v23, 0.0  ;;  %v1185_v0 = vmul.f32 %v4547_v24, %v769_v47  ;;  %v758_v23 = vld [vmem:[%s6765_s2 + $0x5d0] sm:$0xff] }
 0x2ce   : > { %v1541_v21 = vpop.xlane.xlu1 %1540  ;;  %v2771_v11 = vsel %vm2757_vm5, %v2338_v28, %v5351_v42  ;;  %v1496_v6 = vpop.xlane.xlu0 %1495 }
 0x2cf   : > { %v2356_v26 = vrot.slane %v1496_v6, %v4414_v9  ;;  %v2389_v52 = vrot.slane %v1541_v21, %v4412_v8  ;;  %v1213_v6 = vmul.f32 %v4557_v33, %v797_v51 }
 0x2d1   : > { %1849 = vadd.xlane.f32.xlu1 %v1848_v2  ;;  %v2357_v34 = vsel %vm2166_vm4, %v2356_v26, %v2352_v61  ;;  %1774 = vadd.xlane.f32.xlu0 %v1773_v49  ;;  %v1872_v61 = vsel %vm1244_vm1, %v1197_v50, 0.0  ;;  %v1836_v2 = vsel %vm1244_vm1, %v1185_v0, 0.0  ;;  %v757_v49 = vld [vmem:[%s6765_s2 + $0x5c8] sm:$0xff]  ;;  %v776_v0 = vld [vmem:[%s6765_s2 + $0x660] sm:$0xff] }
 0x2d2   : > { %v1478_v42 = vpop.xlane.xlu1 %1477  ;;  %v5504_v40 = vsel %vm2759_vm6, %v2357_v34, %v2771_v11  ;;  %v1535_v44 = vpop.xlane.xlu0 %1534  ;;  %v1875_v11 = vsel %vm1244_vm1, %v1198_v1, 0.0  ;;  %v780_v34 = vld [vmem:[%s6765_s2 + $0x680] sm:$0xff]  ;;  %v1173_v50 = vmul.f32 %v4538_v13, %v757_v49 }
 0x2d3   : > { %v2380_v15 = vrot.slane %v1535_v44, %v4408_v3  ;;  %v3102_v21 = vrot.slane %v1478_v42, %v4410_v7 }
 0x2d5   : > { %1852 = vadd.xlane.f32.xlu1 %v1851_v48  ;;  %v2385_v45 = vsel %vm2152_vm2, %v2384_v14, %v2380_v15  ;;  %1759 = vadd.xlane.f32.xlu0 %v1758_v53  ;;  %v1920_v48 = vsel %vm1244_vm1, %v1213_v6, 0.0  ;;  %v1196_v53 = vmul.f32 %v4563_v36, %v780_v34  ;;  %v1192_v6 = vmul.f32 %v4554_v32, %v776_v0 }
 0x2d6   : > { %v1481_v22 = vpop.xlane.xlu1 %1480  ;;  %v1544_v18 = vpop.xlane.xlu0 %1543  ;;  %v2390_v59 = vsel %vm2159_vm3, %v2389_v52, %v2385_v45  ;;  %v1845_v52 = vsel %vm1244_vm1, %v1188_v20, 0.0  ;;  %v789_v20 = vld [vmem:[%s6765_s2 + $0x6c8] sm:$0xff] }
 0x2d7   : > { %v2394_v60 = vrot.slane %v1544_v18, %v4414_v9  ;;  %v3107_v26 = vrot.slane %v1481_v22, %v4412_v8  ;;  %v775_v22 = vld [vmem:[%s6765_s2 + $0x658] sm:$0xff]  ;;  %v1869_v1 = vsel %vm1244_vm1, %v1196_v53, 0.0 }
 0x2d9   : > { %1873 = vadd.xlane.f32.xlu1 %v1872_v61  ;;  %v5530_v27 = vsel %vm2166_vm4, %v2394_v60, %v2390_v59  ;;  %1783 = vadd.xlane.f32.xlu0 %v1782_v58  ;;  %v1800_v60 = vsel %vm1244_vm1, %v1173_v50, 0.0  ;;  %v1174_v61 = vmul.f32 %v4538_v13, %v758_v23  ;;  %v1191_v58 = vmul.f32 %v4554_v32, %v775_v22 }
 0x2da   : > { %v1502_v17 = vpop.xlane.xlu1 %1501  ;;  %v1475_v28 = vpop.xlane.xlu0 %1474 }
 0x2db   : > { %v3098_v19 = vrot.slane %v1475_v28, %v4408_v3  ;;  %v3121_v14 = vrot.slane %v1502_v17, %v4410_v7 }
 0x2dd   : > { %1876 = vadd.xlane.f32.xlu1 %v1875_v11  ;;  %v3103_v37 = vsel %vm2152_vm2, %v3102_v21, %v3098_v19  ;;  %1837 = vadd.xlane.f32.xlu0 %v1836_v2  ;;  %v1803_v11 = vsel %vm1244_vm1, %v1174_v61, 0.0  ;;  %v1199_v2 = vmul.f32 %v4563_v36, %v783_v39 }
 0x2de   : > { %v1505_v16 = vpop.xlane.xlu1 %1504  ;;  %v1499_v42 = vpop.xlane.xlu0 %1498  ;;  %v3108_v44 = vsel %vm2159_vm3, %v3107_v26, %v3103_v37  ;;  %v1854_v26 = vsel %vm1244_vm1, %v1191_v58, 0.0  ;;  %v796_v37 = vld [vmem:[%s6765_s2 + $0x700] sm:$0xff] }
 0x2df   : > { %v3126_v57 = vrot.slane %v1505_v16, %v4412_v8  ;;  %v3117_v15 = vrot.slane %v1499_v42, %v4408_v3  ;;  %v1212_v50 = vmul.f32 %v4557_v33, %v796_v37 }
 0x2e1   : > { %1921 = vadd.xlane.f32.xlu1 %v1920_v48  ;;  %v3122_v56 = vsel %vm2152_vm2, %v3121_v14, %v3117_v15  ;;  %1846 = vadd.xlane.f32.xlu0 %v1845_v52  ;;  %v1205_v14 = vmul.f32 %v4573_v41, %v789_v20  ;;  %v1878_v48 = vsel %vm1244_vm1, %v1199_v2, 0.0  ;;  %v790_v52 = vld [vmem:[%s6765_s2 + $0x6d0] sm:$0xff]  ;;  %v804_v2 = vld [vmem:[%s6765_s2 + $0x740] sm:$0xff] }
 0x2e2   : > { %v1550_v45 = vpop.xlane.xlu1 %1549  ;;  %v3127_v47 = vsel %vm2159_vm3, %v3126_v57, %v3122_v56  ;;  %v1484_v18 = vpop.xlane.xlu0 %1483  ;;  %v798_v56 = vld [vmem:[%s6765_s2 + $0x710] sm:$0xff] }
 0x2e3   : > { %v3112_v59 = vrot.slane %v1484_v18, %v4414_v9  ;;  %v3159_v42 = vrot.slane %v1550_v45, %v4410_v7  ;;  %v1896_v18 = vsel %vm1244_vm1, %v1205_v14, 0.0  ;;  %v1214_v61 = vmul.f32 %v4557_v33, %v798_v56  ;;  %v806_v14 = vld [vmem:[%s6765_s2 + $0x750] sm:$0xff] }
 0x2e5   : > { %1801 = vadd.xlane.f32.xlu1 %v1800_v60  ;;  %v3113_v51 = vsel %vm2166_vm4, %v3112_v59, %v3108_v44  ;;  %1870 = vadd.xlane.f32.xlu0 %v1869_v1  ;;  %v1857_v44 = vsel %vm1244_vm1, %v1192_v6, 0.0  ;;  %v1206_v59 = vmul.f32 %v4573_v41, %v790_v52  ;;  %v1917_v60 = vsel %vm1244_vm1, %v1212_v50, 0.0  ;;  %v791_v1 = vld [vmem:[%s6765_s2 + $0x6d8] sm:$0xff] }
 0x2e6   : > { %v1553_v17 = vpop.xlane.xlu1 %1552  ;;  %v3539_v28 = vsel %vm2757_vm5, %v3113_v51, %v5380_v10  ;;  %v1508_v21 = vpop.xlane.xlu0 %1507  ;;  %v799_v51 = vld [vmem:[%s6765_s2 + $0x718] sm:$0xff]  ;;  %v1923_v6 = vsel %vm1244_vm1, %v1214_v61, 0.0 }
 0x2e7   : > { %v3131_v19 = vrot.slane %v1508_v21, %v4414_v9  ;;  %v3164_v15 = vrot.slane %v1553_v17, %v4412_v8  ;;  %v1899_v21 = vsel %vm1244_vm1, %v1206_v59, 0.0 }
 0x2e9   : > { %1804 = vadd.xlane.f32.xlu1 %v1803_v11  ;;  %v3132_v49 = vsel %vm2166_vm4, %v3131_v19, %v3127_v47  ;;  %1855 = vadd.xlane.f32.xlu0 %v1854_v26  ;;  %v1207_v19 = vmul.f32 %v4573_v41, %v791_v1  ;;  %v1215_v26 = vmul.f32 %v4557_v33, %v799_v51  ;;  %v777_v51 = vld [vmem:[%s6765_s2 + $0x668] sm:$0xff] }
 0x2ea   : > { %v1514_v10 = vpop.xlane.xlu1 %1513  ;;  %v5592_v16 = vsel %vm2759_vm6, %v3132_v49, %v3539_v28  ;;  %v1547_v34 = vpop.xlane.xlu0 %1546 }
 0x2eb   : > { %v3155_v57 = vrot.slane %v1547_v34, %v4408_v3  ;;  %v2365_v39 = vrot.slane %v1514_v10, %v4410_v7  ;;  %v756_v10 = vld [vmem:[%s6765_s2 + $0x5c0] sm:$0xff] }
 0x2ed   : > { %1858 = vadd.xlane.f32.xlu1 %v1857_v44  ;;  %v3160_v53 = vsel %vm2152_vm2, %v3159_v42, %v3155_v57  ;;  %1879 = vadd.xlane.f32.xlu0 %v1878_v48  ;;  %v1902_v57 = vsel %vm1244_vm1, %v1207_v19, 0.0  ;;  %v1220_v44 = vmul.f32 %v4566_v38, %v804_v2  ;;  %v1172_v48 = vmul.f32 %v4538_v13, %v756_v10 }
 0x2ee   : > { %v1517_v23 = vpop.xlane.xlu1 %1516  ;;  %v1556_v45 = vpop.xlane.xlu0 %1555  ;;  %v3165_v22 = vsel %vm2159_vm3, %v3164_v15, %v3160_v53  ;;  %v1926_v15 = vsel %vm1244_vm1, %v1215_v26, 0.0  ;;  %v759_v53 = vld [vmem:[%s6765_s2 + $0x5d8] sm:$0xff] }
 0x2ef   : > { %v3169_v47 = vrot.slane %v1556_v45, %v4414_v9  ;;  %v2370_v11 = vrot.slane %v1517_v23, %v4412_v8  ;;  %v1222_v45 = vmul.f32 %v4566_v38, %v806_v14  ;;  %v1175_v61 = vmul.f32 %v4538_v13, %v759_v53  ;;  %v805_v14 = vld [vmem:[%s6765_s2 + $0x748] sm:$0xff] }
 0x2f1   : > { %1897 = vadd.xlane.f32.xlu1 %v1896_v18  ;;  %v5618_v58 = vsel %vm2166_vm4, %v3169_v47, %v3165_v22  ;;  %1918 = vadd.xlane.f32.xlu0 %v1917_v60  ;;  %v1941_v18 = vsel %vm1244_vm1, %v1220_v44, 0.0  ;;  %v1797_v60 = vsel %vm1244_vm1, %v1172_v48, 0.0  ;;  %v1806_v19 = vsel %vm1244_vm1, %v1175_v61, 0.0 }
 0x2f2   : > { %v1562_v0 = vpop.xlane.xlu1 %1561  ;;  %v1511_v17 = vpop.xlane.xlu0 %1510 }
 0x2f3   : > { %v2361_v28 = vrot.slane %v1511_v17, %v4408_v3  ;;  %v2403_v22 = vrot.slane %v1562_v0, %v4410_v7 }
 0x2f5   : > { %1900 = vadd.xlane.f32.xlu1 %v1899_v21  ;;  %v2366_v20 = vsel %vm2152_vm2, %v2365_v39, %v2361_v28  ;;  %1924 = vadd.xlane.f32.xlu0 %v1923_v6  ;;  %v1947_v28 = vsel %vm1244_vm1, %v1222_v45, 0.0  ;;  %v814_v6 = vld [vmem:[%s6765_s2 + $0x790] sm:$0xff]  ;;  %v1221_v45 = vmul.f32 %v4566_v38, %v805_v14  ;;  %v815_v14 = vld [vmem:[%s6765_s2 + $0x798] sm:$0xff] }
 0x2f6   : > { %v1634_v49 = vpop.xlane.xlu1 %1633  ;;  %v1520_v37 = vpop.xlane.xlu0 %1519  ;;  %v2371_v34 = vsel %vm2159_vm3, %v2370_v11, %v2366_v20  ;;  %v1193_v11 = vmul.f32 %v4554_v32, %v777_v51  ;;  %v788_v20 = vld [vmem:[%s6765_s2 + $0x6c0] sm:$0xff] }
 0x2f7   : > { %v2375_v42 = vrot.slane %v1520_v37, %v4414_v9  ;;  %v1230_v37 = vmul.f32 %v4576_v43, %v814_v6 }
 0x2f9   : > { %1903 = vadd.xlane.f32.xlu1 %v1902_v57  ;;  %v2376_v50 = vsel %vm2166_vm4, %v2375_v42, %v2371_v34  ;;  %1927 = vadd.xlane.f32.xlu0 %v1926_v15  ;;  %v1860_v34 = vsel %vm1244_vm1, %v1193_v11, 0.0  ;;  %v1204_v42 = vmul.f32 %v4573_v41, %v788_v20  ;;  %v821_v57 = vld [vmem:[%s6765_s2 + $0x7c8] sm:$0xff]  ;;  %v807_v11 = vld [vmem:[%s6765_s2 + $0x758] sm:$0xff] }
 0x2fa   : > { %v1565_v52 = vpop.xlane.xlu1 %1564  ;;  %v2773_v23 = vsel %vm2761_vm7, %v2376_v50, %v5504_v40  ;;  %v1559_v56 = vpop.xlane.xlu0 %1558  ;;  %v813_v40 = vld [vmem:[%s6765_s2 + $0x788] sm:$0xff]  ;;  %v1971_v50 = vsel %vm1244_vm1, %v1230_v37, 0.0  ;;  %v1237_v53 = vmul.f32 %v4580_v46, %v821_v57 }
 0x2fb   : > { %v2399_v47 = vrot.slane %v1559_v56, %v4408_v3  ;;  %v2774_v59 = vsel %vm2763_vm8, %v5530_v27, %v2773_v23  ;;  %v2460_v27 = vrot.slane %v1634_v49, %v4410_v7  ;;  %v1229_v21 = vmul.f32 %v4576_v43, %v813_v40 }
 0x2fc   : > { %v2408_v23 = vrot.slane %v1565_v52, %v4412_v8  ;;  %v1893_v56 = vsel %vm1244_vm1, %v1204_v42, 0.0  ;;  %v1992_v40 = vsel %vm1244_vm1, %v1237_v53, 0.0  ;;  %v682_v42 = vld [vmem:[%s6765_s2 + $0x370] sm:$0xff] }
 0x2fd   : > { %1942 = vadd.xlane.f32.xlu1 %v1941_v18  ;;  %v2404_v1 = vsel %vm2152_vm2, %v2403_v22, %v2399_v47  ;;  %1798 = vadd.xlane.f32.xlu0 %v1797_v60  ;;  %v1968_v10 = vsel %vm1244_vm1, %v1229_v21, 0.0  ;;  %v822_v22 = vld [vmem:[%s6765_s2 + $0x7d0] sm:$0xff]  ;;  %v812_v60 = vld [vmem:[%s6765_s2 + $0x780] sm:$0xff] }
 0x2fe   : > { %v5664_v0 = vpop.xlane.xlu1 %1585  ;;  %v1631_v17 = vpop.xlane.xlu0 %1630  ;;  %v1238_v51 = vmul.f32 %v4580_v46, %v822_v22  ;;  %v820_v22 = vld [vmem:[%s6765_s2 + $0x7c0] sm:$0xff] }
 0x2ff   : > { %v2456_v39 = vrot.slane %v1631_v17, %v4408_v3  ;;  %v2409_v17 = vsel %vm2159_vm3, %v2408_v23, %v2404_v1  ;;  %v1231_v23 = vmul.f32 %v4576_v43, %v815_v14 }
 0x300   : > { %v1995_v20 = vsel %vm1244_vm1, %v1238_v51, 0.0  ;;  %v714_v51 = vld [vmem:[%s6765_s2 + $0x470] sm:$0xff] }
 0x301   : > { %1948 = vadd.xlane.f32.xlu1 %v1947_v28  ;;  %v2461_v26 = vsel %vm2152_vm2, %v2460_v27, %v2456_v39  ;;  %1807 = vadd.xlane.f32.xlu0 %v1806_v19  ;;  %v1944_v27 = vsel %vm1244_vm1, %v1221_v45, 0.0  ;;  %v1228_v39 = vmul.f32 %v4576_v43, %v812_v60  ;;  %v823_v28 = vld [vmem:[%s6765_s2 + $0x7d8] sm:$0xff] }
 0x302   : > { %v5679_v2 = vpop.xlane.xlu1 %1588  ;;  %v5684_v49 = vpop.xlane.xlu0 %1582 }
 0x303   : > { %v1965_v37 = vsel %vm1244_vm1, %v1228_v39, 0.0  ;;  %v1236_v39 = vmul.f32 %v4580_v46, %v820_v22 }
 0x305   : > { %1969 = vadd.xlane.f32.xlu1 %v1968_v10  ;;  %1861 = vadd.xlane.f32.xlu0 %v1860_v34  ;;  %v1239_v10 = vmul.f32 %v4580_v46, %v823_v28  ;;  %v1223_v34 = vmul.f32 %v4566_v38, %v807_v11 }
 0x306   : > { %v5693_v44 = vpop.xlane.xlu1 %1525  ;;  %v1637_v15 = vpop.xlane.xlu0 %1636 }
 0x307   : > { %v2465_v48 = vrot.slane %v1637_v15, %v4412_v8  ;;  %v1950_v53 = vsel %vm1244_vm1, %v1223_v34, 0.0  ;;  %v3140_v60 = vrot.slane %v5693_v44, %v4410_v7  ;;  %v721_v34 = vld [vmem:[%s6765_s2 + $0x4a8] sm:$0xff] }
 0x309   : > { %1972 = vadd.xlane.f32.xlu1 %v1971_v50  ;;  %v2466_v47 = vsel %vm2159_vm3, %v2465_v48, %v2461_v26  ;;  %1894 = vadd.xlane.f32.xlu0 %v1893_v56  ;;  %v1998_v48 = vsel %vm1244_vm1, %v1239_v10, 0.0  ;;  %v1098_v50 = vmul.f32 %v4489_v29, %v682_v42  ;;  %v689_v56 = vld [vmem:[%s6765_s2 + $0x3a8] sm:$0xff]  ;;  %v1989_v10 = vsel %vm1244_vm1, %v1236_v39, 0.0 }
 0x30a   : > { %v1529_v18 = vpop.xlane.xlu1 %1528  ;;  %v1568_v61 = vpop.xlane.xlu0 %1567 }
 0x30b   : > { %v2413_v52 = vrot.slane %v1568_v61, %v4414_v9 }
 0x30d   : > { %1993 = vadd.xlane.f32.xlu1 %v1992_v40  ;;  %v2414_v21 = vsel %vm2166_vm4, %v2413_v52, %v2409_v17  ;;  %1945 = vadd.xlane.f32.xlu0 %v1944_v27  ;;  %v1575_v52 = vsel %vm1244_vm1, %v1098_v50, 0.0  ;;  %v1105_v40 = vmul.f32 %v4492_v30, %v689_v56  ;;  %v3145_v17 = vrot.slane %v1529_v18, %v4412_v8 }
 0x30e   : > { %v5721_v19 = vpop.xlane.xlu1 %1573  ;;  %v5727_v1 = vsel %vm2765_vm9, %v2414_v21, %v2774_v59  ;;  %v1640_v6 = vpop.xlane.xlu0 %1639  ;;  %v1974_v27 = vsel %vm1244_vm1, %v1231_v23, 0.0  ;;  %v688_v21 = vld [vmem:[%s6765_s2 + $0x3a0] sm:$0xff] }
 0x30f   : > { %v2470_v26 = vrot.slane %v1640_v6, %v4414_v9  ;;  %v3178_v56 = vrot.slane %v5721_v19, %v4410_v7 }
 0x311   : > { %1996 = vadd.xlane.f32.xlu1 %v1995_v20  ;;  %v5738_v57 = vsel %vm2166_vm4, %v2470_v26, %v2466_v47  ;;  %1966 = vadd.xlane.f32.xlu0 %v1965_v37  ;;  %v1130_v26 = vmul.f32 %v4522_v62, %v714_v51  ;;  %v1596_v20 = vsel %vm1244_vm1, %v1105_v40, 0.0  ;;  %v1104_v37 = vmul.f32 %v4492_v30, %v688_v21 }
 0x312   : > { %v5740_v59 = vpop.xlane.xlu1 %1645  ;;  %v5745_v15 = vpop.xlane.xlu0 %1591 }
 0x313   : > { %v1671_v23 = vsel %vm1244_vm1, %v1130_v26, 0.0 }
 0x315   : > { %1999 = vadd.xlane.f32.xlu1 %v1998_v48  ;;  %1951 = vadd.xlane.f32.xlu0 %v1950_v53  ;;  %v706_v48 = vld [vmem:[%s6765_s2 + $0x430] sm:$0xff] }
 0x316   : > { %v5754_v45 = vpop.xlane.xlu1 %1657  ;;  %v1523_v47 = vpop.xlane.xlu0 %1522 }
 0x317   : > { %v3136_v61 = vrot.slane %v1523_v47, %v4408_v3  ;;  %v1137_v47 = vmul.f32 %v4525_v63, %v721_v34 }
 0x319   : > { %1576 = vadd.xlane.f32.xlu1 %v1575_v52  ;;  %v3141_v28 = vsel %vm2152_vm2, %v3140_v60, %v3136_v61  ;;  %1975 = vadd.xlane.f32.xlu0 %v1974_v27  ;;  %v1593_v61 = vsel %vm1244_vm1, %v1104_v37, 0.0  ;;  %v1122_v52 = vmul.f32 %v4515_v54, %v706_v48  ;;  %v1692_v39 = vsel %vm1244_vm1, %v1137_v47, 0.0  ;;  %v690_v48 = vld [vmem:[%s6765_s2 + $0x3b0] sm:$0xff]  ;;  %v784_v47 = vld [vmem:[%s6765_s2 + $0x6a0] sm:$0xff] }
 0x31a   : > { %v1661_v44 = vpop.xlane.xlu1 %1660  ;;  %v1532_v11 = vpop.xlane.xlu0 %1531  ;;  %v3146_v6 = vsel %vm2159_vm3, %v3145_v17, %v3141_v28  ;;  %v3235_v17 = vrot.slane %v5740_v59, %v4410_v7 }
 0x31b   : > { %v3150_v18 = vrot.slane %v1532_v11, %v4414_v9  ;;  %v1647_v21 = vsel %vm1244_vm1, %v1122_v52, 0.0 }
 0x31d   : > { %1597 = vadd.xlane.f32.xlu1 %v1596_v20  ;;  %v3151_v42 = vsel %vm2166_vm4, %v3150_v18, %v3146_v6  ;;  %1990 = vadd.xlane.f32.xlu0 %v1989_v10  ;;  %v785_v6 = vld [vmem:[%s6765_s2 + $0x6a8] sm:$0xff]  ;;  %v770_v18 = vld [vmem:[%s6765_s2 + $0x630] sm:$0xff]  ;;  %v2479_v10 = vrot.slane %v5754_v45, %v4410_v7 }
 0x31e   : > { %v1682_v14 = vpop.xlane.xlu1 %1681  ;;  %v3541_v50 = vsel %vm2761_vm7, %v3151_v42, %v5592_v16  ;;  %v1571_v53 = vpop.xlane.xlu0 %1570  ;;  %v778_v16 = vld [vmem:[%s6765_s2 + $0x670] sm:$0xff]  ;;  %v1201_v42 = vmul.f32 %v4563_v36, %v785_v6  ;;  %v683_v6 = vld [vmem:[%s6765_s2 + $0x378] sm:$0xff] }
 0x31f   : > { %v3174_v22 = vrot.slane %v1571_v53, %v4408_v3  ;;  %v5796_v60 = vsel %vm2763_vm8, %v5618_v58, %v3541_v50  ;;  %v720_v58 = vld [vmem:[%s6765_s2 + $0x4a0] sm:$0xff]  ;;  %v1194_v28 = vmul.f32 %v4554_v32, %v778_v16  ;;  %v2484_v50 = vrot.slane %v1661_v44, %v4412_v8 }
 0x320   : > { %v1136_v11 = vmul.f32 %v4525_v63, %v720_v58  ;;  %v1106_v44 = vmul.f32 %v4492_v30, %v690_v48  ;;  %v2498_v16 = vrot.slane %v1682_v14, %v4410_v7 }
 0x321   : > { %1672 = vadd.xlane.f32.xlu1 %v1671_v23  ;;  %v5804_v40 = vsel %vm2152_vm2, %v3178_v56, %v3174_v22  ;;  %1594 = vadd.xlane.f32.xlu0 %v1593_v61  ;;  %v1863_v34 = vsel %vm1244_vm1, %v1194_v28, 0.0  ;;  %v1186_v23 = vmul.f32 %v4547_v24, %v770_v18  ;;  %v1200_v28 = vmul.f32 %v4563_v36, %v784_v47 }
 0x322   : > { %v5806_v19 = vpop.xlane.xlu1 %1609  ;;  %v1643_v51 = vpop.xlane.xlu0 %1642  ;;  %v1689_v53 = vsel %vm1244_vm1, %v1136_v11, 0.0 }
 0x323   : > { %v3231_v27 = vrot.slane %v1643_v51, %v4408_v3 }
 0x325   : > { %1693 = vadd.xlane.f32.xlu1 %v1692_v39  ;;  %v5822_v26 = vsel %vm2152_vm2, %v3235_v17, %v3231_v27  ;;  %1648 = vadd.xlane.f32.xlu0 %v1647_v21  ;;  %v1884_v17 = vsel %vm1244_vm1, %v1201_v42, 0.0  ;;  %v1839_v39 = vsel %vm1244_vm1, %v1186_v23, 0.0  ;;  %v697_v21 = vld [vmem:[%s6765_s2 + $0x3e8] sm:$0xff]  ;;  %v696_v42 = vld [vmem:[%s6765_s2 + $0x3e0] sm:$0xff] }
 0x326   : > { %v1664_v59 = vpop.xlane.xlu1 %1663  ;;  %v1655_v20 = vpop.xlane.xlu0 %1654  ;;  %v1113_v18 = vmul.f32 %v4501_v35, %v697_v21 }
 0x327   : > { %v2475_v37 = vrot.slane %v1655_v20, %v4408_v3  ;;  %v2489_v45 = vrot.slane %v1664_v59, %v4414_v9  ;;  %v1881_v20 = vsel %vm1244_vm1, %v1200_v28, 0.0 }
 0x329   : > { %1864 = vadd.xlane.f32.xlu1 %v1863_v34  ;;  %v2480_v56 = vsel %vm2152_vm2, %v2479_v10, %v2475_v37  ;;  %1690 = vadd.xlane.f32.xlu0 %v1689_v53  ;;  %v1099_v10 = vmul.f32 %v4489_v29, %v683_v6  ;;  %v715_v37 = vld [vmem:[%s6765_s2 + $0x478] sm:$0xff]  ;;  %v1620_v53 = vsel %vm1244_vm1, %v1113_v18, 0.0  ;;  %v722_v18 = vld [vmem:[%s6765_s2 + $0x4b0] sm:$0xff] }
 0x32a   : > { %v5840_v22 = vpop.xlane.xlu1 %1612  ;;  %v2485_v61 = vsel %vm2159_vm3, %v2484_v50, %v2480_v56  ;;  %v1679_v52 = vpop.xlane.xlu0 %1678  ;;  %v1131_v23 = vmul.f32 %v4522_v62, %v715_v37  ;;  %v1112_v56 = vmul.f32 %v4501_v35, %v696_v42  ;;  %v2418_v62 = vrot.slane %v5684_v49, %v4408_v3 }
 0x32b   : > { %v2490_v58 = vsel %vm2166_vm4, %v2489_v45, %v2485_v61  ;;  %v2494_v51 = vrot.slane %v1679_v52, %v4408_v3  ;;  %v1578_v29 = vsel %vm1244_vm1, %v1099_v10, 0.0  ;;  %v728_v45 = vld [vmem:[%s6765_s2 + $0x4e0] sm:$0xff]  ;;  %v707_v52 = vld [vmem:[%s6765_s2 + $0x438] sm:$0xff]  ;;  %v2427_v49 = vrot.slane %v5679_v2, %v4412_v8 }
 0x32c   : > { %v2778_v27 = vsel %vm2757_vm5, %v2490_v58, %v5738_v57  ;;  %v1599_v57 = vsel %vm1244_vm1, %v1106_v44, 0.0  ;;  %v1674_v58 = vsel %vm1244_vm1, %v1131_v23, 0.0  ;;  %v1617_v28 = vsel %vm1244_vm1, %v1112_v56, 0.0  ;;  %v729_v23 = vld [vmem:[%s6765_s2 + $0x4e8] sm:$0xff] }
 0x32d   : > { %1885 = vadd.xlane.f32.xlu1 %v1884_v17  ;;  %v2499_v14 = vsel %vm2152_vm2, %v2498_v16, %v2494_v51  ;;  %1840 = vadd.xlane.f32.xlu0 %v1839_v39  ;;  %v1144_v51 = vmul.f32 %v4535_v12, %v728_v45  ;;  %v771_v17 = vld [vmem:[%s6765_s2 + $0x638] sm:$0xff]  ;;  %v2422_v39 = vrot.slane %v5664_v0, %v4410_v7 }
 0x32e   : > { %v1730_v11 = vpop.xlane.xlu1 %1729  ;;  %v1607_v59 = vpop.xlane.xlu0 %1606  ;;  %v1123_v21 = vmul.f32 %v4515_v54, %v707_v52  ;;  %v2441_v10 = vrot.slane %v5806_v19, %v4410_v7  ;;  %v2446_v56 = vrot.slane %v5840_v22, %v4412_v8 }
 0x32f   : > { %v2423_v0 = vsel %vm2152_vm2, %v2422_v39, %v2418_v62  ;;  %v2536_v37 = vrot.slane %v1730_v11, %v4410_v7 }
 0x331   : > { %1600 = vadd.xlane.f32.xlu1 %v1599_v57  ;;  %1882 = vadd.xlane.f32.xlu0 %v1881_v20  ;;  %v2432_v20 = vrot.slane %v5745_v15, %v4414_v9  ;;  %v1138_v15 = vmul.f32 %v4525_v63, %v722_v18 }
 0x332   : > { %v5869_v34 = vpop.xlane.xlu1 %1669  ;;  %v1685_v48 = vpop.xlane.xlu0 %1684 }
 0x333   : > { %v2503_v50 = vrot.slane %v1685_v48, %v4412_v8  ;;  %v1713_v48 = vsel %vm1244_vm1, %v1144_v51, 0.0  ;;  %v793_v51 = vld [vmem:[%s6765_s2 + $0x6e8] sm:$0xff] }
 0x335   : > { %1621 = vadd.xlane.f32.xlu1 %v1620_v53  ;;  %v2504_v47 = vsel %vm2159_vm3, %v2503_v50, %v2499_v14  ;;  %1579 = vadd.xlane.f32.xlu0 %v1578_v29  ;;  %v2437_v14 = vrot.slane %v1607_v59, %v4408_v3  ;;  %v1187_v59 = vmul.f32 %v4547_v24, %v771_v17  ;;  %v1650_v50 = vsel %vm1244_vm1, %v1123_v21, 0.0 }
 0x336   : > { %v5883_v61 = vpop.xlane.xlu1 %1825  ;;  %v1688_v44 = vpop.xlane.xlu0 %1687  ;;  %v2428_v24 = vsel %vm2159_vm3, %v2427_v49, %v2423_v0 }
 0x337   : > { %v2508_v16 = vrot.slane %v1688_v44, %v4414_v9  ;;  %v2442_v53 = vsel %vm2152_vm2, %v2441_v10, %v2437_v14  ;;  %v2433_v29 = vsel %vm2166_vm4, %v2432_v20, %v2428_v24  ;;  %v1842_v52 = vsel %vm1244_vm1, %v1187_v59, 0.0 }
 0x338   : > { %v2447_v44 = vsel %vm2159_vm3, %v2446_v56, %v2442_v53  ;;  %v2776_v22 = vsel %vm2767_vm10, %v2433_v29, %v5727_v1  ;;  %v1209_v1 = vmul.f32 %v4573_v41, %v793_v51  ;;  %v3254_v29 = vrot.slane %v5869_v34, %v4410_v7 }
 0x339   : > { %1675 = vadd.xlane.f32.xlu1 %v1674_v58  ;;  %v2509_v6 = vsel %vm2166_vm4, %v2508_v16, %v2504_v47  ;;  %1618 = vadd.xlane.f32.xlu0 %v1617_v28  ;;  %v1695_v16 = vsel %vm1244_vm1, %v1138_v15, 0.0  ;;  %v1145_v58 = vmul.f32 %v4535_v12, %v729_v23  ;;  %v779_v28 = vld [vmem:[%s6765_s2 + $0x678] sm:$0xff] }
 0x33a   : > { %v5904_v57 = vpop.xlane.xlu1 %1702  ;;  %v5913_v54 = vsel %vm2759_vm6, %v2509_v6, %v2778_v27  ;;  %v1727_v2 = vpop.xlane.xlu0 %1726  ;;  %v786_v27 = vld [vmem:[%s6765_s2 + $0x6b0] sm:$0xff]  ;;  %v1195_v20 = vmul.f32 %v4554_v32, %v779_v28  ;;  %v1908_v32 = vsel %vm1244_vm1, %v1209_v1, 0.0 }
 0x33b   : > { %v2532_v42 = vrot.slane %v1727_v2, %v4408_v3  ;;  %v1202_v62 = vmul.f32 %v4563_v36, %v786_v27  ;;  %v1716_v0 = vsel %vm1244_vm1, %v1145_v58, 0.0  ;;  %v698_v2 = vld [vmem:[%s6765_s2 + $0x3f0] sm:$0xff]  ;;  %v723_v58 = vld [vmem:[%s6765_s2 + $0x4b8] sm:$0xff] }
 0x33c   : > { %v730_v27 = vld [vmem:[%s6765_s2 + $0x4f0] sm:$0xff] }
 0x33d   : > { %1714 = vadd.xlane.f32.xlu1 %v1713_v48  ;;  %v2537_v19 = vsel %vm2152_vm2, %v2536_v37, %v2532_v42  ;;  %1651 = vadd.xlane.f32.xlu0 %v1650_v50  ;;  %v1887_v6 = vsel %vm1244_vm1, %v1202_v62, 0.0  ;;  %v1114_v48 = vmul.f32 %v4501_v35, %v698_v2  ;;  %v1866_v50 = vsel %vm1244_vm1, %v1195_v20, 0.0 }
 0x33e   : > { %v5929_v11 = vpop.xlane.xlu1 %1831  ;;  %v1616_v45 = vpop.xlane.xlu0 %1615 }
 0x33f   : > { %v2451_v47 = vrot.slane %v1616_v45, %v4414_v9  ;;  %v1623_v45 = vsel %vm1244_vm1, %v1114_v48, 0.0  ;;  %v787_v48 = vld [vmem:[%s6765_s2 + $0x6b8] sm:$0xff] }
 0x341   : > { %1843 = vadd.xlane.f32.xlu1 %v1842_v52  ;;  %v2452_v17 = vsel %vm2166_vm4, %v2451_v47, %v2447_v44  ;;  %1696 = vadd.xlane.f32.xlu0 %v1695_v16  ;;  %v1146_v47 = vmul.f32 %v4535_v12, %v730_v27  ;;  %v737_v44 = vld [vmem:[%s6765_s2 + $0x528] sm:$0xff] }
 0x342   : > { %v5949_v39 = vpop.xlane.xlu1 %1708  ;;  %v1733_v21 = vpop.xlane.xlu0 %1732  ;;  %v2777_v49 = vsel %vm2769_vm11, %v2452_v17, %v2776_v22  ;;  %v2612_v22 = vrot.slane %v5883_v61, %v4410_v7  ;;  %v1153_v28 = vmul.f32 %v4518_v55, %v737_v44  ;;  %v736_v61 = vld [vmem:[%s6765_s2 + $0x520] sm:$0xff] }
 0x343   : > { %v2541_v14 = vrot.slane %v1733_v21, %v4412_v8  ;;  %v4241_v18 = vpack.c.bf16 %v2777_v49, %v5414_v31  ;;  %v792_v31 = vld [vmem:[%s6765_s2 + $0x6e0] sm:$0xff]  ;;  %v1719_v17 = vsel %vm1244_vm1, %v1146_v47, 0.0  ;;  %v1139_v49 = vmul.f32 %v4525_v63, %v723_v58  ;;  %v801_v63 = vld [vmem:[%s6765_s2 + $0x728] sm:$0xff]  ;;  %v731_v47 = vld [vmem:[%s6765_s2 + $0x4f8] sm:$0xff] }
 0x344   : > { %v1208_v15 = vmul.f32 %v4573_v41, %v792_v31  ;;  %v1740_v20 = vsel %vm1244_vm1, %v1153_v28, 0.0  ;;  %v1217_v27 = vmul.f32 %v4557_v33, %v801_v63 }
 0x345   : > { %1888 = vadd.xlane.f32.xlu1 %v1887_v6  ;;  %v2542_v59 = vsel %vm2159_vm3, %v2541_v14, %v2537_v19  ;;  %1717 = vadd.xlane.f32.xlu0 %v1716_v0  ;;  %v691_v19 = vld [vmem:[%s6765_s2 + $0x3b8] sm:$0xff]  ;;  %v794_v14 = vld [vmem:[%s6765_s2 + $0x6f0] sm:$0xff]  ;;  %v1698_v31 = vsel %vm1244_vm1, %v1139_v49, 0.0 }
 0x346   : > { %4242 = vmatprep.subr.bf16.mxu0 %v4241_v18  ;;  %v5965_v10 = vpop.xlane.xlu1 %1711  ;;  %4257 = vmatprep.subr.bf16.mxu1 %v4241_v18  ;;  %v1736_v37 = vpop.xlane.xlu0 %1735  ;;  %v1905_v52 = vsel %vm1244_vm1, %v1208_v15, 0.0  ;;  %v1107_v62 = vmul.f32 %v4492_v30, %v691_v19  ;;  %v1210_v2 = vmul.f32 %v4573_v41, %v794_v14 }
 0x347   : > { %4244 = vmatpush3.bf16.msra.mxu0 %v4241_v18  ;;  %v2546_v42 = vrot.slane %v1736_v37, %v4414_v9  ;;  %4261 = vmatpush3.bf16.msra.mxu1 %v4241_v18  ;;  %v1152_v37 = vmul.f32 %v4518_v55, %v736_v61 }
 0x348   : > { %v1602_v21 = vsel %vm1244_vm1, %v1107_v62, 0.0 }
 0x349   : > { %1909 = vadd.xlane.f32.xlu1 %v1908_v32  ;;  %v5979_v24 = vsel %vm2166_vm4, %v2546_v42, %v2542_v59  ;;  %1867 = vadd.xlane.f32.xlu0 %v1866_v50  ;;  %v2622_v59 = vrot.slane %v5929_v11, %v4414_v9  ;;  %v2513_v11 = vrot.slane %v5904_v57, %v4408_v3 }
 0x34a   : > { %v5981_v53 = vpop.xlane.xlu1 %1750  ;;  %v1667_v23 = vpop.xlane.xlu0 %1666 }
 0x34b   : > { %v3250_v56 = vrot.slane %v1667_v23, %v4408_v3  ;;  %v1911_v23 = vsel %vm1244_vm1, %v1210_v2, 0.0 }
 0x34d   : > { %1624 = vadd.xlane.f32.xlu1 %v1623_v45  ;;  %v5997_v16 = vsel %vm2152_vm2, %v3254_v29, %v3250_v56  ;;  %1906 = vadd.xlane.f32.xlu0 %v1905_v52  ;;  %v2522_v29 = vrot.slane %v5949_v39, %v4412_v8  ;;  %v1737_v56 = vsel %vm1244_vm1, %v1152_v37, 0.0  ;;  %v1203_v45 = vmul.f32 %v4563_v36, %v787_v48  ;;  %v800_v39 = vld [vmem:[%s6765_s2 + $0x720] sm:$0xff] }
 0x34e   : > { %v5999_v34 = vpop.xlane.xlu1 %1756  ;;  %v1823_v51 = vpop.xlane.xlu0 %1822  ;;  %v2527_v52 = vrot.slane %v5965_v10, %v4414_v9  ;;  %v1932_v36 = vsel %vm1244_vm1, %v1217_v27, 0.0 }
 0x34f   : > { %v2608_v30 = vrot.slane %v1823_v51, %v4408_v3  ;;  %v2551_v51 = vrot.slane %v5981_v53, %v4408_v3  ;;  %v1890_v28 = vsel %vm1244_vm1, %v1203_v45, 0.0  ;;  %v744_v53 = vld [vmem:[%s6765_s2 + $0x560] sm:$0xff]  ;;  %v745_v45 = vld [vmem:[%s6765_s2 + $0x568] sm:$0xff] }
 0x350   : > { %v1160_v2 = vmul.f32 %v4528_v4, %v744_v53 }
 0x351   : > { %1720 = vadd.xlane.f32.xlu1 %v1719_v17  ;;  %v2613_v6 = vsel %vm2152_vm2, %v2612_v22, %v2608_v30  ;;  %1603 = vadd.xlane.f32.xlu0 %v1602_v21  ;;  %v1147_v30 = vmul.f32 %v4535_v12, %v731_v47  ;;  %v2560_v17 = vrot.slane %v5999_v34, %v4412_v8  ;;  %v699_v34 = vld [vmem:[%s6765_s2 + $0x3f8] sm:$0xff] }
 0x352   : > { %v1778_v18 = vpop.xlane.xlu1 %1777  ;;  %v1829_v1 = vpop.xlane.xlu0 %1828  ;;  %v1216_v21 = vmul.f32 %v4557_v33, %v800_v39 }
 0x353   : > { %v2617_v0 = vrot.slane %v1829_v1, %v4412_v8 }
 0x355   : > { %1741 = vadd.xlane.f32.xlu1 %v1740_v20  ;;  %v2618_v42 = vsel %vm2159_vm3, %v2617_v0, %v2613_v6  ;;  %1699 = vadd.xlane.f32.xlu0 %v1698_v31  ;;  %v1722_v20 = vsel %vm1244_vm1, %v1147_v30, 0.0  ;;  %v795_v31 = vld [vmem:[%s6765_s2 + $0x6f8] sm:$0xff] }
 0x356   : > { %v1781_v32 = vpop.xlane.xlu1 %1780  ;;  %v6033_v50 = vsel %vm2166_vm4, %v2622_v59, %v2618_v42  ;;  %v1706_v15 = vpop.xlane.xlu0 %1705  ;;  %v1929_v59 = vsel %vm1244_vm1, %v1216_v21, 0.0  ;;  %v738_v42 = vld [vmem:[%s6765_s2 + $0x530] sm:$0xff]  ;;  %v1211_v27 = vmul.f32 %v4573_v41, %v795_v31 }
 0x357   : > { %v2517_v19 = vrot.slane %v1706_v15, %v4410_v7  ;;  %v2579_v63 = vrot.slane %v1781_v32, %v4412_v8 }
 0x359   : > { %1912 = vadd.xlane.f32.xlu1 %v1911_v23  ;;  %v2518_v57 = vsel %vm2152_vm2, %v2517_v19, %v2513_v11  ;;  %1738 = vadd.xlane.f32.xlu0 %v1737_v56  ;;  %v1154_v19 = vmul.f32 %v4518_v55, %v738_v42  ;;  %v808_v23 = vld [vmem:[%s6765_s2 + $0x760] sm:$0xff] }
 0x35a   : > { %v6050_v62 = vpop.xlane.xlu1 %1834  ;;  %v2523_v44 = vsel %vm2159_vm3, %v2522_v29, %v2518_v57  ;;  %v1754_v58 = vpop.xlane.xlu0 %1753  ;;  %v1914_v57 = vsel %vm1244_vm1, %v1211_v27, 0.0  ;;  %v1224_v39 = vmul.f32 %v4566_v38, %v808_v23  ;;  %v753_v27 = vld [vmem:[%s6765_s2 + $0x5a8] sm:$0xff] }
 0x35b   : > { %v2528_v22 = vsel %vm2166_vm4, %v2527_v52, %v2523_v44  ;;  %v2555_v10 = vrot.slane %v1754_v58, %v4410_v7  ;;  %v1743_v44 = vsel %vm1244_vm1, %v1154_v19, 0.0  ;;  %v1161_v58 = vmul.f32 %v4528_v4, %v745_v45  ;;  %v747_v45 = vld [vmem:[%s6765_s2 + $0x578] sm:$0xff] }
 0x35c   : > { %v2780_v49 = vsel %vm2761_vm7, %v2528_v22, %v5913_v54  ;;  %v2574_v54 = vrot.slane %v1778_v18, %v4410_v7 }
 0x35d   : > { %1933 = vadd.xlane.f32.xlu1 %v1932_v36  ;;  %v2556_v14 = vsel %vm2152_vm2, %v2555_v10, %v2551_v51  ;;  %1891 = vadd.xlane.f32.xlu0 %v1890_v28  ;;  %v2781_v12 = vsel %vm2763_vm8, %v5979_v24, %v2780_v49  ;;  %v1115_v24 = vmul.f32 %v4501_v35, %v699_v34  ;;  %v1761_v35 = vsel %vm1244_vm1, %v1160_v2, 0.0  ;;  %v739_v36 = vld [vmem:[%s6765_s2 + $0x538] sm:$0xff]  ;;  %v802_v10 = vld [vmem:[%s6765_s2 + $0x730] sm:$0xff]  ;;  %v752_v34 = vld [vmem:[%s6765_s2 + $0x5a0] sm:$0xff] }
 0x35e   : > { %v6072_v6 = vpop.xlane.xlu1 %1849  ;;  %v1775_v61 = vpop.xlane.xlu0 %1774  ;;  %v2561_v1 = vsel %vm2159_vm3, %v2560_v17, %v2556_v14  ;;  %v3383_v28 = vrot.slane %v6050_v62, %v4408_v3  ;;  %v1953_v49 = vsel %vm1244_vm1, %v1224_v39, 0.0  ;;  %v1155_v53 = vmul.f32 %v4518_v55, %v739_v36  ;;  %v760_v36 = vld [vmem:[%s6765_s2 + $0x5e0] sm:$0xff] }
 0x35f   : > { %v2570_v0 = vrot.slane %v1775_v61, %v4408_v3  ;;  %v1626_v11 = vsel %vm1244_vm1, %v1115_v24, 0.0  ;;  %v1764_v14 = vsel %vm1244_vm1, %v1161_v58, 0.0  ;;  %v746_v24 = vld [vmem:[%s6765_s2 + $0x570] sm:$0xff]  ;;  %v1163_v39 = vmul.f32 %v4528_v4, %v747_v45 }
 0x361   : > { %1723 = vadd.xlane.f32.xlu1 %v1722_v20  ;;  %v2575_v37 = vsel %vm2152_vm2, %v2574_v54, %v2570_v0  ;;  %1930 = vadd.xlane.f32.xlu0 %v1929_v59  ;;  %v1746_v54 = vsel %vm1244_vm1, %v1155_v53, 0.0  ;;  %v1168_v0 = vmul.f32 %v4531_v5, %v752_v34  ;;  %v811_v53 = vld [vmem:[%s6765_s2 + $0x778] sm:$0xff] }
 0x362   : > { %v6091_v18 = vpop.xlane.xlu1 %1852  ;;  %v1760_v48 = vpop.xlane.xlu0 %1759  ;;  %v2580_v32 = vsel %vm2159_vm3, %v2579_v63, %v2575_v37  ;;  %v803_v63 = vld [vmem:[%s6765_s2 + $0x738] sm:$0xff] }
 0x363   : > { %v2565_v15 = vrot.slane %v1760_v48, %v4414_v9  ;;  %v1785_v37 = vsel %vm1244_vm1, %v1168_v0, 0.0  ;;  %v1219_v42 = vmul.f32 %v4557_v33, %v803_v63 }
 0x365   : > { %1762 = vadd.xlane.f32.xlu1 %v1761_v35  ;;  %v2566_v29 = vsel %vm2166_vm4, %v2565_v15, %v2561_v1  ;;  %1627 = vadd.xlane.f32.xlu0 %v1626_v11  ;;  %v809_v1 = vld [vmem:[%s6765_s2 + $0x768] sm:$0xff]  ;;  %v816_v15 = vld [vmem:[%s6765_s2 + $0x7a0] sm:$0xff] }
 0x366   : > { %v6106_v56 = vpop.xlane.xlu1 %1873  ;;  %v2782_v41 = vsel %vm2765_vm9, %v2566_v29, %v2781_v12  ;;  %v1784_v47 = vpop.xlane.xlu0 %1783  ;;  %v1218_v12 = vmul.f32 %v4557_v33, %v802_v10  ;;  %v1225_v2 = vmul.f32 %v4566_v38, %v809_v1  ;;  %v1938_v33 = vsel %vm1244_vm1, %v1219_v42, 0.0  ;;  %v817_v10 = vld [vmem:[%s6765_s2 + $0x7a8] sm:$0xff] }
 0x367   : > { %v2584_v52 = vrot.slane %v1784_v47, %v4414_v9  ;;  %v1232_v19 = vmul.f32 %v4576_v43, %v816_v15  ;;  %v1169_v29 = vmul.f32 %v4531_v5, %v753_v27  ;;  %v810_v47 = vld [vmem:[%s6765_s2 + $0x770] sm:$0xff]  ;;  %v755_v15 = vld [vmem:[%s6765_s2 + $0x5b8] sm:$0xff] }
 0x368   : > { %v1935_v20 = vsel %vm1244_vm1, %v1218_v12, 0.0  ;;  %v1956_v48 = vsel %vm1244_vm1, %v1225_v2, 0.0  ;;  %v1226_v58 = vmul.f32 %v4566_v38, %v810_v47  ;;  %v754_v12 = vld [vmem:[%s6765_s2 + $0x5b0] sm:$0xff]  ;;  %v824_v2 = vld [vmem:[%s6765_s2 + $0x7e0] sm:$0xff] }
 0x369   : > { %1915 = vadd.xlane.f32.xlu1 %v1914_v57  ;;  %v2585_v51 = vsel %vm2166_vm4, %v2584_v52, %v2580_v32  ;;  %1744 = vadd.xlane.f32.xlu0 %v1743_v44  ;;  %v1162_v32 = vmul.f32 %v4528_v4, %v746_v24  ;;  %v1977_v57 = vsel %vm1244_vm1, %v1232_v19, 0.0  ;;  %v1788_v44 = vsel %vm1244_vm1, %v1169_v29, 0.0  ;;  %v761_v24 = vld [vmem:[%s6765_s2 + $0x5e8] sm:$0xff] }
 0x36a   : > { %v6121_v22 = vpop.xlane.xlu1 %1876  ;;  %v6127_v30 = vsel %vm2767_vm10, %v2585_v51, %v2782_v41  ;;  %v1838_v17 = vpop.xlane.xlu0 %1837  ;;  %v1770_v4 = vsel %vm1244_vm1, %v1163_v39, 0.0  ;;  %v1240_v42 = vmul.f32 %v4580_v46, %v824_v2  ;;  %v1171_v29 = vmul.f32 %v4531_v5, %v755_v15 }
 0x36b   : > { %v3387_v21 = vrot.slane %v1838_v17, %v4410_v7  ;;  %v1767_v23 = vsel %vm1244_vm1, %v1162_v32, 0.0  ;;  %v1177_v32 = vmul.f32 %v4538_v13, %v761_v24 }
 0x36d   : > { %1954 = vadd.xlane.f32.xlu1 %v1953_v49  ;;  %v6140_v61 = vsel %vm2152_vm2, %v3387_v21, %v3383_v28  ;;  %1765 = vadd.xlane.f32.xlu0 %v1764_v14  ;;  %v1176_v28 = vmul.f32 %v4538_v13, %v760_v36  ;;  %v1959_v21 = vsel %vm1244_vm1, %v1226_v58, 0.0  ;;  %v1233_v49 = vmul.f32 %v4576_v43, %v817_v10 }
 0x36e   : > { %v6142_v62 = vpop.xlane.xlu1 %1921  ;;  %v6147_v55 = vpop.xlane.xlu0 %1846  ;;  %v1812_v45 = vsel %vm1244_vm1, %v1177_v32, 0.0 }
 0x36f   : > { %v1809_v1 = vsel %vm1244_vm1, %v1176_v28, 0.0  ;;  %v1980_v0 = vsel %vm1244_vm1, %v1233_v49, 0.0  ;;  %v763_v28 = vld [vmem:[%s6765_s2 + $0x5f8] sm:$0xff]  ;;  %v762_v49 = vld [vmem:[%s6765_s2 + $0x5f0] sm:$0xff] }
 0x371   : > { %1747 = vadd.xlane.f32.xlu1 %v1746_v54  ;;  %1936 = vadd.xlane.f32.xlu0 %v1935_v20  ;;  %v1227_v54 = vmul.f32 %v4566_v38, %v811_v53  ;;  %v1170_v20 = vmul.f32 %v4531_v5, %v754_v12  ;;  %v1794_v5 = vsel %vm1244_vm1, %v1171_v29, 0.0  ;;  %v2631_v29 = vrot.slane %v6072_v6, %v4410_v7 }
 0x372   : > { %v6156_v59 = vpop.xlane.xlu1 %1801  ;;  %v6161_v31 = vpop.xlane.xlu0 %1870  ;;  %v2636_v6 = vrot.slane %v6091_v18, %v4412_v8 }
 0x373   : > { %v1962_v38 = vsel %vm1244_vm1, %v1227_v54, 0.0  ;;  %v1179_v54 = vmul.f32 %v4538_v13, %v763_v28 }
 0x375   : > { %1786 = vadd.xlane.f32.xlu1 %v1785_v37  ;;  %1957 = vadd.xlane.f32.xlu0 %v1956_v48  ;;  %v1791_v48 = vsel %vm1244_vm1, %v1170_v20, 0.0  ;;  %v1178_v20 = vmul.f32 %v4538_v13, %v762_v49  ;;  %v2627_v13 = vrot.slane %v6147_v55, %v4408_v3  ;;  %v2650_v55 = vrot.slane %v6106_v56, %v4410_v7 }
 0x376   : > { %v6170_v35 = vpop.xlane.xlu1 %1804  ;;  %v6175_v11 = vpop.xlane.xlu0 %1855 }
 0x379   : > { %1939 = vadd.xlane.f32.xlu1 %v1938_v33  ;;  %1768 = vadd.xlane.f32.xlu0 %v1767_v23  ;;  %v818_v33 = vld [vmem:[%s6765_s2 + $0x7b0] sm:$0xff]  ;;  %v2001_v23 = vsel %vm1244_vm1, %v1240_v42, 0.0  ;;  %v1818_v42 = vsel %vm1244_vm1, %v1179_v54, 0.0 }
 0x37a   : > { %v6184_v41 = vpop.xlane.xlu1 %1858  ;;  %v6189_v52 = vpop.xlane.xlu0 %1879  ;;  %v1234_v47 = vmul.f32 %v4576_v43, %v818_v33  ;;  %v827_v33 = vld [vmem:[%s6765_s2 + $0x7f8] sm:$0xff] }
 0x37c   : > { %v1983_v10 = vsel %vm1244_vm1, %v1234_v47, 0.0 }
 0x37d   : > { %1978 = vadd.xlane.f32.xlu1 %v1977_v57  ;;  %1789 = vadd.xlane.f32.xlu0 %v1788_v44  ;;  %v819_v57 = vld [vmem:[%s6765_s2 + $0x7b8] sm:$0xff]  ;;  %v825_v44 = vld [vmem:[%s6765_s2 + $0x7e8] sm:$0xff] }
 0x37e   : > { %v6198_v51 = vpop.xlane.xlu1 %1897  ;;  %v6203_v17 = vpop.xlane.xlu0 %1918  ;;  %v1235_v36 = vmul.f32 %v4576_v43, %v819_v57  ;;  %v3402_v43 = vrot.slane %v6184_v41, %v4408_v3  ;;  %v826_v41 = vld [vmem:[%s6765_s2 + $0x7f0] sm:$0xff]  ;;  %v1243_v57 = vmul.f32 %v4580_v46, %v827_v33 }
 0x37f   : > { %v1242_v32 = vmul.f32 %v4580_v46, %v826_v41  ;;  %v2669_v56 = vrot.slane %v6198_v51, %v4410_v7  ;;  %v2688_v51 = vrot.slane %v6142_v62, %v4410_v7 }
 0x380   : > { %v2010_v49 = vsel %vm1244_vm1, %v1243_v57, 0.0 }
 0x381   : > { %1771 = vadd.xlane.f32.xlu1 %v1770_v4  ;;  %1960 = vadd.xlane.f32.xlu0 %v1959_v21  ;;  %v1241_v4 = vmul.f32 %v4580_v46, %v825_v44  ;;  %v2007_v47 = vsel %vm1244_vm1, %v1242_v32, 0.0  ;;  %v2632_v44 = vsel %vm2152_vm2, %v2631_v29, %v2627_v13  ;;  %v2660_v46 = vrot.slane %v6189_v52, %v4414_v9 }
 0x382   : > { %v6212_v14 = vpop.xlane.xlu1 %1900  ;;  %v6217_v34 = vpop.xlane.xlu0 %1924  ;;  %v2637_v28 = vsel %vm2159_vm3, %v2636_v6, %v2632_v44 }
 0x383   : > { %v2674_v52 = vrot.slane %v6212_v14, %v4412_v8  ;;  %v2684_v14 = vrot.slane %v6203_v17, %v4408_v3 }
 0x385   : > { %1810 = vadd.xlane.f32.xlu1 %v1809_v1  ;;  %1981 = vadd.xlane.f32.xlu0 %v1980_v0  ;;  %v1986_v1 = vsel %vm1244_vm1, %v1235_v36, 0.0  ;;  %v2004_v0 = vsel %vm1244_vm1, %v1241_v4, 0.0 }
 0x386   : > { %v6226_v63 = vpop.xlane.xlu1 %1903  ;;  %v6231_v37 = vpop.xlane.xlu0 %1927 }
 0x387   : > { %v2679_v62 = vrot.slane %v6226_v63, %v4414_v9  ;;  %v2698_v63 = vrot.slane %v6231_v37, %v4414_v9 }
 0x389   : > { %1963 = vadd.xlane.f32.xlu1 %v1962_v38  ;;  %1792 = vadd.xlane.f32.xlu0 %v1791_v48  ;;  %v1815_v48 = vsel %vm1244_vm1, %v1178_v20, 0.0 }
 0x38a   : > { %v6240_v27 = vpop.xlane.xlu1 %1942  ;;  %v6245_v19 = vpop.xlane.xlu0 %1798 }
 0x38d   : > { %2002 = vadd.xlane.f32.xlu1 %v2001_v23  ;;  %1813 = vadd.xlane.f32.xlu0 %v1812_v45  ;;  %v2646_v45 = vrot.slane %v6161_v31, %v4408_v3 }
 0x38e   : > { %v6254_v39 = vpop.xlane.xlu1 %1948  ;;  %v6259_v58 = vpop.xlane.xlu0 %1807 }
 0x38f   : > { %v2651_v4 = vsel %vm2152_vm2, %v2650_v55, %v2646_v45  ;;  %v2712_v29 = vrot.slane %v6254_v39, %v4412_v8  ;;  %v2603_v57 = vrot.slane %v6259_v58, %v4414_v9  ;;  %v2598_v39 = vrot.slane %v6170_v35, %v4412_v8 }
 0x391   : > { %1795 = vadd.xlane.f32.xlu1 %v1794_v5  ;;  %1984 = vadd.xlane.f32.xlu0 %v1983_v10  ;;  %v2641_v5 = vrot.slane %v6175_v11, %v4414_v9  ;;  %v2655_v11 = vrot.slane %v6121_v22, %v4412_v8 }
 0x392   : > { %v6268_v21 = vpop.xlane.xlu1 %1969  ;;  %v1862_v53 = vpop.xlane.xlu0 %1861 }
 0x393   : > { %v3406_v12 = vrot.slane %v1862_v53, %v4410_v7  ;;  %v2642_v53 = vsel %vm2166_vm4, %v2641_v5, %v2637_v28  ;;  %v2726_v13 = vrot.slane %v6268_v21, %v4410_v7 }
 0x394   : > { %v2785_v20 = vsel %vm2757_vm5, %v2642_v53, %v6033_v50  ;;  %v2693_v50 = vrot.slane %v6217_v34, %v4412_v8 }
 0x395   : > { %1987 = vadd.xlane.f32.xlu1 %v1986_v1  ;;  %v6281_v2 = vsel %vm2152_vm2, %v3406_v12, %v3402_v43  ;;  %2005 = vadd.xlane.f32.xlu0 %v2004_v0  ;;  %v2656_v12 = vsel %vm2159_vm3, %v2655_v11, %v2651_v4  ;;  %v2593_v0 = vrot.slane %v6156_v59, %v4410_v7 }
 0x396   : > { %v6283_v24 = vpop.xlane.xlu1 %1972  ;;  %v1895_v38 = vpop.xlane.xlu0 %1894  ;;  %v2661_v22 = vsel %vm2166_vm4, %v2660_v46, %v2656_v12 }
 0x397   : > { %v2665_v36 = vrot.slane %v1895_v38, %v4408_v3  ;;  %v2786_v32 = vsel %vm2759_vm6, %v2661_v22, %v2785_v20  ;;  %v2731_v55 = vrot.slane %v6283_v24, %v4412_v8 }
 0x399   : > { %1819 = vadd.xlane.f32.xlu1 %v1818_v42  ;;  %1816 = vadd.xlane.f32.xlu0 %v1815_v48  ;;  %v2670_v18 = vsel %vm2152_vm2, %v2669_v56, %v2665_v36  ;;  %v2589_v42 = vrot.slane %v6245_v19, %v4408_v3  ;;  %v2703_v48 = vrot.slane %v6240_v27, %v4408_v3 }
 0x39a   : > { %v6293_v15 = vpop.xlane.xlu1 %1993  ;;  %v1946_v23 = vpop.xlane.xlu0 %1945  ;;  %v2675_v41 = vsel %vm2159_vm3, %v2674_v52, %v2670_v18 }
 0x39b   : > { %v2707_v54 = vrot.slane %v1946_v23, %v4410_v7  ;;  %v2680_v19 = vsel %vm2166_vm4, %v2679_v62, %v2675_v41  ;;  %v2594_v37 = vsel %vm2152_vm2, %v2593_v0, %v2589_v42 }
 0x39c   : > { %v2787_v36 = vsel %vm2761_vm7, %v2680_v19, %v2786_v32  ;;  %v2599_v35 = vsel %vm2159_vm3, %v2598_v39, %v2594_v37 }
 0x39d   : > { %2008 = vadd.xlane.f32.xlu0 %v2007_v47  ;;  %v2708_v23 = vsel %vm2152_vm2, %v2707_v54, %v2703_v48  ;;  %v2689_v47 = vsel %vm2152_vm2, %v2688_v51, %v2684_v14  ;;  %v2604_v28 = vsel %vm2166_vm4, %v2603_v57, %v2599_v35 }
 0x39e   : > { %v6310_v10 = vpop.xlane.xlu1 %1996  ;;  %v1967_v31 = vpop.xlane.xlu0 %1966  ;;  %v2694_v5 = vsel %vm2159_vm3, %v2693_v50, %v2689_v47  ;;  %v2784_v54 = vsel %vm2769_vm11, %v2604_v28, %v6127_v30 }
 0x39f   : > { %v2722_v38 = vrot.slane %v1967_v31, %v4408_v3  ;;  %v2745_v31 = vrot.slane %v6293_v15, %v4410_v7  ;;  %v2699_v46 = vsel %vm2166_vm4, %v2698_v63, %v2694_v5  ;;  %v2750_v56 = vrot.slane %v6310_v10, %v4412_v8 }
 0x3a1   : > { %2011 = vadd.xlane.f32.xlu0 %v2010_v49  ;;  %v2727_v34 = vsel %vm2152_vm2, %v2726_v13, %v2722_v38  ;;  %v2788_v49 = vsel %vm2763_vm8, %v2699_v46, %v2787_v36 }
 0x3a2   : > { %v2000_v43 = vpop.xlane.xlu1 %1999  ;;  %v1952_v1 = vpop.xlane.xlu0 %1951  ;;  %v2732_v4 = vsel %vm2159_vm3, %v2731_v55, %v2727_v34 }
 0x3a3   : > { %v2717_v27 = vrot.slane %v1952_v1, %v4414_v9  ;;  %v2755_v15 = vrot.slane %v2000_v43, %v4414_v9 }
 0x3a6   : > { %v1577_v59 = vpop.xlane.xlu1 %1576  ;;  %v1976_v33 = vpop.xlane.xlu0 %1975 }
 0x3a7   : > { %v3183_v17 = vrot.slane %v1577_v59, %v4412_v8  ;;  %v2736_v45 = vrot.slane %v1976_v33, %v4414_v9 }
 0x3a9   : > { %v6363_v21 = vsel %vm2159_vm3, %v3183_v17, %v5804_v40  ;;  %v2713_v40 = vsel %vm2159_vm3, %v2712_v29, %v2708_v23  ;;  %v2737_v11 = vsel %vm2166_vm4, %v2736_v45, %v2732_v4 }
 0x3aa   : > { %v6371_v44 = vpop.xlane.xlu1 %1597  ;;  %v1991_v6 = vpop.xlane.xlu0 %1990  ;;  %v2718_v58 = vsel %vm2166_vm4, %v2717_v27, %v2713_v40 }
 0x3ab   : > { %v2741_v24 = vrot.slane %v1991_v6, %v4408_v3  ;;  %v2789_v12 = vsel %vm2765_vm9, %v2718_v58, %v2788_v49 }
 0x3ac   : > { %v2790_v10 = vsel %vm2767_vm10, %v2737_v11, %v2789_v12 }
 0x3ad   : > { %v2746_v53 = vsel %vm2152_vm2, %v2745_v31, %v2741_v24 }
 0x3ae   : > { %v1673_v18 = vpop.xlane.xlu1 %1672  ;;  %v2751_v52 = vsel %vm2159_vm3, %v2750_v56, %v2746_v53  ;;  %v6394_v1 = vpop.xlane.xlu0 %1594 }
 0x3af   : > { %v3259_v51 = vrot.slane %v1673_v18, %v4412_v8  ;;  %v2756_v22 = vsel %vm2166_vm4, %v2755_v15, %v2751_v52 }
 0x3b0   : > { %v2791_v0 = vsel %vm2769_vm11, %v2756_v22, %v2790_v10 }
 0x3b1   : > { %v3260_v43 = vsel %vm2159_vm3, %v3259_v51, %v5997_v16  ;;  %v4245_v41 = vpack.c.bf16 %v2791_v0, %v2784_v54  ;;  %v3568_v16 = vld [vmem:[%s6766_s3 + $0x20] sm:$0xff]  ;;  %v3193_v0 = vrot.slane %v6394_v1, %v4408_v3 }
 0x3b2   : > { %v1694_v20 = vpop.xlane.xlu1 %1693  ;;  %v1649_v38 = vpop.xlane.xlu0 %1648  ;;  %4167 = vmatprep.mubr.msk.f32.mxu1 %vm1244_vm1, %v3568_v16 }
 0x3b3   : > { %v3240_v14 = vrot.slane %v1649_v38, %v4412_v8  ;;  %4246 = vmatprep.subr.bf16.mxu0 %v4245_v41  ;;  %4258 = vmatprep.subr.bf16.mxu1 %v4245_v41  ;;  %v3273_v59 = vrot.slane %v1694_v20, %v4410_v7 }
 0x3b4   : > { %4248 = vmatpush3.bf16.msra.mxu0 %v4245_v41  ;;  %4262 = vmatpush3.bf16.msra.mxu1 %v4245_v41 }
 0x3b5   : > { %v3241_v62 = vsel %vm2159_vm3, %v3240_v14, %v5822_v26  ;;  %v3197_v14 = vrot.slane %v6371_v44, %v4410_v7 }
 0x3b6   : > { %v1865_v42 = vpop.xlane.xlu1 %1864  ;;  %v1691_v48 = vpop.xlane.xlu0 %1690 }
 0x3b7   : > { %v3411_v30 = vrot.slane %v1865_v42, %v4412_v8  ;;  %v3269_v32 = vrot.slane %v1691_v48, %v4408_v3  ;;  %v3198_v16 = vsel %vm2152_vm2, %v3197_v14, %v3193_v0 }
 0x3b9   : > { %v3412_v50 = vsel %vm2159_vm3, %v3411_v30, %v6281_v2  ;;  %v3274_v13 = vsel %vm2152_vm2, %v3273_v59, %v3269_v32 }
 0x3ba   : > { %v1886_v26 = vpop.xlane.xlu1 %1885  ;;  %v1841_v33 = vpop.xlane.xlu0 %1840 }
 0x3bb   : > { %v3392_v17 = vrot.slane %v1841_v33, %v4412_v8  ;;  %v3425_v27 = vrot.slane %v1886_v26, %v4410_v7 }
 0x3bd   : > { %v3393_v63 = vsel %vm2159_vm3, %v3392_v17, %v6140_v61 }
 0x3be   : > { %v1601_v19 = vpop.xlane.xlu1 %1600  ;;  %v1883_v23 = vpop.xlane.xlu0 %1882 }
 0x3bf   : > { %v3421_v29 = vrot.slane %v1883_v23, %v4408_v3  ;;  %v3202_v38 = vrot.slane %v1601_v19, %v4412_v8  ;;  %v3564_v19 = vld [vmem:[%s6766_s3] sm:$0xff] }
 0x3c0   : > { %4161 = vmatprep.mubr.msk.f32.mxu0 %vm1244_vm1, %v3564_v19 }
 0x3c1   : > { %v3426_v34 = vsel %vm2152_vm2, %v3425_v27, %v3421_v29  ;;  %v3203_v1 = vsel %vm2159_vm3, %v3202_v38, %v3198_v16 }
 0x3c2   : > { %v6423_v45 = vpop.xlane.xlu1 %1621  ;;  %v1580_v2 = vpop.xlane.xlu0 %1579 }
 0x3c3   : > { %v3188_v47 = vrot.slane %v1580_v2, %v4414_v9 }
 0x3c5   : > { %v3189_v37 = vsel %vm2166_vm4, %v3188_v47, %v6363_v21 }
 0x3c6   : > { %v1676_v57 = vpop.xlane.xlu1 %1675  ;;  %v3543_v61 = vsel %vm2765_vm9, %v3189_v37, %v5796_v60  ;;  %v6430_v55 = vpop.xlane.xlu0 %1618 }
 0x3c7   : > { %v3264_v39 = vrot.slane %v1676_v57, %v4414_v9 }
 0x3c9   : > { %v3265_v5 = vsel %vm2166_vm4, %v3264_v39, %v3260_v43 }
 0x3ca   : > { %v1715_v40 = vpop.xlane.xlu1 %1714  ;;  %v1652_v36 = vpop.xlane.xlu0 %1651 }
 0x3cb   : > { %v3245_v6 = vrot.slane %v1652_v36, %v4414_v9  ;;  %v3288_v49 = vrot.slane %v1715_v40, %v4408_v3 }
 0x3cd   : > { %v3246_v31 = vsel %vm2166_vm4, %v3245_v6, %v3241_v62  ;;  %v3216_v6 = vrot.slane %v6423_v45, %v4410_v7 }
 0x3ce   : > { %v1844_v58 = vpop.xlane.xlu1 %1843  ;;  %v3546_v4 = vsel %vm2757_vm5, %v3265_v5, %v3246_v31  ;;  %v1697_v21 = vpop.xlane.xlu0 %1696  ;;  %v3212_v5 = vrot.slane %v6430_v55, %v4408_v3 }
 0x3cf   : > { %v3397_v24 = vrot.slane %v1844_v58, %v4414_v9  ;;  %v3278_v60 = vrot.slane %v1697_v21, %v4412_v8 }
 0x3d0   : > { %v3217_v21 = vsel %vm2152_vm2, %v3216_v6, %v3212_v5 }
 0x3d1   : > { %v3398_v46 = vsel %vm2166_vm4, %v3397_v24, %v3393_v63  ;;  %v3279_v35 = vsel %vm2159_vm3, %v3278_v60, %v3274_v13 }
 0x3d2   : > { %v1889_v56 = vpop.xlane.xlu1 %1888  ;;  %v1718_v11 = vpop.xlane.xlu0 %1717 }
 0x3d3   : > { %v3430_v28 = vrot.slane %v1889_v56, %v4412_v8  ;;  %v3292_v15 = vrot.slane %v1718_v11, %v4410_v7 }
 0x3d5   : > { %v3431_v53 = vsel %vm2159_vm3, %v3430_v28, %v3426_v34  ;;  %v3293_v18 = vsel %vm2152_vm2, %v3292_v15, %v3288_v49 }
 0x3d6   : > { %v1910_v12 = vpop.xlane.xlu1 %1909  ;;  %v1868_v52 = vpop.xlane.xlu0 %1867 }
 0x3d7   : > { %v3416_v51 = vrot.slane %v1868_v52, %v4414_v9  ;;  %v3444_v20 = vrot.slane %v1910_v12, %v4410_v7 }
 0x3d9   : > { %v3417_v10 = vsel %vm2166_vm4, %v3416_v51, %v3412_v50 }
 0x3da   : > { %v1625_v22 = vpop.xlane.xlu1 %1624  ;;  %v3553_v54 = vsel %vm2757_vm5, %v3417_v10, %v3398_v46  ;;  %v1907_v43 = vpop.xlane.xlu0 %1906 }
 0x3db   : > { %v3440_v41 = vrot.slane %v1907_v43, %v4408_v3  ;;  %v3221_v40 = vrot.slane %v1625_v22, %v4412_v8 }
 0x3dd   : > { %v3445_v62 = vsel %vm2152_vm2, %v3444_v20, %v3440_v41  ;;  %v3222_v46 = vsel %vm2159_vm3, %v3221_v40, %v3217_v21 }
 0x3de   : > { %v1721_v42 = vpop.xlane.xlu1 %1720  ;;  %v1604_v48 = vpop.xlane.xlu0 %1603 }
 0x3df   : > { %v3297_v30 = vrot.slane %v1721_v42, %v4412_v8  ;;  %v3207_v59 = vrot.slane %v1604_v48, %v4414_v9 }
 0x3e1   : > { %v3298_v32 = vsel %vm2159_vm3, %v3297_v30, %v3293_v18  ;;  %v3208_v50 = vsel %vm2166_vm4, %v3207_v59, %v3203_v1 }
 0x3e2   : > { %v1742_v13 = vpop.xlane.xlu1 %1741  ;;  %v3544_v26 = vsel %vm2767_vm10, %v3208_v50, %v3543_v61  ;;  %v1700_v44 = vpop.xlane.xlu0 %1699 }
 0x3e3   : > { %v3283_v33 = vrot.slane %v1700_v44, %v4414_v9  ;;  %v3311_v10 = vrot.slane %v1742_v13, %v4410_v7 }
 0x3e5   : > { %v3284_v17 = vsel %vm2166_vm4, %v3283_v33, %v3279_v35 }
 0x3e6   : > { %v1913_v63 = vpop.xlane.xlu1 %1912  ;;  %v3547_v23 = vsel %vm2759_vm6, %v3284_v17, %v3546_v4  ;;  %v1739_v27 = vpop.xlane.xlu0 %1738 }
 0x3e7   : > { %v3449_v24 = vrot.slane %v1913_v63, %v4412_v8  ;;  %v3307_v12 = vrot.slane %v1739_v27, %v4408_v3 }
 0x3e9   : > { %v3450_v28 = vsel %vm2159_vm3, %v3449_v24, %v3445_v62 }
 0x3ea   : > { %v6471_v29 = vpop.xlane.xlu1 %1933  ;;  %v1892_v34 = vpop.xlane.xlu0 %1891 }
 0x3eb   : > { %v3435_v2 = vrot.slane %v1892_v34, %v4414_v9 }
 0x3ed   : > { %v3436_v47 = vsel %vm2166_vm4, %v3435_v2, %v3431_v53  ;;  %v3463_v2 = vrot.slane %v6471_v29, %v4410_v7 }
 0x3ee   : > { %v1724_v37 = vpop.xlane.xlu1 %1723  ;;  %v3554_v57 = vsel %vm2759_vm6, %v3436_v47, %v3553_v54  ;;  %v6476_v61 = vpop.xlane.xlu0 %1930 }
 0x3ef   : > { %v3302_v39 = vrot.slane %v1724_v37, %v4414_v9  ;;  %v3459_v63 = vrot.slane %v6476_v61, %v4408_v3 }
 0x3f1   : > { %v3303_v36 = vsel %vm2166_vm4, %v3302_v39, %v3298_v32  ;;  %v3464_v5 = vsel %vm2152_vm2, %v3463_v2, %v3459_v63  ;;  %v3572_v2 = vld [vmem:[%s6766_s3 + $0x40] sm:$0xff] }
 0x3f2   : > { %v3548_v31 = vsel %vm2761_vm7, %v3303_v36, %v3547_v23  ;;  %v1763_v58 = vpop.xlane.xlu1 %1762  ;;  %v1628_v4 = vpop.xlane.xlu0 %1627 }
 0x3f3   : > { %v3226_v60 = vrot.slane %v1628_v4, %v4414_v9 }
 0x3f5   : > { %v3227_v55 = vsel %vm2166_vm4, %v3226_v60, %v3222_v46 }
 0x3f6   : > { %v1916_v35 = vpop.xlane.xlu1 %1915  ;;  %v3545_v56 = vsel %vm2769_vm11, %v3227_v55, %v3544_v26  ;;  %v1745_v11 = vpop.xlane.xlu0 %1744 }
 0x3f7   : > { %v3454_v45 = vrot.slane %v1916_v35, %v4414_v9  ;;  %v4249_v49 = vpack.c.bf16 %v3545_v56, %v5445_v25  ;;  %v3316_v51 = vrot.slane %v1745_v11, %v4412_v8  ;;  %v3312_v25 = vsel %vm2152_vm2, %v3311_v10, %v3307_v12 }
 0x3f9   : > { %v3455_v15 = vsel %vm2166_vm4, %v3454_v45, %v3450_v28  ;;  %4250 = vmatprep.subr.bf16.mxu0 %v4249_v49  ;;  %4259 = vmatprep.subr.bf16.mxu1 %v4249_v49  ;;  %v3317_v0 = vsel %vm2159_vm3, %v3316_v51, %v3312_v25 }
 0x3fa   : > { %v6497_v53 = vsel %vm2761_vm7, %v3455_v15, %v3554_v57  ;;  %v1955_v18 = vpop.xlane.xlu1 %1954  ;;  %v1766_v52 = vpop.xlane.xlu0 %1765  ;;  %4252 = vmatpush3.bf16.msra.mxu0 %v4249_v49  ;;  %4263 = vmatpush3.bf16.msra.mxu1 %v4249_v49  ;;  %v3326_v57 = vrot.slane %v1763_v58, %v4408_v3 }
 0x3fb   : > { %v3330_v19 = vrot.slane %v1766_v52, %v4410_v7  ;;  %v3478_v61 = vrot.slane %v1955_v18, %v4408_v3 }
 0x3fd   : > { %v3331_v40 = vsel %vm2152_vm2, %v3330_v19, %v3326_v57  ;;  %v3570_v19 = vld [vmem:[%s6766_s3 + $0x30] sm:$0xff]  ;;  %v3575_v57 = vld [vmem:[%s6766_s3 + $0x58] sm:$0xff] }
 0x3fe   : > { %v1748_v22 = vpop.xlane.xlu1 %1747  ;;  %v1937_v54 = vpop.xlane.xlu0 %1936 }
 0x3ff   : > { %v3321_v43 = vrot.slane %v1748_v22, %v4414_v9  ;;  %v3468_v23 = vrot.slane %v1937_v54, %v4412_v8 }
 0x401   : > { %v3322_v20 = vsel %vm2166_vm4, %v3321_v43, %v3317_v0  ;;  %v3469_v36 = vsel %vm2159_vm3, %v3468_v23, %v3464_v5  ;;  %v3566_v23 = vld [vmem:[%s6766_s3 + $0x10] sm:$0xff]  ;;  %v3577_v5 = vld [vmem:[%s6766_s3 + $0x68] sm:$0xff] }
 0x402   : > { %v6507_v41 = vsel %vm2763_vm8, %v3322_v20, %v3548_v31  ;;  %v1787_v38 = vpop.xlane.xlu1 %1786  ;;  %v1958_v14 = vpop.xlane.xlu0 %1957 }
 0x403   : > { %v3482_v47 = vrot.slane %v1958_v14, %v4410_v7  ;;  %v3345_v6 = vrot.slane %v1787_v38, %v4408_v3 }
 0x405   : > { %v3483_v4 = vsel %vm2152_vm2, %v3482_v47, %v3478_v61  ;;  %v3573_v47 = vld [vmem:[%s6766_s3 + $0x48] sm:$0xff]  ;;  %v3578_v61 = vld [vmem:[%s6766_s3 + $0x70] sm:$0xff] }
 0x406   : > { %v1940_v62 = vpop.xlane.xlu1 %1939  ;;  %v1769_v42 = vpop.xlane.xlu0 %1768 }
 0x407   : > { %v3473_v37 = vrot.slane %v1940_v62, %v4414_v9  ;;  %v3335_v39 = vrot.slane %v1769_v42, %v4412_v8 }
 0x409   : > { %v3474_v21 = vsel %vm2166_vm4, %v3473_v37, %v3469_v36  ;;  %v3336_v60 = vsel %vm2159_vm3, %v3335_v39, %v3331_v40  ;;  %v3574_v37 = vld [vmem:[%s6766_s3 + $0x50] sm:$0xff]  ;;  %v3576_v39 = vld [vmem:[%s6766_s3 + $0x60] sm:$0xff]  ;;  %v3579_v40 = vld [vmem:[%s6766_s3 + $0x78] sm:$0xff] }
 0x40a   : > { %v1979_v48 = vpop.xlane.xlu1 %1978  ;;  %v1790_v30 = vpop.xlane.xlu0 %1789  ;;  %v3580_v36 = vld [vmem:[%s6766_s3 + $0x80] sm:$0xff] }
 0x40b   : > { %v3349_v29 = vrot.slane %v1790_v30, %v4410_v7  ;;  %v3497_v18 = vrot.slane %v1979_v48, %v4408_v3 }
 0x40d   : > { %v3350_v15 = vsel %vm2152_vm2, %v3349_v29, %v3345_v6  ;;  %v3581_v6 = vld [vmem:[%s6766_s3 + $0x88] sm:$0xff]  ;;  %v3582_v29 = vld [vmem:[%s6766_s3 + $0x90] sm:$0xff] }
 0x40e   : > { %v1772_v16 = vpop.xlane.xlu1 %1771  ;;  %v1961_v59 = vpop.xlane.xlu0 %1960 }
 0x40f   : > { %v3340_v58 = vrot.slane %v1772_v16, %v4414_v9  ;;  %v3487_v46 = vrot.slane %v1961_v59, %v4412_v8  ;;  %v3556_v59 = vsel %vm2763_vm8, %v3474_v21, %v6497_v53  ;;  %v3585_v21 = vld [vmem:[%s6766_s3 + $0xa8] sm:$0xff] }
 0x411   : > { %v3341_v10 = vsel %vm2166_vm4, %v3340_v58, %v3336_v60  ;;  %v3488_v43 = vsel %vm2159_vm3, %v3487_v46, %v3483_v4  ;;  %v3584_v4 = vld [vmem:[%s6766_s3 + $0xa0] sm:$0xff]  ;;  %v3586_v58 = vld [vmem:[%s6766_s3 + $0xb0] sm:$0xff]  ;;  %v3589_v46 = vld [vmem:[%s6766_s3 + $0xc8] sm:$0xff] }
 0x412   : > { %v1811_v1 = vpop.xlane.xlu1 %1810  ;;  %v1982_v32 = vpop.xlane.xlu0 %1981  ;;  %v3588_v60 = vld [vmem:[%s6766_s3 + $0xc0] sm:$0xff] }
 0x413   : > { %v3501_v55 = vrot.slane %v1982_v32, %v4410_v7  ;;  %v3364_v11 = vrot.slane %v1811_v1, %v4408_v3 }
 0x415   : > { %v3502_v0 = vsel %vm2152_vm2, %v3501_v55, %v3497_v18  ;;  %v3590_v55 = vld [vmem:[%s6766_s3 + $0xd0] sm:$0xff] }
 0x416   : > { %v1964_v50 = vpop.xlane.xlu1 %1963  ;;  %v1793_v13 = vpop.xlane.xlu0 %1792 }
 0x417   : > { %v3354_v45 = vrot.slane %v1793_v13, %v4412_v8  ;;  %v3492_v28 = vrot.slane %v1964_v50, %v4414_v9  ;;  %v3550_v50 = vsel %vm2765_vm9, %v3341_v10, %v6507_v41  ;;  %v3565_v41 = vld [vmem:[%s6766_s3 + $0x8] sm:$0xff] }
 0x419   : > { %v3355_v14 = vsel %vm2159_vm3, %v3354_v45, %v3350_v15  ;;  %v3493_v62 = vsel %vm2166_vm4, %v3492_v28, %v3488_v43  ;;  %v3594_v45 = vld [vmem:[%s6766_s3 + $0xf0] sm:$0xff]  ;;  %v3595_v28 = vld [vmem:[%s6766_s3 + $0xf8] sm:$0xff] }
 0x41a   : > { %v2003_v26 = vpop.xlane.xlu1 %2002  ;;  %v1814_v44 = vpop.xlane.xlu0 %1813 }
 0x41b   : > { %v3368_v24 = vrot.slane %v1814_v44, %v4410_v7  ;;  %v3516_v42 = vrot.slane %v2003_v26, %v4408_v3  ;;  %v3557_v3 = vsel %vm2765_vm9, %v3493_v62, %v3556_v59 }
 0x41d   : > { %v3369_v22 = vsel %vm2152_vm2, %v3368_v24, %v3364_v11  ;;  %v3587_v24 = vld [vmem:[%s6766_s3 + $0xb8] sm:$0xff]  ;;  %v3593_v11 = vld [vmem:[%s6766_s3 + $0xe8] sm:$0xff] }
 0x41e   : > { %v1796_v33 = vpop.xlane.xlu1 %1795  ;;  %v1985_v17 = vpop.xlane.xlu0 %1984 }
 0x41f   : > { %v3506_v49 = vrot.slane %v1985_v17, %v4412_v8  ;;  %v3359_v12 = vrot.slane %v1796_v33, %v4414_v9 }
 0x421   : > { %v3507_v48 = vsel %vm2159_vm3, %v3506_v49, %v3502_v0 }
 0x422   : > { %v2006_v27 = vpop.xlane.xlu0 %2005  ;;  %v1988_v34 = vpop.xlane.xlu1 %1987 }
 0x423   : > { %v3511_v52 = vrot.slane %v1988_v34, %v4414_v9  ;;  %v3520_v25 = vrot.slane %v2006_v27, %v4410_v7  ;;  %v3360_v7 = vsel %vm2166_vm4, %v3359_v12, %v3355_v14  ;;  %v3571_v27 = vld [vmem:[%s6766_s3 + $0x38] sm:$0xff] }
 0x424   : > { %v3551_v26 = vsel %vm2767_vm10, %v3360_v7, %v3550_v50  ;;  %v3567_v34 = vld [vmem:[%s6766_s3 + $0x18] sm:$0xff] }
 0x425   : > { %v3512_v30 = vsel %vm2166_vm4, %v3511_v52, %v3507_v48  ;;  %v3521_v1 = vsel %vm2152_vm2, %v3520_v25, %v3516_v42 }
 0x426   : > { %v1817_v31 = vpop.xlane.xlu0 %1816  ;;  %v1820_v56 = vpop.xlane.xlu1 %1819  ;;  %v3558_v44 = vsel %vm2767_vm10, %v3512_v30, %v3557_v3 }
 0x427   : > { %v3373_v35 = vrot.slane %v1817_v31, %v4412_v8  ;;  %v3378_v54 = vrot.slane %v1820_v56, %v4414_v9  ;;  %v3583_v31 = vld [vmem:[%s6766_s3 + $0x98] sm:$0xff]  ;;  %v3592_v56 = vld [vmem:[%s6766_s3 + $0xe0] sm:$0xff] }
 0x429   : > { %v3374_v20 = vsel %vm2159_vm3, %v3373_v35, %v3369_v22  ;;  %v3591_v35 = vld [vmem:[%s6766_s3 + $0xd8] sm:$0xff] }
 0x42a   : > { %v2009_v51 = vpop.xlane.xlu0 %2008 }
 0x42b   : > { %v3525_v38 = vrot.slane %v2009_v51, %v4412_v8  ;;  %v3379_v8 = vsel %vm2166_vm4, %v3378_v54, %v3374_v20 }
 0x42c   : > { %v3552_v53 = vsel %vm2769_vm11, %v3379_v8, %v3551_v26 }
 0x42d   : > { %v3526_v13 = vsel %vm2159_vm3, %v3525_v38, %v3521_v1 }
 0x42e   : > { %v2012_v16 = vpop.xlane.xlu0 %2011 }
 0x42f   : > { %v3530_v32 = vrot.slane %v2012_v16, %v4414_v9  ;;  %v3569_v9 = vld [vmem:[%s6766_s3 + $0x28] sm:$0xff] }
 0x431   : > { %v3531_v33 = vsel %vm2166_vm4, %v3530_v32, %v3526_v13 }
 0x432   : > { %v3559_v17 = vsel %vm2769_vm11, %v3531_v33, %v3558_v44 }
 0x433   : > { %v4253_v63 = vpack.c.bf16 %v3559_v17, %v3552_v53 }
 0x435   : > { %4254 = vmatprep.subr.bf16.mxu0 %v4253_v63  ;;  %4260 = vmatprep.subr.bf16.mxu1 %v4253_v63 }
 0x436   : > { %4256 = vmatpush3.bf16.msra.mxu0 %v4253_v63  ;;  %4264 = vmatpush3.bf16.msra.mxu1 %v4253_v63 }
 0x439   : > { %4168 = vmatmul.mubr.msk.f32.vlgmr.msra.gmra.mrb[0].mxu1 %vm1244_vm1, %v3569_v9  ;;  %4162 = vmatmul.mubr.msk.f32.vlgmr.msra.gmra.mrb[16].mxu0 %vm1244_vm1, %v3565_v41 }
 0x43a   : > { %4170 = vmatprep.mubr.msk.f32.mxu1 %vm1244_vm1, %v3570_v19  ;;  %4164 = vmatprep.mubr.msk.f32.mxu0 %vm1244_vm1, %v3566_v23 }
 0x43d   : > { %4171 = vmatmul.mubr.msk.f32.gmra.mrb[2].mxu1 %vm1244_vm1, %v3571_v27  ;;  %4165 = vmatmul.mubr.msk.f32.gmra.mrb[18].mxu0 %vm1244_vm1, %v3567_v34 }
 0x43e   : > { %4173 = vmatprep.mubr.msk.f32.mxu1 %vm1244_vm1, %v3572_v2 }
 0x441   : > { %4174 = vmatmul.mubr.msk.f32.gmra.mrb[4].mxu1 %vm1244_vm1, %v3573_v47 }
 0x442   : > { %4176 = vmatprep.mubr.msk.f32.mxu1 %vm1244_vm1, %v3574_v37 }
 0x445   : > { %4177 = vmatmul.mubr.msk.f32.gmra.mrb[6].mxu1 %vm1244_vm1, %v3575_v57 }
 0x446   : > { %4179 = vmatprep.mubr.msk.f32.mxu1 %vm1244_vm1, %v3576_v39 }
 0x449   : > { %4180 = vmatmul.mubr.msk.f32.gmra.mrb[8].mxu1 %vm1244_vm1, %v3577_v5 }
 0x44a   : > { %4182 = vmatprep.mubr.msk.f32.mxu1 %vm1244_vm1, %v3578_v61 }
 0x44d   : > { %4183 = vmatmul.mubr.msk.f32.gmra.mrb[10].mxu1 %vm1244_vm1, %v3579_v40 }
 0x44e   : > { %4185 = vmatprep.mubr.msk.f32.mxu1 %vm1244_vm1, %v3580_v36 }
 0x451   : > { %4186 = vmatmul.mubr.msk.f32.gmra.mrb[12].mxu1 %vm1244_vm1, %v3581_v6 }
 0x452   : > { %4188 = vmatprep.mubr.msk.f32.mxu1 %vm1244_vm1, %v3582_v29 }
 0x455   : > { %4189 = vmatmul.mubr.msk.f32.gmra.mrb[14].mxu1 %vm1244_vm1, %v3583_v31 }
 0x456   : > { %4191 = vmatprep.mubr.msk.f32.mxu1 %vm1244_vm1, %v3584_v4 }
 0x459   : > { %4192 = vmatmul.mubr.msk.f32.gmra.mrb[16].mxu1 %vm1244_vm1, %v3585_v21 }
 0x45a   : > { %4194 = vmatprep.mubr.msk.f32.mxu1 %vm1244_vm1, %v3586_v58 }
 0x45d   : > { %4195 = vmatmul.mubr.msk.f32.gmra.mrb[18].mxu1 %vm1244_vm1, %v3587_v24 }
 0x45e   : > { %4197 = vmatprep.mubr.msk.f32.mxu1 %vm1244_vm1, %v3588_v60 }
 0x461   : > { %4198 = vmatmul.mubr.msk.f32.gmra.mrb[20].mxu1 %vm1244_vm1, %v3589_v46 }
 0x462   : > { %4200 = vmatprep.mubr.msk.f32.mxu1 %vm1244_vm1, %v3590_v55 }
 0x465   : > { %4201 = vmatmul.mubr.msk.f32.gmra.mrb[22].mxu1 %vm1244_vm1, %v3591_v35 }
 0x466   : > { %4203 = vmatprep.mubr.msk.f32.mxu1 %vm1244_vm1, %v3592_v56 }
 0x469   : > { %4204 = vmatmul.mubr.msk.f32.gmra.mrb[24].mxu1 %vm1244_vm1, %v3593_v11 }
 0x46a   : > { %4206 = vmatprep.mubr.msk.f32.mxu1 %vm1244_vm1, %v3594_v45 }
 0x46d   : > { %4207 = vmatmul.mubr.msk.f32.gmra.mrb[26].mxu1 %vm1244_vm1, %v3595_v28 }
 0x50c   : > { %v4169_v49 = vpop.f32.mrb[0].mxu1  ;;  %v4163_v15 = vpop.f32.mrb[16].mxu0 }
 0x50d   : > { %3922 = vst.msk [vmem:[%s6694_s8 + $0x28] sm:$0xff] %vm367_vm0, %v4169_v49  ;;  %v3778_v18 = vpop.f32.mrb[1].mxu1  ;;  %3918 = vst.msk [vmem:[%s6694_s8 + $0x8] sm:$0xff] %vm367_vm0, %v4163_v15  ;;  %v3758_v12 = vpop.f32.mrb[17].mxu0 }
 0x50e   : > { %3921 = vst.msk [vmem:[%s6694_s8 + $0x20] sm:$0xff] %vm367_vm0, %v3778_v18  ;;  %3917 = vst.msk [vmem:[%s6694_s8] sm:$0xff] %vm367_vm0, %v3758_v12 }
 0x510   : > { %v4172_v52 = vpop.f32.mrb[2].mxu1  ;;  %v4166_v51 = vpop.f32.mrb[18].mxu0 }
 0x511   : > { %3924 = vst.msk [vmem:[%s6694_s8 + $0x38] sm:$0xff] %vm367_vm0, %v4172_v52  ;;  %v3788_v10 = vpop.f32.mrb[3].mxu1  ;;  %3920 = vst.msk [vmem:[%s6694_s8 + $0x18] sm:$0xff] %vm367_vm0, %v4166_v51  ;;  %v3768_v22 = vpop.f32.mrb[19].mxu0 }
 0x512   : > { %3923 = vst.msk [vmem:[%s6694_s8 + $0x30] sm:$0xff] %vm367_vm0, %v3788_v10  ;;  %3919 = vst.msk [vmem:[%s6694_s8 + $0x10] sm:$0xff] %vm367_vm0, %v3768_v22 }
 0x514   : > { %v4175_v25 = vpop.f32.mrb[4].mxu1 }
 0x515   : > { %3926 = vst.msk [vmem:[%s6694_s8 + $0x48] sm:$0xff] %vm367_vm0, %v4175_v25  ;;  %v3798_v54 = vpop.f32.mrb[5].mxu1 }
 0x516   : > { %3925 = vst.msk [vmem:[%s6694_s8 + $0x40] sm:$0xff] %vm367_vm0, %v3798_v54 }
 0x518   : > { %v4178_v43 = vpop.f32.mrb[6].mxu1 }
 0x519   : > { %3928 = vst.msk [vmem:[%s6694_s8 + $0x58] sm:$0xff] %vm367_vm0, %v4178_v43  ;;  %v3808_v0 = vpop.f32.mrb[7].mxu1 }
 0x51a   : > { %3927 = vst.msk [vmem:[%s6694_s8 + $0x50] sm:$0xff] %vm367_vm0, %v3808_v0 }
 0x51c   : > { %v4181_v20 = vpop.f32.mrb[8].mxu1 }
 0x51d   : > { %3930 = vst.msk [vmem:[%s6694_s8 + $0x68] sm:$0xff] %vm367_vm0, %v4181_v20  ;;  %v3818_v38 = vpop.f32.mrb[9].mxu1 }
 0x51e   : > { %3929 = vst.msk [vmem:[%s6694_s8 + $0x60] sm:$0xff] %vm367_vm0, %v3818_v38 }
 0x520   : > { %v4184_v14 = vpop.f32.mrb[10].mxu1 }
 0x521   : > { %3932 = vst.msk [vmem:[%s6694_s8 + $0x78] sm:$0xff] %vm367_vm0, %v4184_v14  ;;  %v3828_v62 = vpop.f32.mrb[11].mxu1 }
 0x522   : > { %3931 = vst.msk [vmem:[%s6694_s8 + $0x70] sm:$0xff] %vm367_vm0, %v3828_v62 }
 0x524   : > { %v4187_v42 = vpop.f32.mrb[12].mxu1 }
 0x525   : > { %3934 = vst.msk [vmem:[%s6694_s8 + $0x88] sm:$0xff] %vm367_vm0, %v4187_v42  ;;  %v3838_v48 = vpop.f32.mrb[13].mxu1 }
 0x526   : > { %3933 = vst.msk [vmem:[%s6694_s8 + $0x80] sm:$0xff] %vm367_vm0, %v3838_v48 }
 0x528   : > { %v4190_v7 = vpop.f32.mrb[14].mxu1 }
 0x529   : > { %3936 = vst.msk [vmem:[%s6694_s8 + $0x98] sm:$0xff] %vm367_vm0, %v4190_v7  ;;  %v3848_v30 = vpop.f32.mrb[15].mxu1 }
 0x52a   : > { %3935 = vst.msk [vmem:[%s6694_s8 + $0x90] sm:$0xff] %vm367_vm0, %v3848_v30 }
 0x52c   : > { %v4193_v16 = vpop.f32.mrb[16].mxu1 }
 0x52d   : > { %3938 = vst.msk [vmem:[%s6694_s8 + $0xa8] sm:$0xff] %vm367_vm0, %v4193_v16  ;;  %v3858_v59 = vpop.f32.mrb[17].mxu1 }
 0x52e   : > { %3937 = vst.msk [vmem:[%s6694_s8 + $0xa0] sm:$0xff] %vm367_vm0, %v3858_v59 }
 0x530   : > { %v4196_v1 = vpop.f32.mrb[18].mxu1 }
 0x531   : > { %3940 = vst.msk [vmem:[%s6694_s8 + $0xb8] sm:$0xff] %vm367_vm0, %v4196_v1  ;;  %v3868_v8 = vpop.f32.mrb[19].mxu1 }
 0x532   : > { %3939 = vst.msk [vmem:[%s6694_s8 + $0xb0] sm:$0xff] %vm367_vm0, %v3868_v8 }
 0x534   : > { %v4199_v32 = vpop.f32.mrb[20].mxu1 }
 0x535   : > { %3942 = vst.msk [vmem:[%s6694_s8 + $0xc8] sm:$0xff] %vm367_vm0, %v4199_v32  ;;  %v3878_v50 = vpop.f32.mrb[21].mxu1 }
 0x536   : > { %3941 = vst.msk [vmem:[%s6694_s8 + $0xc0] sm:$0xff] %vm367_vm0, %v3878_v50 }
 0x538   : > { %v4202_v3 = vpop.f32.mrb[22].mxu1 }
 0x539   : > { %3944 = vst.msk [vmem:[%s6694_s8 + $0xd8] sm:$0xff] %vm367_vm0, %v4202_v3  ;;  %v3888_v13 = vpop.f32.mrb[23].mxu1 }
 0x53a   : > { %3943 = vst.msk [vmem:[%s6694_s8 + $0xd0] sm:$0xff] %vm367_vm0, %v3888_v13 }
 0x53c   : > { %v4205_v26 = vpop.f32.mrb[24].mxu1 }
 0x53d   : > { %3946 = vst.msk [vmem:[%s6694_s8 + $0xe8] sm:$0xff] %vm367_vm0, %v4205_v26  ;;  %v3898_v44 = vpop.f32.mrb[25].mxu1 }
 0x53e   : > { %3945 = vst.msk [vmem:[%s6694_s8 + $0xe0] sm:$0xff] %vm367_vm0, %v3898_v44 }
 0x540   : > { %v4208_v33 = vpop.f32.mrb[26].mxu1 }
 0x541   : > { %3948 = vst.msk [vmem:[%s6694_s8 + $0xf8] sm:$0xff] %vm367_vm0, %v4208_v33  ;;  %v3908_v53 = vpop.f32.mrb[27].mxu1 }
 0x542   : > { %3947 = vst.msk [vmem:[%s6694_s8 + $0xf0] sm:$0xff] %vm367_vm0, %v3908_v53 }
 0x543 PF: > { %s14_s15 = sadd.s32 1, %s4281_s15  }
 0x544   : > { %p11_p4 = scmp.ge.s32.totalorder %s14_s15, 4  }
 0x546   :  { %13 = sbr.rel (!%p11_p4) target bundleno = 1 (0x1), region = 66 }

// kernel: simple_block2d_forward.27
= control target key start
LH: loop header
LB: loop body
LE: loop exit
PB: predicated region body
PF: predicated region fallthrough
CT: control target
= control target key end

     0   :  { %vm97_vm0 = vcmask 261120   ;;  %vm1147_vm1 = vcmask 7168   ;;  %s2458_s1 = inlined_call_operand.vmem [shape: f32[32,128], index: 1, kind: input, shape index: {}]   ;;  %s2459_s0 = inlined_call_operand.vmem [shape: f32[512,32], index: 0, kind: input, shape index: {}]   ;;  %s2460_s3 = inlined_call_operand.vmem [shape: f32[128,1], index: 3, kind: input, shape index: {}]   ;;  %s2461_s2 = inlined_call_operand.vmem [shape: f32[1,128], index: 2, kind: input, shape index: {}]   ;;  %s2462_s4 = inlined_call_operand.<no memory space> [shape: f32[1,1], index: 4, kind: input, shape index: {}]   ;;  %s2463_s5 = inlined_call_operand.vmem [shape: f32[512,1], index: 5, kind: output, shape index: {}]  }
   0x1   :  { %v86_v0 = vld [vmem:[%s2458_s1] sm:$0xff]  ;;  %v87_v1 = vld [vmem:[%s2458_s1 + $0x8] sm:$0xff]  ;;  %v88_v2 = vld [vmem:[%s2458_s1 + $0x10] sm:$0xff] }
   0x2   :  { %v1662_v3 = vpack.c.bf16 %v87_v1, %v86_v0  ;;  %v89_v4 = vld [vmem:[%s2458_s1 + $0x18] sm:$0xff]  ;;  %v22_v5 = vld [vmem:[%s2459_s0] sm:$0xff]  ;;  %v23_v7 = vld [vmem:[%s2459_s0 + $0x8] sm:$0xff] }
   0x3   :  { %v1666_v6 = vpack.c.bf16 %v89_v4, %v88_v2  ;;  %1438 = vmatprep.mubr.msk.f32.mxu0 %vm97_vm0, %v22_v5  ;;  %v24_v8 = vld [vmem:[%s2459_s0 + $0x10] sm:$0xff]  ;;  %v25_v9 = vld [vmem:[%s2459_s0 + $0x18] sm:$0xff]  ;;  %v26_v10 = vld [vmem:[%s2459_s0 + $0x20] sm:$0xff] }
   0x4   :  { %1663 = vmatprep.subr.bf16.mxu0 %v1662_v3  ;;  %v27_v11 = vld [vmem:[%s2459_s0 + $0x28] sm:$0xff]  ;;  %v28_v12 = vld [vmem:[%s2459_s0 + $0x30] sm:$0xff]  ;;  %v29_v13 = vld [vmem:[%s2459_s0 + $0x38] sm:$0xff] }
   0x5   :  { %1665 = vmatpush3.bf16.msra.mxu0 %v1662_v3  ;;  %v30_v14 = vld [vmem:[%s2459_s0 + $0x40] sm:$0xff]  ;;  %v740_v16 = vld [vmem:[%s2460_s3 + $0x8] sm:$0xff]  ;;  %v741_v17 = vld [vmem:[%s2460_s3 + $0x10] sm:$0xff] }
   0x6   :  { %1667 = vmatprep.subr.bf16.mxu0 %v1666_v6  ;;  %v739_v15 = vld [vmem:[%s2460_s3] sm:$0xff]  ;;  %v742_v18 = vld [vmem:[%s2460_s3 + $0x18] sm:$0xff]  ;;  %v31_v19 = vld [vmem:[%s2459_s0 + $0x48] sm:$0xff] }
   0x7   :  { %v1670_v20 = vpack.c.bf16 %v740_v16, %v739_v15  ;;  %v32_v21 = vld [vmem:[%s2459_s0 + $0x50] sm:$0xff]  ;;  %v1674_v22 = vpack.c.bf16 %v742_v18, %v741_v17  ;;  %v743_v23 = vld [vmem:[%s2460_s3 + $0x20] sm:$0xff]  ;;  %v744_v24 = vld [vmem:[%s2460_s3 + $0x28] sm:$0xff] }
   0x8   :  { %v33_v25 = vld [vmem:[%s2459_s0 + $0x58] sm:$0xff]  ;;  %v34_v26 = vld [vmem:[%s2459_s0 + $0x60] sm:$0xff]  ;;  %v1678_v27 = vpack.c.bf16 %v744_v24, %v743_v23  ;;  %v745_v28 = vld [vmem:[%s2460_s3 + $0x30] sm:$0xff] }
   0x9   :  { %1669 = vmatpush3.bf16.msra.mxu0 %v1666_v6  ;;  %1702 = vmatprep.subr.bf16.mxu1 %v1670_v20  ;;  %v746_v29 = vld [vmem:[%s2460_s3 + $0x38] sm:$0xff]  ;;  %v35_v30 = vld [vmem:[%s2459_s0 + $0x68] sm:$0xff]  ;;  %v36_v31 = vld [vmem:[%s2459_s0 + $0x70] sm:$0xff] }
   0xa   :  { %1671 = vmatprep.subr.bf16.mxu0 %v1670_v20  ;;  %1710 = vmatpush3.bf16.msra.mxu1 %v1670_v20  ;;  %v1682_v32 = vpack.c.bf16 %v746_v29, %v745_v28  ;;  %v747_v33 = vld [vmem:[%s2460_s3 + $0x40] sm:$0xff]  ;;  %v748_v34 = vld [vmem:[%s2460_s3 + $0x48] sm:$0xff]  ;;  %v37_v35 = vld [vmem:[%s2459_s0 + $0x78] sm:$0xff] }
   0xb   :  { %1703 = vmatprep.subr.bf16.mxu1 %v1674_v22  ;;  %v38_v36 = vld [vmem:[%s2459_s0 + $0x80] sm:$0xff]  ;;  %v1686_v37 = vpack.c.bf16 %v748_v34, %v747_v33  ;;  %v749_v38 = vld [vmem:[%s2460_s3 + $0x50] sm:$0xff]  ;;  %v750_v39 = vld [vmem:[%s2460_s3 + $0x58] sm:$0xff] }
   0xc   :  { %1439 = vmatmul.mubr.msk.f32.vlgmr.msra.gmra.mrb[0].mxu0 %vm97_vm0, %v23_v7  ;;  %v39_v40 = vld [vmem:[%s2459_s0 + $0x88] sm:$0xff]  ;;  %v40_v41 = vld [vmem:[%s2459_s0 + $0x90] sm:$0xff]  ;;  %v1690_v42 = vpack.c.bf16 %v750_v39, %v749_v38  ;;  %v751_v43 = vld [vmem:[%s2460_s3 + $0x60] sm:$0xff] }
   0xd   :  { %1441 = vmatprep.mubr.msk.f32.mxu0 %vm97_vm0, %v24_v8  ;;  %1673 = vmatpush3.bf16.msra.mxu0 %v1670_v20  ;;  %v752_v44 = vld [vmem:[%s2460_s3 + $0x68] sm:$0xff]  ;;  %v41_v45 = vld [vmem:[%s2459_s0 + $0x98] sm:$0xff]  ;;  %v42_v46 = vld [vmem:[%s2459_s0 + $0xa0] sm:$0xff] }
   0xe   :  { %1675 = vmatprep.subr.bf16.mxu0 %v1674_v22  ;;  %1711 = vmatpush3.bf16.msra.mxu1 %v1674_v22  ;;  %v1694_v47 = vpack.c.bf16 %v752_v44, %v751_v43  ;;  %v43_v48 = vld [vmem:[%s2459_s0 + $0xa8] sm:$0xff]  ;;  %v44_v49 = vld [vmem:[%s2459_s0 + $0xb0] sm:$0xff]  ;;  %v45_v50 = vld [vmem:[%s2459_s0 + $0xb8] sm:$0xff] }
   0xf   :  { %1704 = vmatprep.subr.bf16.mxu1 %v1678_v27  ;;  %v46_v51 = vld [vmem:[%s2459_s0 + $0xc0] sm:$0xff]  ;;  %v47_v52 = vld [vmem:[%s2459_s0 + $0xc8] sm:$0xff]  ;;  %v48_v53 = vld [vmem:[%s2459_s0 + $0xd0] sm:$0xff] }
  0x10   :  { %1442 = vmatmul.mubr.msk.f32.gmra.mrb[2].mxu0 %vm97_vm0, %v25_v9  ;;  %v49_v54 = vld [vmem:[%s2459_s0 + $0xd8] sm:$0xff]  ;;  %v50_v55 = vld [vmem:[%s2459_s0 + $0xe0] sm:$0xff]  ;;  %v51_v56 = vld [vmem:[%s2459_s0 + $0xe8] sm:$0xff] }
  0x11   :  { %1444 = vmatprep.mubr.msk.f32.mxu0 %vm97_vm0, %v26_v10  ;;  %1677 = vmatpush3.bf16.msra.mxu0 %v1674_v22  ;;  %v52_v57 = vld [vmem:[%s2459_s0 + $0xf0] sm:$0xff]  ;;  %v53_v58 = vld [vmem:[%s2459_s0 + $0xf8] sm:$0xff]  ;;  %v54_v59 = vld [vmem:[%s2459_s0 + $0x100] sm:$0xff] }
  0x12   :  { %1679 = vmatprep.subr.bf16.mxu0 %v1678_v27  ;;  %1712 = vmatpush3.bf16.msra.mxu1 %v1678_v27  ;;  %v55_v60 = vld [vmem:[%s2459_s0 + $0x108] sm:$0xff]  ;;  %v56_v61 = vld [vmem:[%s2459_s0 + $0x110] sm:$0xff]  ;;  %v57_v62 = vld [vmem:[%s2459_s0 + $0x118] sm:$0xff] }
  0x13   :  { %1705 = vmatprep.subr.bf16.mxu1 %v1682_v32  ;;  %v58_v63 = vld [vmem:[%s2459_s0 + $0x120] sm:$0xff]  ;;  %v59_v0 = vld [vmem:[%s2459_s0 + $0x128] sm:$0xff]  ;;  %v60_v1 = vld [vmem:[%s2459_s0 + $0x130] sm:$0xff] }
  0x14   :  { %1445 = vmatmul.mubr.msk.f32.gmra.mrb[4].mxu0 %vm97_vm0, %v27_v11  ;;  %v61_v2 = vld [vmem:[%s2459_s0 + $0x138] sm:$0xff]  ;;  %v62_v3 = vld [vmem:[%s2459_s0 + $0x140] sm:$0xff]  ;;  %v63_v4 = vld [vmem:[%s2459_s0 + $0x148] sm:$0xff] }
  0x15   :  { %1447 = vmatprep.mubr.msk.f32.mxu0 %vm97_vm0, %v28_v12  ;;  %1681 = vmatpush3.bf16.msra.mxu0 %v1678_v27  ;;  %v64_v5 = vld [vmem:[%s2459_s0 + $0x150] sm:$0xff]  ;;  %v65_v6 = vld [vmem:[%s2459_s0 + $0x158] sm:$0xff]  ;;  %v66_v7 = vld [vmem:[%s2459_s0 + $0x160] sm:$0xff] }
  0x16   :  { %1683 = vmatprep.subr.bf16.mxu0 %v1682_v32  ;;  %1713 = vmatpush3.bf16.msra.mxu1 %v1682_v32  ;;  %v753_v8 = vld [vmem:[%s2460_s3 + $0x70] sm:$0xff]  ;;  %v754_v9 = vld [vmem:[%s2460_s3 + $0x78] sm:$0xff]  ;;  %v67_v11 = vld [vmem:[%s2459_s0 + $0x168] sm:$0xff] }
  0x17   :  { %1706 = vmatprep.subr.bf16.mxu1 %v1686_v37  ;;  %v1698_v10 = vpack.c.bf16 %v754_v9, %v753_v8  ;;  %v68_v12 = vld [vmem:[%s2459_s0 + $0x170] sm:$0xff]  ;;  %v71_v15 = vld [vmem:[%s2459_s0 + $0x188] sm:$0xff]  ;;  %v73_v17 = vld [vmem:[%s2459_s0 + $0x198] sm:$0xff] }
  0x18   :  { %1448 = vmatmul.mubr.msk.f32.gmra.mrb[6].mxu0 %vm97_vm0, %v29_v13  ;;  %v69_v13 = vld [vmem:[%s2459_s0 + $0x178] sm:$0xff]  ;;  %v72_v16 = vld [vmem:[%s2459_s0 + $0x190] sm:$0xff]  ;;  %v74_v18 = vld [vmem:[%s2459_s0 + $0x1a0] sm:$0xff] }
  0x19   :  { %1450 = vmatprep.mubr.msk.f32.mxu0 %vm97_vm0, %v30_v14  ;;  %1685 = vmatpush3.bf16.msra.mxu0 %v1682_v32  ;;  %v70_v14 = vld [vmem:[%s2459_s0 + $0x180] sm:$0xff]  ;;  %v76_v20 = vld [vmem:[%s2459_s0 + $0x1b0] sm:$0xff]  ;;  %v79_v23 = vld [vmem:[%s2459_s0 + $0x1c8] sm:$0xff] }
  0x1a   :  { %1687 = vmatprep.subr.bf16.mxu0 %v1686_v37  ;;  %1714 = vmatpush3.bf16.msra.mxu1 %v1686_v37  ;;  %v78_v22 = vld [vmem:[%s2459_s0 + $0x1c0] sm:$0xff]  ;;  %v80_v24 = vld [vmem:[%s2459_s0 + $0x1d0] sm:$0xff]  ;;  %v83_v27 = vld [vmem:[%s2459_s0 + $0x1e8] sm:$0xff] }
  0x1b   :  { %1707 = vmatprep.subr.bf16.mxu1 %v1690_v42  ;;  %v84_v28 = vld [vmem:[%s2459_s0 + $0x1f0] sm:$0xff]  ;;  %v85_v29 = vld [vmem:[%s2459_s0 + $0x1f8] sm:$0xff] }
  0x1c   :  { %1451 = vmatmul.mubr.msk.f32.gmra.mrb[8].mxu0 %vm97_vm0, %v31_v19  ;;  %v75_v19 = vld [vmem:[%s2459_s0 + $0x1a8] sm:$0xff] }
  0x1d   :  { %1453 = vmatprep.mubr.msk.f32.mxu0 %vm97_vm0, %v32_v21  ;;  %1689 = vmatpush3.bf16.msra.mxu0 %v1686_v37  ;;  %v77_v21 = vld [vmem:[%s2459_s0 + $0x1b8] sm:$0xff]  ;;  %v10_v37 = vstv %s2462_s4 }
  0x1e   :  { %1691 = vmatprep.subr.bf16.mxu0 %v1690_v42  ;;  %1715 = vmatpush3.bf16.msra.mxu1 %v1690_v42  ;;  %11 = vst [vmem:[#allocation2] sm:$0x1] %v10_v37 }
  0x1f   :  { %1708 = vmatprep.subr.bf16.mxu1 %v1694_v47 }
  0x20   :  { %1454 = vmatmul.mubr.msk.f32.gmra.mrb[10].mxu0 %vm97_vm0, %v33_v25  ;;  %v81_v25 = vld [vmem:[%s2459_s0 + $0x1d8] sm:$0xff] }
  0x21   :  { %1456 = vmatprep.mubr.msk.f32.mxu0 %vm97_vm0, %v34_v26  ;;  %1693 = vmatpush3.bf16.msra.mxu0 %v1690_v42  ;;  %v82_v26 = vld [vmem:[%s2459_s0 + $0x1e0] sm:$0xff] }
  0x22   :  { %1695 = vmatprep.subr.bf16.mxu0 %v1694_v47  ;;  %1716 = vmatpush3.bf16.msra.mxu1 %v1694_v47 }
  0x23   :  { %1709 = vmatprep.subr.bf16.mxu1 %v1698_v10 }
  0x24   :  { %1457 = vmatmul.mubr.msk.f32.gmra.mrb[12].mxu0 %vm97_vm0, %v35_v30  ;;  %v2067_v30 = vld [vmem:[%s2461_s2] ss:$0 sm:$0xff] }
  0x25   :  { %1459 = vmatprep.mubr.msk.f32.mxu0 %vm97_vm0, %v36_v31  ;;  %1697 = vmatpush3.bf16.msra.mxu0 %v1694_v47 }
  0x26   :  { %1699 = vmatprep.subr.bf16.mxu0 %v1698_v10  ;;  %1717 = vmatpush3.bf16.msra.mxu1 %v1698_v10 }
  0x28   :  { %1460 = vmatmul.mubr.msk.f32.gmra.mrb[14].mxu0 %vm97_vm0, %v37_v35 }
  0x29   :  { %1462 = vmatprep.mubr.msk.f32.mxu0 %vm97_vm0, %v38_v36  ;;  %1701 = vmatpush3.bf16.msra.mxu0 %v1698_v10 }
  0x2c   :  { %1463 = vmatmul.mubr.msk.f32.gmra.mrb[16].mxu0 %vm97_vm0, %v39_v40 }
  0x2d   :  { %1465 = vmatprep.mubr.msk.f32.mxu0 %vm97_vm0, %v40_v41 }
  0x30   :  { %1466 = vmatmul.mubr.msk.f32.gmra.mrb[18].mxu0 %vm97_vm0, %v41_v45 }
  0x31   :  { %1468 = vmatprep.mubr.msk.f32.mxu0 %vm97_vm0, %v42_v46 }
  0x34   :  { %1469 = vmatmul.mubr.msk.f32.gmra.mrb[20].mxu0 %vm97_vm0, %v43_v48 }
  0x35   :  { %1471 = vmatprep.mubr.msk.f32.mxu0 %vm97_vm0, %v44_v49 }
  0x38   :  { %1472 = vmatmul.mubr.msk.f32.gmra.mrb[22].mxu0 %vm97_vm0, %v45_v50 }
  0x39   :  { %1474 = vmatprep.mubr.msk.f32.mxu0 %vm97_vm0, %v46_v51 }
  0x3c   :  { %1475 = vmatmul.mubr.msk.f32.gmra.mrb[24].mxu0 %vm97_vm0, %v47_v52 }
  0x3d   :  { %1477 = vmatprep.mubr.msk.f32.mxu0 %vm97_vm0, %v48_v53 }
  0x40   :  { %1478 = vmatmul.mubr.msk.f32.gmra.mrb[26].mxu0 %vm97_vm0, %v49_v54 }
  0x41   :  { %1480 = vmatprep.mubr.msk.f32.mxu0 %vm97_vm0, %v50_v55 }
  0x44   :  { %1481 = vmatmul.mubr.msk.f32.gmra.mrb[28].mxu0 %vm97_vm0, %v51_v56 }
  0x45   :  { %1483 = vmatprep.mubr.msk.f32.mxu0 %vm97_vm0, %v52_v57 }
  0x48   :  { %1484 = vmatmul.mubr.msk.f32.gmra.mrb[30].mxu0 %vm97_vm0, %v53_v58 }
  0x49   :  { %1486 = vmatprep.mubr.msk.f32.mxu0 %vm97_vm0, %v54_v59 }
  0x4c   :  { %1487 = vmatmul.mubr.msk.f32.gmra.mrb[32].mxu0 %vm97_vm0, %v55_v60 }
  0x4d   :  { %1489 = vmatprep.mubr.msk.f32.mxu0 %vm97_vm0, %v56_v61 }
  0x50   :  { %1490 = vmatmul.mubr.msk.f32.gmra.mrb[34].mxu0 %vm97_vm0, %v57_v62 }
  0x51   :  { %1492 = vmatprep.mubr.msk.f32.mxu0 %vm97_vm0, %v58_v63 }
  0x54   :  { %1493 = vmatmul.mubr.msk.f32.gmra.mrb[36].mxu0 %vm97_vm0, %v59_v0 }
  0x55   :  { %1495 = vmatprep.mubr.msk.f32.mxu0 %vm97_vm0, %v60_v1 }
  0x58   :  { %1496 = vmatmul.mubr.msk.f32.gmra.mrb[38].mxu0 %vm97_vm0, %v61_v2 }
  0x59   :  { %1498 = vmatprep.mubr.msk.f32.mxu0 %vm97_vm0, %v62_v3 }
  0x5c   :  { %1499 = vmatmul.mubr.msk.f32.gmra.mrb[40].mxu0 %vm97_vm0, %v63_v4 }
  0x5d   :  { %1501 = vmatprep.mubr.msk.f32.mxu0 %vm97_vm0, %v64_v5 }
  0x60   :  { %1502 = vmatmul.mubr.msk.f32.gmra.mrb[42].mxu0 %vm97_vm0, %v65_v6 }
  0x61   :  { %1504 = vmatprep.mubr.msk.f32.mxu0 %vm97_vm0, %v66_v7 }
  0x64   :  { %1505 = vmatmul.mubr.msk.f32.gmra.mrb[44].mxu0 %vm97_vm0, %v67_v11 }
  0x65   :  { %1507 = vmatprep.mubr.msk.f32.mxu0 %vm97_vm0, %v68_v12 }
  0x68   :  { %1508 = vmatmul.mubr.msk.f32.gmra.mrb[46].mxu0 %vm97_vm0, %v69_v13 }
  0x69   :  { %1510 = vmatprep.mubr.msk.f32.mxu0 %vm97_vm0, %v70_v14 }
  0x6c   :  { %1511 = vmatmul.mubr.msk.f32.gmra.mrb[48].mxu0 %vm97_vm0, %v71_v15 }
  0x6d   :  { %1513 = vmatprep.mubr.msk.f32.mxu0 %vm97_vm0, %v72_v16 }
  0x70   :  { %1514 = vmatmul.mubr.msk.f32.gmra.mrb[50].mxu0 %vm97_vm0, %v73_v17 }
  0x71   :  { %1516 = vmatprep.mubr.msk.f32.mxu0 %vm97_vm0, %v74_v18 }
  0x74   :  { %1517 = vmatmul.mubr.msk.f32.gmra.mrb[52].mxu0 %vm97_vm0, %v75_v19 }
  0x75   :  { %1519 = vmatprep.mubr.msk.f32.mxu0 %vm97_vm0, %v76_v20 }
  0x78   :  { %1520 = vmatmul.mubr.msk.f32.gmra.mrb[54].mxu0 %vm97_vm0, %v77_v21 }
  0x79   :  { %1522 = vmatprep.mubr.msk.f32.mxu0 %vm97_vm0, %v78_v22 }
  0x7c   :  { %1523 = vmatmul.mubr.msk.f32.gmra.mrb[56].mxu0 %vm97_vm0, %v79_v23 }
  0x7d   :  { %1525 = vmatprep.mubr.msk.f32.mxu0 %vm97_vm0, %v80_v24 }
  0x80   :  { %1526 = vmatmul.mubr.msk.f32.gmra.mrb[58].mxu0 %vm97_vm0, %v81_v25 }
  0x81   :  { %1528 = vmatprep.mubr.msk.f32.mxu0 %vm97_vm0, %v82_v26 }
  0x84   :  { %1529 = vmatmul.mubr.msk.f32.gmra.mrb[60].mxu0 %vm97_vm0, %v83_v27 }
  0x85   :  { %1531 = vmatprep.mubr.msk.f32.mxu0 %vm97_vm0, %v84_v28 }
  0x88   :  { %1532 = vmatmul.mubr.msk.f32.gmra.mrb[62].mxu0 %vm97_vm0, %v85_v29 }
  0xdf   :  { %v1440_v31 = vpop.f32.mrb[0].mxu0 }
  0xe0   :  { %v362_v32 = vadd.f32 %v1440_v31, %v2067_v30  ;;  %v356_v33 = vpop.f32.mrb[1].mxu0 }
  0xe1   :  { %v357_v34 = vadd.f32 %v2067_v30, %v356_v33 }
  0xe2   :  { %v676_v38 = vmax.f32 %v362_v32, 0.0 }
  0xe3   :  { %v675_v35 = vmax.f32 %v357_v34, 0.0  ;;  %v1443_v36 = vpop.f32.mrb[2].mxu0 }
  0xe4   :  { %v372_v39 = vadd.f32 %v1443_v36, %v2067_v30  ;;  %v366_v40 = vpop.f32.mrb[3].mxu0 }
  0xe5   :  { %v367_v41 = vadd.f32 %v2067_v30, %v366_v40  ;;  %1566 = vmatprep.mubr.f32.mxu0 %v675_v35 }
  0xe6   :  { %1567 = vmatmul.mubr.f32.vlgmr.msra.gmra.mrb[64].mxu0 %v676_v38  ;;  %v678_v44 = vmax.f32 %v372_v39, 0.0 }
  0xe7   :  { %v677_v42 = vmax.f32 %v367_v41, 0.0  ;;  %v1446_v43 = vpop.f32.mrb[4].mxu0 }
  0xe8   :  { %v382_v45 = vadd.f32 %v1446_v43, %v2067_v30  ;;  %v376_v46 = vpop.f32.mrb[5].mxu0 }
  0xe9   :  { %v377_v47 = vadd.f32 %v2067_v30, %v376_v46  ;;  %1569 = vmatprep.mubr.f32.mxu0 %v677_v42 }
  0xea   :  { %1570 = vmatmul.mubr.f32.gmra.mrb[66].mxu0 %v678_v44  ;;  %v680_v50 = vmax.f32 %v382_v45, 0.0 }
  0xeb   :  { %v679_v48 = vmax.f32 %v377_v47, 0.0  ;;  %v1449_v49 = vpop.f32.mrb[6].mxu0 }
  0xec   :  { %v392_v51 = vadd.f32 %v1449_v49, %v2067_v30  ;;  %v386_v52 = vpop.f32.mrb[7].mxu0 }
  0xed   :  { %1572 = vmatprep.mubr.f32.mxu0 %v679_v48  ;;  %v387_v53 = vadd.f32 %v2067_v30, %v386_v52 }
  0xee   :  { %1573 = vmatmul.mubr.f32.gmra.mrb[68].mxu0 %v680_v50  ;;  %v682_v56 = vmax.f32 %v392_v51, 0.0 }
  0xef   :  { %v1452_v54 = vpop.f32.mrb[8].mxu0  ;;  %v681_v55 = vmax.f32 %v387_v53, 0.0 }
  0xf0   :  { %v402_v57 = vadd.f32 %v1452_v54, %v2067_v30  ;;  %v396_v58 = vpop.f32.mrb[9].mxu0 }
  0xf1   :  { %v397_v59 = vadd.f32 %v2067_v30, %v396_v58  ;;  %1575 = vmatprep.mubr.f32.mxu1 %v681_v55 }
  0xf2   :  { %1576 = vmatmul.mubr.f32.vlgmr.msra.gmra.mrb[0].mxu1 %v682_v56  ;;  %v684_v62 = vmax.f32 %v402_v57, 0.0 }
  0xf3   :  { %v683_v60 = vmax.f32 %v397_v59, 0.0  ;;  %v1455_v61 = vpop.f32.mrb[10].mxu0 }
  0xf4   :  { %v412_v63 = vadd.f32 %v1455_v61, %v2067_v30  ;;  %v406_v0 = vpop.f32.mrb[11].mxu0 }
  0xf5   :  { %v407_v1 = vadd.f32 %v2067_v30, %v406_v0  ;;  %1578 = vmatprep.mubr.f32.mxu1 %v683_v60 }
  0xf6   :  { %1579 = vmatmul.mubr.f32.gmra.mrb[2].mxu1 %v684_v62  ;;  %v686_v4 = vmax.f32 %v412_v63, 0.0 }
  0xf7   :  { %v685_v2 = vmax.f32 %v407_v1, 0.0  ;;  %v1458_v3 = vpop.f32.mrb[12].mxu0 }
  0xf8   :  { %v422_v5 = vadd.f32 %v1458_v3, %v2067_v30  ;;  %v416_v6 = vpop.f32.mrb[13].mxu0 }
  0xf9   :  { %v417_v7 = vadd.f32 %v2067_v30, %v416_v6  ;;  %1581 = vmatprep.mubr.f32.mxu1 %v685_v2 }
  0xfa   :  { %1582 = vmatmul.mubr.f32.gmra.mrb[4].mxu1 %v686_v4  ;;  %v688_v10 = vmax.f32 %v422_v5, 0.0 }
  0xfb   :  { %v687_v8 = vmax.f32 %v417_v7, 0.0  ;;  %v1461_v9 = vpop.f32.mrb[14].mxu0 }
  0xfc   :  { %v432_v11 = vadd.f32 %v1461_v9, %v2067_v30  ;;  %v426_v12 = vpop.f32.mrb[15].mxu0 }
  0xfd   :  { %v427_v13 = vadd.f32 %v2067_v30, %v426_v12  ;;  %1584 = vmatprep.mubr.f32.mxu1 %v687_v8 }
  0xfe   :  { %1585 = vmatmul.mubr.f32.gmra.mrb[6].mxu1 %v688_v10  ;;  %v690_v16 = vmax.f32 %v432_v11, 0.0 }
  0xff   :  { %v689_v14 = vmax.f32 %v427_v13, 0.0  ;;  %v1464_v15 = vpop.f32.mrb[16].mxu0 }
 0x100   :  { %v442_v17 = vadd.f32 %v1464_v15, %v2067_v30  ;;  %v436_v18 = vpop.f32.mrb[17].mxu0 }
 0x101   :  { %v437_v19 = vadd.f32 %v2067_v30, %v436_v18  ;;  %1587 = vmatprep.mubr.f32.mxu1 %v689_v14 }
 0x102   :  { %1588 = vmatmul.mubr.f32.gmra.mrb[8].mxu1 %v690_v16  ;;  %v692_v22 = vmax.f32 %v442_v17, 0.0 }
 0x103   :  { %v691_v20 = vmax.f32 %v437_v19, 0.0  ;;  %v1467_v21 = vpop.f32.mrb[18].mxu0 }
 0x104   :  { %v452_v23 = vadd.f32 %v1467_v21, %v2067_v30  ;;  %v446_v24 = vpop.f32.mrb[19].mxu0 }
 0x105   :  { %v447_v25 = vadd.f32 %v2067_v30, %v446_v24  ;;  %1590 = vmatprep.mubr.f32.mxu1 %v691_v20 }
 0x106   :  { %1591 = vmatmul.mubr.f32.gmra.mrb[10].mxu1 %v692_v22  ;;  %v694_v28 = vmax.f32 %v452_v23, 0.0 }
 0x107   :  { %v693_v26 = vmax.f32 %v447_v25, 0.0  ;;  %v1470_v27 = vpop.f32.mrb[20].mxu0 }
 0x108   :  { %v462_v29 = vadd.f32 %v1470_v27, %v2067_v30  ;;  %v456_v31 = vpop.f32.mrb[21].mxu0 }
 0x109   :  { %v457_v32 = vadd.f32 %v2067_v30, %v456_v31  ;;  %1593 = vmatprep.mubr.f32.mxu1 %v693_v26 }
 0x10a   :  { %1594 = vmatmul.mubr.f32.gmra.mrb[12].mxu1 %v694_v28  ;;  %v696_v35 = vmax.f32 %v462_v29, 0.0 }
 0x10b   :  { %v695_v33 = vmax.f32 %v457_v32, 0.0  ;;  %v1473_v34 = vpop.f32.mrb[22].mxu0 }
 0x10c   :  { %v472_v36 = vadd.f32 %v1473_v34, %v2067_v30  ;;  %v466_v37 = vpop.f32.mrb[23].mxu0 }
 0x10d   :  { %v467_v38 = vadd.f32 %v2067_v30, %v466_v37  ;;  %1596 = vmatprep.mubr.f32.mxu1 %v695_v33 }
 0x10e   :  { %1597 = vmatmul.mubr.f32.gmra.mrb[14].mxu1 %v696_v35  ;;  %v698_v41 = vmax.f32 %v472_v36, 0.0 }
 0x10f   :  { %v697_v39 = vmax.f32 %v467_v38, 0.0  ;;  %v1476_v40 = vpop.f32.mrb[24].mxu0 }
 0x110   :  { %v482_v42 = vadd.f32 %v1476_v40, %v2067_v30  ;;  %v476_v43 = vpop.f32.mrb[25].mxu0 }
 0x111   :  { %v477_v44 = vadd.f32 %v2067_v30, %v476_v43  ;;  %1599 = vmatprep.mubr.f32.mxu1 %v697_v39 }
 0x112   :  { %1600 = vmatmul.mubr.f32.gmra.mrb[16].mxu1 %v698_v41  ;;  %v700_v47 = vmax.f32 %v482_v42, 0.0 }
 0x113   :  { %v699_v45 = vmax.f32 %v477_v44, 0.0  ;;  %v1479_v46 = vpop.f32.mrb[26].mxu0 }
 0x114   :  { %v492_v48 = vadd.f32 %v1479_v46, %v2067_v30  ;;  %v486_v49 = vpop.f32.mrb[27].mxu0 }
 0x115   :  { %v487_v50 = vadd.f32 %v2067_v30, %v486_v49  ;;  %1602 = vmatprep.mubr.f32.mxu1 %v699_v45 }
 0x116   :  { %1603 = vmatmul.mubr.f32.gmra.mrb[18].mxu1 %v700_v47  ;;  %v702_v53 = vmax.f32 %v492_v48, 0.0 }
 0x117   :  { %v701_v51 = vmax.f32 %v487_v50, 0.0  ;;  %v1482_v52 = vpop.f32.mrb[28].mxu0 }
 0x118   :  { %v502_v54 = vadd.f32 %v1482_v52, %v2067_v30  ;;  %v496_v55 = vpop.f32.mrb[29].mxu0 }
 0x119   :  { %v497_v56 = vadd.f32 %v2067_v30, %v496_v55  ;;  %1605 = vmatprep.mubr.f32.mxu1 %v701_v51 }
 0x11a   :  { %1606 = vmatmul.mubr.f32.gmra.mrb[20].mxu1 %v702_v53  ;;  %v704_v59 = vmax.f32 %v502_v54, 0.0 }
 0x11b   :  { %v703_v57 = vmax.f32 %v497_v56, 0.0  ;;  %v1485_v58 = vpop.f32.mrb[30].mxu0 }
 0x11c   :  { %v512_v60 = vadd.f32 %v1485_v58, %v2067_v30  ;;  %v506_v61 = vpop.f32.mrb[31].mxu0 }
 0x11d   :  { %v507_v62 = vadd.f32 %v2067_v30, %v506_v61  ;;  %1608 = vmatprep.mubr.f32.mxu1 %v703_v57 }
 0x11e   :  { %1609 = vmatmul.mubr.f32.gmra.mrb[22].mxu1 %v704_v59  ;;  %v706_v1 = vmax.f32 %v512_v60, 0.0 }
 0x11f   :  { %v705_v63 = vmax.f32 %v507_v62, 0.0  ;;  %v1488_v0 = vpop.f32.mrb[32].mxu0 }
 0x120   :  { %v522_v2 = vadd.f32 %v1488_v0, %v2067_v30  ;;  %v516_v3 = vpop.f32.mrb[33].mxu0 }
 0x121   :  { %v517_v4 = vadd.f32 %v2067_v30, %v516_v3  ;;  %1611 = vmatprep.mubr.f32.mxu1 %v705_v63 }
 0x122   :  { %1612 = vmatmul.mubr.f32.gmra.mrb[24].mxu1 %v706_v1  ;;  %v708_v7 = vmax.f32 %v522_v2, 0.0 }
 0x123   :  { %v707_v5 = vmax.f32 %v517_v4, 0.0  ;;  %v1491_v6 = vpop.f32.mrb[34].mxu0 }
 0x124   :  { %v532_v8 = vadd.f32 %v1491_v6, %v2067_v30  ;;  %v526_v9 = vpop.f32.mrb[35].mxu0 }
 0x125   :  { %v527_v10 = vadd.f32 %v2067_v30, %v526_v9  ;;  %1614 = vmatprep.mubr.f32.mxu1 %v707_v5 }
 0x126   :  { %1615 = vmatmul.mubr.f32.gmra.mrb[26].mxu1 %v708_v7  ;;  %v710_v13 = vmax.f32 %v532_v8, 0.0 }
 0x127   :  { %v709_v11 = vmax.f32 %v527_v10, 0.0  ;;  %v1494_v12 = vpop.f32.mrb[36].mxu0 }
 0x128   :  { %v542_v14 = vadd.f32 %v1494_v12, %v2067_v30  ;;  %v536_v15 = vpop.f32.mrb[37].mxu0 }
 0x129   :  { %v537_v16 = vadd.f32 %v2067_v30, %v536_v15  ;;  %1617 = vmatprep.mubr.f32.mxu1 %v709_v11 }
 0x12a   :  { %1618 = vmatmul.mubr.f32.gmra.mrb[28].mxu1 %v710_v13  ;;  %v712_v19 = vmax.f32 %v542_v14, 0.0 }
 0x12b   :  { %v711_v17 = vmax.f32 %v537_v16, 0.0  ;;  %v1497_v18 = vpop.f32.mrb[38].mxu0 }
 0x12c   :  { %v552_v20 = vadd.f32 %v1497_v18, %v2067_v30  ;;  %v546_v21 = vpop.f32.mrb[39].mxu0 }
 0x12d   :  { %v547_v22 = vadd.f32 %v2067_v30, %v546_v21  ;;  %1620 = vmatprep.mubr.f32.mxu1 %v711_v17 }
 0x12e   :  { %1621 = vmatmul.mubr.f32.gmra.mrb[30].mxu1 %v712_v19  ;;  %v714_v25 = vmax.f32 %v552_v20, 0.0 }
 0x12f   :  { %v713_v23 = vmax.f32 %v547_v22, 0.0  ;;  %v1500_v24 = vpop.f32.mrb[40].mxu0 }
 0x130   :  { %v562_v26 = vadd.f32 %v1500_v24, %v2067_v30  ;;  %v556_v27 = vpop.f32.mrb[41].mxu0 }
 0x131   :  { %v557_v28 = vadd.f32 %v2067_v30, %v556_v27  ;;  %1623 = vmatprep.mubr.f32.mxu1 %v713_v23 }
 0x132   :  { %1624 = vmatmul.mubr.f32.gmra.mrb[32].mxu1 %v714_v25  ;;  %v716_v32 = vmax.f32 %v562_v26, 0.0 }
 0x133   :  { %v715_v29 = vmax.f32 %v557_v28, 0.0  ;;  %v1503_v31 = vpop.f32.mrb[42].mxu0 }
 0x134   :  { %v572_v33 = vadd.f32 %v1503_v31, %v2067_v30  ;;  %v566_v34 = vpop.f32.mrb[43].mxu0 }
 0x135   :  { %v567_v35 = vadd.f32 %v2067_v30, %v566_v34  ;;  %1626 = vmatprep.mubr.f32.mxu1 %v715_v29 }
 0x136   :  { %1627 = vmatmul.mubr.f32.gmra.mrb[34].mxu1 %v716_v32  ;;  %v718_v38 = vmax.f32 %v572_v33, 0.0 }
 0x137   :  { %v717_v36 = vmax.f32 %v567_v35, 0.0  ;;  %v1506_v37 = vpop.f32.mrb[44].mxu0  ;;  %v2136_v35 = vld [vmem:[#allocation2] ss:$0 sm:$0xff] }
 0x138   :  { %v582_v39 = vadd.f32 %v1506_v37, %v2067_v30  ;;  %v576_v40 = vpop.f32.mrb[45].mxu0 }
 0x139   :  { %v577_v41 = vadd.f32 %v2067_v30, %v576_v40  ;;  %1629 = vmatprep.mubr.f32.mxu1 %v717_v36 }
 0x13a   :  { %1630 = vmatmul.mubr.f32.gmra.mrb[36].mxu1 %v718_v38  ;;  %v720_v44 = vmax.f32 %v582_v39, 0.0 }
 0x13b   :  { %v719_v42 = vmax.f32 %v577_v41, 0.0  ;;  %v1509_v43 = vpop.f32.mrb[46].mxu0 }
 0x13c   :  { %v592_v45 = vadd.f32 %v1509_v43, %v2067_v30  ;;  %v586_v46 = vpop.f32.mrb[47].mxu0 }
 0x13d   :  { %v587_v47 = vadd.f32 %v2067_v30, %v586_v46  ;;  %1632 = vmatprep.mubr.f32.mxu1 %v719_v42 }
 0x13e   :  { %1633 = vmatmul.mubr.f32.gmra.mrb[38].mxu1 %v720_v44  ;;  %v722_v50 = vmax.f32 %v592_v45, 0.0 }
 0x13f   :  { %v721_v48 = vmax.f32 %v587_v47, 0.0  ;;  %v1512_v49 = vpop.f32.mrb[48].mxu0 }
 0x140   :  { %v602_v51 = vadd.f32 %v1512_v49, %v2067_v30  ;;  %v596_v52 = vpop.f32.mrb[49].mxu0 }
 0x141   :  { %v597_v53 = vadd.f32 %v2067_v30, %v596_v52  ;;  %1635 = vmatprep.mubr.f32.mxu1 %v721_v48 }
 0x142   :  { %1636 = vmatmul.mubr.f32.gmra.mrb[40].mxu1 %v722_v50  ;;  %v724_v56 = vmax.f32 %v602_v51, 0.0 }
 0x143   :  { %v723_v54 = vmax.f32 %v597_v53, 0.0  ;;  %v1515_v55 = vpop.f32.mrb[50].mxu0 }
 0x144   :  { %v612_v57 = vadd.f32 %v1515_v55, %v2067_v30  ;;  %v606_v58 = vpop.f32.mrb[51].mxu0 }
 0x145   :  { %v607_v59 = vadd.f32 %v2067_v30, %v606_v58  ;;  %1638 = vmatprep.mubr.f32.mxu1 %v723_v54 }
 0x146   :  { %1639 = vmatmul.mubr.f32.gmra.mrb[42].mxu1 %v724_v56  ;;  %v726_v62 = vmax.f32 %v612_v57, 0.0 }
 0x147   :  { %v725_v60 = vmax.f32 %v607_v59, 0.0  ;;  %v1518_v61 = vpop.f32.mrb[52].mxu0 }
 0x148   :  { %v622_v63 = vadd.f32 %v1518_v61, %v2067_v30  ;;  %v616_v0 = vpop.f32.mrb[53].mxu0 }
 0x149   :  { %v617_v1 = vadd.f32 %v2067_v30, %v616_v0  ;;  %1641 = vmatprep.mubr.f32.mxu1 %v725_v60 }
 0x14a   :  { %1642 = vmatmul.mubr.f32.gmra.mrb[44].mxu1 %v726_v62  ;;  %v728_v4 = vmax.f32 %v622_v63, 0.0 }
 0x14b   :  { %v727_v2 = vmax.f32 %v617_v1, 0.0  ;;  %v1521_v3 = vpop.f32.mrb[54].mxu0 }
 0x14c   :  { %v632_v5 = vadd.f32 %v1521_v3, %v2067_v30  ;;  %v626_v6 = vpop.f32.mrb[55].mxu0 }
 0x14d   :  { %v627_v7 = vadd.f32 %v2067_v30, %v626_v6  ;;  %1644 = vmatprep.mubr.f32.mxu1 %v727_v2 }
 0x14e   :  { %1645 = vmatmul.mubr.f32.gmra.mrb[46].mxu1 %v728_v4  ;;  %v730_v10 = vmax.f32 %v632_v5, 0.0 }
 0x14f   :  { %v729_v8 = vmax.f32 %v627_v7, 0.0  ;;  %v1524_v9 = vpop.f32.mrb[56].mxu0 }
 0x150   :  { %v642_v11 = vadd.f32 %v1524_v9, %v2067_v30  ;;  %v636_v12 = vpop.f32.mrb[57].mxu0 }
 0x151   :  { %v637_v13 = vadd.f32 %v2067_v30, %v636_v12  ;;  %1647 = vmatprep.mubr.f32.mxu1 %v729_v8 }
 0x152   :  { %1648 = vmatmul.mubr.f32.gmra.mrb[48].mxu1 %v730_v10  ;;  %v732_v16 = vmax.f32 %v642_v11, 0.0 }
 0x153   :  { %v731_v14 = vmax.f32 %v637_v13, 0.0  ;;  %v1527_v15 = vpop.f32.mrb[58].mxu0 }
 0x154   :  { %v652_v17 = vadd.f32 %v1527_v15, %v2067_v30  ;;  %v646_v18 = vpop.f32.mrb[59].mxu0 }
 0x155   :  { %v647_v19 = vadd.f32 %v2067_v30, %v646_v18  ;;  %1650 = vmatprep.mubr.f32.mxu1 %v731_v14 }
 0x156   :  { %1651 = vmatmul.mubr.f32.gmra.mrb[50].mxu1 %v732_v16  ;;  %v734_v22 = vmax.f32 %v652_v17, 0.0 }
 0x157   :  { %v733_v20 = vmax.f32 %v647_v19, 0.0  ;;  %v1530_v21 = vpop.f32.mrb[60].mxu0 }
 0x158   :  { %v662_v23 = vadd.f32 %v1530_v21, %v2067_v30  ;;  %v656_v24 = vpop.f32.mrb[61].mxu0 }
 0x159   :  { %v657_v25 = vadd.f32 %v2067_v30, %v656_v24  ;;  %1653 = vmatprep.mubr.f32.mxu1 %v733_v20 }
 0x15a   :  { %1654 = vmatmul.mubr.f32.gmra.mrb[52].mxu1 %v734_v22  ;;  %v736_v28 = vmax.f32 %v662_v23, 0.0 }
 0x15b   :  { %v735_v26 = vmax.f32 %v657_v25, 0.0  ;;  %v1533_v27 = vpop.f32.mrb[62].mxu0 }
 0x15c   :  { %v672_v29 = vadd.f32 %v1533_v27, %v2067_v30  ;;  %v666_v31 = vpop.f32.mrb[63].mxu0 }
 0x15d   :  { %v667_v32 = vadd.f32 %v2067_v30, %v666_v31  ;;  %1656 = vmatprep.mubr.f32.mxu1 %v735_v26 }
 0x15e   :  { %1657 = vmatmul.mubr.f32.gmra.mrb[54].mxu1 %v736_v28  ;;  %v738_v34 = vmax.f32 %v672_v29, 0.0 }
 0x15f   :  { %v737_v33 = vmax.f32 %v667_v32, 0.0 }
 0x161   :  { %1659 = vmatprep.mubr.f32.mxu1 %v737_v33 }
 0x162   :  { %1660 = vmatmul.mubr.f32.gmra.mrb[56].mxu1 %v738_v34 }
 0x1b9   :  { %v1568_v36 = vpop.f32.mrb[64].mxu0 }
 0x1ba   :  { %v834_v37 = vadd.f32 %v1568_v36, %v2136_v35  ;;  %v828_v38 = vpop.f32.mrb[65].mxu0 }
 0x1bb   :  { %v829_v39 = vadd.f32 %v2136_v35, %v828_v38 }
 0x1bc   :  { %1149 = vst.msk [vmem:[%s2463_s5 + $0x8] sm:$0xff] %vm1147_vm1, %v834_v37 }
 0x1bd   :  { %1148 = vst.msk [vmem:[%s2463_s5] sm:$0xff] %vm1147_vm1, %v829_v39  ;;  %v1571_v30 = vpop.f32.mrb[66].mxu0 }
 0x1be   :  { %v844_v40 = vadd.f32 %v1571_v30, %v2136_v35  ;;  %v838_v41 = vpop.f32.mrb[67].mxu0 }
 0x1bf   :  { %v839_v42 = vadd.f32 %v2136_v35, %v838_v41 }
 0x1c0   :  { %1151 = vst.msk [vmem:[%s2463_s5 + $0x18] sm:$0xff] %vm1147_vm1, %v844_v40 }
 0x1c1   :  { %1150 = vst.msk [vmem:[%s2463_s5 + $0x10] sm:$0xff] %vm1147_vm1, %v839_v42  ;;  %v1574_v43 = vpop.f32.mrb[68].mxu0 }
 0x1c2   :  { %v854_v44 = vadd.f32 %v1574_v43, %v2136_v35  ;;  %v848_v45 = vpop.f32.mrb[69].mxu0 }
 0x1c3   :  { %v849_v46 = vadd.f32 %v2136_v35, %v848_v45 }
 0x1c4   :  { %1153 = vst.msk [vmem:[%s2463_s5 + $0x28] sm:$0xff] %vm1147_vm1, %v854_v44 }
 0x1c5   :  { %1152 = vst.msk [vmem:[%s2463_s5 + $0x20] sm:$0xff] %vm1147_vm1, %v849_v46  ;;  %v1577_v47 = vpop.f32.mrb[0].mxu1 }
 0x1c6   :  { %v864_v48 = vadd.f32 %v1577_v47, %v2136_v35  ;;  %v858_v49 = vpop.f32.mrb[1].mxu1 }
 0x1c7   :  { %v859_v50 = vadd.f32 %v2136_v35, %v858_v49 }
 0x1c8   :  { %1155 = vst.msk [vmem:[%s2463_s5 + $0x38] sm:$0xff] %vm1147_vm1, %v864_v48 }
 0x1c9   :  { %1154 = vst.msk [vmem:[%s2463_s5 + $0x30] sm:$0xff] %vm1147_vm1, %v859_v50  ;;  %v1580_v51 = vpop.f32.mrb[2].mxu1 }
 0x1ca   :  { %v874_v52 = vadd.f32 %v1580_v51, %v2136_v35  ;;  %v868_v53 = vpop.f32.mrb[3].mxu1 }
 0x1cb   :  { %v869_v54 = vadd.f32 %v2136_v35, %v868_v53 }
 0x1cc   :  { %1157 = vst.msk [vmem:[%s2463_s5 + $0x48] sm:$0xff] %vm1147_vm1, %v874_v52 }
 0x1cd   :  { %1156 = vst.msk [vmem:[%s2463_s5 + $0x40] sm:$0xff] %vm1147_vm1, %v869_v54  ;;  %v1583_v55 = vpop.f32.mrb[4].mxu1 }
 0x1ce   :  { %v884_v56 = vadd.f32 %v1583_v55, %v2136_v35  ;;  %v878_v57 = vpop.f32.mrb[5].mxu1 }
 0x1cf   :  { %v879_v58 = vadd.f32 %v2136_v35, %v878_v57 }
 0x1d0   :  { %1159 = vst.msk [vmem:[%s2463_s5 + $0x58] sm:$0xff] %vm1147_vm1, %v884_v56 }
 0x1d1   :  { %1158 = vst.msk [vmem:[%s2463_s5 + $0x50] sm:$0xff] %vm1147_vm1, %v879_v58  ;;  %v1586_v59 = vpop.f32.mrb[6].mxu1 }
 0x1d2   :  { %v894_v60 = vadd.f32 %v1586_v59, %v2136_v35  ;;  %v888_v61 = vpop.f32.mrb[7].mxu1 }
 0x1d3   :  { %v889_v62 = vadd.f32 %v2136_v35, %v888_v61 }
 0x1d4   :  { %1161 = vst.msk [vmem:[%s2463_s5 + $0x68] sm:$0xff] %vm1147_vm1, %v894_v60 }
 0x1d5   :  { %1160 = vst.msk [vmem:[%s2463_s5 + $0x60] sm:$0xff] %vm1147_vm1, %v889_v62  ;;  %v1589_v63 = vpop.f32.mrb[8].mxu1 }
 0x1d6   :  { %v904_v0 = vadd.f32 %v1589_v63, %v2136_v35  ;;  %v898_v1 = vpop.f32.mrb[9].mxu1 }
 0x1d7   :  { %v899_v2 = vadd.f32 %v2136_v35, %v898_v1 }
 0x1d8   :  { %1163 = vst.msk [vmem:[%s2463_s5 + $0x78] sm:$0xff] %vm1147_vm1, %v904_v0 }
 0x1d9   :  { %1162 = vst.msk [vmem:[%s2463_s5 + $0x70] sm:$0xff] %vm1147_vm1, %v899_v2  ;;  %v1592_v3 = vpop.f32.mrb[10].mxu1 }
 0x1da   :  { %v914_v4 = vadd.f32 %v1592_v3, %v2136_v35  ;;  %v908_v5 = vpop.f32.mrb[11].mxu1 }
 0x1db   :  { %v909_v6 = vadd.f32 %v2136_v35, %v908_v5 }
 0x1dc   :  { %1165 = vst.msk [vmem:[%s2463_s5 + $0x88] sm:$0xff] %vm1147_vm1, %v914_v4 }
 0x1dd   :  { %1164 = vst.msk [vmem:[%s2463_s5 + $0x80] sm:$0xff] %vm1147_vm1, %v909_v6  ;;  %v1595_v7 = vpop.f32.mrb[12].mxu1 }
 0x1de   :  { %v924_v8 = vadd.f32 %v1595_v7, %v2136_v35  ;;  %v918_v9 = vpop.f32.mrb[13].mxu1 }
 0x1df   :  { %v919_v10 = vadd.f32 %v2136_v35, %v918_v9 }
 0x1e0   :  { %1167 = vst.msk [vmem:[%s2463_s5 + $0x98] sm:$0xff] %vm1147_vm1, %v924_v8 }
 0x1e1   :  { %1166 = vst.msk [vmem:[%s2463_s5 + $0x90] sm:$0xff] %vm1147_vm1, %v919_v10  ;;  %v1598_v11 = vpop.f32.mrb[14].mxu1 }
 0x1e2   :  { %v934_v12 = vadd.f32 %v1598_v11, %v2136_v35  ;;  %v928_v13 = vpop.f32.mrb[15].mxu1 }
 0x1e3   :  { %v929_v14 = vadd.f32 %v2136_v35, %v928_v13 }
 0x1e4   :  { %1169 = vst.msk [vmem:[%s2463_s5 + $0xa8] sm:$0xff] %vm1147_vm1, %v934_v12 }
 0x1e5   :  { %1168 = vst.msk [vmem:[%s2463_s5 + $0xa0] sm:$0xff] %vm1147_vm1, %v929_v14  ;;  %v1601_v15 = vpop.f32.mrb[16].mxu1 }
 0x1e6   :  { %v944_v16 = vadd.f32 %v1601_v15, %v2136_v35  ;;  %v938_v17 = vpop.f32.mrb[17].mxu1 }
 0x1e7   :  { %v939_v18 = vadd.f32 %v2136_v35, %v938_v17 }
 0x1e8   :  { %1171 = vst.msk [vmem:[%s2463_s5 + $0xb8] sm:$0xff] %vm1147_vm1, %v944_v16 }
 0x1e9   :  { %1170 = vst.msk [vmem:[%s2463_s5 + $0xb0] sm:$0xff] %vm1147_vm1, %v939_v18  ;;  %v1604_v19 = vpop.f32.mrb[18].mxu1 }
 0x1ea   :  { %v954_v20 = vadd.f32 %v1604_v19, %v2136_v35  ;;  %v948_v21 = vpop.f32.mrb[19].mxu1 }
 0x1eb   :  { %v949_v22 = vadd.f32 %v2136_v35, %v948_v21 }
 0x1ec   :  { %1173 = vst.msk [vmem:[%s2463_s5 + $0xc8] sm:$0xff] %vm1147_vm1, %v954_v20 }
 0x1ed   :  { %1172 = vst.msk [vmem:[%s2463_s5 + $0xc0] sm:$0xff] %vm1147_vm1, %v949_v22  ;;  %v1607_v23 = vpop.f32.mrb[20].mxu1 }
 0x1ee   :  { %v964_v24 = vadd.f32 %v1607_v23, %v2136_v35  ;;  %v958_v25 = vpop.f32.mrb[21].mxu1 }
 0x1ef   :  { %v959_v26 = vadd.f32 %v2136_v35, %v958_v25 }
 0x1f0   :  { %1175 = vst.msk [vmem:[%s2463_s5 + $0xd8] sm:$0xff] %vm1147_vm1, %v964_v24 }
 0x1f1   :  { %1174 = vst.msk [vmem:[%s2463_s5 + $0xd0] sm:$0xff] %vm1147_vm1, %v959_v26  ;;  %v1610_v27 = vpop.f32.mrb[22].mxu1 }
 0x1f2   :  { %v974_v28 = vadd.f32 %v1610_v27, %v2136_v35  ;;  %v968_v29 = vpop.f32.mrb[23].mxu1 }
 0x1f3   :  { %v969_v31 = vadd.f32 %v2136_v35, %v968_v29 }
 0x1f4   :  { %1177 = vst.msk [vmem:[%s2463_s5 + $0xe8] sm:$0xff] %vm1147_vm1, %v974_v28 }
 0x1f5   :  { %1176 = vst.msk [vmem:[%s2463_s5 + $0xe0] sm:$0xff] %vm1147_vm1, %v969_v31  ;;  %v1613_v32 = vpop.f32.mrb[24].mxu1 }
 0x1f6   :  { %v984_v33 = vadd.f32 %v1613_v32, %v2136_v35  ;;  %v978_v34 = vpop.f32.mrb[25].mxu1 }
 0x1f7   :  { %v979_v36 = vadd.f32 %v2136_v35, %v978_v34 }
 0x1f8   :  { %1179 = vst.msk [vmem:[%s2463_s5 + $0xf8] sm:$0xff] %vm1147_vm1, %v984_v33 }
 0x1f9   :  { %1178 = vst.msk [vmem:[%s2463_s5 + $0xf0] sm:$0xff] %vm1147_vm1, %v979_v36  ;;  %v1616_v37 = vpop.f32.mrb[26].mxu1 }
 0x1fa   :  { %v994_v38 = vadd.f32 %v1616_v37, %v2136_v35  ;;  %v988_v39 = vpop.f32.mrb[27].mxu1 }
 0x1fb   :  { %v989_v30 = vadd.f32 %v2136_v35, %v988_v39 }
 0x1fc   :  { %1181 = vst.msk [vmem:[%s2463_s5 + $0x108] sm:$0xff] %vm1147_vm1, %v994_v38 }
 0x1fd   :  { %1180 = vst.msk [vmem:[%s2463_s5 + $0x100] sm:$0xff] %vm1147_vm1, %v989_v30  ;;  %v1619_v40 = vpop.f32.mrb[28].mxu1 }
 0x1fe   :  { %v1004_v41 = vadd.f32 %v1619_v40, %v2136_v35  ;;  %v998_v42 = vpop.f32.mrb[29].mxu1 }
 0x1ff   :  { %v999_v43 = vadd.f32 %v2136_v35, %v998_v42 }
 0x200   :  { %1183 = vst.msk [vmem:[%s2463_s5 + $0x118] sm:$0xff] %vm1147_vm1, %v1004_v41 }
 0x201   :  { %1182 = vst.msk [vmem:[%s2463_s5 + $0x110] sm:$0xff] %vm1147_vm1, %v999_v43  ;;  %v1622_v44 = vpop.f32.mrb[30].mxu1 }
 0x202   :  { %v1014_v45 = vadd.f32 %v1622_v44, %v2136_v35  ;;  %v1008_v46 = vpop.f32.mrb[31].mxu1 }
 0x203   :  { %v1009_v47 = vadd.f32 %v2136_v35, %v1008_v46 }
 0x204   :  { %1185 = vst.msk [vmem:[%s2463_s5 + $0x128] sm:$0xff] %vm1147_vm1, %v1014_v45 }
 0x205   :  { %1184 = vst.msk [vmem:[%s2463_s5 + $0x120] sm:$0xff] %vm1147_vm1, %v1009_v47  ;;  %v1625_v48 = vpop.f32.mrb[32].mxu1 }
 0x206   :  { %v1024_v49 = vadd.f32 %v1625_v48, %v2136_v35  ;;  %v1018_v50 = vpop.f32.mrb[33].mxu1 }
 0x207   :  { %v1019_v51 = vadd.f32 %v2136_v35, %v1018_v50 }
 0x208   :  { %1187 = vst.msk [vmem:[%s2463_s5 + $0x138] sm:$0xff] %vm1147_vm1, %v1024_v49 }
 0x209   :  { %1186 = vst.msk [vmem:[%s2463_s5 + $0x130] sm:$0xff] %vm1147_vm1, %v1019_v51  ;;  %v1628_v52 = vpop.f32.mrb[34].mxu1 }
 0x20a   :  { %v1034_v53 = vadd.f32 %v1628_v52, %v2136_v35  ;;  %v1028_v54 = vpop.f32.mrb[35].mxu1 }
 0x20b   :  { %v1029_v55 = vadd.f32 %v2136_v35, %v1028_v54 }
 0x20c   :  { %1189 = vst.msk [vmem:[%s2463_s5 + $0x148] sm:$0xff] %vm1147_vm1, %v1034_v53 }
 0x20d   :  { %1188 = vst.msk [vmem:[%s2463_s5 + $0x140] sm:$0xff] %vm1147_vm1, %v1029_v55  ;;  %v1631_v56 = vpop.f32.mrb[36].mxu1 }
 0x20e   :  { %v1044_v57 = vadd.f32 %v1631_v56, %v2136_v35  ;;  %v1038_v58 = vpop.f32.mrb[37].mxu1 }
 0x20f   :  { %v1039_v59 = vadd.f32 %v2136_v35, %v1038_v58 }
 0x210   :  { %1191 = vst.msk [vmem:[%s2463_s5 + $0x158] sm:$0xff] %vm1147_vm1, %v1044_v57 }
 0x211   :  { %1190 = vst.msk [vmem:[%s2463_s5 + $0x150] sm:$0xff] %vm1147_vm1, %v1039_v59  ;;  %v1634_v60 = vpop.f32.mrb[38].mxu1 }
 0x212   :  { %v1054_v61 = vadd.f32 %v1634_v60, %v2136_v35  ;;  %v1048_v62 = vpop.f32.mrb[39].mxu1 }
 0x213   :  { %v1049_v63 = vadd.f32 %v2136_v35, %v1048_v62 }
 0x214   :  { %1193 = vst.msk [vmem:[%s2463_s5 + $0x168] sm:$0xff] %vm1147_vm1, %v1054_v61 }
 0x215   :  { %1192 = vst.msk [vmem:[%s2463_s5 + $0x160] sm:$0xff] %vm1147_vm1, %v1049_v63  ;;  %v1637_v0 = vpop.f32.mrb[40].mxu1 }
 0x216   :  { %v1064_v1 = vadd.f32 %v1637_v0, %v2136_v35  ;;  %v1058_v2 = vpop.f32.mrb[41].mxu1 }
 0x217   :  { %v1059_v3 = vadd.f32 %v2136_v35, %v1058_v2 }
 0x218   :  { %1195 = vst.msk [vmem:[%s2463_s5 + $0x178] sm:$0xff] %vm1147_vm1, %v1064_v1 }
 0x219   :  { %1194 = vst.msk [vmem:[%s2463_s5 + $0x170] sm:$0xff] %vm1147_vm1, %v1059_v3  ;;  %v1640_v4 = vpop.f32.mrb[42].mxu1 }
 0x21a   :  { %v1074_v5 = vadd.f32 %v1640_v4, %v2136_v35  ;;  %v1068_v6 = vpop.f32.mrb[43].mxu1 }
 0x21b   :  { %v1069_v7 = vadd.f32 %v2136_v35, %v1068_v6 }
 0x21c   :  { %1197 = vst.msk [vmem:[%s2463_s5 + $0x188] sm:$0xff] %vm1147_vm1, %v1074_v5 }
 0x21d   :  { %1196 = vst.msk [vmem:[%s2463_s5 + $0x180] sm:$0xff] %vm1147_vm1, %v1069_v7  ;;  %v1643_v8 = vpop.f32.mrb[44].mxu1 }
 0x21e   :  { %v1084_v9 = vadd.f32 %v1643_v8, %v2136_v35  ;;  %v1078_v10 = vpop.f32.mrb[45].mxu1 }
 0x21f   :  { %v1079_v11 = vadd.f32 %v2136_v35, %v1078_v10 }
 0x220   :  { %1199 = vst.msk [vmem:[%s2463_s5 + $0x198] sm:$0xff] %vm1147_vm1, %v1084_v9 }
 0x221   :  { %1198 = vst.msk [vmem:[%s2463_s5 + $0x190] sm:$0xff] %vm1147_vm1, %v1079_v11  ;;  %v1646_v12 = vpop.f32.mrb[46].mxu1 }
 0x222   :  { %v1094_v13 = vadd.f32 %v1646_v12, %v2136_v35  ;;  %v1088_v14 = vpop.f32.mrb[47].mxu1 }
 0x223   :  { %v1089_v15 = vadd.f32 %v2136_v35, %v1088_v14 }
 0x224   :  { %1201 = vst.msk [vmem:[%s2463_s5 + $0x1a8] sm:$0xff] %vm1147_vm1, %v1094_v13 }
 0x225   :  { %1200 = vst.msk [vmem:[%s2463_s5 + $0x1a0] sm:$0xff] %vm1147_vm1, %v1089_v15  ;;  %v1649_v16 = vpop.f32.mrb[48].mxu1 }
 0x226   :  { %v1104_v17 = vadd.f32 %v1649_v16, %v2136_v35  ;;  %v1098_v18 = vpop.f32.mrb[49].mxu1 }
 0x227   :  { %v1099_v19 = vadd.f32 %v2136_v35, %v1098_v18 }
 0x228   :  { %1203 = vst.msk [vmem:[%s2463_s5 + $0x1b8] sm:$0xff] %vm1147_vm1, %v1104_v17 }
 0x229   :  { %1202 = vst.msk [vmem:[%s2463_s5 + $0x1b0] sm:$0xff] %vm1147_vm1, %v1099_v19  ;;  %v1652_v20 = vpop.f32.mrb[50].mxu1 }
 0x22a   :  { %v1114_v21 = vadd.f32 %v1652_v20, %v2136_v35  ;;  %v1108_v22 = vpop.f32.mrb[51].mxu1 }
 0x22b   :  { %v1109_v23 = vadd.f32 %v2136_v35, %v1108_v22 }
 0x22c   :  { %1205 = vst.msk [vmem:[%s2463_s5 + $0x1c8] sm:$0xff] %vm1147_vm1, %v1114_v21 }
 0x22d   :  { %1204 = vst.msk [vmem:[%s2463_s5 + $0x1c0] sm:$0xff] %vm1147_vm1, %v1109_v23  ;;  %v1655_v24 = vpop.f32.mrb[52].mxu1 }
 0x22e   :  { %v1124_v25 = vadd.f32 %v1655_v24, %v2136_v35  ;;  %v1118_v26 = vpop.f32.mrb[53].mxu1 }
 0x22f   :  { %v1119_v27 = vadd.f32 %v2136_v35, %v1118_v26 }
 0x230   :  { %1207 = vst.msk [vmem:[%s2463_s5 + $0x1d8] sm:$0xff] %vm1147_vm1, %v1124_v25 }
 0x231   :  { %1206 = vst.msk [vmem:[%s2463_s5 + $0x1d0] sm:$0xff] %vm1147_vm1, %v1119_v27  ;;  %v1658_v28 = vpop.f32.mrb[54].mxu1 }
 0x232   :  { %v1134_v29 = vadd.f32 %v1658_v28, %v2136_v35  ;;  %v1128_v31 = vpop.f32.mrb[55].mxu1 }
 0x233   :  { %v1129_v32 = vadd.f32 %v2136_v35, %v1128_v31 }
 0x234   :  { %1209 = vst.msk [vmem:[%s2463_s5 + $0x1e8] sm:$0xff] %vm1147_vm1, %v1134_v29 }
 0x235   :  { %1208 = vst.msk [vmem:[%s2463_s5 + $0x1e0] sm:$0xff] %vm1147_vm1, %v1129_v32  ;;  %v1661_v33 = vpop.f32.mrb[56].mxu1 }
 0x236   :  { %v1144_v34 = vadd.f32 %v1661_v33, %v2136_v35  ;;  %v1138_v36 = vpop.f32.mrb[57].mxu1 }
 0x237   :  { %v1139_v37 = vadd.f32 %v2136_v35, %v1138_v36 }
 0x238   :  { %1211 = vst.msk [vmem:[%s2463_s5 + $0x1f8] sm:$0xff] %vm1147_vm1, %v1144_v34 }
 0x239   :  { %1210 = vst.msk [vmem:[%s2463_s5 + $0x1f0] sm:$0xff] %vm1147_vm1, %v1139_v37 }

</bundles_post_ra>
